<compile_context>
chip_gen: v5e
topology: v5e:2x2
jax: 0.10.0
libtpu: 0.0.40
codegen_flags: <defaults>
</compile_context>

<pallas_src>
import jax
import jax.numpy as jnp
from jax import lax
from jax.experimental import pallas as pl
from jax.experimental.pallas import tpu as pltpu


def _round_up(x, m):
    return (x + m - 1) // m * m


# ---------------------------------------------------------------------------
# Fused forward kernel (all feature columns in one pallas_call)
# ---------------------------------------------------------------------------
def _fused_embedder_call(seq_items, char_items, vec_items, B, out_dim,
                         mxu_dtype=jnp.float32):
    """seq_items : list of (ids (B,L) i32, table (V,E) f32, pad_idx)
    char_items: list of (ids (B,T) i32, table (Vc,E2) f32,
                         w_ih (E2,3H), w_hh (H,3H), b_ih (1,3H), b_hh (1,3H))
    vec_items : list of (x (B,D) f32, w1 (D,2E), b1 (1,2E), w2 (2E,E), b2 (1,E))
    Returns the concatenated pooled features, shape (B, out_dim) f32."""

    # ---- batch tile: largest 8-aligned tile whose temporaries fit VMEM -----
    # f32 bytes of batch-proportional temporaries per batch row (one-hots,
    # hoisted GRU projections, MLP hidden); weights/tables are single-buffered.
    row_bytes = 0
    for ids, tab, _ in seq_items:
        row_bytes += 4 * ids.shape[1] * tab.shape[0]                      # one-hot (L,V)
    for ids, tab, w_ih, w_hh, b_ih, b_hh in char_items:
        row_bytes += 4 * ids.shape[1] * (tab.shape[0] + tab.shape[1]      # one-hot + x
                                         + w_ih.shape[1])                 # gi (T,3H)
    for x, w1, b1, w2, b2 in vec_items:
        row_bytes += 4 * (x.shape[1] + w1.shape[1] + w2.shape[1])
    budget = 24 * 1024 * 1024           # temporaries budget: fits v7x's 64 MiB VMEM
    tb_cap = max(8, (budget // max(row_bytes, 1)) // 8 * 8)

    B8 = _round_up(B, 8)                # pad batch to a sublane multiple
    tb = min(B8, 128, tb_cap)           # <=128 rows keeps M a single MXU push group
    if B8 >= 16 and B8 // tb < 2:       # give both v7x TensorCores a grid step
        tb = max(8, _round_up(pl.cdiv(B8, 2), 8))
    B_pad = _round_up(B8, tb)           # every batch block is full (no ragged tile)
    grid = (B_pad // tb,)
    out_dim_pad = _round_up(out_dim, 128)   # lane-dense output slab (no vst.msk)

    def pad_b(a):
        if a.shape[0] == B_pad:
            return a
        return jnp.pad(a, [(0, B_pad - a.shape[0])] + [(0, 0)] * (a.ndim - 1))

    inputs, batch_flags, seq_pads = [], [], []
    for ids, tab, pad in seq_items:
        inputs += [pad_b(ids), tab]
        batch_flags += [True, False]
        seq_pads.append(int(pad))
    n_char = len(char_items)
    for ids, tab, w_ih, w_hh, b_ih, b_hh in char_items:
        inputs += [pad_b(ids), tab, w_ih, w_hh, b_ih, b_hh]
        batch_flags += [True, False, False, False, False, False]
    n_vec = len(vec_items)
    for x, w1, b1, w2, b2 in vec_items:
        inputs += [pad_b(x), w1, b1, w2, b2]
        batch_flags += [True, False, False, False, False]

    def batch_spec(arr):                # batch-blocked operand
        nd = arr.ndim
        return pl.BlockSpec((tb,) + arr.shape[1:],
                            lambda i, _nd=nd: (i,) + (0,) * (_nd - 1))

    def full_spec(arr, single_buffer):  # grid-invariant weights / tables
        nd = arr.ndim
        idx = lambda i, _nd=nd: (0,) * _nd
        if single_buffer:
            # index_map is grid-invariant -> keep ONE VMEM copy (no double buffer)
            return pl.BlockSpec(arr.shape, idx, pipeline_mode=pl.Buffered(1))
        return pl.BlockSpec(arr.shape, idx)

    cdt = mxu_dtype                     # MXU operand dtype (bf16 exact for one-hot)

    def kernel(*refs):
        out_ref = refs[-1]
        refs = refs[:-1]
        pos = 0
        off = 0                         # static lane offset into out_ref
        iota_cache = {}                 # share iota across same-shaped columns

        def one_hot(ids, V):
            shape = ids.shape + (V,)
            if shape not in iota_cache:
                iota_cache[shape] = lax.broadcasted_iota(jnp.int32, shape, 2)
            return (ids[:, :, None] == iota_cache[shape]).astype(cdt)

        # ---- sequence columns: vectorized masked-mean pooling ------------
        for pad in seq_pads:
            ids_ref, tab_ref = refs[pos], refs[pos + 1]
            pos += 2
            ids = ids_ref[...]                                   # (tb, L) int32
            tab = tab_ref[...].astype(cdt)                       # (V, E)
            V, E = tab_ref.shape
            # INVARIANT: tab[pad] == 0 (nn.Embedding padding_idx semantics), so
            # one-hot hits on <PAD> already contribute 0 — no mask multiply on oh.
            oh = one_hot(ids, V)                                 # (tb, L, V)
            cnt = jnp.sum((ids != pad).astype(jnp.float32), axis=1, keepdims=True)
            acc = jnp.sum(oh, axis=1)                            # (tb, V)
            summed = jnp.dot(acc.astype(cdt), tab,
                             preferred_element_type=jnp.float32)
            out_ref[:, off:off + E] = summed / jnp.maximum(cnt, 1e-9)
            off += E

        # ---- char columns: one-hot embed + GRU --------------------------
        # Input-side projections hoisted (one fused (.,3H) matmul for all t);
        # recurrences of different columns interleaved in one unrolled loop.
        # NOTE: like the original module (no pack_padded_sequence), the hidden
        # state is updated on <PAD> positions too (their embedding is 0).
        char_cols = []
        for _ in range(n_char):
            (ids_ref, tab_ref, wih_ref, whh_ref,
             bih_ref, bhh_ref) = refs[pos:pos + 6]
            pos += 6
            ids = ids_ref[...]                                   # (tb, T) int32
            tab = tab_ref[...].astype(cdt)                       # (Vc, E2)
            Vc, E2 = tab_ref.shape
            T = ids_ref.shape[1]
            H = whh_ref.shape[0]
            oh = one_hot(ids, Vc)                                # (tb, T, Vc)
            x = jnp.dot(oh.reshape(tb * T, Vc), tab,
                        preferred_element_type=jnp.float32)      # (tb*T, E2)
            gi = (jnp.dot(x.astype(cdt), wih_ref[...].astype(cdt),
                          preferred_element_type=jnp.float32)
                  + bih_ref[...]).reshape(tb, T, 3 * H)          # (tb, T, 3H)
            char_cols.append(dict(gi=gi,
                                  whh=whh_ref[...].astype(cdt),
                                  bhh=bhh_ref[...],
                                  h=jnp.zeros((tb, H), jnp.float32),
                                  T=T, H=H, off=off))
            off += H

        T_max = max((c["T"] for c in char_cols), default=0)
        for t in range(T_max):                     # T small & static -> unrolled
            for col in char_cols:                  # interleave independent columns
                if t >= col["T"]:
                    continue
                H = col["H"]
                gh = jnp.dot(col["h"].astype(cdt), col["whh"],
                             preferred_element_type=jnp.float32) + col["bhh"]
                gi_t = col["gi"][:, t, :]
                r = jax.nn.sigmoid(gi_t[:, 0:H] + gh[:, 0:H])
                z = jax.nn.sigmoid(gi_t[:, H:2 * H] + gh[:, H:2 * H])
                n = jnp.tanh(gi_t[:, 2 * H:3 * H] + r * gh[:, 2 * H:3 * H])
                col["h"] = (1.0 - z) * n + z * col["h"]
        for col in char_cols:
            out_ref[:, col["off"]:col["off"] + col["H"]] = col["h"]

        # ---- vector columns: Linear -> ReLU -> Linear -> ReLU -------------
        for _ in range(n_vec):
            x_ref, w1_ref, b1_ref, w2_ref, b2_ref = refs[pos:pos + 5]
            pos += 5
            E = w2_ref.shape[1]
            hdn = jnp.maximum(
                jnp.dot(x_ref[...].astype(cdt), w1_ref[...].astype(cdt),
                        preferred_element_type=jnp.float32) + b1_ref[...], 0.0)
            o = jnp.maximum(
                jnp.dot(hdn.astype(cdt), w2_ref[...].astype(cdt),
                        preferred_element_type=jnp.float32) + b2_ref[...], 0.0)
            out_ref[:, off:off + E] = o
            off += E

        if off < out_dim_pad:                      # zero the lane padding once
            out_ref[:, off:] = jnp.zeros((tb, out_dim_pad - off), jnp.float32)

    def call(single_buffer):
        in_specs = [batch_spec(a) if bf else full_spec(a, single_buffer)
                    for a, bf in zip(inputs, batch_flags)]
        return pl.pallas_call(
            kernel,
            out_shape=jax.ShapeDtypeStruct((B_pad, out_dim_pad), jnp.float32),
            grid=grid,
            in_specs=in_specs,
            out_specs=pl.BlockSpec((tb, out_dim_pad), lambda i: (i, 0)),
            compiler_params=pltpu.CompilerParams(
                dimension_semantics=("parallel",),      # batch shards across v7x TCs
                vmem_limit_bytes=48 * 1024 * 1024),     # > v5e's 16 MiB default,
        )(*inputs)                                      # < v7x's 64 MiB physical

    try:
        out = call(single_buffer=True)     # single-buffered grid-invariant weights
    except Exception:
        out = call(single_buffer=False)    # fallback: default double-buffering
    return out[:B, :out_dim]               # drop batch/lane padding


# ---------------------------------------------------------------------------
# APKFeatureEmbedder (forward-pass equivalent)
# ---------------------------------------------------------------------------
class APKFeatureEmbedderPallas:
    def __init__(self, vocab_dict, sequence_cols, char_cols, vector_cols,
                 vector_dims, embedding_dim, key, mxu_dtype=jnp.float32):
        self.embedding_dim = embedding_dim
        self.sequence_cols = sequence_cols
        self.char_cols = char_cols
        self.vector_cols = vector_cols
        # mxu_dtype=jnp.bfloat16 runs the MXU matmuls in bf16 (exact one-hots,
        # biggest relative win on v5e); f32 default keeps the self-check tight.
        self.mxu_dtype = mxu_dtype
        E = embedding_dim
        keys = iter(jax.random.split(key, 128))

        # sequence embedders: Embedding(V, E) with padding_idx row zeroed
        self.seq_tables, self.seq_pad = {}, {}
        for col in sequence_cols:
            vocab = vocab_dict[col]
            pad = vocab.get('<PAD>', 0)
            tab = jax.random.normal(next(keys), (len(vocab), E), jnp.float32) * 0.1
            self.seq_tables[col] = tab.at[pad].set(0.0)   # INVARIANT used by kernel
            self.seq_pad[col] = pad

        # char embedders (E//2) + GRU(hidden=E); fused gate layout [r | z | n]
        self.char_tables, self.char_gru = {}, {}
        for col in char_cols:
            vocab = vocab_dict[col]
            pad = vocab.get('<PAD>', 0)
            tab = jax.random.normal(next(keys), (len(vocab), E // 2), jnp.float32) * 0.1
            self.char_tables[col] = tab.at[pad].set(0.0)
            w_ih = jax.random.normal(next(keys), (E // 2, 3 * E), jnp.float32) * 0.1
            w_hh = jax.random.normal(next(keys), (E, 3 * E), jnp.float32) * 0.1
            b_ih = jax.random.normal(next(keys), (1, 3 * E), jnp.float32) * 0.1
            b_hh = jax.random.normal(next(keys), (1, 3 * E), jnp.float32) * 0.1
            self.char_gru[col] = (w_ih, w_hh, b_ih, b_hh)

        # vector reducers: Linear(D, 2E) -> ReLU -> Linear(2E, E) -> ReLU
        self.vec_mlp = {}
        for col in vector_cols:
            D = vector_dims.get(col, 256)
            w1 = jax.random.normal(next(keys), (D, 2 * E), jnp.float32) * 0.1
            b1 = jax.random.normal(next(keys), (1, 2 * E), jnp.float32) * 0.1
            w2 = jax.random.normal(next(keys), (2 * E, E), jnp.float32) * 0.1
            b2 = jax.random.normal(next(keys), (1, E), jnp.float32) * 0.1
            self.vec_mlp[col] = (w1, b1, w2, b2)

        self.output_dim = (len(sequence_cols) + len(char_cols) + len(vector_cols)) * E

    def forward(self, seq_feats, char_feats, vector_feats, scalars=None):
        seq_items, char_items, vec_items = [], [], []
        for name, seq in seq_feats.items():
            if name in self.seq_tables:
                seq_items.append((seq, self.seq_tables[name], self.seq_pad[name]))
        for name, cseq in char_feats.items():
            if name in self.char_tables:
                char_items.append((cseq, self.char_tables[name]) + self.char_gru[name])
        for name, vec in vector_feats.items():
            if name in self.vec_mlp:
                vec_items.append((vec,) + self.vec_mlp[name])

        n_feats = len(seq_items) + len(char_items) + len(vec_items)
        if n_feats == 0:
            # empty-feature fallback (zeros) — trivial, no kernel needed.
            bsz = 1
            for d in (seq_feats, char_feats, vector_feats, scalars or {}):
                if d:
                    bsz = next(iter(d.values())).shape[0]
                    break
            return jnp.zeros((bsz, max(self.output_dim, 1)), jnp.float32), scalars

        first = (seq_items or char_items or vec_items)[0][0]
        B = first.shape[0]
        concat = _fused_embedder_call(seq_items, char_items, vec_items,
                                      B, n_feats * self.embedding_dim,
                                      mxu_dtype=self.mxu_dtype)
        return concat, scalars


# ---------------------------------------------------------------------------
# Pure-JAX reference for verification
# ---------------------------------------------------------------------------
def reference_forward(model, seq_feats, char_feats, vector_feats):
    outs = []
    for name, seq in seq_feats.items():
        tab = model.seq_tables[name]
        pad = model.seq_pad[name]
        emb = tab[seq]                                        # (B, L, E)
        mask = (seq != pad)[..., None].astype(jnp.float32)
        summed = (emb * mask).sum(axis=1)
        cnt = jnp.maximum(mask.sum(axis=1), 1e-9)
        outs.append(summed / cnt)
    for name, cseq in char_feats.items():
        tab = model.char_tables[name]
        w_ih, w_hh, b_ih, b_hh = model.char_gru[name]
        x = tab[cseq]                                         # (B, T, E2)
        B, T, _ = x.shape
        H = w_hh.shape[0]
        gi = jnp.einsum('bte,eg->btg', x, w_ih) + b_ih        # (B, T, 3H)
        h = jnp.zeros((B, H), jnp.float32)
        for t in range(T):
            gh = h @ w_hh + b_hh
            r = jax.nn.sigmoid(gi[:, t, 0:H] + gh[:, 0:H])
            z = jax.nn.sigmoid(gi[:, t, H:2 * H] + gh[:, H:2 * H])
            n = jnp.tanh(gi[:, t, 2 * H:] + r * gh[:, 2 * H:])
            h = (1.0 - z) * n + z * h
        outs.append(h)
    for name, vec in vector_feats.items():
        w1, b1, w2, b2 = model.vec_mlp[name]
        hdn = jnp.maximum(vec @ w1 + b1, 0.0)
        outs.append(jnp.maximum(hdn @ w2 + b2, 0.0))
    return jnp.concatenate(outs, axis=1)


if __name__ == "__main__":
    B = 2            # batch
    E = 32           # embedding_dim
    L = 8            # sequence length (token-id features)
    T = 8            # char sequence length
    V_SEQ = 32       # vocab for sequence column
    V_CHAR = 16      # vocab for char column
    D_VEC = 64       # dense vector dim

    vocab_dict = {
        'api_calls': {f'tok{i}': i for i in range(V_SEQ)} | {'<PAD>': 0},
        'pkg_name': {f'ch{i}': i for i in range(V_CHAR)} | {'<PAD>': 0},
    }
    key = jax.random.PRNGKey(0)
    k_model, k_seq, k_char, k_vec = jax.random.split(key, 4)

    model = APKFeatureEmbedderPallas(
        vocab_dict=vocab_dict,
        sequence_cols=['api_calls'],
        char_cols=['pkg_name'],
        vector_cols=['tlsh'],
        vector_dims={'tlsh': D_VEC},
        embedding_dim=E,
        key=k_model,
    )

    # deterministic inputs (0 == <PAD> so masking is exercised)
    seq_ids = jax.random.randint(k_seq, (B, L), 0, V_SEQ, dtype=jnp.int32)
    char_ids = jax.random.randint(k_char, (B, T), 0, V_CHAR, dtype=jnp.int32)
    vec = jax.random.normal(k_vec, (B, D_VEC), jnp.float32)

    seq_feats = {'api_calls': seq_ids}
    char_feats = {'pkg_name': char_ids}
    vector_feats = {'tlsh': vec}
    scalars = {'file_size': jnp.ones((B, 1), jnp.float32)}

    out, scalars_out = model.forward(seq_feats, char_feats, vector_feats, scalars)
    out = jax.block_until_ready(out)
    assert out.shape == (B, model.output_dim), out.shape

    ref = reference_forward(model, seq_feats, char_feats, vector_feats)
    # f32 MXU multi-pass accumulation may differ slightly from XLA's dot
    assert jnp.allclose(out, ref, atol=1e-4, rtol=1e-4), \
        f"max abs err {jnp.max(jnp.abs(out - ref))}"

    print("KERNEL_OK")
</pallas_src>

<mosaic_0001>
module attributes {stable_mosaic.version = 11 : i64} {
  func.func @kernel(%arg0: i32, %arg1: memref<8x8xi32, #tpu.memory_space<vmem>>, %arg2: memref<33x32xf32, #tpu.memory_space<vmem>>, %arg3: memref<8x8xi32, #tpu.memory_space<vmem>>, %arg4: memref<17x16xf32, #tpu.memory_space<vmem>>, %arg5: memref<16x96xf32, #tpu.memory_space<vmem>>, %arg6: memref<32x96xf32, #tpu.memory_space<vmem>>, %arg7: memref<1x96xf32, #tpu.memory_space<vmem>>, %arg8: memref<1x96xf32, #tpu.memory_space<vmem>>, %arg9: memref<8x64xf32, #tpu.memory_space<vmem>>, %arg10: memref<64x64xf32, #tpu.memory_space<vmem>>, %arg11: memref<1x64xf32, #tpu.memory_space<vmem>>, %arg12: memref<64x32xf32, #tpu.memory_space<vmem>>, %arg13: memref<1x32xf32, #tpu.memory_space<vmem>>, %arg14: memref<8x128xf32, #tpu.memory_space<vmem>>) attributes {dimension_semantics = [#tpu.dimension_semantics<parallel>], iteration_bounds = array<i64: 1>, scalar_prefetch = 0 : i64, scratch_operands = 0 : i64, tpu.core_type = #tpu.core_type<tc>, window_params = [{transform_indices = @transform_0, window_bounds = array<i64: 8, 8>}, {pipeline_mode = #tpu.pipeline_mode<synchronous>, transform_indices = @transform_1, window_bounds = array<i64: 33, 32>}, {transform_indices = @transform_2, window_bounds = array<i64: 8, 8>}, {pipeline_mode = #tpu.pipeline_mode<synchronous>, transform_indices = @transform_3, window_bounds = array<i64: 17, 16>}, {pipeline_mode = #tpu.pipeline_mode<synchronous>, transform_indices = @transform_4, window_bounds = array<i64: 16, 96>}, {pipeline_mode = #tpu.pipeline_mode<synchronous>, transform_indices = @transform_5, window_bounds = array<i64: 32, 96>}, {pipeline_mode = #tpu.pipeline_mode<synchronous>, transform_indices = @transform_6, window_bounds = array<i64: 1, 96>}, {pipeline_mode = #tpu.pipeline_mode<synchronous>, transform_indices = @transform_7, window_bounds = array<i64: 1, 96>}, {transform_indices = @transform_8, window_bounds = array<i64: 8, 64>}, {pipeline_mode = #tpu.pipeline_mode<synchronous>, transform_indices = @transform_9, window_bounds = array<i64: 64, 64>}, {pipeline_mode = #tpu.pipeline_mode<synchronous>, transform_indices = @transform_10, window_bounds = array<i64: 1, 64>}, {pipeline_mode = #tpu.pipeline_mode<synchronous>, transform_indices = @transform_11, window_bounds = array<i64: 64, 32>}, {pipeline_mode = #tpu.pipeline_mode<synchronous>, transform_indices = @transform_12, window_bounds = array<i64: 1, 32>}, {transform_indices = @transform_13, window_bounds = array<i64: 8, 128>}]} {
    %c0 = arith.constant 0 : index
    %c0_0 = arith.constant 0 : index
    %0 = vector.load %arg1[%c0, %c0_0] : memref<8x8xi32, #tpu.memory_space<vmem>>, vector<8x8xi32>
    %c0_1 = arith.constant 0 : index
    %c0_2 = arith.constant 0 : index
    %1 = vector.load %arg2[%c0_1, %c0_2] : memref<33x32xf32, #tpu.memory_space<vmem>>, vector<33x32xf32>
    %2 = tpu.iota {dimensions = array<i32: 2>} : vector<8x8x33xi32>
    %3 = vector.shape_cast %0 : vector<8x8xi32> to vector<8x8x1xi32>
    %4 = vector.broadcast %3 : vector<8x8x1xi32> to vector<8x8x33xi32>
    %5 = arith.cmpi eq, %4, %2 : vector<8x8x33xi32>
    %6 = arith.extui %5 : vector<8x8x33xi1> to vector<8x8x33xi32>
    %7 = arith.sitofp %6 : vector<8x8x33xi32> to vector<8x8x33xf32>
    %c0_i32 = arith.constant 0 : i32
    %8 = vector.broadcast %c0_i32 : i32 to vector<8x8xi32>
    %9 = arith.cmpi ne, %0, %8 : vector<8x8xi32>
    %10 = arith.extui %9 : vector<8x8xi1> to vector<8x8xi32>
    %11 = arith.sitofp %10 : vector<8x8xi32> to vector<8x8xf32>
    %cst = arith.constant dense<0.000000e+00> : vector<8xf32>
    %12 = vector.multi_reduction <add>, %11, %cst [1] : vector<8x8xf32> to vector<8xf32>
    %13 = vector.shape_cast %12 : vector<8xf32> to vector<8x1xf32>
    %cst_3 = arith.constant dense<0.000000e+00> : vector<8x33xf32>
    %14 = vector.multi_reduction <add>, %7, %cst_3 [1] : vector<8x8x33xf32> to vector<8x33xf32>
    %cst_4 = arith.constant dense<0.000000e+00> : vector<8x32xf32>
    %15 = tpu.matmul %14, %1, %cst_4 {dimension_numbers = #tpu.dot_dimension_numbers<[1], [0], [0], [1], [0, 0, 1, 1], [], []>} : vector<8x33xf32>, vector<33x32xf32>, vector<8x32xf32> -> vector<8x32xf32>
    %cst_5 = arith.constant 9.99999971E-10 : f32
    %16 = vector.broadcast %cst_5 : f32 to vector<8x1xf32>
    %17 = arith.maximumf %13, %16 : vector<8x1xf32>
    %18 = vector.broadcast %17 : vector<8x1xf32> to vector<8x32xf32>
    %19 = arith.divf %15, %18 : vector<8x32xf32>
    %c0_6 = arith.constant 0 : index
    %c0_7 = arith.constant 0 : index
    %20 = vector.load %arg14[%c0_6, %c0_7] : memref<8x128xf32, #tpu.memory_space<vmem>>, vector<8x32xf32>
    tpu.vector_store %arg14[%c0_6, %c0_7], %19 {strides = array<i32>} : memref<8x128xf32, #tpu.memory_space<vmem>>, vector<8x32xf32>,
    %c0_8 = arith.constant 0 : index
    %c0_9 = arith.constant 0 : index
    %21 = vector.load %arg3[%c0_8, %c0_9] : memref<8x8xi32, #tpu.memory_space<vmem>>, vector<8x8xi32>
    %c0_10 = arith.constant 0 : index
    %c0_11 = arith.constant 0 : index
    %22 = vector.load %arg4[%c0_10, %c0_11] : memref<17x16xf32, #tpu.memory_space<vmem>>, vector<17x16xf32>
    %23 = tpu.iota {dimensions = array<i32: 2>} : vector<8x8x17xi32>
    %24 = vector.shape_cast %21 : vector<8x8xi32> to vector<8x8x1xi32>
    %25 = vector.broadcast %24 : vector<8x8x1xi32> to vector<8x8x17xi32>
    %26 = arith.cmpi eq, %25, %23 : vector<8x8x17xi32>
    %27 = arith.extui %26 : vector<8x8x17xi1> to vector<8x8x17xi32>
    %28 = arith.sitofp %27 : vector<8x8x17xi32> to vector<8x8x17xf32>
    %29 = vector.shape_cast %28 : vector<8x8x17xf32> to vector<64x17xf32>
    %cst_12 = arith.constant dense<0.000000e+00> : vector<64x16xf32>
    %30 = tpu.matmul %29, %22, %cst_12 {dimension_numbers = #tpu.dot_dimension_numbers<[1], [0], [0], [1], [0, 0, 1, 1], [], []>} : vector<64x17xf32>, vector<17x16xf32>, vector<64x16xf32> -> vector<64x16xf32>
    %c0_13 = arith.constant 0 : index
    %c0_14 = arith.constant 0 : index
    %31 = vector.load %arg5[%c0_13, %c0_14] : memref<16x96xf32, #tpu.memory_space<vmem>>, vector<16x96xf32>
    %cst_15 = arith.constant dense<0.000000e+00> : vector<64x96xf32>
    %32 = tpu.matmul %30, %31, %cst_15 {dimension_numbers = #tpu.dot_dimension_numbers<[1], [0], [0], [1], [0, 0, 1, 1], [], []>} : vector<64x16xf32>, vector<16x96xf32>, vector<64x96xf32> -> vector<64x96xf32>
    %c0_16 = arith.constant 0 : index
    %c0_17 = arith.constant 0 : index
    %33 = vector.load %arg7[%c0_16, %c0_17] : memref<1x96xf32, #tpu.memory_space<vmem>>, vector<1x96xf32>
    %34 = vector.broadcast %33 : vector<1x96xf32> to vector<64x96xf32>
    %35 = arith.addf %32, %34 : vector<64x96xf32>
    %36 = vector.shape_cast %35 : vector<64x96xf32> to vector<8x8x96xf32>
    %c0_18 = arith.constant 0 : index
    %c0_19 = arith.constant 0 : index
    %37 = vector.load %arg6[%c0_18, %c0_19] : memref<32x96xf32, #tpu.memory_space<vmem>>, vector<32x96xf32>
    %c0_20 = arith.constant 0 : index
    %c0_21 = arith.constant 0 : index
    %38 = vector.load %arg8[%c0_20, %c0_21] : memref<1x96xf32, #tpu.memory_space<vmem>>, vector<1x96xf32>
    %cst_22 = arith.constant 0.000000e+00 : f32
    %39 = vector.broadcast %cst_22 : f32 to vector<8x32xf32>
    %cst_23 = arith.constant dense<0.000000e+00> : vector<8x96xf32>
    %40 = tpu.matmul %39, %37, %cst_23 {dimension_numbers = #tpu.dot_dimension_numbers<[1], [0], [0], [1], [0, 0, 1, 1], [], []>} : vector<8x32xf32>, vector<32x96xf32>, vector<8x96xf32> -> vector<8x96xf32>
    %41 = vector.broadcast %38 : vector<1x96xf32> to vector<8x96xf32>
    %42 = arith.addf %40, %41 : vector<8x96xf32>
    %43 = vector.extract_strided_slice %36 {offsets = [0, 0, 0], sizes = [8, 1, 96], strides = [1, 1, 1]} : vector<8x8x96xf32> to vector<8x1x96xf32>
    %44 = vector.shape_cast %43 : vector<8x1x96xf32> to vector<8x96xf32>
    %45 = vector.extract_strided_slice %44 {offsets = [0, 0], sizes = [8, 32], strides = [1, 1]} : vector<8x96xf32> to vector<8x32xf32>
    %46 = vector.extract_strided_slice %42 {offsets = [0, 0], sizes = [8, 32], strides = [1, 1]} : vector<8x96xf32> to vector<8x32xf32>
    %47 = arith.addf %45, %46 : vector<8x32xf32>
    %48 = arith.negf %47 : vector<8x32xf32>
    %49 = math.exp %48 : vector<8x32xf32>
    %cst_24 = arith.constant 1.000000e+00 : f32
    %50 = vector.broadcast %cst_24 : f32 to vector<8x32xf32>
    %51 = arith.addf %50, %49 : vector<8x32xf32>
    %52 = arith.divf %50, %51 : vector<8x32xf32>
    %53 = vector.extract_strided_slice %44 {offsets = [0, 32], sizes = [8, 32], strides = [1, 1]} : vector<8x96xf32> to vector<8x32xf32>
    %54 = vector.extract_strided_slice %42 {offsets = [0, 32], sizes = [8, 32], strides = [1, 1]} : vector<8x96xf32> to vector<8x32xf32>
    %55 = arith.addf %53, %54 : vector<8x32xf32>
    %56 = arith.negf %55 : vector<8x32xf32>
    %57 = math.exp %56 : vector<8x32xf32>
    %cst_25 = arith.constant 1.000000e+00 : f32
    %58 = vector.broadcast %cst_25 : f32 to vector<8x32xf32>
    %59 = arith.addf %58, %57 : vector<8x32xf32>
    %60 = arith.divf %58, %59 : vector<8x32xf32>
    %61 = vector.extract_strided_slice %44 {offsets = [0, 64], sizes = [8, 32], strides = [1, 1]} : vector<8x96xf32> to vector<8x32xf32>
    %62 = vector.extract_strided_slice %42 {offsets = [0, 64], sizes = [8, 32], strides = [1, 1]} : vector<8x96xf32> to vector<8x32xf32>
    %63 = arith.mulf %52, %62 : vector<8x32xf32>
    %64 = arith.addf %61, %63 : vector<8x32xf32>
    %65 = math.tanh %64 : vector<8x32xf32>
    %cst_26 = arith.constant 1.000000e+00 : f32
    %66 = vector.broadcast %cst_26 : f32 to vector<8x32xf32>
    %67 = arith.subf %66, %60 : vector<8x32xf32>
    %68 = arith.mulf %67, %65 : vector<8x32xf32>
    %69 = arith.mulf %60, %39 : vector<8x32xf32>
    %70 = arith.addf %68, %69 : vector<8x32xf32>
    %cst_27 = arith.constant dense<0.000000e+00> : vector<8x96xf32>
    %71 = tpu.matmul %70, %37, %cst_27 {dimension_numbers = #tpu.dot_dimension_numbers<[1], [0], [0], [1], [0, 0, 1, 1], [], []>} : vector<8x32xf32>, vector<32x96xf32>, vector<8x96xf32> -> vector<8x96xf32>
    %72 = vector.broadcast %38 : vector<1x96xf32> to vector<8x96xf32>
    %73 = arith.addf %71, %72 : vector<8x96xf32>
    %74 = vector.extract_strided_slice %36 {offsets = [0, 1, 0], sizes = [8, 1, 96], strides = [1, 1, 1]} : vector<8x8x96xf32> to vector<8x1x96xf32>
    %75 = vector.shape_cast %74 : vector<8x1x96xf32> to vector<8x96xf32>
    %76 = vector.extract_strided_slice %75 {offsets = [0, 0], sizes = [8, 32], strides = [1, 1]} : vector<8x96xf32> to vector<8x32xf32>
    %77 = vector.extract_strided_slice %73 {offsets = [0, 0], sizes = [8, 32], strides = [1, 1]} : vector<8x96xf32> to vector<8x32xf32>
    %78 = arith.addf %76, %77 : vector<8x32xf32>
    %79 = arith.negf %78 : vector<8x32xf32>
    %80 = math.exp %79 : vector<8x32xf32>
    %cst_28 = arith.constant 1.000000e+00 : f32
    %81 = vector.broadcast %cst_28 : f32 to vector<8x32xf32>
    %82 = arith.addf %81, %80 : vector<8x32xf32>
    %83 = arith.divf %81, %82 : vector<8x32xf32>
    %84 = vector.extract_strided_slice %75 {offsets = [0, 32], sizes = [8, 32], strides = [1, 1]} : vector<8x96xf32> to vector<8x32xf32>
    %85 = vector.extract_strided_slice %73 {offsets = [0, 32], sizes = [8, 32], strides = [1, 1]} : vector<8x96xf32> to vector<8x32xf32>
    %86 = arith.addf %84, %85 : vector<8x32xf32>
    %87 = arith.negf %86 : vector<8x32xf32>
    %88 = math.exp %87 : vector<8x32xf32>
    %cst_29 = arith.constant 1.000000e+00 : f32
    %89 = vector.broadcast %cst_29 : f32 to vector<8x32xf32>
    %90 = arith.addf %89, %88 : vector<8x32xf32>
    %91 = arith.divf %89, %90 : vector<8x32xf32>
    %92 = vector.extract_strided_slice %75 {offsets = [0, 64], sizes = [8, 32], strides = [1, 1]} : vector<8x96xf32> to vector<8x32xf32>
    %93 = vector.extract_strided_slice %73 {offsets = [0, 64], sizes = [8, 32], strides = [1, 1]} : vector<8x96xf32> to vector<8x32xf32>
    %94 = arith.mulf %83, %93 : vector<8x32xf32>
    %95 = arith.addf %92, %94 : vector<8x32xf32>
    %96 = math.tanh %95 : vector<8x32xf32>
    %cst_30 = arith.constant 1.000000e+00 : f32
    %97 = vector.broadcast %cst_30 : f32 to vector<8x32xf32>
    %98 = arith.subf %97, %91 : vector<8x32xf32>
    %99 = arith.mulf %98, %96 : vector<8x32xf32>
    %100 = arith.mulf %91, %70 : vector<8x32xf32>
    %101 = arith.addf %99, %100 : vector<8x32xf32>
    %cst_31 = arith.constant dense<0.000000e+00> : vector<8x96xf32>
    %102 = tpu.matmul %101, %37, %cst_31 {dimension_numbers = #tpu.dot_dimension_numbers<[1], [0], [0], [1], [0, 0, 1, 1], [], []>} : vector<8x32xf32>, vector<32x96xf32>, vector<8x96xf32> -> vector<8x96xf32>
    %103 = vector.broadcast %38 : vector<1x96xf32> to vector<8x96xf32>
    %104 = arith.addf %102, %103 : vector<8x96xf32>
    %105 = vector.extract_strided_slice %36 {offsets = [0, 2, 0], sizes = [8, 1, 96], strides = [1, 1, 1]} : vector<8x8x96xf32> to vector<8x1x96xf32>
    %106 = vector.shape_cast %105 : vector<8x1x96xf32> to vector<8x96xf32>
    %107 = vector.extract_strided_slice %106 {offsets = [0, 0], sizes = [8, 32], strides = [1, 1]} : vector<8x96xf32> to vector<8x32xf32>
    %108 = vector.extract_strided_slice %104 {offsets = [0, 0], sizes = [8, 32], strides = [1, 1]} : vector<8x96xf32> to vector<8x32xf32>
    %109 = arith.addf %107, %108 : vector<8x32xf32>
    %110 = arith.negf %109 : vector<8x32xf32>
    %111 = math.exp %110 : vector<8x32xf32>
    %cst_32 = arith.constant 1.000000e+00 : f32
    %112 = vector.broadcast %cst_32 : f32 to vector<8x32xf32>
    %113 = arith.addf %112, %111 : vector<8x32xf32>
    %114 = arith.divf %112, %113 : vector<8x32xf32>
    %115 = vector.extract_strided_slice %106 {offsets = [0, 32], sizes = [8, 32], strides = [1, 1]} : vector<8x96xf32> to vector<8x32xf32>
    %116 = vector.extract_strided_slice %104 {offsets = [0, 32], sizes = [8, 32], strides = [1, 1]} : vector<8x96xf32> to vector<8x32xf32>
    %117 = arith.addf %115, %116 : vector<8x32xf32>
    %118 = arith.negf %117 : vector<8x32xf32>
    %119 = math.exp %118 : vector<8x32xf32>
    %cst_33 = arith.constant 1.000000e+00 : f32
    %120 = vector.broadcast %cst_33 : f32 to vector<8x32xf32>
    %121 = arith.addf %120, %119 : vector<8x32xf32>
    %122 = arith.divf %120, %121 : vector<8x32xf32>
    %123 = vector.extract_strided_slice %106 {offsets = [0, 64], sizes = [8, 32], strides = [1, 1]} : vector<8x96xf32> to vector<8x32xf32>
    %124 = vector.extract_strided_slice %104 {offsets = [0, 64], sizes = [8, 32], strides = [1, 1]} : vector<8x96xf32> to vector<8x32xf32>
    %125 = arith.mulf %114, %124 : vector<8x32xf32>
    %126 = arith.addf %123, %125 : vector<8x32xf32>
    %127 = math.tanh %126 : vector<8x32xf32>
    %cst_34 = arith.constant 1.000000e+00 : f32
    %128 = vector.broadcast %cst_34 : f32 to vector<8x32xf32>
    %129 = arith.subf %128, %122 : vector<8x32xf32>
    %130 = arith.mulf %129, %127 : vector<8x32xf32>
    %131 = arith.mulf %122, %101 : vector<8x32xf32>
    %132 = arith.addf %130, %131 : vector<8x32xf32>
    %cst_35 = arith.constant dense<0.000000e+00> : vector<8x96xf32>
    %133 = tpu.matmul %132, %37, %cst_35 {dimension_numbers = #tpu.dot_dimension_numbers<[1], [0], [0], [1], [0, 0, 1, 1], [], []>} : vector<8x32xf32>, vector<32x96xf32>, vector<8x96xf32> -> vector<8x96xf32>
    %134 = vector.broadcast %38 : vector<1x96xf32> to vector<8x96xf32>
    %135 = arith.addf %133, %134 : vector<8x96xf32>
    %136 = vector.extract_strided_slice %36 {offsets = [0, 3, 0], sizes = [8, 1, 96], strides = [1, 1, 1]} : vector<8x8x96xf32> to vector<8x1x96xf32>
    %137 = vector.shape_cast %136 : vector<8x1x96xf32> to vector<8x96xf32>
    %138 = vector.extract_strided_slice %137 {offsets = [0, 0], sizes = [8, 32], strides = [1, 1]} : vector<8x96xf32> to vector<8x32xf32>
    %139 = vector.extract_strided_slice %135 {offsets = [0, 0], sizes = [8, 32], strides = [1, 1]} : vector<8x96xf32> to vector<8x32xf32>
    %140 = arith.addf %138, %139 : vector<8x32xf32>
    %141 = arith.negf %140 : vector<8x32xf32>
    %142 = math.exp %141 : vector<8x32xf32>
    %cst_36 = arith.constant 1.000000e+00 : f32
    %143 = vector.broadcast %cst_36 : f32 to vector<8x32xf32>
    %144 = arith.addf %143, %142 : vector<8x32xf32>
    %145 = arith.divf %143, %144 : vector<8x32xf32>
    %146 = vector.extract_strided_slice %137 {offsets = [0, 32], sizes = [8, 32], strides = [1, 1]} : vector<8x96xf32> to vector<8x32xf32>
    %147 = vector.extract_strided_slice %135 {offsets = [0, 32], sizes = [8, 32], strides = [1, 1]} : vector<8x96xf32> to vector<8x32xf32>
    %148 = arith.addf %146, %147 : vector<8x32xf32>
    %149 = arith.negf %148 : vector<8x32xf32>
    %150 = math.exp %149 : vector<8x32xf32>
    %cst_37 = arith.constant 1.000000e+00 : f32
    %151 = vector.broadcast %cst_37 : f32 to vector<8x32xf32>
    %152 = arith.addf %151, %150 : vector<8x32xf32>
    %153 = arith.divf %151, %152 : vector<8x32xf32>
    %154 = vector.extract_strided_slice %137 {offsets = [0, 64], sizes = [8, 32], strides = [1, 1]} : vector<8x96xf32> to vector<8x32xf32>
    %155 = vector.extract_strided_slice %135 {offsets = [0, 64], sizes = [8, 32], strides = [1, 1]} : vector<8x96xf32> to vector<8x32xf32>
    %156 = arith.mulf %145, %155 : vector<8x32xf32>
    %157 = arith.addf %154, %156 : vector<8x32xf32>
    %158 = math.tanh %157 : vector<8x32xf32>
    %cst_38 = arith.constant 1.000000e+00 : f32
    %159 = vector.broadcast %cst_38 : f32 to vector<8x32xf32>
    %160 = arith.subf %159, %153 : vector<8x32xf32>
    %161 = arith.mulf %160, %158 : vector<8x32xf32>
    %162 = arith.mulf %153, %132 : vector<8x32xf32>
    %163 = arith.addf %161, %162 : vector<8x32xf32>
    %cst_39 = arith.constant dense<0.000000e+00> : vector<8x96xf32>
    %164 = tpu.matmul %163, %37, %cst_39 {dimension_numbers = #tpu.dot_dimension_numbers<[1], [0], [0], [1], [0, 0, 1, 1], [], []>} : vector<8x32xf32>, vector<32x96xf32>, vector<8x96xf32> -> vector<8x96xf32>
    %165 = vector.broadcast %38 : vector<1x96xf32> to vector<8x96xf32>
    %166 = arith.addf %164, %165 : vector<8x96xf32>
    %167 = vector.extract_strided_slice %36 {offsets = [0, 4, 0], sizes = [8, 1, 96], strides = [1, 1, 1]} : vector<8x8x96xf32> to vector<8x1x96xf32>
    %168 = vector.shape_cast %167 : vector<8x1x96xf32> to vector<8x96xf32>
    %169 = vector.extract_strided_slice %168 {offsets = [0, 0], sizes = [8, 32], strides = [1, 1]} : vector<8x96xf32> to vector<8x32xf32>
    %170 = vector.extract_strided_slice %166 {offsets = [0, 0], sizes = [8, 32], strides = [1, 1]} : vector<8x96xf32> to vector<8x32xf32>
    %171 = arith.addf %169, %170 : vector<8x32xf32>
    %172 = arith.negf %171 : vector<8x32xf32>
    %173 = math.exp %172 : vector<8x32xf32>
    %cst_40 = arith.constant 1.000000e+00 : f32
    %174 = vector.broadcast %cst_40 : f32 to vector<8x32xf32>
    %175 = arith.addf %174, %173 : vector<8x32xf32>
    %176 = arith.divf %174, %175 : vector<8x32xf32>
    %177 = vector.extract_strided_slice %168 {offsets = [0, 32], sizes = [8, 32], strides = [1, 1]} : vector<8x96xf32> to vector<8x32xf32>
    %178 = vector.extract_strided_slice %166 {offsets = [0, 32], sizes = [8, 32], strides = [1, 1]} : vector<8x96xf32> to vector<8x32xf32>
    %179 = arith.addf %177, %178 : vector<8x32xf32>
    %180 = arith.negf %179 : vector<8x32xf32>
    %181 = math.exp %180 : vector<8x32xf32>
    %cst_41 = arith.constant 1.000000e+00 : f32
    %182 = vector.broadcast %cst_41 : f32 to vector<8x32xf32>
    %183 = arith.addf %182, %181 : vector<8x32xf32>
    %184 = arith.divf %182, %183 : vector<8x32xf32>
    %185 = vector.extract_strided_slice %168 {offsets = [0, 64], sizes = [8, 32], strides = [1, 1]} : vector<8x96xf32> to vector<8x32xf32>
    %186 = vector.extract_strided_slice %166 {offsets = [0, 64], sizes = [8, 32], strides = [1, 1]} : vector<8x96xf32> to vector<8x32xf32>
    %187 = arith.mulf %176, %186 : vector<8x32xf32>
    %188 = arith.addf %185, %187 : vector<8x32xf32>
    %189 = math.tanh %188 : vector<8x32xf32>
    %cst_42 = arith.constant 1.000000e+00 : f32
    %190 = vector.broadcast %cst_42 : f32 to vector<8x32xf32>
    %191 = arith.subf %190, %184 : vector<8x32xf32>
    %192 = arith.mulf %191, %189 : vector<8x32xf32>
    %193 = arith.mulf %184, %163 : vector<8x32xf32>
    %194 = arith.addf %192, %193 : vector<8x32xf32>
    %cst_43 = arith.constant dense<0.000000e+00> : vector<8x96xf32>
    %195 = tpu.matmul %194, %37, %cst_43 {dimension_numbers = #tpu.dot_dimension_numbers<[1], [0], [0], [1], [0, 0, 1, 1], [], []>} : vector<8x32xf32>, vector<32x96xf32>, vector<8x96xf32> -> vector<8x96xf32>
    %196 = vector.broadcast %38 : vector<1x96xf32> to vector<8x96xf32>
    %197 = arith.addf %195, %196 : vector<8x96xf32>
    %198 = vector.extract_strided_slice %36 {offsets = [0, 5, 0], sizes = [8, 1, 96], strides = [1, 1, 1]} : vector<8x8x96xf32> to vector<8x1x96xf32>
    %199 = vector.shape_cast %198 : vector<8x1x96xf32> to vector<8x96xf32>
    %200 = vector.extract_strided_slice %199 {offsets = [0, 0], sizes = [8, 32], strides = [1, 1]} : vector<8x96xf32> to vector<8x32xf32>
    %201 = vector.extract_strided_slice %197 {offsets = [0, 0], sizes = [8, 32], strides = [1, 1]} : vector<8x96xf32> to vector<8x32xf32>
    %202 = arith.addf %200, %201 : vector<8x32xf32>
    %203 = arith.negf %202 : vector<8x32xf32>
    %204 = math.exp %203 : vector<8x32xf32>
    %cst_44 = arith.constant 1.000000e+00 : f32
    %205 = vector.broadcast %cst_44 : f32 to vector<8x32xf32>
    %206 = arith.addf %205, %204 : vector<8x32xf32>
    %207 = arith.divf %205, %206 : vector<8x32xf32>
    %208 = vector.extract_strided_slice %199 {offsets = [0, 32], sizes = [8, 32], strides = [1, 1]} : vector<8x96xf32> to vector<8x32xf32>
    %209 = vector.extract_strided_slice %197 {offsets = [0, 32], sizes = [8, 32], strides = [1, 1]} : vector<8x96xf32> to vector<8x32xf32>
    %210 = arith.addf %208, %209 : vector<8x32xf32>
    %211 = arith.negf %210 : vector<8x32xf32>
    %212 = math.exp %211 : vector<8x32xf32>
    %cst_45 = arith.constant 1.000000e+00 : f32
    %213 = vector.broadcast %cst_45 : f32 to vector<8x32xf32>
    %214 = arith.addf %213, %212 : vector<8x32xf32>
    %215 = arith.divf %213, %214 : vector<8x32xf32>
    %216 = vector.extract_strided_slice %199 {offsets = [0, 64], sizes = [8, 32], strides = [1, 1]} : vector<8x96xf32> to vector<8x32xf32>
    %217 = vector.extract_strided_slice %197 {offsets = [0, 64], sizes = [8, 32], strides = [1, 1]} : vector<8x96xf32> to vector<8x32xf32>
    %218 = arith.mulf %207, %217 : vector<8x32xf32>
    %219 = arith.addf %216, %218 : vector<8x32xf32>
    %220 = math.tanh %219 : vector<8x32xf32>
    %cst_46 = arith.constant 1.000000e+00 : f32
    %221 = vector.broadcast %cst_46 : f32 to vector<8x32xf32>
    %222 = arith.subf %221, %215 : vector<8x32xf32>
    %223 = arith.mulf %222, %220 : vector<8x32xf32>
    %224 = arith.mulf %215, %194 : vector<8x32xf32>
    %225 = arith.addf %223, %224 : vector<8x32xf32>
    %cst_47 = arith.constant dense<0.000000e+00> : vector<8x96xf32>
    %226 = tpu.matmul %225, %37, %cst_47 {dimension_numbers = #tpu.dot_dimension_numbers<[1], [0], [0], [1], [0, 0, 1, 1], [], []>} : vector<8x32xf32>, vector<32x96xf32>, vector<8x96xf32> -> vector<8x96xf32>
    %227 = vector.broadcast %38 : vector<1x96xf32> to vector<8x96xf32>
    %228 = arith.addf %226, %227 : vector<8x96xf32>
    %229 = vector.extract_strided_slice %36 {offsets = [0, 6, 0], sizes = [8, 1, 96], strides = [1, 1, 1]} : vector<8x8x96xf32> to vector<8x1x96xf32>
    %230 = vector.shape_cast %229 : vector<8x1x96xf32> to vector<8x96xf32>
    %231 = vector.extract_strided_slice %230 {offsets = [0, 0], sizes = [8, 32], strides = [1, 1]} : vector<8x96xf32> to vector<8x32xf32>
    %232 = vector.extract_strided_slice %228 {offsets = [0, 0], sizes = [8, 32], strides = [1, 1]} : vector<8x96xf32> to vector<8x32xf32>
    %233 = arith.addf %231, %232 : vector<8x32xf32>
    %234 = arith.negf %233 : vector<8x32xf32>
    %235 = math.exp %234 : vector<8x32xf32>
    %cst_48 = arith.constant 1.000000e+00 : f32
    %236 = vector.broadcast %cst_48 : f32 to vector<8x32xf32>
    %237 = arith.addf %236, %235 : vector<8x32xf32>
    %238 = arith.divf %236, %237 : vector<8x32xf32>
    %239 = vector.extract_strided_slice %230 {offsets = [0, 32], sizes = [8, 32], strides = [1, 1]} : vector<8x96xf32> to vector<8x32xf32>
    %240 = vector.extract_strided_slice %228 {offsets = [0, 32], sizes = [8, 32], strides = [1, 1]} : vector<8x96xf32> to vector<8x32xf32>
    %241 = arith.addf %239, %240 : vector<8x32xf32>
    %242 = arith.negf %241 : vector<8x32xf32>
    %243 = math.exp %242 : vector<8x32xf32>
    %cst_49 = arith.constant 1.000000e+00 : f32
    %244 = vector.broadcast %cst_49 : f32 to vector<8x32xf32>
    %245 = arith.addf %244, %243 : vector<8x32xf32>
    %246 = arith.divf %244, %245 : vector<8x32xf32>
    %247 = vector.extract_strided_slice %230 {offsets = [0, 64], sizes = [8, 32], strides = [1, 1]} : vector<8x96xf32> to vector<8x32xf32>
    %248 = vector.extract_strided_slice %228 {offsets = [0, 64], sizes = [8, 32], strides = [1, 1]} : vector<8x96xf32> to vector<8x32xf32>
    %249 = arith.mulf %238, %248 : vector<8x32xf32>
    %250 = arith.addf %247, %249 : vector<8x32xf32>
    %251 = math.tanh %250 : vector<8x32xf32>
    %cst_50 = arith.constant 1.000000e+00 : f32
    %252 = vector.broadcast %cst_50 : f32 to vector<8x32xf32>
    %253 = arith.subf %252, %246 : vector<8x32xf32>
    %254 = arith.mulf %253, %251 : vector<8x32xf32>
    %255 = arith.mulf %246, %225 : vector<8x32xf32>
    %256 = arith.addf %254, %255 : vector<8x32xf32>
    %cst_51 = arith.constant dense<0.000000e+00> : vector<8x96xf32>
    %257 = tpu.matmul %256, %37, %cst_51 {dimension_numbers = #tpu.dot_dimension_numbers<[1], [0], [0], [1], [0, 0, 1, 1], [], []>} : vector<8x32xf32>, vector<32x96xf32>, vector<8x96xf32> -> vector<8x96xf32>
    %258 = vector.broadcast %38 : vector<1x96xf32> to vector<8x96xf32>
    %259 = arith.addf %257, %258 : vector<8x96xf32>
    %260 = vector.extract_strided_slice %36 {offsets = [0, 7, 0], sizes = [8, 1, 96], strides = [1, 1, 1]} : vector<8x8x96xf32> to vector<8x1x96xf32>
    %261 = vector.shape_cast %260 : vector<8x1x96xf32> to vector<8x96xf32>
    %262 = vector.extract_strided_slice %261 {offsets = [0, 0], sizes = [8, 32], strides = [1, 1]} : vector<8x96xf32> to vector<8x32xf32>
    %263 = vector.extract_strided_slice %259 {offsets = [0, 0], sizes = [8, 32], strides = [1, 1]} : vector<8x96xf32> to vector<8x32xf32>
    %264 = arith.addf %262, %263 : vector<8x32xf32>
    %265 = arith.negf %264 : vector<8x32xf32>
    %266 = math.exp %265 : vector<8x32xf32>
    %cst_52 = arith.constant 1.000000e+00 : f32
    %267 = vector.broadcast %cst_52 : f32 to vector<8x32xf32>
    %268 = arith.addf %267, %266 : vector<8x32xf32>
    %269 = arith.divf %267, %268 : vector<8x32xf32>
    %270 = vector.extract_strided_slice %261 {offsets = [0, 32], sizes = [8, 32], strides = [1, 1]} : vector<8x96xf32> to vector<8x32xf32>
    %271 = vector.extract_strided_slice %259 {offsets = [0, 32], sizes = [8, 32], strides = [1, 1]} : vector<8x96xf32> to vector<8x32xf32>
    %272 = arith.addf %270, %271 : vector<8x32xf32>
    %273 = arith.negf %272 : vector<8x32xf32>
    %274 = math.exp %273 : vector<8x32xf32>
    %cst_53 = arith.constant 1.000000e+00 : f32
    %275 = vector.broadcast %cst_53 : f32 to vector<8x32xf32>
    %276 = arith.addf %275, %274 : vector<8x32xf32>
    %277 = arith.divf %275, %276 : vector<8x32xf32>
    %278 = vector.extract_strided_slice %261 {offsets = [0, 64], sizes = [8, 32], strides = [1, 1]} : vector<8x96xf32> to vector<8x32xf32>
    %279 = vector.extract_strided_slice %259 {offsets = [0, 64], sizes = [8, 32], strides = [1, 1]} : vector<8x96xf32> to vector<8x32xf32>
    %280 = arith.mulf %269, %279 : vector<8x32xf32>
    %281 = arith.addf %278, %280 : vector<8x32xf32>
    %282 = math.tanh %281 : vector<8x32xf32>
    %cst_54 = arith.constant 1.000000e+00 : f32
    %283 = vector.broadcast %cst_54 : f32 to vector<8x32xf32>
    %284 = arith.subf %283, %277 : vector<8x32xf32>
    %285 = arith.mulf %284, %282 : vector<8x32xf32>
    %286 = arith.mulf %277, %256 : vector<8x32xf32>
    %287 = arith.addf %285, %286 : vector<8x32xf32>
    %c0_55 = arith.constant 0 : index
    %c32 = arith.constant 32 : index
    %288 = vector.load %arg14[%c0_55, %c32] : memref<8x128xf32, #tpu.memory_space<vmem>>, vector<8x32xf32>
    tpu.vector_store %arg14[%c0_55, %c32], %287 {strides = array<i32>} : memref<8x128xf32, #tpu.memory_space<vmem>>, vector<8x32xf32>,
    %c0_56 = arith.constant 0 : index
    %c0_57 = arith.constant 0 : index
    %289 = vector.load %arg9[%c0_56, %c0_57] : memref<8x64xf32, #tpu.memory_space<vmem>>, vector<8x64xf32>
    %c0_58 = arith.constant 0 : index
    %c0_59 = arith.constant 0 : index
    %290 = vector.load %arg10[%c0_58, %c0_59] : memref<64x64xf32, #tpu.memory_space<vmem>>, vector<64x64xf32>
    %cst_60 = arith.constant dense<0.000000e+00> : vector<8x64xf32>
    %291 = tpu.matmul %289, %290, %cst_60 {dimension_numbers = #tpu.dot_dimension_numbers<[1], [0], [0], [1], [0, 0, 1, 1], [], []>} : vector<8x64xf32>, vector<64x64xf32>, vector<8x64xf32> -> vector<8x64xf32>
    %c0_61 = arith.constant 0 : index
    %c0_62 = arith.constant 0 : index
    %292 = vector.load %arg11[%c0_61, %c0_62] : memref<1x64xf32, #tpu.memory_space<vmem>>, vector<1x64xf32>
    %293 = vector.broadcast %292 : vector<1x64xf32> to vector<8x64xf32>
    %294 = arith.addf %291, %293 : vector<8x64xf32>
    %cst_63 = arith.constant 0.000000e+00 : f32
    %295 = vector.broadcast %cst_63 : f32 to vector<8x64xf32>
    %296 = arith.maximumf %294, %295 : vector<8x64xf32>
    %c0_64 = arith.constant 0 : index
    %c0_65 = arith.constant 0 : index
    %297 = vector.load %arg12[%c0_64, %c0_65] : memref<64x32xf32, #tpu.memory_space<vmem>>, vector<64x32xf32>
    %cst_66 = arith.constant dense<0.000000e+00> : vector<8x32xf32>
    %298 = tpu.matmul %296, %297, %cst_66 {dimension_numbers = #tpu.dot_dimension_numbers<[1], [0], [0], [1], [0, 0, 1, 1], [], []>} : vector<8x64xf32>, vector<64x32xf32>, vector<8x32xf32> -> vector<8x32xf32>
    %c0_67 = arith.constant 0 : index
    %c0_68 = arith.constant 0 : index
    %299 = vector.load %arg13[%c0_67, %c0_68] : memref<1x32xf32, #tpu.memory_space<vmem>>, vector<1x32xf32>
    %300 = vector.broadcast %299 : vector<1x32xf32> to vector<8x32xf32>
    %301 = arith.addf %298, %300 : vector<8x32xf32>
    %cst_69 = arith.constant 0.000000e+00 : f32
    %302 = vector.broadcast %cst_69 : f32 to vector<8x32xf32>
    %303 = arith.maximumf %301, %302 : vector<8x32xf32>
    %c0_70 = arith.constant 0 : index
    %c64 = arith.constant 64 : index
    %304 = vector.load %arg14[%c0_70, %c64] : memref<8x128xf32, #tpu.memory_space<vmem>>, vector<8x32xf32>
    tpu.vector_store %arg14[%c0_70, %c64], %303 {strides = array<i32>} : memref<8x128xf32, #tpu.memory_space<vmem>>, vector<8x32xf32>,
    %cst_71 = arith.constant 0.000000e+00 : f32
    %305 = vector.broadcast %cst_71 : f32 to vector<8x32xf32>
    %c0_72 = arith.constant 0 : index
    %c96 = arith.constant 96 : index
    %306 = vector.load %arg14[%c0_72, %c96] : memref<8x128xf32, #tpu.memory_space<vmem>>, vector<8x32xf32>
    tpu.vector_store %arg14[%c0_72, %c96], %305 {strides = array<i32>} : memref<8x128xf32, #tpu.memory_space<vmem>>, vector<8x32xf32>,
    return
  }
  func.func @transform_0(%arg0: i32) -> (i32, i32) {
    %c0_i32 = arith.constant 0 : i32
    %c0_i32_0 = arith.constant 0 : i32
    return %arg0, %c0_i32 : i32, i32
  }
  func.func @transform_1(%arg0: i32) -> (i32, i32) {
    %c0_i32 = arith.constant 0 : i32
    %c0_i32_0 = arith.constant 0 : i32
    %c0_i32_1 = arith.constant 0 : i32
    return %c0_i32, %c0_i32_0 : i32, i32
  }
  func.func @transform_2(%arg0: i32) -> (i32, i32) {
    %c0_i32 = arith.constant 0 : i32
    %c0_i32_0 = arith.constant 0 : i32
    return %arg0, %c0_i32 : i32, i32
  }
  func.func @transform_3(%arg0: i32) -> (i32, i32) {
    %c0_i32 = arith.constant 0 : i32
    %c0_i32_0 = arith.constant 0 : i32
    %c0_i32_1 = arith.constant 0 : i32
    return %c0_i32, %c0_i32_0 : i32, i32
  }
  func.func @transform_4(%arg0: i32) -> (i32, i32) {
    %c0_i32 = arith.constant 0 : i32
    %c0_i32_0 = arith.constant 0 : i32
    %c0_i32_1 = arith.constant 0 : i32
    return %c0_i32, %c0_i32_0 : i32, i32
  }
  func.func @transform_5(%arg0: i32) -> (i32, i32) {
    %c0_i32 = arith.constant 0 : i32
    %c0_i32_0 = arith.constant 0 : i32
    %c0_i32_1 = arith.constant 0 : i32
    return %c0_i32, %c0_i32_0 : i32, i32
  }
  func.func @transform_6(%arg0: i32) -> (i32, i32) {
    %c0_i32 = arith.constant 0 : i32
    %c0_i32_0 = arith.constant 0 : i32
    %c0_i32_1 = arith.constant 0 : i32
    return %c0_i32, %c0_i32_0 : i32, i32
  }
  func.func @transform_7(%arg0: i32) -> (i32, i32) {
    %c0_i32 = arith.constant 0 : i32
    %c0_i32_0 = arith.constant 0 : i32
    %c0_i32_1 = arith.constant 0 : i32
    return %c0_i32, %c0_i32_0 : i32, i32
  }
  func.func @transform_8(%arg0: i32) -> (i32, i32) {
    %c0_i32 = arith.constant 0 : i32
    %c0_i32_0 = arith.constant 0 : i32
    return %arg0, %c0_i32 : i32, i32
  }
  func.func @transform_9(%arg0: i32) -> (i32, i32) {
    %c0_i32 = arith.constant 0 : i32
    %c0_i32_0 = arith.constant 0 : i32
    %c0_i32_1 = arith.constant 0 : i32
    return %c0_i32, %c0_i32_0 : i32, i32
  }
  func.func @transform_10(%arg0: i32) -> (i32, i32) {
    %c0_i32 = arith.constant 0 : i32
    %c0_i32_0 = arith.constant 0 : i32
    %c0_i32_1 = arith.constant 0 : i32
    return %c0_i32, %c0_i32_0 : i32, i32
  }
  func.func @transform_11(%arg0: i32) -> (i32, i32) {
    %c0_i32 = arith.constant 0 : i32
    %c0_i32_0 = arith.constant 0 : i32
    %c0_i32_1 = arith.constant 0 : i32
    return %c0_i32, %c0_i32_0 : i32, i32
  }
  func.func @transform_12(%arg0: i32) -> (i32, i32) {
    %c0_i32 = arith.constant 0 : i32
    %c0_i32_0 = arith.constant 0 : i32
    %c0_i32_1 = arith.constant 0 : i32
    return %c0_i32, %c0_i32_0 : i32, i32
  }
  func.func @transform_13(%arg0: i32) -> (i32, i32) {
    %c0_i32 = arith.constant 0 : i32
    %c0_i32_0 = arith.constant 0 : i32
    return %arg0, %c0_i32 : i32, i32
  }
}

module attributes {stable_mosaic.version = 11 : i64} {
  func.func @kernel(%arg0: i32, %arg1: memref<8x8xi32, #tpu.memory_space<vmem>>, %arg2: memref<33x32xf32, #tpu.memory_space<vmem>>, %arg3: memref<8x8xi32, #tpu.memory_space<vmem>>, %arg4: memref<17x16xf32, #tpu.memory_space<vmem>>, %arg5: memref<16x96xf32, #tpu.memory_space<vmem>>, %arg6: memref<32x96xf32, #tpu.memory_space<vmem>>, %arg7: memref<1x96xf32, #tpu.memory_space<vmem>>, %arg8: memref<1x96xf32, #tpu.memory_space<vmem>>, %arg9: memref<8x64xf32, #tpu.memory_space<vmem>>, %arg10: memref<64x64xf32, #tpu.memory_space<vmem>>, %arg11: memref<1x64xf32, #tpu.memory_space<vmem>>, %arg12: memref<64x32xf32, #tpu.memory_space<vmem>>, %arg13: memref<1x32xf32, #tpu.memory_space<vmem>>, %arg14: memref<8x128xf32, #tpu.memory_space<vmem>>) attributes {dimension_semantics = [#tpu.dimension_semantics<parallel>], iteration_bounds = array<i64: 1>, scalar_prefetch = 0 : i64, scratch_operands = 0 : i64, tpu.core_type = #tpu.core_type<tc>, window_params = [{transform_indices = @transform_0, window_bounds = array<i64: 8, 8>}, {pipeline_mode = #tpu.pipeline_mode<synchronous>, transform_indices = @transform_1, window_bounds = array<i64: 33, 32>}, {transform_indices = @transform_2, window_bounds = array<i64: 8, 8>}, {pipeline_mode = #tpu.pipeline_mode<synchronous>, transform_indices = @transform_3, window_bounds = array<i64: 17, 16>}, {pipeline_mode = #tpu.pipeline_mode<synchronous>, transform_indices = @transform_4, window_bounds = array<i64: 16, 96>}, {pipeline_mode = #tpu.pipeline_mode<synchronous>, transform_indices = @transform_5, window_bounds = array<i64: 32, 96>}, {pipeline_mode = #tpu.pipeline_mode<synchronous>, transform_indices = @transform_6, window_bounds = array<i64: 1, 96>}, {pipeline_mode = #tpu.pipeline_mode<synchronous>, transform_indices = @transform_7, window_bounds = array<i64: 1, 96>}, {transform_indices = @transform_8, window_bounds = array<i64: 8, 64>}, {pipeline_mode = #tpu.pipeline_mode<synchronous>, transform_indices = @transform_9, window_bounds = array<i64: 64, 64>}, {pipeline_mode = #tpu.pipeline_mode<synchronous>, transform_indices = @transform_10, window_bounds = array<i64: 1, 64>}, {pipeline_mode = #tpu.pipeline_mode<synchronous>, transform_indices = @transform_11, window_bounds = array<i64: 64, 32>}, {pipeline_mode = #tpu.pipeline_mode<synchronous>, transform_indices = @transform_12, window_bounds = array<i64: 1, 32>}, {transform_indices = @transform_13, window_bounds = array<i64: 8, 128>}]} {
    %c0 = arith.constant 0 : index
    %c0_0 = arith.constant 0 : index
    %0 = vector.load %arg1[%c0, %c0_0] : memref<8x8xi32, #tpu.memory_space<vmem>>, vector<8x8xi32>
    %c0_1 = arith.constant 0 : index
    %c0_2 = arith.constant 0 : index
    %1 = vector.load %arg2[%c0_1, %c0_2] : memref<33x32xf32, #tpu.memory_space<vmem>>, vector<33x32xf32>
    %2 = tpu.iota {dimensions = array<i32: 2>} : vector<8x8x33xi32>
    %3 = vector.shape_cast %0 : vector<8x8xi32> to vector<8x8x1xi32>
    %4 = vector.broadcast %3 : vector<8x8x1xi32> to vector<8x8x33xi32>
    %5 = arith.cmpi eq, %4, %2 : vector<8x8x33xi32>
    %6 = arith.extui %5 : vector<8x8x33xi1> to vector<8x8x33xi32>
    %7 = arith.sitofp %6 : vector<8x8x33xi32> to vector<8x8x33xf32>
    %c0_i32 = arith.constant 0 : i32
    %8 = vector.broadcast %c0_i32 : i32 to vector<8x8xi32>
    %9 = arith.cmpi ne, %0, %8 : vector<8x8xi32>
    %10 = arith.extui %9 : vector<8x8xi1> to vector<8x8xi32>
    %11 = arith.sitofp %10 : vector<8x8xi32> to vector<8x8xf32>
    %cst = arith.constant dense<0.000000e+00> : vector<8xf32>
    %12 = vector.multi_reduction <add>, %11, %cst [1] : vector<8x8xf32> to vector<8xf32>
    %13 = vector.shape_cast %12 : vector<8xf32> to vector<8x1xf32>
    %cst_3 = arith.constant dense<0.000000e+00> : vector<8x33xf32>
    %14 = vector.multi_reduction <add>, %7, %cst_3 [1] : vector<8x8x33xf32> to vector<8x33xf32>
    %cst_4 = arith.constant dense<0.000000e+00> : vector<8x32xf32>
    %15 = tpu.matmul %14, %1, %cst_4 {dimension_numbers = #tpu.dot_dimension_numbers<[1], [0], [0], [1], [0, 0, 1, 1], [], []>} : vector<8x33xf32>, vector<33x32xf32>, vector<8x32xf32> -> vector<8x32xf32>
    %cst_5 = arith.constant 9.99999971E-10 : f32
    %16 = vector.broadcast %cst_5 : f32 to vector<8x1xf32>
    %17 = arith.maximumf %13, %16 : vector<8x1xf32>
    %18 = vector.broadcast %17 : vector<8x1xf32> to vector<8x32xf32>
    %19 = arith.divf %15, %18 : vector<8x32xf32>
    %c0_6 = arith.constant 0 : index
    %c0_7 = arith.constant 0 : index
    %20 = vector.load %arg14[%c0_6, %c0_7] : memref<8x128xf32, #tpu.memory_space<vmem>>, vector<8x32xf32>
    tpu.vector_store %arg14[%c0_6, %c0_7], %19 {strides = array<i32>} : memref<8x128xf32, #tpu.memory_space<vmem>>, vector<8x32xf32>,
    %c0_8 = arith.constant 0 : index
    %c0_9 = arith.constant 0 : index
    %21 = vector.load %arg3[%c0_8, %c0_9] : memref<8x8xi32, #tpu.memory_space<vmem>>, vector<8x8xi32>
    %c0_10 = arith.constant 0 : index
    %c0_11 = arith.constant 0 : index
    %22 = vector.load %arg4[%c0_10, %c0_11] : memref<17x16xf32, #tpu.memory_space<vmem>>, vector<17x16xf32>
    %23 = tpu.iota {dimensions = array<i32: 2>} : vector<8x8x17xi32>
    %24 = vector.shape_cast %21 : vector<8x8xi32> to vector<8x8x1xi32>
    %25 = vector.broadcast %24 : vector<8x8x1xi32> to vector<8x8x17xi32>
    %26 = arith.cmpi eq, %25, %23 : vector<8x8x17xi32>
    %27 = arith.extui %26 : vector<8x8x17xi1> to vector<8x8x17xi32>
    %28 = arith.sitofp %27 : vector<8x8x17xi32> to vector<8x8x17xf32>
    %29 = vector.shape_cast %28 : vector<8x8x17xf32> to vector<64x17xf32>
    %cst_12 = arith.constant dense<0.000000e+00> : vector<64x16xf32>
    %30 = tpu.matmul %29, %22, %cst_12 {dimension_numbers = #tpu.dot_dimension_numbers<[1], [0], [0], [1], [0, 0, 1, 1], [], []>} : vector<64x17xf32>, vector<17x16xf32>, vector<64x16xf32> -> vector<64x16xf32>
    %c0_13 = arith.constant 0 : index
    %c0_14 = arith.constant 0 : index
    %31 = vector.load %arg5[%c0_13, %c0_14] : memref<16x96xf32, #tpu.memory_space<vmem>>, vector<16x96xf32>
    %cst_15 = arith.constant dense<0.000000e+00> : vector<64x96xf32>
    %32 = tpu.matmul %30, %31, %cst_15 {dimension_numbers = #tpu.dot_dimension_numbers<[1], [0], [0], [1], [0, 0, 1, 1], [], []>} : vector<64x16xf32>, vector<16x96xf32>, vector<64x96xf32> -> vector<64x96xf32>
    %c0_16 = arith.constant 0 : index
    %c0_17 = arith.constant 0 : index
    %33 = vector.load %arg7[%c0_16, %c0_17] : memref<1x96xf32, #tpu.memory_space<vmem>>, vector<1x96xf32>
    %34 = vector.broadcast %33 : vector<1x96xf32> to vector<64x96xf32>
    %35 = arith.addf %32, %34 : vector<64x96xf32>
    %36 = vector.shape_cast %35 : vector<64x96xf32> to vector<8x8x96xf32>
    %c0_18 = arith.constant 0 : index
    %c0_19 = arith.constant 0 : index
    %37 = vector.load %arg6[%c0_18, %c0_19] : memref<32x96xf32, #tpu.memory_space<vmem>>, vector<32x96xf32>
    %c0_20 = arith.constant 0 : index
    %c0_21 = arith.constant 0 : index
    %38 = vector.load %arg8[%c0_20, %c0_21] : memref<1x96xf32, #tpu.memory_space<vmem>>, vector<1x96xf32>
    %cst_22 = arith.constant 0.000000e+00 : f32
    %39 = vector.broadcast %cst_22 : f32 to vector<8x32xf32>
    %cst_23 = arith.constant dense<0.000000e+00> : vector<8x96xf32>
    %40 = tpu.matmul %39, %37, %cst_23 {dimension_numbers = #tpu.dot_dimension_numbers<[1], [0], [0], [1], [0, 0, 1, 1], [], []>} : vector<8x32xf32>, vector<32x96xf32>, vector<8x96xf32> -> vector<8x96xf32>
    %41 = vector.broadcast %38 : vector<1x96xf32> to vector<8x96xf32>
    %42 = arith.addf %40, %41 : vector<8x96xf32>
    %43 = vector.extract_strided_slice %36 {offsets = [0, 0, 0], sizes = [8, 1, 96], strides = [1, 1, 1]} : vector<8x8x96xf32> to vector<8x1x96xf32>
    %44 = vector.shape_cast %43 : vector<8x1x96xf32> to vector<8x96xf32>
    %45 = vector.extract_strided_slice %44 {offsets = [0, 0], sizes = [8, 32], strides = [1, 1]} : vector<8x96xf32> to vector<8x32xf32>
    %46 = vector.extract_strided_slice %42 {offsets = [0, 0], sizes = [8, 32], strides = [1, 1]} : vector<8x96xf32> to vector<8x32xf32>
    %47 = arith.addf %45, %46 : vector<8x32xf32>
    %48 = arith.negf %47 : vector<8x32xf32>
    %49 = math.exp %48 : vector<8x32xf32>
    %cst_24 = arith.constant 1.000000e+00 : f32
    %50 = vector.broadcast %cst_24 : f32 to vector<8x32xf32>
    %51 = arith.addf %50, %49 : vector<8x32xf32>
    %52 = arith.divf %50, %51 : vector<8x32xf32>
    %53 = vector.extract_strided_slice %44 {offsets = [0, 32], sizes = [8, 32], strides = [1, 1]} : vector<8x96xf32> to vector<8x32xf32>
    %54 = vector.extract_strided_slice %42 {offsets = [0, 32], sizes = [8, 32], strides = [1, 1]} : vector<8x96xf32> to vector<8x32xf32>
    %55 = arith.addf %53, %54 : vector<8x32xf32>
    %56 = arith.negf %55 : vector<8x32xf32>
    %57 = math.exp %56 : vector<8x32xf32>
    %cst_25 = arith.constant 1.000000e+00 : f32
    %58 = vector.broadcast %cst_25 : f32 to vector<8x32xf32>
    %59 = arith.addf %58, %57 : vector<8x32xf32>
    %60 = arith.divf %58, %59 : vector<8x32xf32>
    %61 = vector.extract_strided_slice %44 {offsets = [0, 64], sizes = [8, 32], strides = [1, 1]} : vector<8x96xf32> to vector<8x32xf32>
    %62 = vector.extract_strided_slice %42 {offsets = [0, 64], sizes = [8, 32], strides = [1, 1]} : vector<8x96xf32> to vector<8x32xf32>
    %63 = arith.mulf %52, %62 : vector<8x32xf32>
    %64 = arith.addf %61, %63 : vector<8x32xf32>
    %65 = math.tanh %64 : vector<8x32xf32>
    %cst_26 = arith.constant 1.000000e+00 : f32
    %66 = vector.broadcast %cst_26 : f32 to vector<8x32xf32>
    %67 = arith.subf %66, %60 : vector<8x32xf32>
    %68 = arith.mulf %67, %65 : vector<8x32xf32>
    %69 = arith.mulf %60, %39 : vector<8x32xf32>
    %70 = arith.addf %68, %69 : vector<8x32xf32>
    %cst_27 = arith.constant dense<0.000000e+00> : vector<8x96xf32>
    %71 = tpu.matmul %70, %37, %cst_27 {dimension_numbers = #tpu.dot_dimension_numbers<[1], [0], [0], [1], [0, 0, 1, 1], [], []>} : vector<8x32xf32>, vector<32x96xf32>, vector<8x96xf32> -> vector<8x96xf32>
    %72 = vector.broadcast %38 : vector<1x96xf32> to vector<8x96xf32>
    %73 = arith.addf %71, %72 : vector<8x96xf32>
    %74 = vector.extract_strided_slice %36 {offsets = [0, 1, 0], sizes = [8, 1, 96], strides = [1, 1, 1]} : vector<8x8x96xf32> to vector<8x1x96xf32>
    %75 = vector.shape_cast %74 : vector<8x1x96xf32> to vector<8x96xf32>
    %76 = vector.extract_strided_slice %75 {offsets = [0, 0], sizes = [8, 32], strides = [1, 1]} : vector<8x96xf32> to vector<8x32xf32>
    %77 = vector.extract_strided_slice %73 {offsets = [0, 0], sizes = [8, 32], strides = [1, 1]} : vector<8x96xf32> to vector<8x32xf32>
    %78 = arith.addf %76, %77 : vector<8x32xf32>
    %79 = arith.negf %78 : vector<8x32xf32>
    %80 = math.exp %79 : vector<8x32xf32>
    %cst_28 = arith.constant 1.000000e+00 : f32
    %81 = vector.broadcast %cst_28 : f32 to vector<8x32xf32>
    %82 = arith.addf %81, %80 : vector<8x32xf32>
    %83 = arith.divf %81, %82 : vector<8x32xf32>
    %84 = vector.extract_strided_slice %75 {offsets = [0, 32], sizes = [8, 32], strides = [1, 1]} : vector<8x96xf32> to vector<8x32xf32>
    %85 = vector.extract_strided_slice %73 {offsets = [0, 32], sizes = [8, 32], strides = [1, 1]} : vector<8x96xf32> to vector<8x32xf32>
    %86 = arith.addf %84, %85 : vector<8x32xf32>
    %87 = arith.negf %86 : vector<8x32xf32>
    %88 = math.exp %87 : vector<8x32xf32>
    %cst_29 = arith.constant 1.000000e+00 : f32
    %89 = vector.broadcast %cst_29 : f32 to vector<8x32xf32>
    %90 = arith.addf %89, %88 : vector<8x32xf32>
    %91 = arith.divf %89, %90 : vector<8x32xf32>
    %92 = vector.extract_strided_slice %75 {offsets = [0, 64], sizes = [8, 32], strides = [1, 1]} : vector<8x96xf32> to vector<8x32xf32>
    %93 = vector.extract_strided_slice %73 {offsets = [0, 64], sizes = [8, 32], strides = [1, 1]} : vector<8x96xf32> to vector<8x32xf32>
    %94 = arith.mulf %83, %93 : vector<8x32xf32>
    %95 = arith.addf %92, %94 : vector<8x32xf32>
    %96 = math.tanh %95 : vector<8x32xf32>
    %cst_30 = arith.constant 1.000000e+00 : f32
    %97 = vector.broadcast %cst_30 : f32 to vector<8x32xf32>
    %98 = arith.subf %97, %91 : vector<8x32xf32>
    %99 = arith.mulf %98, %96 : vector<8x32xf32>
    %100 = arith.mulf %91, %70 : vector<8x32xf32>
    %101 = arith.addf %99, %100 : vector<8x32xf32>
    %cst_31 = arith.constant dense<0.000000e+00> : vector<8x96xf32>
    %102 = tpu.matmul %101, %37, %cst_31 {dimension_numbers = #tpu.dot_dimension_numbers<[1], [0], [0], [1], [0, 0, 1, 1], [], []>} : vector<8x32xf32>, vector<32x96xf32>, vector<8x96xf32> -> vector<8x96xf32>
    %103 = vector.broadcast %38 : vector<1x96xf32> to vector<8x96xf32>
    %104 = arith.addf %102, %103 : vector<8x96xf32>
    %105 = vector.extract_strided_slice %36 {offsets = [0, 2, 0], sizes = [8, 1, 96], strides = [1, 1, 1]} : vector<8x8x96xf32> to vector<8x1x96xf32>
    %106 = vector.shape_cast %105 : vector<8x1x96xf32> to vector<8x96xf32>
    %107 = vector.extract_strided_slice %106 {offsets = [0, 0], sizes = [8, 32], strides = [1, 1]} : vector<8x96xf32> to vector<8x32xf32>
    %108 = vector.extract_strided_slice %104 {offsets = [0, 0], sizes = [8, 32], strides = [1, 1]} : vector<8x96xf32> to vector<8x32xf32>
    %109 = arith.addf %107, %108 : vector<8x32xf32>
    %110 = arith.negf %109 : vector<8x32xf32>
    %111 = math.exp %110 : vector<8x32xf32>
    %cst_32 = arith.constant 1.000000e+00 : f32
    %112 = vector.broadcast %cst_32 : f32 to vector<8x32xf32>
    %113 = arith.addf %112, %111 : vector<8x32xf32>
    %114 = arith.divf %112, %113 : vector<8x32xf32>
    %115 = vector.extract_strided_slice %106 {offsets = [0, 32], sizes = [8, 32], strides = [1, 1]} : vector<8x96xf32> to vector<8x32xf32>
    %116 = vector.extract_strided_slice %104 {offsets = [0, 32], sizes = [8, 32], strides = [1, 1]} : vector<8x96xf32> to vector<8x32xf32>
    %117 = arith.addf %115, %116 : vector<8x32xf32>
    %118 = arith.negf %117 : vector<8x32xf32>
    %119 = math.exp %118 : vector<8x32xf32>
    %cst_33 = arith.constant 1.000000e+00 : f32
    %120 = vector.broadcast %cst_33 : f32 to vector<8x32xf32>
    %121 = arith.addf %120, %119 : vector<8x32xf32>
    %122 = arith.divf %120, %121 : vector<8x32xf32>
    %123 = vector.extract_strided_slice %106 {offsets = [0, 64], sizes = [8, 32], strides = [1, 1]} : vector<8x96xf32> to vector<8x32xf32>
    %124 = vector.extract_strided_slice %104 {offsets = [0, 64], sizes = [8, 32], strides = [1, 1]} : vector<8x96xf32> to vector<8x32xf32>
    %125 = arith.mulf %114, %124 : vector<8x32xf32>
    %126 = arith.addf %123, %125 : vector<8x32xf32>
    %127 = math.tanh %126 : vector<8x32xf32>
    %cst_34 = arith.constant 1.000000e+00 : f32
    %128 = vector.broadcast %cst_34 : f32 to vector<8x32xf32>
    %129 = arith.subf %128, %122 : vector<8x32xf32>
    %130 = arith.mulf %129, %127 : vector<8x32xf32>
    %131 = arith.mulf %122, %101 : vector<8x32xf32>
    %132 = arith.addf %130, %131 : vector<8x32xf32>
    %cst_35 = arith.constant dense<0.000000e+00> : vector<8x96xf32>
    %133 = tpu.matmul %132, %37, %cst_35 {dimension_numbers = #tpu.dot_dimension_numbers<[1], [0], [0], [1], [0, 0, 1, 1], [], []>} : vector<8x32xf32>, vector<32x96xf32>, vector<8x96xf32> -> vector<8x96xf32>
    %134 = vector.broadcast %38 : vector<1x96xf32> to vector<8x96xf32>
    %135 = arith.addf %133, %134 : vector<8x96xf32>
    %136 = vector.extract_strided_slice %36 {offsets = [0, 3, 0], sizes = [8, 1, 96], strides = [1, 1, 1]} : vector<8x8x96xf32> to vector<8x1x96xf32>
    %137 = vector.shape_cast %136 : vector<8x1x96xf32> to vector<8x96xf32>
    %138 = vector.extract_strided_slice %137 {offsets = [0, 0], sizes = [8, 32], strides = [1, 1]} : vector<8x96xf32> to vector<8x32xf32>
    %139 = vector.extract_strided_slice %135 {offsets = [0, 0], sizes = [8, 32], strides = [1, 1]} : vector<8x96xf32> to vector<8x32xf32>
    %140 = arith.addf %138, %139 : vector<8x32xf32>
    %141 = arith.negf %140 : vector<8x32xf32>
    %142 = math.exp %141 : vector<8x32xf32>
    %cst_36 = arith.constant 1.000000e+00 : f32
    %143 = vector.broadcast %cst_36 : f32 to vector<8x32xf32>
    %144 = arith.addf %143, %142 : vector<8x32xf32>
    %145 = arith.divf %143, %144 : vector<8x32xf32>
    %146 = vector.extract_strided_slice %137 {offsets = [0, 32], sizes = [8, 32], strides = [1, 1]} : vector<8x96xf32> to vector<8x32xf32>
    %147 = vector.extract_strided_slice %135 {offsets = [0, 32], sizes = [8, 32], strides = [1, 1]} : vector<8x96xf32> to vector<8x32xf32>
    %148 = arith.addf %146, %147 : vector<8x32xf32>
    %149 = arith.negf %148 : vector<8x32xf32>
    %150 = math.exp %149 : vector<8x32xf32>
    %cst_37 = arith.constant 1.000000e+00 : f32
    %151 = vector.broadcast %cst_37 : f32 to vector<8x32xf32>
    %152 = arith.addf %151, %150 : vector<8x32xf32>
    %153 = arith.divf %151, %152 : vector<8x32xf32>
    %154 = vector.extract_strided_slice %137 {offsets = [0, 64], sizes = [8, 32], strides = [1, 1]} : vector<8x96xf32> to vector<8x32xf32>
    %155 = vector.extract_strided_slice %135 {offsets = [0, 64], sizes = [8, 32], strides = [1, 1]} : vector<8x96xf32> to vector<8x32xf32>
    %156 = arith.mulf %145, %155 : vector<8x32xf32>
    %157 = arith.addf %154, %156 : vector<8x32xf32>
    %158 = math.tanh %157 : vector<8x32xf32>
    %cst_38 = arith.constant 1.000000e+00 : f32
    %159 = vector.broadcast %cst_38 : f32 to vector<8x32xf32>
    %160 = arith.subf %159, %153 : vector<8x32xf32>
    %161 = arith.mulf %160, %158 : vector<8x32xf32>
    %162 = arith.mulf %153, %132 : vector<8x32xf32>
    %163 = arith.addf %161, %162 : vector<8x32xf32>
    %cst_39 = arith.constant dense<0.000000e+00> : vector<8x96xf32>
    %164 = tpu.matmul %163, %37, %cst_39 {dimension_numbers = #tpu.dot_dimension_numbers<[1], [0], [0], [1], [0, 0, 1, 1], [], []>} : vector<8x32xf32>, vector<32x96xf32>, vector<8x96xf32> -> vector<8x96xf32>
    %165 = vector.broadcast %38 : vector<1x96xf32> to vector<8x96xf32>
    %166 = arith.addf %164, %165 : vector<8x96xf32>
    %167 = vector.extract_strided_slice %36 {offsets = [0, 4, 0], sizes = [8, 1, 96], strides = [1, 1, 1]} : vector<8x8x96xf32> to vector<8x1x96xf32>
    %168 = vector.shape_cast %167 : vector<8x1x96xf32> to vector<8x96xf32>
    %169 = vector.extract_strided_slice %168 {offsets = [0, 0], sizes = [8, 32], strides = [1, 1]} : vector<8x96xf32> to vector<8x32xf32>
    %170 = vector.extract_strided_slice %166 {offsets = [0, 0], sizes = [8, 32], strides = [1, 1]} : vector<8x96xf32> to vector<8x32xf32>
    %171 = arith.addf %169, %170 : vector<8x32xf32>
    %172 = arith.negf %171 : vector<8x32xf32>
    %173 = math.exp %172 : vector<8x32xf32>
    %cst_40 = arith.constant 1.000000e+00 : f32
    %174 = vector.broadcast %cst_40 : f32 to vector<8x32xf32>
    %175 = arith.addf %174, %173 : vector<8x32xf32>
    %176 = arith.divf %174, %175 : vector<8x32xf32>
    %177 = vector.extract_strided_slice %168 {offsets = [0, 32], sizes = [8, 32], strides = [1, 1]} : vector<8x96xf32> to vector<8x32xf32>
    %178 = vector.extract_strided_slice %166 {offsets = [0, 32], sizes = [8, 32], strides = [1, 1]} : vector<8x96xf32> to vector<8x32xf32>
    %179 = arith.addf %177, %178 : vector<8x32xf32>
    %180 = arith.negf %179 : vector<8x32xf32>
    %181 = math.exp %180 : vector<8x32xf32>
    %cst_41 = arith.constant 1.000000e+00 : f32
    %182 = vector.broadcast %cst_41 : f32 to vector<8x32xf32>
    %183 = arith.addf %182, %181 : vector<8x32xf32>
    %184 = arith.divf %182, %183 : vector<8x32xf32>
    %185 = vector.extract_strided_slice %168 {offsets = [0, 64], sizes = [8, 32], strides = [1, 1]} : vector<8x96xf32> to vector<8x32xf32>
    %186 = vector.extract_strided_slice %166 {offsets = [0, 64], sizes = [8, 32], strides = [1, 1]} : vector<8x96xf32> to vector<8x32xf32>
    %187 = arith.mulf %176, %186 : vector<8x32xf32>
    %188 = arith.addf %185, %187 : vector<8x32xf32>
    %189 = math.tanh %188 : vector<8x32xf32>
    %cst_42 = arith.constant 1.000000e+00 : f32
    %190 = vector.broadcast %cst_42 : f32 to vector<8x32xf32>
    %191 = arith.subf %190, %184 : vector<8x32xf32>
    %192 = arith.mulf %191, %189 : vector<8x32xf32>
    %193 = arith.mulf %184, %163 : vector<8x32xf32>
    %194 = arith.addf %192, %193 : vector<8x32xf32>
    %cst_43 = arith.constant dense<0.000000e+00> : vector<8x96xf32>
    %195 = tpu.matmul %194, %37, %cst_43 {dimension_numbers = #tpu.dot_dimension_numbers<[1], [0], [0], [1], [0, 0, 1, 1], [], []>} : vector<8x32xf32>, vector<32x96xf32>, vector<8x96xf32> -> vector<8x96xf32>
    %196 = vector.broadcast %38 : vector<1x96xf32> to vector<8x96xf32>
    %197 = arith.addf %195, %196 : vector<8x96xf32>
    %198 = vector.extract_strided_slice %36 {offsets = [0, 5, 0], sizes = [8, 1, 96], strides = [1, 1, 1]} : vector<8x8x96xf32> to vector<8x1x96xf32>
    %199 = vector.shape_cast %198 : vector<8x1x96xf32> to vector<8x96xf32>
    %200 = vector.extract_strided_slice %199 {offsets = [0, 0], sizes = [8, 32], strides = [1, 1]} : vector<8x96xf32> to vector<8x32xf32>
    %201 = vector.extract_strided_slice %197 {offsets = [0, 0], sizes = [8, 32], strides = [1, 1]} : vector<8x96xf32> to vector<8x32xf32>
    %202 = arith.addf %200, %201 : vector<8x32xf32>
    %203 = arith.negf %202 : vector<8x32xf32>
    %204 = math.exp %203 : vector<8x32xf32>
    %cst_44 = arith.constant 1.000000e+00 : f32
    %205 = vector.broadcast %cst_44 : f32 to vector<8x32xf32>
    %206 = arith.addf %205, %204 : vector<8x32xf32>
    %207 = arith.divf %205, %206 : vector<8x32xf32>
    %208 = vector.extract_strided_slice %199 {offsets = [0, 32], sizes = [8, 32], strides = [1, 1]} : vector<8x96xf32> to vector<8x32xf32>
    %209 = vector.extract_strided_slice %197 {offsets = [0, 32], sizes = [8, 32], strides = [1, 1]} : vector<8x96xf32> to vector<8x32xf32>
    %210 = arith.addf %208, %209 : vector<8x32xf32>
    %211 = arith.negf %210 : vector<8x32xf32>
    %212 = math.exp %211 : vector<8x32xf32>
    %cst_45 = arith.constant 1.000000e+00 : f32
    %213 = vector.broadcast %cst_45 : f32 to vector<8x32xf32>
    %214 = arith.addf %213, %212 : vector<8x32xf32>
    %215 = arith.divf %213, %214 : vector<8x32xf32>
    %216 = vector.extract_strided_slice %199 {offsets = [0, 64], sizes = [8, 32], strides = [1, 1]} : vector<8x96xf32> to vector<8x32xf32>
    %217 = vector.extract_strided_slice %197 {offsets = [0, 64], sizes = [8, 32], strides = [1, 1]} : vector<8x96xf32> to vector<8x32xf32>
    %218 = arith.mulf %207, %217 : vector<8x32xf32>
    %219 = arith.addf %216, %218 : vector<8x32xf32>
    %220 = math.tanh %219 : vector<8x32xf32>
    %cst_46 = arith.constant 1.000000e+00 : f32
    %221 = vector.broadcast %cst_46 : f32 to vector<8x32xf32>
    %222 = arith.subf %221, %215 : vector<8x32xf32>
    %223 = arith.mulf %222, %220 : vector<8x32xf32>
    %224 = arith.mulf %215, %194 : vector<8x32xf32>
    %225 = arith.addf %223, %224 : vector<8x32xf32>
    %cst_47 = arith.constant dense<0.000000e+00> : vector<8x96xf32>
    %226 = tpu.matmul %225, %37, %cst_47 {dimension_numbers = #tpu.dot_dimension_numbers<[1], [0], [0], [1], [0, 0, 1, 1], [], []>} : vector<8x32xf32>, vector<32x96xf32>, vector<8x96xf32> -> vector<8x96xf32>
    %227 = vector.broadcast %38 : vector<1x96xf32> to vector<8x96xf32>
    %228 = arith.addf %226, %227 : vector<8x96xf32>
    %229 = vector.extract_strided_slice %36 {offsets = [0, 6, 0], sizes = [8, 1, 96], strides = [1, 1, 1]} : vector<8x8x96xf32> to vector<8x1x96xf32>
    %230 = vector.shape_cast %229 : vector<8x1x96xf32> to vector<8x96xf32>
    %231 = vector.extract_strided_slice %230 {offsets = [0, 0], sizes = [8, 32], strides = [1, 1]} : vector<8x96xf32> to vector<8x32xf32>
    %232 = vector.extract_strided_slice %228 {offsets = [0, 0], sizes = [8, 32], strides = [1, 1]} : vector<8x96xf32> to vector<8x32xf32>
    %233 = arith.addf %231, %232 : vector<8x32xf32>
    %234 = arith.negf %233 : vector<8x32xf32>
    %235 = math.exp %234 : vector<8x32xf32>
    %cst_48 = arith.constant 1.000000e+00 : f32
    %236 = vector.broadcast %cst_48 : f32 to vector<8x32xf32>
    %237 = arith.addf %236, %235 : vector<8x32xf32>
    %238 = arith.divf %236, %237 : vector<8x32xf32>
    %239 = vector.extract_strided_slice %230 {offsets = [0, 32], sizes = [8, 32], strides = [1, 1]} : vector<8x96xf32> to vector<8x32xf32>
    %240 = vector.extract_strided_slice %228 {offsets = [0, 32], sizes = [8, 32], strides = [1, 1]} : vector<8x96xf32> to vector<8x32xf32>
    %241 = arith.addf %239, %240 : vector<8x32xf32>
    %242 = arith.negf %241 : vector<8x32xf32>
    %243 = math.exp %242 : vector<8x32xf32>
    %cst_49 = arith.constant 1.000000e+00 : f32
    %244 = vector.broadcast %cst_49 : f32 to vector<8x32xf32>
    %245 = arith.addf %244, %243 : vector<8x32xf32>
    %246 = arith.divf %244, %245 : vector<8x32xf32>
    %247 = vector.extract_strided_slice %230 {offsets = [0, 64], sizes = [8, 32], strides = [1, 1]} : vector<8x96xf32> to vector<8x32xf32>
    %248 = vector.extract_strided_slice %228 {offsets = [0, 64], sizes = [8, 32], strides = [1, 1]} : vector<8x96xf32> to vector<8x32xf32>
    %249 = arith.mulf %238, %248 : vector<8x32xf32>
    %250 = arith.addf %247, %249 : vector<8x32xf32>
    %251 = math.tanh %250 : vector<8x32xf32>
    %cst_50 = arith.constant 1.000000e+00 : f32
    %252 = vector.broadcast %cst_50 : f32 to vector<8x32xf32>
    %253 = arith.subf %252, %246 : vector<8x32xf32>
    %254 = arith.mulf %253, %251 : vector<8x32xf32>
    %255 = arith.mulf %246, %225 : vector<8x32xf32>
    %256 = arith.addf %254, %255 : vector<8x32xf32>
    %cst_51 = arith.constant dense<0.000000e+00> : vector<8x96xf32>
    %257 = tpu.matmul %256, %37, %cst_51 {dimension_numbers = #tpu.dot_dimension_numbers<[1], [0], [0], [1], [0, 0, 1, 1], [], []>} : vector<8x32xf32>, vector<32x96xf32>, vector<8x96xf32> -> vector<8x96xf32>
    %258 = vector.broadcast %38 : vector<1x96xf32> to vector<8x96xf32>
    %259 = arith.addf %257, %258 : vector<8x96xf32>
    %260 = vector.extract_strided_slice %36 {offsets = [0, 7, 0], sizes = [8, 1, 96], strides = [1, 1, 1]} : vector<8x8x96xf32> to vector<8x1x96xf32>
    %261 = vector.shape_cast %260 : vector<8x1x96xf32> to vector<8x96xf32>
    %262 = vector.extract_strided_slice %261 {offsets = [0, 0], sizes = [8, 32], strides = [1, 1]} : vector<8x96xf32> to vector<8x32xf32>
    %263 = vector.extract_strided_slice %259 {offsets = [0, 0], sizes = [8, 32], strides = [1, 1]} : vector<8x96xf32> to vector<8x32xf32>
    %264 = arith.addf %262, %263 : vector<8x32xf32>
    %265 = arith.negf %264 : vector<8x32xf32>
    %266 = math.exp %265 : vector<8x32xf32>
    %cst_52 = arith.constant 1.000000e+00 : f32
    %267 = vector.broadcast %cst_52 : f32 to vector<8x32xf32>
    %268 = arith.addf %267, %266 : vector<8x32xf32>
    %269 = arith.divf %267, %268 : vector<8x32xf32>
    %270 = vector.extract_strided_slice %261 {offsets = [0, 32], sizes = [8, 32], strides = [1, 1]} : vector<8x96xf32> to vector<8x32xf32>
    %271 = vector.extract_strided_slice %259 {offsets = [0, 32], sizes = [8, 32], strides = [1, 1]} : vector<8x96xf32> to vector<8x32xf32>
    %272 = arith.addf %270, %271 : vector<8x32xf32>
    %273 = arith.negf %272 : vector<8x32xf32>
    %274 = math.exp %273 : vector<8x32xf32>
    %cst_53 = arith.constant 1.000000e+00 : f32
    %275 = vector.broadcast %cst_53 : f32 to vector<8x32xf32>
    %276 = arith.addf %275, %274 : vector<8x32xf32>
    %277 = arith.divf %275, %276 : vector<8x32xf32>
    %278 = vector.extract_strided_slice %261 {offsets = [0, 64], sizes = [8, 32], strides = [1, 1]} : vector<8x96xf32> to vector<8x32xf32>
    %279 = vector.extract_strided_slice %259 {offsets = [0, 64], sizes = [8, 32], strides = [1, 1]} : vector<8x96xf32> to vector<8x32xf32>
    %280 = arith.mulf %269, %279 : vector<8x32xf32>
    %281 = arith.addf %278, %280 : vector<8x32xf32>
    %282 = math.tanh %281 : vector<8x32xf32>
    %cst_54 = arith.constant 1.000000e+00 : f32
    %283 = vector.broadcast %cst_54 : f32 to vector<8x32xf32>
    %284 = arith.subf %283, %277 : vector<8x32xf32>
    %285 = arith.mulf %284, %282 : vector<8x32xf32>
    %286 = arith.mulf %277, %256 : vector<8x32xf32>
    %287 = arith.addf %285, %286 : vector<8x32xf32>
    %c0_55 = arith.constant 0 : index
    %c32 = arith.constant 32 : index
    %288 = vector.load %arg14[%c0_55, %c32] : memref<8x128xf32, #tpu.memory_space<vmem>>, vector<8x32xf32>
    tpu.vector_store %arg14[%c0_55, %c32], %287 {strides = array<i32>} : memref<8x128xf32, #tpu.memory_space<vmem>>, vector<8x32xf32>,
    %c0_56 = arith.constant 0 : index
    %c0_57 = arith.constant 0 : index
    %289 = vector.load %arg9[%c0_56, %c0_57] : memref<8x64xf32, #tpu.memory_space<vmem>>, vector<8x64xf32>
    %c0_58 = arith.constant 0 : index
    %c0_59 = arith.constant 0 : index
    %290 = vector.load %arg10[%c0_58, %c0_59] : memref<64x64xf32, #tpu.memory_space<vmem>>, vector<64x64xf32>
    %cst_60 = arith.constant dense<0.000000e+00> : vector<8x64xf32>
    %291 = tpu.matmul %289, %290, %cst_60 {dimension_numbers = #tpu.dot_dimension_numbers<[1], [0], [0], [1], [0, 0, 1, 1], [], []>} : vector<8x64xf32>, vector<64x64xf32>, vector<8x64xf32> -> vector<8x64xf32>
    %c0_61 = arith.constant 0 : index
    %c0_62 = arith.constant 0 : index
    %292 = vector.load %arg11[%c0_61, %c0_62] : memref<1x64xf32, #tpu.memory_space<vmem>>, vector<1x64xf32>
    %293 = vector.broadcast %292 : vector<1x64xf32> to vector<8x64xf32>
    %294 = arith.addf %291, %293 : vector<8x64xf32>
    %cst_63 = arith.constant 0.000000e+00 : f32
    %295 = vector.broadcast %cst_63 : f32 to vector<8x64xf32>
    %296 = arith.maximumf %294, %295 : vector<8x64xf32>
    %c0_64 = arith.constant 0 : index
    %c0_65 = arith.constant 0 : index
    %297 = vector.load %arg12[%c0_64, %c0_65] : memref<64x32xf32, #tpu.memory_space<vmem>>, vector<64x32xf32>
    %cst_66 = arith.constant dense<0.000000e+00> : vector<8x32xf32>
    %298 = tpu.matmul %296, %297, %cst_66 {dimension_numbers = #tpu.dot_dimension_numbers<[1], [0], [0], [1], [0, 0, 1, 1], [], []>} : vector<8x64xf32>, vector<64x32xf32>, vector<8x32xf32> -> vector<8x32xf32>
    %c0_67 = arith.constant 0 : index
    %c0_68 = arith.constant 0 : index
    %299 = vector.load %arg13[%c0_67, %c0_68] : memref<1x32xf32, #tpu.memory_space<vmem>>, vector<1x32xf32>
    %300 = vector.broadcast %299 : vector<1x32xf32> to vector<8x32xf32>
    %301 = arith.addf %298, %300 : vector<8x32xf32>
    %cst_69 = arith.constant 0.000000e+00 : f32
    %302 = vector.broadcast %cst_69 : f32 to vector<8x32xf32>
    %303 = arith.maximumf %301, %302 : vector<8x32xf32>
    %c0_70 = arith.constant 0 : index
    %c64 = arith.constant 64 : index
    %304 = vector.load %arg14[%c0_70, %c64] : memref<8x128xf32, #tpu.memory_space<vmem>>, vector<8x32xf32>
    tpu.vector_store %arg14[%c0_70, %c64], %303 {strides = array<i32>} : memref<8x128xf32, #tpu.memory_space<vmem>>, vector<8x32xf32>,
    %cst_71 = arith.constant 0.000000e+00 : f32
    %305 = vector.broadcast %cst_71 : f32 to vector<8x32xf32>
    %c0_72 = arith.constant 0 : index
    %c96 = arith.constant 96 : index
    %306 = vector.load %arg14[%c0_72, %c96] : memref<8x128xf32, #tpu.memory_space<vmem>>, vector<8x32xf32>
    tpu.vector_store %arg14[%c0_72, %c96], %305 {strides = array<i32>} : memref<8x128xf32, #tpu.memory_space<vmem>>, vector<8x32xf32>,
    return
  }
  func.func @transform_0(%arg0: i32) -> (i32, i32) {
    %c0_i32 = arith.constant 0 : i32
    %c0_i32_0 = arith.constant 0 : i32
    return %arg0, %c0_i32 : i32, i32
  }
  func.func @transform_1(%arg0: i32) -> (i32, i32) {
    %c0_i32 = arith.constant 0 : i32
    %c0_i32_0 = arith.constant 0 : i32
    %c0_i32_1 = arith.constant 0 : i32
    return %c0_i32, %c0_i32_0 : i32, i32
  }
  func.func @transform_2(%arg0: i32) -> (i32, i32) {
    %c0_i32 = arith.constant 0 : i32
    %c0_i32_0 = arith.constant 0 : i32
    return %arg0, %c0_i32 : i32, i32
  }
  func.func @transform_3(%arg0: i32) -> (i32, i32) {
    %c0_i32 = arith.constant 0 : i32
    %c0_i32_0 = arith.constant 0 : i32
    %c0_i32_1 = arith.constant 0 : i32
    return %c0_i32, %c0_i32_0 : i32, i32
  }
  func.func @transform_4(%arg0: i32) -> (i32, i32) {
    %c0_i32 = arith.constant 0 : i32
    %c0_i32_0 = arith.constant 0 : i32
    %c0_i32_1 = arith.constant 0 : i32
    return %c0_i32, %c0_i32_0 : i32, i32
  }
  func.func @transform_5(%arg0: i32) -> (i32, i32) {
    %c0_i32 = arith.constant 0 : i32
    %c0_i32_0 = arith.constant 0 : i32
    %c0_i32_1 = arith.constant 0 : i32
    return %c0_i32, %c0_i32_0 : i32, i32
  }
  func.func @transform_6(%arg0: i32) -> (i32, i32) {
    %c0_i32 = arith.constant 0 : i32
    %c0_i32_0 = arith.constant 0 : i32
    %c0_i32_1 = arith.constant 0 : i32
    return %c0_i32, %c0_i32_0 : i32, i32
  }
  func.func @transform_7(%arg0: i32) -> (i32, i32) {
    %c0_i32 = arith.constant 0 : i32
    %c0_i32_0 = arith.constant 0 : i32
    %c0_i32_1 = arith.constant 0 : i32
    return %c0_i32, %c0_i32_0 : i32, i32
  }
  func.func @transform_8(%arg0: i32) -> (i32, i32) {
    %c0_i32 = arith.constant 0 : i32
    %c0_i32_0 = arith.constant 0 : i32
    return %arg0, %c0_i32 : i32, i32
  }
  func.func @transform_9(%arg0: i32) -> (i32, i32) {
    %c0_i32 = arith.constant 0 : i32
    %c0_i32_0 = arith.constant 0 : i32
    %c0_i32_1 = arith.constant 0 : i32
    return %c0_i32, %c0_i32_0 : i32, i32
  }
  func.func @transform_10(%arg0: i32) -> (i32, i32) {
    %c0_i32 = arith.constant 0 : i32
    %c0_i32_0 = arith.constant 0 : i32
    %c0_i32_1 = arith.constant 0 : i32
    return %c0_i32, %c0_i32_0 : i32, i32
  }
  func.func @transform_11(%arg0: i32) -> (i32, i32) {
    %c0_i32 = arith.constant 0 : i32
    %c0_i32_0 = arith.constant 0 : i32
    %c0_i32_1 = arith.constant 0 : i32
    return %c0_i32, %c0_i32_0 : i32, i32
  }
  func.func @transform_12(%arg0: i32) -> (i32, i32) {
    %c0_i32 = arith.constant 0 : i32
    %c0_i32_0 = arith.constant 0 : i32
    %c0_i32_1 = arith.constant 0 : i32
    return %c0_i32, %c0_i32_0 : i32, i32
  }
  func.func @transform_13(%arg0: i32) -> (i32, i32) {
    %c0_i32 = arith.constant 0 : i32
    %c0_i32_0 = arith.constant 0 : i32
    return %arg0, %c0_i32 : i32, i32
  }
}

</mosaic_0001>

<bundles_post_ra>
// kernel: tpu_custom_call.1
= control target key start
LH: loop header
LB: loop body
LE: loop exit
PB: predicated region body
PF: predicated region fallthrough
CT: control target
= control target key end

     0   :  { %v51_v0 = vlaneseq  ;;  %vm221_vm0 = vcmask 1040384   ;;  %s6176_s0 = inlined_call_operand.vmem [shape: s32[8,8], index: 0, kind: input, shape index: {}]   ;;  %s6177_s1 = inlined_call_operand.vmem [shape: f32[33,32], index: 1, kind: input, shape index: {}]   ;;  %s6178_s2 = inlined_call_operand.vmem [shape: s32[8,8], index: 2, kind: input, shape index: {}]   ;;  %s6179_s3 = inlined_call_operand.vmem [shape: f32[17,16], index: 3, kind: input, shape index: {}]   ;;  %s6180_s4 = inlined_call_operand.vmem [shape: f32[16,96], index: 4, kind: input, shape index: {}]   ;;  %s6181_s5 = inlined_call_operand.vmem [shape: f32[32,96], index: 5, kind: input, shape index: {}]   ;;  %s6182_s6 = inlined_call_operand.vmem [shape: f32[1,96], index: 6, kind: input, shape index: {}]   ;;  %s6183_s7 = inlined_call_operand.vmem [shape: f32[1,96], index: 7, kind: input, shape index: {}]   ;;  %s6184_s8 = inlined_call_operand.vmem [shape: f32[8,64], index: 8, kind: input, shape index: {}]   ;;  %s6185_s9 = inlined_call_operand.vmem [shape: f32[64,64], index: 9, kind: input, shape index: {}]   ;;  %s6186_s10 = inlined_call_operand.vmem [shape: f32[1,64], index: 10, kind: input, shape index: {}]   ;;  %s6187_s11 = inlined_call_operand.vmem [shape: f32[64,32], index: 11, kind: input, shape index: {}]   ;;  %s6188_s12 = inlined_call_operand.vmem [shape: f32[1,32], index: 12, kind: input, shape index: {}]   ;;  %s6189_s13 = inlined_call_operand.hbm [shape: f32[8,128], index: 13, kind: output, shape index: {}]  }
   0x1   :  { %v266_v1 = vld [vmem:[%s6179_s3 + $0x10] sm:$0x1]  ;;  %v265_v2 = vld [vmem:[%s6179_s3 + $0x8] sm:$0xff] }
   0x2   :  { %3650 = vmatpush.msk.msra.mxu1 %vm221_vm0, %v266_v1  ;;  %v55_v3 = vshrl.u32 %v51_v0, 7 }
   0x4   :  { %389 = vmatpush.msra.mxu1 %v265_v2  ;;  %3745 = vset.pattern.permute.xlu1 %v55_v3 }
   0x5   :  { %3744 = vset.pattern.permute.xlu0 %v55_v3 }
   0x6   :  { %18 = vsyncpa [#allocation3], 0  ;;  %v263_v4 = vld [vmem:[%s6178_s2] sm:$0xff]  ;;  %3746 = vset.pattern.permute.xlu2 %v55_v3  ;;  %v4258_v14 = vand.u32 127, %v51_v0  ;;  %vm347_vm1 = vcmask 138240   ;;  %v4171_v16 = vmov 0.0  }
   0x7   :  { %v281_v5 = vperm.slane %v263_v4, 2  ;;  %v267_v6 = vperm.slane %v263_v4, 0  ;;  %v295_v7 = vperm.slane %v263_v4, 4  ;;  %v288_v8 = vperm.slane %v263_v4, 3  ;;  %v264_v13 = vld [vmem:[%s6179_s3] sm:$0xff]  ;;  %v4266_v18 = vld [vmem:[%s6181_s5 + $0x18] sm:$0xff] }
   0x8   :  { %v274_v9 = vperm.slane %v263_v4, 1  ;;  %v302_v10 = vperm.slane %v263_v4, 5  ;;  %v316_v11 = vperm.slane %v263_v4, 7  ;;  %v309_v12 = vperm.slane %v263_v4, 6  ;;  %390 = vmatpush.msra.mxu1 %v264_v13  ;;  %v4271_v19 = vld [vmem:[%s6181_s5 + $0x10] sm:$0xff]  ;;  %511 = vmatpush.msra.mxu3 %v4266_v18  ;;  %v4277_v20 = vld [vmem:[%s6181_s5 + $0x8] sm:$0xff] }
   0x9   :  { %v4286_v23 = vld [vmem:[%s6181_s5] sm:$0xff]  ;;  %v417_v29 = vld [vmem:[%s6180_s4 + $0x8] sm:$0xff]  ;;  %vm422_vm10 = vcmask 130048   ;;  %s3622_s28 = sshll.u32 %s6189_s13, 4  ;;  %s3623_s28 = int_to_ptr.hbm [resolvable:$true] %s3622_s28 }
   0xa   :  { %512 = vmatpush.msra.mxu3 %v4271_v19  ;;  %461 = vmatpush.msra.mxu2 %v417_v29  ;;  %v416_v37 = vld [vmem:[%s6180_s4] sm:$0xff]  ;;  %s4172_s4 = smov 64  }
   0xb   :  { %v4328_v40 = vld [vmem:[%s6183_s7] ss:$0 sm:$0xff] }
   0xc   :  { %286 = vperm.xlu1 %3745, %v281_v5   ;;  %513 = vmatpush.msra.mxu3 %v4277_v20  ;;  %v4366_v56 = vld [vmem:[%s6182_s6] ss:$0 sm:$0xff]  ;;  %s4173_s6 = smov 96  }
   0xd   :  { %272 = vperm.xlu0 %3744, %v267_v6   ;;  %462 = vmatpush.msra.mxu2 %v416_v37 }
   0xe   :  { %300 = vperm.xlu2 %3746, %v295_v7   ;;  %514 = vmatpush.msra.mxu3 %v4286_v23 }
   0xf   :  { %515 = vmatmul.f32.vlgmr.msra.gmra.mxu3 %v4171_v16 }
  0x10   :  { %877 = vmatpush.msrb.mxu3 %v4266_v18 }
  0x12   :  { %878 = vmatpush.msrb.mxu3 %v4271_v19 }
  0x14   :  { %293 = vperm.xlu1 %3745, %v288_v8   ;;  %879 = vmatpush.msrb.mxu3 %v4277_v20 }
  0x15   :  { %279 = vperm.xlu0 %3744, %v274_v9  }
  0x16   :  { %307 = vperm.xlu2 %3746, %v302_v10   ;;  %880 = vmatpush.msrb.mxu3 %v4286_v23 }
  0x18   :  { %1639 = vmatpush.msra.mxu3 %v4266_v18 }
  0x1a   :  { %1640 = vmatpush.msra.mxu3 %v4271_v19 }
  0x1c   :  { %321 = vperm.xlu1 %3745, %v316_v11   ;;  %1641 = vmatpush.msra.mxu3 %v4277_v20 }
  0x1d   :  { %314 = vperm.xlu0 %3744, %v309_v12  }
  0x1e   :  { %1642 = vmatpush.msra.mxu3 %v4286_v23 }
  0x68   :  { %v301_v27 = vpop.permute.xlu2 %300 }
  0x69   :  { %vm327_vm6 = vcmp.eq.s32.totalorder %v301_v27, %v4258_v14 }
  0x6a   :  { %v3646_v30 = vsel %vm327_vm6, 1.0, %v4171_v16 }
  0x70   :  { %v308_v31 = vpop.permute.xlu2 %307 }
  0x71   :  { %vm328_vm7 = vcmp.eq.s32.totalorder %v308_v31, %v4258_v14 }
  0x72   :  { %v3647_v32 = vsel %vm328_vm7, 1.0, %v4171_v16 }
  0x7e   :  { %v287_v24 = vpop.permute.xlu1 %286 }
  0x7f   :  { %v273_v15 = vpop.permute.xlu0 %272  ;;  %vm325_vm4 = vcmp.eq.s32.totalorder %v287_v24, %v4258_v14 }
  0x80   :  { %vm323_vm2 = vcmp.eq.s32.totalorder %v273_v15, %v4258_v14  ;;  %v3644_v25 = vsel %vm325_vm4, 1.0, %v4171_v16 }
  0x81   :  { %v3642_v17 = vsel %vm323_vm2, 1.0, %v4171_v16 }
  0x82   :  { %3651 = vmatmul.msk.f32.vlgmr.msra.gmra.mxu1 %vm347_vm1, %v3642_v17 }
  0x86   :  { %v294_v26 = vpop.permute.xlu1 %293 }
  0x87   :  { %v280_v21 = vpop.permute.xlu0 %279  ;;  %vm326_vm5 = vcmp.eq.s32.totalorder %v294_v26, %v4258_v14 }
  0x88   :  { %vm324_vm3 = vcmp.eq.s32.totalorder %v280_v21, %v4258_v14  ;;  %v3645_v28 = vsel %vm326_vm5, 1.0, %v4171_v16 }
  0x89   :  { %v3643_v22 = vsel %vm324_vm3, 1.0, %v4171_v16 }
  0x8a   :  { %3652 = vmatmul.msk.f32.gmra.mxu1 %vm347_vm1, %v3643_v22 }
  0x8e   :  { %v322_v35 = vpop.permute.xlu1 %321 }
  0x8f   :  { %v315_v33 = vpop.permute.xlu0 %314  ;;  %vm330_vm9 = vcmp.eq.s32.totalorder %v322_v35, %v4258_v14 }
  0x90   :  { %vm329_vm8 = vcmp.eq.s32.totalorder %v315_v33, %v4258_v14  ;;  %v3649_v36 = vsel %vm330_vm9, 1.0, %v4171_v16 }
  0x91   :  { %v3648_v34 = vsel %vm329_vm8, 1.0, %v4171_v16 }
  0x92   :  { %3653 = vmatmul.msk.f32.gmra.mxu1 %vm347_vm1, %v3644_v25  ;;  %v516_v41 = vpop.f32.mrf.mxu3 }
  0x93   :  { %v4331_v43 = vadd.f32 %v4328_v40, %v516_v41 }
  0x95   :  { %695 = vrot.lane.b32.xlu1 %v4331_v43, %s4172_s4  ;;  %v521_v45 = vrot.slane %v4331_v43, 2  ;;  %v520_v46 = vrot.slane %v4331_v43, 1  ;;  %v524_v47 = vrot.slane %v4331_v43, 5  ;;  %v523_v48 = vrot.slane %v4331_v43, 4 }
  0x96   :  { %v522_v49 = vrot.slane %v4331_v43, 3  ;;  %v525_v51 = vrot.slane %v4331_v43, 6  ;;  %v526_v52 = vrot.slane %v4331_v43, 7 }
  0x97   :  { %699 = vrot.lane.b32.xlu0 %v521_v45, %s4172_s4  ;;  %697 = vrot.lane.b32.xlu2 %v520_v46, %s4172_s4 }
  0x9a   :  { %3654 = vmatmul.msk.f32.gmra.mxu1 %vm347_vm1, %v3645_v28 }
  0x9d   :  { %705 = vrot.lane.b32.xlu1 %v524_v47, %s4172_s4 }
  0x9f   :  { %703 = vrot.lane.b32.xlu0 %v523_v48, %s4172_s4  ;;  %701 = vrot.lane.b32.xlu2 %v522_v49, %s4172_s4 }
  0xa2   :  { %3655 = vmatmul.msk.f32.gmra.mxu1 %vm347_vm1, %v3646_v30 }
  0xa7   :  { %707 = vrot.lane.b32.xlu2 %v525_v51, %s4172_s4  ;;  %709 = vrot.lane.b32.xlu0 %v526_v52, %s4172_s4 }
  0xaa   :  { %3656 = vmatmul.msk.f32.gmra.mxu1 %vm347_vm1, %v3647_v32 }
  0xb2   :  { %3657 = vmatmul.msk.f32.gmra.mxu1 %vm347_vm1, %v3648_v34 }
  0xba   :  { %3658 = vmatmul.msk.f32.gmra.mxu1 %vm347_vm1, %v3649_v36 }
  0xff   :  { %v392_v38 = vpop.f32.mrf.mxu1 }
 0x100   :  { %3659 = vmatmul.msk.f32.vlgmr.msra.gmra.mxu2 %vm422_vm10, %v392_v38 }
 0x107   :  { %v395_v39 = vpop.f32.mrf.mxu1  ;;  %v696_v28 = vpop.permute.xlu1 %695 }
 0x108   :  { %3660 = vmatmul.msk.f32.gmra.mxu2 %vm422_vm10, %v395_v39 }
 0x10f   :  { %v398_v42 = vpop.f32.mrf.mxu1 }
 0x110   :  { %3661 = vmatmul.msk.f32.gmra.mxu2 %vm422_vm10, %v398_v42 }
 0x117   :  { %v401_v44 = vpop.f32.mrf.mxu1 }
 0x118   :  { %3662 = vmatmul.msk.f32.gmra.mxu2 %vm422_vm10, %v401_v44 }
 0x11f   :  { %v404_v50 = vpop.f32.mrf.mxu1 }
 0x120   :  { %3663 = vmatmul.msk.f32.gmra.mxu2 %vm422_vm10, %v404_v50  ;;  %v698_v50 = vpop.permute.xlu2 %697 }
 0x127   :  { %v407_v53 = vpop.f32.mrf.mxu1 }
 0x128   :  { %3664 = vmatmul.msk.f32.gmra.mxu2 %vm422_vm10, %v407_v53 }
 0x12f   :  { %v410_v54 = vpop.f32.mrf.mxu1 }
 0x130   :  { %3665 = vmatmul.msk.f32.gmra.mxu2 %vm422_vm10, %v410_v54 }
 0x137   :  { %v413_v55 = vpop.f32.mrf.mxu1 }
 0x138   :  { %3666 = vmatmul.msk.f32.gmra.mxu2 %vm422_vm10, %v413_v55 }
 0x183   :  { %v464_v57 = vpop.f32.mrf.mxu2 }
 0x184   :  { %v4369_v58 = vadd.f32 %v4366_v56, %v464_v57 }
 0x186   :  { %v535_v59 = vadd.f32 %v4331_v43, %v4369_v58 }
 0x188   :  { %v3667_v60 = vmul.f32 -1.442695, %v535_v59 }
 0x18a   :  { %3751 = vpow2.f32 %v3667_v60 }
 0x18b   :  { %v467_v61 = vpop.f32.mrf.mxu2 }
 0x18c   :  { %v4374_v62 = vadd.f32 %v4366_v56, %v467_v61 }
 0x18e   :  { %v536_v63 = vadd.f32 %v520_v46, %v4374_v62 }
 0x190   :  { %v3752_v0 = vpop.eup %3751  ;;  %v3668_v1 = vmul.f32 -1.442695, %v536_v63 }
 0x191   :  { %v567_v2 = vadd.f32 1.0, %v3752_v0 }
 0x192   :  { %3753 = vpow2.f32 %v3668_v1 }
 0x193   :  { %v470_v3 = vpop.f32.mrf.mxu2  ;;  %3755 = vrcp.f32 %v567_v2  ;;  %v586_v15 = vand.u32 2147483648, %v567_v2  ;;  %v584_v21 = vand.u32 2147483647, %v567_v2  ;;  %vm580_vm12 = vweird.f32 %v567_v2 }
 0x194   :  { %v4378_v4 = vadd.f32 %v4366_v56, %v470_v3 }
 0x195   :  { %v587_v29 = vor.u32 1.1754944e-38, %v586_v15  ;;  %vm585_vm14 = vcmp.eq.f32.partialorder %v584_v21, 8.507059e+37 }
 0x196   :  { %v537_v5 = vadd.f32 %v521_v45, %v4378_v4 }
 0x198   :  { %v3754_v6 = vpop.eup %3753  ;;  %v3669_v7 = vmul.f32 -1.442695, %v537_v5 }
 0x199   :  { %v3756_v8 = vpop.eup %3755  ;;  %v568_v9 = vadd.f32 1.0, %v3754_v6 }
 0x19a   :  { %v576_v10 = vmul.f32 %v3756_v8, %v567_v2  ;;  %3757 = vpow2.f32 %v3669_v7  ;;  %vm581_vm11 = vweird.f32 %v3756_v8 }
 0x19b   :  { %v473_v11 = vpop.f32.mrf.mxu2  ;;  %3759 = vrcp.f32 %v568_v9  ;;  %vm582_vm13 = vmor %vm580_vm12, %vm581_vm11  ;;  %v601_v38 = vand.u32 2147483648, %v568_v9  ;;  %v599_v41 = vand.u32 2147483647, %v568_v9  ;;  %vm595_vm1 = vweird.f32 %v568_v9 }
 0x19c   :  { %v4382_v12 = vadd.f32 %v4366_v56, %v473_v11  ;;  %v577_v13 = vsub.f32 1.0, %v576_v10 }
 0x19d   :  { %v602_v53 = vor.u32 1.1754944e-38, %v601_v38  ;;  %vm600_vm3 = vcmp.eq.f32.partialorder %v599_v41, 8.507059e+37 }
 0x19e   :  { %v578_v17 = vmul.f32 %v3756_v8, %v577_v13  ;;  %v538_v22 = vadd.f32 %v522_v49, %v4382_v12 }
 0x1a0   :  { %v3758_v24 = vpop.eup %3757  ;;  %v579_v25 = vadd.f32 %v3756_v8, %v578_v17  ;;  %v3670_v26 = vmul.f32 -1.442695, %v538_v22 }
 0x1a1   :  { %v3760_v27 = vpop.eup %3759  ;;  %v569_v30 = vadd.f32 1.0, %v3758_v24 }
 0x1a2   :  { %v583_v31 = vsel %vm582_vm13, %v3756_v8, %v579_v25  ;;  %v591_v32 = vmul.f32 %v3760_v27, %v568_v9  ;;  %3761 = vpow2.f32 %v3670_v26  ;;  %vm596_vm15 = vweird.f32 %v3760_v27  ;;  %v700_v9 = vpop.permute.xlu0 %699 }
 0x1a3   :  { %v4385_v33 = vsel %vm585_vm14, %v587_v29, %v583_v31  ;;  %v476_v34 = vpop.f32.mrf.mxu2  ;;  %3763 = vrcp.f32 %v569_v30  ;;  %vm597_vm2 = vmor %vm595_vm1, %vm596_vm15  ;;  %v616_v0 = vand.u32 2147483648, %v569_v30  ;;  %v614_v2 = vand.u32 2147483647, %v569_v30 }
 0x1a4   :  { %v719_v35 = vmul.f32 %v696_v28, %v4385_v33  ;;  %v4389_v36 = vadd.f32 %v4366_v56, %v476_v34  ;;  %v592_v37 = vsub.f32 1.0, %v591_v32  ;;  %vm610_vm5 = vweird.f32 %v569_v30  ;;  %v702_v34 = vpop.permute.xlu2 %701 }
 0x1a5   :  { %v617_v10 = vor.u32 1.1754944e-38, %v616_v0  ;;  %vm615_vm7 = vcmp.eq.f32.partialorder %v614_v2, 8.507059e+37 }
 0x1a6   :  { %735 = vrot.lane.b32.xlu0 %v719_v35, %s4172_s4  ;;  %v593_v39 = vmul.f32 %v3760_v27, %v592_v37  ;;  %v539_v42 = vadd.f32 %v523_v48, %v4389_v36 }
 0x1a8   :  { %v3762_v44 = vpop.eup %3761  ;;  %v594_v45 = vadd.f32 %v3760_v27, %v593_v39  ;;  %v3671_v46 = vmul.f32 -1.442695, %v539_v42 }
 0x1a9   :  { %v3764_v49 = vpop.eup %3763  ;;  %v570_v54 = vadd.f32 1.0, %v3762_v44 }
 0x1aa   :  { %v598_v55 = vsel %vm597_vm2, %v3760_v27, %v594_v45  ;;  %v606_v57 = vmul.f32 %v3764_v49, %v569_v30  ;;  %3765 = vpow2.f32 %v3671_v46  ;;  %vm611_vm4 = vweird.f32 %v3764_v49 }
 0x1ab   :  { %v4395_v59 = vsel %vm600_vm3, %v602_v53, %v598_v55  ;;  %v479_v60 = vpop.f32.mrf.mxu2  ;;  %3767 = vrcp.f32 %v570_v54  ;;  %vm612_vm6 = vmor %vm610_vm5, %vm611_vm4  ;;  %v631_v25 = vand.u32 2147483648, %v570_v54  ;;  %v629_v27 = vand.u32 2147483647, %v570_v54 }
 0x1ac   :  { %v720_v61 = vmul.f32 %v698_v50, %v4395_v59  ;;  %v4399_v48 = vadd.f32 %v4366_v56, %v479_v60  ;;  %v607_v63 = vsub.f32 1.0, %v606_v57  ;;  %vm625_vm9 = vweird.f32 %v570_v54 }
 0x1ad   :  { %v632_v35 = vor.u32 1.1754944e-38, %v631_v25  ;;  %vm630_vm11 = vcmp.eq.f32.partialorder %v629_v27, 8.507059e+37 }
 0x1ae   :  { %737 = vrot.lane.b32.xlu1 %v720_v61, %s4172_s4  ;;  %v608_v1 = vmul.f32 %v3764_v49, %v607_v63  ;;  %v540_v3 = vadd.f32 %v524_v47, %v4399_v48 }
 0x1b0   :  { %v3766_v5 = vpop.eup %3765  ;;  %v609_v6 = vadd.f32 %v3764_v49, %v608_v1  ;;  %v3672_v7 = vmul.f32 -1.442695, %v540_v3 }
 0x1b1   :  { %v3768_v8 = vpop.eup %3767  ;;  %v571_v11 = vadd.f32 1.0, %v3766_v5 }
 0x1b2   :  { %v613_v13 = vsel %vm612_vm6, %v3764_v49, %v609_v6  ;;  %v621_v15 = vmul.f32 %v3768_v8, %v570_v54  ;;  %3769 = vpow2.f32 %v3672_v7  ;;  %vm626_vm8 = vweird.f32 %v3768_v8 }
 0x1b3   :  { %v4405_v17 = vsel %vm615_vm7, %v617_v10, %v613_v13  ;;  %v482_v21 = vpop.f32.mrf.mxu2  ;;  %3771 = vrcp.f32 %v571_v11  ;;  %vm627_vm10 = vmor %vm625_vm9, %vm626_vm8  ;;  %v646_v49 = vand.u32 2147483648, %v571_v11  ;;  %v644_v53 = vand.u32 2147483647, %v571_v11  ;;  %v706_v10 = vpop.permute.xlu1 %705 }
 0x1b4   :  { %v721_v22 = vmul.f32 %v700_v9, %v4405_v17  ;;  %v4409_v47 = vadd.f32 %v4366_v56, %v482_v21  ;;  %v622_v24 = vsub.f32 1.0, %v621_v15  ;;  %vm640_vm13 = vweird.f32 %v571_v11 }
 0x1b5   :  { %v647_v0 = vor.u32 1.1754944e-38, %v646_v49  ;;  %vm645_vm15 = vcmp.eq.f32.partialorder %v644_v53, 8.507059e+37 }
 0x1b6   :  { %739 = vrot.lane.b32.xlu2 %v721_v22, %s4172_s4  ;;  %v623_v26 = vmul.f32 %v3768_v8, %v622_v24  ;;  %v541_v28 = vadd.f32 %v525_v51, %v4409_v47 }
 0x1b8   :  { %v3770_v29 = vpop.eup %3769  ;;  %v624_v30 = vadd.f32 %v3768_v8, %v623_v26  ;;  %v3673_v31 = vmul.f32 -1.442695, %v541_v28 }
 0x1b9   :  { %v3772_v32 = vpop.eup %3771  ;;  %v572_v37 = vadd.f32 1.0, %v3770_v29 }
 0x1ba   :  { %v628_v38 = vsel %vm627_vm10, %v3768_v8, %v624_v30  ;;  %3773 = vpow2.f32 %v3673_v31  ;;  %v636_v39 = vmul.f32 %v3772_v32, %v571_v11  ;;  %vm641_vm12 = vweird.f32 %v3772_v32 }
 0x1bb   :  { %v4415_v41 = vsel %vm630_vm11, %v632_v35, %v628_v38  ;;  %v485_v42 = vpop.f32.mrf.mxu2  ;;  %3775 = vrcp.f32 %v572_v37  ;;  %vm642_vm14 = vmor %vm640_vm13, %vm641_vm12  ;;  %v659_v6 = vand.u32 2147483647, %v572_v37  ;;  %vm655_vm2 = vweird.f32 %v572_v37  ;;  %v708_v35 = vpop.permute.xlu2 %707 }
 0x1bc   :  { %v722_v44 = vmul.f32 %v702_v34, %v4415_v41  ;;  %v4419_v51 = vadd.f32 %v4366_v56, %v485_v42  ;;  %v637_v45 = vsub.f32 1.0, %v636_v39  ;;  %v704_v56 = vpop.permute.xlu0 %703  ;;  %vm205_vm13 = vcmask 1041409  }
 0x1bd   :  { %vm660_vm4 = vcmp.eq.f32.partialorder %v659_v6, 8.507059e+37 }
 0x1be   :  { %741 = vrot.lane.b32.xlu1 %v722_v44, %s4172_s4  ;;  %v638_v46 = vmul.f32 %v3772_v32, %v637_v45  ;;  %v542_v50 = vadd.f32 %v526_v52, %v4419_v51  ;;  %v661_v52 = vand.u32 2147483648, %v572_v37 }
 0x1c0   :  { %v3774_v54 = vpop.eup %3773  ;;  %v639_v55 = vadd.f32 %v3772_v32, %v638_v46  ;;  %v3674_v57 = vmul.f32 -1.442695, %v542_v50  ;;  %v662_v11 = vor.u32 1.1754944e-38, %v661_v52 }
 0x1c1   :  { %v3776_v60 = vpop.eup %3775  ;;  %v573_v61 = vadd.f32 1.0, %v3774_v54 }
 0x1c2   :  { %v643_v63 = vsel %vm642_vm14, %v3772_v32, %v639_v55  ;;  %v651_v1 = vmul.f32 %v3776_v60, %v572_v37  ;;  %3777 = vpow2.f32 %v3674_v57  ;;  %vm656_vm1 = vweird.f32 %v3776_v60 }
 0x1c3   :  { %3779 = vrcp.f32 %v573_v61  ;;  %v4425_v2 = vsel %vm645_vm15, %v647_v0, %v643_v63  ;;  %vm657_vm3 = vmor %vm655_vm2, %vm656_vm1  ;;  %v676_v26 = vand.u32 2147483648, %v573_v61  ;;  %v674_v28 = vand.u32 2147483647, %v573_v61 }
 0x1c4   :  { %v652_v3 = vsub.f32 1.0, %v651_v1  ;;  %v723_v43 = vmul.f32 %v704_v56, %v4425_v2  ;;  %vm670_vm6 = vweird.f32 %v573_v61  ;;  %v710_v49 = vpop.permute.xlu0 %709  ;;  %vm207_vm14 = vcmask 1042434  }
 0x1c5   :  { %v677_v31 = vor.u32 1.1754944e-38, %v676_v26  ;;  %vm675_vm8 = vcmp.eq.f32.partialorder %v674_v28, 8.507059e+37  ;;  %vm209_vm15 = vcmask 1043459   ;;  %vm211_vm1 = vcmask 1044484  }
 0x1c6   :  { %v653_v5 = vmul.f32 %v3776_v60, %v652_v3  ;;  %743 = vrot.lane.b32.xlu2 %v723_v43, %s4172_s4  ;;  %vm213_vm2 = vcmask 1045509  }
 0x1c8   :  { %v3778_v7 = vpop.eup %3777  ;;  %v654_v8 = vadd.f32 %v3776_v60, %v653_v5 }
 0x1c9   :  { %v3780_v9 = vpop.eup %3779  ;;  %v574_v13 = vadd.f32 1.0, %v3778_v7 }
 0x1ca   :  { %v666_v15 = vmul.f32 %v3780_v9, %v573_v61  ;;  %v658_v21 = vsel %vm657_vm3, %v3776_v60, %v654_v8  ;;  %vm671_vm5 = vweird.f32 %v3780_v9  ;;  %vm215_vm3 = vcmask 1046534  }
 0x1cb   :  { %v4429_v22 = vsel %vm660_vm4, %v662_v11, %v658_v21  ;;  %3781 = vrcp.f32 %v574_v13  ;;  %vm672_vm7 = vmor %vm670_vm6, %vm671_vm5  ;;  %v691_v42 = vand.u32 2147483648, %v574_v13  ;;  %v689_v45 = vand.u32 2147483647, %v574_v13 }
 0x1cc   :  { %v667_v24 = vsub.f32 1.0, %v666_v15  ;;  %v724_v25 = vmul.f32 %v706_v10, %v4429_v22  ;;  %vm685_vm10 = vweird.f32 %v574_v13  ;;  %vm217_vm4 = vcmask 1047559  }
 0x1cd   :  { %v692_v50 = vor.u32 1.1754944e-38, %v691_v42  ;;  %vm690_vm12 = vcmp.eq.f32.partialorder %v689_v45, 8.507059e+37  ;;  %v824_v42 = vmul.f32 0.0, %v4395_v59  ;;  %vm6190_vm5 = vcmask 261120  }
 0x1ce   :  { %v668_v27 = vmul.f32 %v3780_v9, %v667_v24  ;;  %745 = vrot.lane.b32.xlu0 %v724_v25, %s4172_s4 }
 0x1d0   :  { %v669_v29 = vadd.f32 %v3780_v9, %v668_v27 }
 0x1d1   :  { %v3782_v30 = vpop.eup %3781 }
 0x1d2   :  { %v673_v32 = vsel %vm672_vm7, %v3780_v9, %v669_v29  ;;  %v681_v34 = vmul.f32 %v3782_v30, %v574_v13  ;;  %vm686_vm9 = vweird.f32 %v3782_v30  ;;  %v777_v29 = vsub.f32 1.0, %v4405_v17 }
 0x1d3   :  { %v4433_v37 = vsel %vm675_vm8, %v677_v31, %v673_v32  ;;  %vm687_vm11 = vmor %vm685_vm10, %vm686_vm9  ;;  %v775_v32 = vsub.f32 1.0, %v4385_v33 }
 0x1d4   :  { %v725_v38 = vmul.f32 %v708_v35, %v4433_v37  ;;  %v682_v39 = vsub.f32 1.0, %v681_v34  ;;  %v776_v34 = vsub.f32 1.0, %v4395_v59  ;;  %v825_v35 = vmul.f32 0.0, %v4405_v17 }
 0x1d6   :  { %747 = vrot.lane.b32.xlu1 %v725_v38, %s4172_s4  ;;  %v683_v44 = vmul.f32 %v3782_v30, %v682_v39 }
 0x1d8   :  { %v684_v46 = vadd.f32 %v3782_v30, %v683_v44 }
 0x1da   :  { %v688_v53 = vsel %vm687_vm11, %v3782_v30, %v684_v46  ;;  %v823_v46 = vmul.f32 0.0, %v4385_v33  ;;  %v779_v33 = vsub.f32 1.0, %v4425_v2 }
 0x1db   :  { %v4437_v54 = vsel %vm690_vm12, %v692_v50, %v688_v53 }
 0x1dc   :  { %v726_v55 = vmul.f32 %v710_v49, %v4437_v54 }
 0x1de   :  { %749 = vrot.lane.b32.xlu2 %v726_v55, %s4172_s4 }
 0x210   :  { %v740_v57 = vpop.permute.xlu2 %739 }
 0x211   :  { %v761_v60 = vadd.f32 %v740_v57, %v4378_v4 }
 0x213   :  { %3783 = vtanh.f32 %v761_v60 }
 0x218   :  { %v736_v61 = vpop.permute.xlu0 %735 }
 0x219   :  { %v3784_v56 = vpop.eup %3783  ;;  %v759_v63 = vadd.f32 %v736_v61, %v4369_v58  ;;  %v780_v61 = vsub.f32 1.0, %v4429_v22 }
 0x21a   :  { %795 = vrot.lane.b32.xlu1 %v3784_v56, %s4173_s6 }
 0x21b   :  { %3785 = vtanh.f32 %v759_v63 }
 0x220   :  { %v738_v0 = vpop.permute.xlu1 %737  ;;  %v744_v43 = vpop.permute.xlu2 %743 }
 0x221   :  { %v3786_v1 = vpop.eup %3785  ;;  %v760_v3 = vadd.f32 %v738_v0, %v4374_v62  ;;  %v763_v52 = vadd.f32 %v744_v43, %v4389_v36  ;;  %v778_v0 = vsub.f32 1.0, %v4415_v41  ;;  %v828_v43 = vmul.f32 0.0, %v4429_v22 }
 0x222   :  { %791 = vrot.lane.b32.xlu2 %v3786_v1, %s4173_s6  ;;  %v827_v1 = vmul.f32 0.0, %v4425_v2 }
 0x223   :  { %3787 = vtanh.f32 %v760_v3 }
 0x224   :  { %3789 = vtanh.f32 %v763_v52  ;;  %v826_v52 = vmul.f32 0.0, %v4415_v41 }
 0x229   :  { %v3788_v5 = vpop.eup %3787 }
 0x22a   :  { %v3790_v6 = vpop.eup %3789  ;;  %793 = vrot.lane.b32.xlu0 %v3788_v5, %s4173_s6 }
 0x22b   :  { %799 = vrot.lane.b32.xlu1 %v3790_v6, %s4173_s6 }
 0x230   :  { %v742_v7 = vpop.permute.xlu1 %741 }
 0x231   :  { %v762_v8 = vadd.f32 %v742_v7, %v4382_v12 }
 0x233   :  { %3791 = vtanh.f32 %v762_v8 }
 0x238   :  { %v750_v9 = vpop.permute.xlu2 %749 }
 0x239   :  { %v3792_v10 = vpop.eup %3791  ;;  %v766_v11 = vadd.f32 %v750_v9, %v4419_v51 }
 0x23a   :  { %797 = vrot.lane.b32.xlu0 %v3792_v10, %s4173_s6 }
 0x23b   :  { %3793 = vtanh.f32 %v766_v11 }
 0x240   :  { %v746_v13 = vpop.permute.xlu0 %745 }
 0x241   :  { %v3794_v15 = vpop.eup %3793  ;;  %v764_v21 = vadd.f32 %v746_v13, %v4399_v48 }
 0x242   :  { %805 = vrot.lane.b32.xlu1 %v3794_v15, %s4173_s6  ;;  %v782_v15 = vsub.f32 1.0, %v4437_v54 }
 0x243   :  { %3795 = vtanh.f32 %v764_v21 }
 0x248   :  { %v748_v24 = vpop.permute.xlu1 %747 }
 0x249   :  { %v3796_v25 = vpop.eup %3795  ;;  %v765_v26 = vadd.f32 %v748_v24, %v4409_v47  ;;  %v781_v24 = vsub.f32 1.0, %v4433_v37 }
 0x24a   :  { %801 = vrot.lane.b32.xlu2 %v3796_v25, %s4173_s6  ;;  %v830_v25 = vmul.f32 0.0, %v4437_v54 }
 0x24b   :  { %3797 = vtanh.f32 %v765_v26 }
 0x251   :  { %v3798_v27 = vpop.eup %3797 }
 0x252   :  { %803 = vrot.lane.b32.xlu0 %v3798_v27, %s4173_s6  ;;  %v829_v27 = vmul.f32 0.0, %v4433_v37 }
 0x27c   :  { %v792_v30 = vpop.permute.xlu2 %791 }
 0x27d   :  { %v815_v39 = vmul.f32 %v792_v30, %v775_v32 }
 0x27f   :  { %v4467_v50 = vadd.f32 %v823_v46, %v815_v39 }
 0x28c   :  { %v796_v28 = vpop.permute.xlu1 %795 }
 0x28d   :  { %v817_v31 = vmul.f32 %v796_v28, %v777_v29 }
 0x28f   :  { %v4462_v45 = vadd.f32 %v825_v35, %v817_v31 }
 0x291   :  { %v849_v55 = vrot.slane %v4462_v45, 6 }
 0x29c   :  { %v794_v38 = vpop.permute.xlu0 %793 }
 0x29d   :  { %v816_v44 = vmul.f32 %v794_v38, %v776_v34  ;;  %v800_v57 = vpop.permute.xlu1 %799 }
 0x29e   :  { %v819_v56 = vmul.f32 %v800_v57, %v779_v33 }
 0x29f   :  { %v4465_v49 = vadd.f32 %v824_v42, %v816_v44 }
 0x2a0   :  { %v4482_v6 = vadd.f32 %v827_v1, %v819_v56 }
 0x2a1   :  { %v847_v53 = vrot.slane %v4465_v49, 7 }
 0x2a2   :  { %v853_v10 = vrot.slane %v4482_v6, 4 }
 0x2a3   :  { %v848_v59 = vsel %vm205_vm13, %v847_v53, %v4467_v50 }
 0x2a4   :  { %v850_v17 = vsel %vm207_vm14, %v849_v55, %v848_v59  ;;  %v802_v60 = vpop.permute.xlu2 %801 }
 0x2a5   :  { %v820_v63 = vmul.f32 %v802_v60, %v780_v61 }
 0x2a7   :  { %v4484_v7 = vadd.f32 %v828_v43, %v820_v63 }
 0x2a9   :  { %v855_v2 = vrot.slane %v4484_v7, 3  ;;  %v1193_v43 = vrot.slane %v4484_v7, 7 }
 0x2ac   :  { %v798_v3 = vpop.permute.xlu0 %797 }
 0x2ad   :  { %v818_v5 = vmul.f32 %v798_v3, %v778_v0 }
 0x2af   :  { %v4486_v8 = vadd.f32 %v826_v52, %v818_v5 }
 0x2b1   :  { %v851_v9 = vrot.slane %v4486_v8, 5 }
 0x2b3   :  { %v852_v22 = vsel %vm209_vm15, %v851_v9, %v850_v17 }
 0x2b4   :  { %v854_v41 = vsel %vm211_vm1, %v853_v10, %v852_v22  ;;  %v806_v13 = vpop.permute.xlu1 %805 }
 0x2b5   :  { %v856_v11 = vsel %vm213_vm2, %v855_v2, %v854_v41  ;;  %v822_v21 = vmul.f32 %v806_v13, %v782_v15 }
 0x2b7   :  { %v4498_v29 = vadd.f32 %v830_v25, %v822_v21 }
 0x2b9   :  { %v859_v32 = vrot.slane %v4498_v29, 1 }
 0x2c4   :  { %v804_v26 = vpop.permute.xlu0 %803 }
 0x2c5   :  { %v821_v28 = vmul.f32 %v804_v26, %v781_v24 }
 0x2c7   :  { %v4500_v30 = vadd.f32 %v829_v27, %v821_v28 }
 0x2c9   :  { %v857_v31 = vrot.slane %v4500_v30, 2 }
 0x2cb   :  { %v858_v34 = vsel %vm215_vm3, %v857_v31, %v856_v11 }
 0x2cc   :  { %v860_v35 = vsel %vm217_vm4, %v859_v32, %v858_v34 }
 0x2cd   :  { %861 = vrot.lane.b32.xlu2 %v860_v35, %s4173_s6 }
 0x327   :  { %v862_v54 = vpop.permute.xlu2 %861 }
 0x328   :  { %3675 = vmatmul.msk.f32.vlgmr.msrb.gmra.mxu3 %vm6190_vm5, %v862_v54 }
 0x329   :  { %2401 = vmatpush.msrb.mxu3 %v4266_v18 }
 0x32b   :  { %2402 = vmatpush.msrb.mxu3 %v4271_v19 }
 0x32d   :  { %2403 = vmatpush.msrb.mxu3 %v4277_v20 }
 0x32f   :  { %2404 = vmatpush.msrb.mxu3 %v4286_v23 }
 0x3ab   :  { %v882_v37 = vpop.f32.mrf.mxu3 }
 0x3ac   :  { %v4513_v38 = vadd.f32 %v4328_v40, %v882_v37 }
 0x3ae   :  { %1063 = vrot.lane.b32.xlu2 %v4513_v38, %s4172_s4  ;;  %v887_v39 = vrot.slane %v4513_v38, 1  ;;  %v886_v42 = vrot.slane %v4513_v38, 7  ;;  %v890_v44 = vrot.slane %v4513_v38, 4  ;;  %v889_v20 = vrot.slane %v4513_v38, 3 }
 0x3af   :  { %v888_v23 = vrot.slane %v4513_v38, 2  ;;  %v892_v55 = vrot.slane %v4513_v38, 6  ;;  %v891_v59 = vrot.slane %v4513_v38, 5  ;;  %v902_v52 = vadd.f32 %v4513_v38, %v4374_v62 }
 0x3b0   :  { %1065 = vrot.lane.b32.xlu1 %v887_v39, %s4172_s4  ;;  %1061 = vrot.lane.b32.xlu0 %v886_v42, %s4172_s4  ;;  %v906_v18 = vadd.f32 %v890_v44, %v4399_v48  ;;  %v903_v22 = vadd.f32 %v887_v39, %v4378_v4  ;;  %v901_v41 = vadd.f32 %v886_v42, %v4369_v58 }
 0x3b1   :  { %v3677_v9 = vmul.f32 -1.442695, %v902_v52  ;;  %v905_v7 = vadd.f32 %v889_v20, %v4389_v36  ;;  %v904_v24 = vadd.f32 %v888_v23, %v4382_v12  ;;  %v908_v34 = vadd.f32 %v892_v55, %v4419_v51 }
 0x3b2   :  { %v3681_v19 = vmul.f32 -1.442695, %v906_v18  ;;  %v3678_v13 = vmul.f32 -1.442695, %v903_v22  ;;  %v3676_v15 = vmul.f32 -1.442695, %v901_v41  ;;  %v907_v54 = vadd.f32 %v891_v59, %v4409_v47 }
 0x3b3   :  { %v3680_v26 = vmul.f32 -1.442695, %v905_v7  ;;  %v3679_v27 = vmul.f32 -1.442695, %v904_v24 }
 0x3b4   :  { %3799 = vpow2.f32 %v3681_v19  ;;  %v3682_v19 = vmul.f32 -1.442695, %v907_v54 }
 0x3b6   :  { %1071 = vrot.lane.b32.xlu2 %v890_v44, %s4172_s4  ;;  %v3683_v44 = vmul.f32 -1.442695, %v908_v34 }
 0x3b8   :  { %1069 = vrot.lane.b32.xlu1 %v889_v20, %s4172_s4  ;;  %1067 = vrot.lane.b32.xlu0 %v888_v23, %s4172_s4 }
 0x3ba   :  { %v3800_v40 = vpop.eup %3799 }
 0x3bb   :  { %v938_v46 = vadd.f32 1.0, %v3800_v40 }
 0x3bd   :  { %3801 = vrcp.f32 %v938_v46  ;;  %v1027_v56 = vand.u32 2147483648, %v938_v46  ;;  %vm1021_vm7 = vweird.f32 %v938_v46  ;;  %v1025_v63 = vand.u32 2147483647, %v938_v46 }
 0x3be   :  { %3803 = vpow2.f32 %v3677_v9 }
 0x3bf   :  { %v1028_v1 = vor.u32 1.1754944e-38, %v1027_v56  ;;  %vm1026_vm9 = vcmp.eq.f32.partialorder %v1025_v63, 8.507059e+37 }
 0x3c0   :  { %1075 = vrot.lane.b32.xlu1 %v892_v55, %s4172_s4  ;;  %1073 = vrot.lane.b32.xlu0 %v891_v59, %s4172_s4 }
 0x3c3   :  { %v3802_v17 = vpop.eup %3801 }
 0x3c4   :  { %v1017_v57 = vmul.f32 %v3802_v17, %v938_v46  ;;  %vm1022_vm6 = vweird.f32 %v3802_v17  ;;  %v3804_v10 = vpop.eup %3803 }
 0x3c5   :  { %vm1023_vm8 = vmor %vm1021_vm7, %vm1022_vm6  ;;  %v934_v2 = vadd.f32 1.0, %v3804_v10 }
 0x3c6   :  { %v1018_v33 = vsub.f32 1.0, %v1017_v57 }
 0x3c7   :  { %3805 = vrcp.f32 %v934_v2  ;;  %v967_v39 = vand.u32 2147483648, %v934_v2  ;;  %vm961_vm11 = vweird.f32 %v934_v2  ;;  %v965_v42 = vand.u32 2147483647, %v934_v2 }
 0x3c8   :  { %v1019_v60 = vmul.f32 %v3802_v17, %v1018_v33  ;;  %3807 = vpow2.f32 %v3678_v13 }
 0x3c9   :  { %3809 = vpow2.f32 %v3676_v15  ;;  %v968_v40 = vor.u32 1.1754944e-38, %v967_v39  ;;  %vm966_vm6 = vcmp.eq.f32.partialorder %v965_v42, 8.507059e+37 }
 0x3ca   :  { %v1020_v61 = vadd.f32 %v3802_v17, %v1019_v60  ;;  %3811 = vpow2.f32 %v3680_v26 }
 0x3cb   :  { %3813 = vpow2.f32 %v3679_v27 }
 0x3cc   :  { %v1024_v0 = vsel %vm1023_vm8, %v3802_v17, %v1020_v61 }
 0x3cd   :  { %v4532_v3 = vsel %vm1026_vm9, %v1028_v1, %v1024_v0  ;;  %v3806_v11 = vpop.eup %3805 }
 0x3ce   :  { %v4538_v5 = vmul.f32 %v1193_v43, %v4532_v3  ;;  %v957_v21 = vmul.f32 %v3806_v11, %v934_v2  ;;  %v3808_v31 = vpop.eup %3807  ;;  %vm962_vm10 = vweird.f32 %v3806_v11 }
 0x3cf   :  { %v3810_v32 = vpop.eup %3809  ;;  %v4545_v35 = vadd.f32 1.0, %v3808_v31  ;;  %vm963_vm12 = vmor %vm961_vm11, %vm962_vm10 }
 0x3d0   :  { %v958_v25 = vsub.f32 1.0, %v957_v21  ;;  %v4548_v38 = vadd.f32 1.0, %v3810_v32  ;;  %v3812_v18 = vpop.eup %3811 }
 0x3d1   :  { %3815 = vrcp.f32 %v4545_v35  ;;  %v3814_v23 = vpop.eup %3813  ;;  %v4552_v46 = vadd.f32 1.0, %v3812_v18  ;;  %vm976_vm9 = vweird.f32 %v4545_v35  ;;  %v982_v31 = vand.u32 2147483648, %v4545_v35 }
 0x3d2   :  { %v959_v28 = vmul.f32 %v3806_v11, %v958_v25  ;;  %3817 = vrcp.f32 %v4548_v38  ;;  %v4556_v17 = vadd.f32 1.0, %v3814_v23  ;;  %v952_v32 = vand.u32 2147483648, %v4548_v38 }
 0x3d3   :  { %3819 = vpow2.f32 %v3683_v44  ;;  %v980_v54 = vand.u32 2147483647, %v4545_v35  ;;  %vm946_vm11 = vweird.f32 %v4548_v38 }
 0x3d4   :  { %v960_v37 = vadd.f32 %v3806_v11, %v959_v28  ;;  %3821 = vpow2.f32 %v3682_v19  ;;  %v953_v23 = vor.u32 1.1754944e-38, %v952_v32 }
 0x3d5   :  { %3823 = vrcp.f32 %v4552_v46 }
 0x3d6   :  { %v964_v20 = vsel %vm963_vm12, %v3806_v11, %v960_v37  ;;  %3825 = vrcp.f32 %v4556_v17  ;;  %v950_v37 = vand.u32 2147483647, %v4548_v38 }
 0x3d7   :  { %v4554_v59 = vsel %vm966_vm6, %v968_v40, %v964_v20  ;;  %v3816_v33 = vpop.eup %3815  ;;  %v983_v20 = vor.u32 1.1754944e-38, %v982_v31  ;;  %vm981_vm6 = vcmp.eq.f32.partialorder %v980_v54, 8.507059e+37 }
 0x3d8   :  { %v3818_v60 = vpop.eup %3817  ;;  %v972_v63 = vmul.f32 %v3816_v33, %v4545_v35  ;;  %vm977_vm7 = vweird.f32 %v3816_v33 }
 0x3d9   :  { %v3820_v61 = vpop.eup %3819  ;;  %v942_v0 = vmul.f32 %v3818_v60, %v4548_v38  ;;  %vm947_vm8 = vweird.f32 %v3818_v60  ;;  %vm4587_vm10 = vmor %vm976_vm9, %vm977_vm7  ;;  %vm951_vm7 = vcmp.eq.f32.partialorder %v950_v37, 8.507059e+37 }
 0x3da   :  { %v3822_v56 = vpop.eup %3821  ;;  %v4564_v43 = vadd.f32 1.0, %v3820_v61  ;;  %v973_v22 = vsub.f32 1.0, %v972_v63  ;;  %vm4594_vm12 = vmor %vm946_vm11, %vm947_vm8 }
 0x3db   :  { %v4567_v9 = vpop.eup %3823  ;;  %v4569_v10 = vadd.f32 1.0, %v3822_v56  ;;  %v943_v41 = vsub.f32 1.0, %v942_v0 }
 0x3dc   :  { %v4571_v2 = vpop.eup %3825  ;;  %3827 = vrcp.f32 %v4564_v43  ;;  %v1002_v11 = vmul.f32 %v4567_v9, %v4552_v46  ;;  %v974_v15 = vmul.f32 %v3816_v33, %v973_v22  ;;  %vm1007_vm8 = vweird.f32 %v4567_v9 }
 0x3dd   :  { %3829 = vrcp.f32 %v4569_v10  ;;  %v987_v13 = vmul.f32 %v4571_v2, %v4556_v17  ;;  %v944_v21 = vmul.f32 %v3818_v60, %v943_v41  ;;  %vm992_vm9 = vweird.f32 %v4571_v2 }
 0x3de   :  { %v1003_v7 = vsub.f32 1.0, %v1002_v11  ;;  %v975_v26 = vadd.f32 %v3816_v33, %v974_v15  ;;  %v997_v22 = vand.u32 2147483648, %v4556_v17  ;;  %v1010_v41 = vand.u32 2147483647, %v4552_v46 }
 0x3df   :  { %v988_v24 = vsub.f32 1.0, %v987_v13  ;;  %v945_v27 = vadd.f32 %v3818_v60, %v944_v21  ;;  %v995_v11 = vand.u32 2147483647, %v4556_v17  ;;  %v1057_v54 = vand.u32 2147483648, %v4564_v43 }
 0x3e0   :  { %v1004_v42 = vmul.f32 %v4567_v9, %v1003_v7  ;;  %v979_v18 = vsel %vm4587_vm10, %v3816_v33, %v975_v26  ;;  %vm1006_vm10 = vweird.f32 %v4552_v46  ;;  %v998_v26 = vor.u32 1.1754944e-38, %v997_v22 }
 0x3e1   :  { %v989_v44 = vmul.f32 %v4571_v2, %v988_v24  ;;  %v949_v19 = vsel %vm4594_vm12, %v3818_v60, %v945_v27  ;;  %vm1008_vm11 = vmor %vm1006_vm10, %vm1007_vm8  ;;  %vm991_vm12 = vweird.f32 %v4556_v17  ;;  %vm996_vm8 = vcmp.eq.f32.partialorder %v995_v11, 8.507059e+37 }
 0x3e2   :  { %v4580_v25 = vpop.eup %3827  ;;  %v4612_v33 = vsel %vm951_vm7, %v953_v23, %v949_v19  ;;  %v1005_v60 = vadd.f32 %v4567_v9, %v1004_v42  ;;  %vm1011_vm7 = vcmp.eq.f32.partialorder %v1010_v41, 8.507059e+37  ;;  %v1042_v37 = vand.u32 2147483648, %v4569_v10 }
 0x3e3   :  { %v4582_v28 = vpop.eup %3829  ;;  %v1047_v35 = vmul.f32 %v4580_v25, %v4564_v43  ;;  %v990_v61 = vadd.f32 %v4571_v2, %v989_v44  ;;  %v1055_v39 = vand.u32 2147483647, %v4564_v43  ;;  %v1040_v42 = vand.u32 2147483647, %v4569_v10 }
 0x3e4   :  { %v1032_v38 = vmul.f32 %v4582_v28, %v4569_v10  ;;  %v1009_v13 = vsel %vm1008_vm11, %v4567_v9, %v1005_v60  ;;  %vm1037_vm10 = vweird.f32 %v4582_v28  ;;  %vm1051_vm11 = vweird.f32 %v4564_v43 }
 0x3e5   :  { %v1048_v0 = vsub.f32 1.0, %v1047_v35  ;;  %v1058_v19 = vor.u32 1.1754944e-38, %v1057_v54  ;;  %v1043_v35 = vor.u32 1.1754944e-38, %v1042_v37  ;;  %vm1041_vm5 = vcmp.eq.f32.partialorder %v1040_v42, 8.507059e+37 }
 0x3e7   :  { %v1049_v21 = vmul.f32 %v4580_v25, %v1048_v0 }
 0x3e9   :  { %v1050_v32 = vadd.f32 %v4580_v25, %v1049_v21 }
 0x408   :  { %v1064_v55 = vpop.permute.xlu2 %1063 }
 0x409   :  { %v1086_v57 = vmul.f32 %v1064_v55, %v4554_v59  ;;  %v4610_v55 = vsel %vm981_vm6, %v983_v20, %v979_v18  ;;  %vm993_vm6 = vmor %vm991_vm12, %vm992_vm9  ;;  %vm1052_vm9 = vweird.f32 %v4580_v25 }
 0x40a   :  { %v994_v15 = vsel %vm993_vm6, %v4571_v2, %v990_v61  ;;  %vm1053_vm12 = vmor %vm1051_vm11, %vm1052_vm9  ;;  %vm1036_vm6 = vweird.f32 %v4569_v10  ;;  %vm140_vm9 = vcmask 269312  }
 0x40b   :  { %1103 = vrot.lane.b32.xlu1 %v1086_v57, %s4172_s4  ;;  %v4636_v31 = vsel %vm996_vm8, %v998_v26, %v994_v15  ;;  %v1054_v44 = vsel %vm1053_vm12, %v4580_v25, %v1050_v32  ;;  %vm1056_vm8 = vcmp.eq.f32.partialorder %v1055_v39, 8.507059e+37  ;;  %v45_v15 = vld [vmem:[%s6176_s0] sm:$0xff] }
 0x40c   :  { %v53_v21 = vperm.slane %v45_v15, 0  ;;  %v81_v54 = vperm.slane %v45_v15, 4 }
 0x410   :  { %v1072_v1 = vpop.permute.xlu2 %1071 }
 0x411   :  { %v1090_v52 = vmul.f32 %v1072_v1, %v4532_v3  ;;  %v1033_v1 = vsub.f32 1.0, %v1032_v38  ;;  %v4654_v38 = vsel %vm1056_vm8, %v1058_v19, %v1054_v44  ;;  %v102_v44 = vperm.slane %v45_v15, 7 }
 0x412   :  { %v67_v19 = vperm.slane %v45_v15, 2 }
 0x413   :  { %1111 = vrot.lane.b32.xlu1 %v1090_v52, %s4172_s4  ;;  %v1012_v52 = vand.u32 2147483648, %v4552_v46  ;;  %v1034_v7 = vmul.f32 %v4582_v28, %v1033_v1 }
 0x415   :  { %v1013_v24 = vor.u32 1.1754944e-38, %v1012_v52  ;;  %v1035_v34 = vadd.f32 %v4582_v28, %v1034_v7 }
 0x417   :  { %v4634_v46 = vsel %vm1011_vm7, %v1013_v24, %v1009_v13  ;;  %vm1038_vm7 = vmor %vm1036_vm6, %vm1037_vm10 }
 0x418   :  { %v1039_v18 = vsel %vm1038_vm7, %v4582_v28, %v1035_v34  ;;  %v95_v34 = vperm.slane %v45_v15, 6 }
 0x419   :  { %v4656_v23 = vsel %vm1041_vm5, %v1043_v35, %v1039_v18  ;;  %v88_v35 = vperm.slane %v45_v15, 5 }
 0x422   :  { %v1066_v40 = vpop.permute.xlu1 %1065  ;;  %v1062_v57 = vpop.permute.xlu0 %1061 }
 0x423   :  { %v1087_v56 = vmul.f32 %v1066_v40, %v4610_v55  ;;  %v1085_v63 = vmul.f32 %v1062_v57, %v4612_v33 }
 0x425   :  { %1105 = vrot.lane.b32.xlu0 %v1087_v56, %s4172_s4  ;;  %1101 = vrot.lane.b32.xlu2 %v1085_v63, %s4172_s4 }
 0x42a   :  { %v1070_v27 = vpop.permute.xlu1 %1069  ;;  %v1068_v17 = vpop.permute.xlu0 %1067 }
 0x42b   :  { %v1089_v9 = vmul.f32 %v1070_v27, %v4634_v46  ;;  %v1088_v2 = vmul.f32 %v1068_v17, %v4636_v31  ;;  %v74_v27 = vperm.slane %v45_v15, 3  ;;  %v60_v17 = vperm.slane %v45_v15, 1 }
 0x42d   :  { %1109 = vrot.lane.b32.xlu0 %v1089_v9, %s4172_s4  ;;  %1107 = vrot.lane.b32.xlu2 %v1088_v2, %s4172_s4 }
 0x432   :  { %v1076_v20 = vpop.permute.xlu1 %1075  ;;  %v1074_v40 = vpop.permute.xlu0 %1073 }
 0x433   :  { %v1092_v43 = vmul.f32 %v1076_v20, %v4654_v38  ;;  %v1091_v57 = vmul.f32 %v1074_v40, %v4656_v23  ;;  %v1189_v40 = vrot.slane %v4467_v50, 7 }
 0x435   :  { %1115 = vrot.lane.b32.xlu0 %v1092_v43, %s4172_s4  ;;  %1113 = vrot.lane.b32.xlu2 %v1091_v57, %s4172_s4  ;;  %v1142_v43 = vsub.f32 1.0, %v4554_v59  ;;  %v1141_v57 = vsub.f32 1.0, %v4612_v33 }
 0x47d   :  { %v1104_v10 = vpop.permute.xlu1 %1103 }
 0x47e   :  { %v1126_v25 = vadd.f32 %v1104_v10, %v4374_v62 }
 0x47f   :  { %v1102_v28 = vpop.permute.xlu2 %1101 }
 0x480   :  { %3831 = vtanh.f32 %v1126_v25  ;;  %v1125_v60 = vadd.f32 %v1102_v28, %v4369_v58  ;;  %v1143_v25 = vsub.f32 1.0, %v4610_v55 }
 0x482   :  { %3833 = vtanh.f32 %v1125_v60 }
 0x485   :  { %v1112_v61 = vpop.permute.xlu1 %1111 }
 0x486   :  { %v3832_v56 = vpop.eup %3831  ;;  %v1130_v63 = vadd.f32 %v1112_v61, %v4399_v48  ;;  %v1204_v61 = vmul.f32 %v1189_v40, %v4612_v33  ;;  %v1192_v33 = vrot.slane %v4482_v6, 7 }
 0x487   :  { %1159 = vrot.lane.b32.xlu0 %v3832_v56, %s4173_s6  ;;  %v1108_v0 = vpop.permute.xlu2 %1107 }
 0x488   :  { %v3834_v1 = vpop.eup %3833  ;;  %3835 = vtanh.f32 %v1130_v63  ;;  %v1128_v52 = vadd.f32 %v1108_v0, %v4382_v12  ;;  %v1190_v63 = vrot.slane %v4462_v45, 7 }
 0x489   :  { %1157 = vrot.lane.b32.xlu1 %v3834_v1, %s4173_s6  ;;  %v1205_v1 = vmul.f32 %v4554_v59, %v847_v53  ;;  %v1144_v59 = vsub.f32 1.0, %v4636_v31 }
 0x48a   :  { %3837 = vtanh.f32 %v1128_v52  ;;  %v1206_v52 = vmul.f32 %v1190_v63, %v4610_v55  ;;  %v1145_v55 = vsub.f32 1.0, %v4634_v46 }
 0x48e   :  { %v3836_v22 = vpop.eup %3835 }
 0x48f   :  { %1167 = vrot.lane.b32.xlu0 %v3836_v22, %s4173_s6  ;;  %v1114_v41 = vpop.permute.xlu2 %1113 }
 0x490   :  { %v3838_v11 = vpop.eup %3837  ;;  %v1131_v13 = vadd.f32 %v1114_v41, %v4409_v47 }
 0x491   :  { %1163 = vrot.lane.b32.xlu1 %v3838_v11, %s4173_s6  ;;  %v1146_v11 = vsub.f32 1.0, %v4532_v3 }
 0x492   :  { %3839 = vtanh.f32 %v1131_v13  ;;  %v1191_v13 = vrot.slane %v4486_v8, 7  ;;  %v1208_v8 = vmul.f32 %v1192_v33, %v4634_v46 }
 0x497   :  { %v1106_v7 = vpop.permute.xlu0 %1105  ;;  %58 = vperm.xlu0 %3744, %v53_v21   ;;  %v1207_v21 = vmul.f32 %v1191_v13, %v4636_v31  ;;  %v1195_v31 = vrot.slane %v4498_v29, 7  ;;  %v46_v13 = vld [vmem:[%s6177_s1] sm:$0xff] }
 0x498   :  { %v3840_v24 = vpop.eup %3839  ;;  %v1127_v26 = vadd.f32 %v1106_v7, %v4378_v4 }
 0x499   :  { %1169 = vrot.lane.b32.xlu1 %v3840_v24, %s4173_s6 }
 0x49a   :  { %3841 = vtanh.f32 %v1127_v26 }
 0x49f   :  { %v1110_v9 = vpop.permute.xlu0 %1109  ;;  %79 = vperm.xlu0 %3744, %v74_v27  }
 0x4a0   :  { %v3842_v2 = vpop.eup %3841  ;;  %v1129_v32 = vadd.f32 %v1110_v9, %v4389_v36 }
 0x4a1   :  { %1161 = vrot.lane.b32.xlu2 %v3842_v2, %s4173_s6  ;;  %65 = vperm.xlu1 %3745, %v60_v17  }
 0x4a2   :  { %3843 = vtanh.f32 %v1129_v32 }
 0x4a7   :  { %v1116_v37 = vpop.permute.xlu0 %1115  ;;  %100 = vperm.xlu0 %3744, %v95_v34   ;;  %v1194_v34 = vrot.slane %v4500_v30, 7  ;;  %v1211_v30 = vmul.f32 %v1195_v31, %v4654_v38 }
 0x4a8   :  { %v3844_v39 = vpop.eup %3843  ;;  %v1132_v42 = vadd.f32 %v1116_v37, %v4419_v51 }
 0x4a9   :  { %1165 = vrot.lane.b32.xlu2 %v3844_v39, %s4173_s6  ;;  %86 = vperm.xlu1 %3745, %v81_v54   ;;  %v1148_v54 = vsub.f32 1.0, %v4654_v38 }
 0x4aa   :  { %3845 = vtanh.f32 %v1132_v42  ;;  %v1147_v42 = vsub.f32 1.0, %v4656_v23 }
 0x4b0   :  { %v3846_v18 = vpop.eup %3845 }
 0x4b1   :  { %1171 = vrot.lane.b32.xlu2 %v3846_v18, %s4173_s6  ;;  %107 = vperm.xlu1 %3745, %v102_v44  }
 0x4b9   :  { %72 = vperm.xlu2 %3746, %v67_v19  }
 0x4c1   :  { %93 = vperm.xlu2 %3746, %v88_v35   ;;  %v1210_v35 = vmul.f32 %v1194_v34, %v4656_v23  ;;  %v48_v23 = vld [vmem:[%s6177_s1 + $0x10] sm:$0xff] }
 0x4c2   :  { %v4776_v34 = vld [vmem:[%s6181_s5 + $0x10] sm:$0xff] }
 0x4f9   :  { %v1160_v20 = vpop.permute.xlu0 %1159 }
 0x4fa   :  { %v1182_v60 = vmul.f32 %v1160_v20, %v1142_v43 }
 0x4fb   :  { %v1158_v10 = vpop.permute.xlu1 %1157  ;;  %v1162_v28 = vpop.permute.xlu2 %1161 }
 0x4fc   :  { %v1181_v56 = vmul.f32 %v1158_v10, %v1141_v57  ;;  %v1183_v0 = vmul.f32 %v1162_v28, %v1143_v25  ;;  %v4693_v22 = vadd.f32 %v1205_v1, %v1182_v60  ;;  %v50_v57 = vld [vmem:[%s6177_s1 + $0x20] sm:$0x1]  ;;  %v49_v10 = vld [vmem:[%s6177_s1 + $0x18] sm:$0xff] }
 0x4fd   :  { %3640 = vmatpush.msk.msra.mxu0 %vm221_vm0, %v50_v57 }
 0x4fe   :  { %v4690_v50 = vadd.f32 %v1204_v61, %v1181_v56  ;;  %v4699_v45 = vadd.f32 %v1206_v52, %v1183_v0  ;;  %v47_v0 = vld [vmem:[%s6177_s1 + $0x8] sm:$0xff] }
 0x4ff   :  { %237 = vmatpush.msra.mxu0 %v49_v10 }
 0x500   :  { %v1228_v41 = vrot.slane %v4690_v50, 1  ;;  %v1230_v27 = vrot.slane %v4699_v45, 7 }
 0x501   :  { %v1168_v15 = vpop.permute.xlu0 %1167  ;;  %238 = vmatpush.msra.mxu0 %v48_v23 }
 0x502   :  { %v1229_v49 = vsel %vm205_vm13, %v4693_v22, %v1228_v41  ;;  %v1186_v53 = vmul.f32 %v1168_v15, %v1146_v11 }
 0x503   :  { %v1164_v7 = vpop.permute.xlu1 %1163  ;;  %v1166_v24 = vpop.permute.xlu2 %1165  ;;  %239 = vmatpush.msra.mxu0 %v47_v0 }
 0x504   :  { %v4707_v3 = vadd.f32 %v4538_v5, %v1186_v53  ;;  %v1184_v6 = vmul.f32 %v1164_v7, %v1144_v59  ;;  %v1185_v26 = vmul.f32 %v1166_v24, %v1145_v55  ;;  %v1231_v5 = vsel %vm207_vm14, %v1230_v27, %v1229_v49 }
 0x505   :  { %240 = vmatpush.msra.mxu0 %v46_v13 }
 0x506   :  { %v4711_v17 = vadd.f32 %v1207_v21, %v1184_v6  ;;  %v4713_v9 = vadd.f32 %v1208_v8, %v1185_v26  ;;  %v1236_v37 = vrot.slane %v4707_v3, 4  ;;  %v4770_v8 = vld [vmem:[%s6181_s5 + $0x18] sm:$0xff] }
 0x507   :  { %1258 = vmatpush.msrb.mxu0 %v4770_v8 }
 0x508   :  { %v1232_v2 = vrot.slane %v4711_v17, 6  ;;  %v1234_v32 = vrot.slane %v4713_v9, 5 }
 0x509   :  { %v59_v46 = vpop.permute.xlu0 %58  ;;  %1259 = vmatpush.msrb.mxu0 %v4776_v34 }
 0x50a   :  { %v1233_v39 = vsel %vm209_vm15, %v1232_v2, %v1231_v5  ;;  %vm109_vm5 = vcmp.eq.s32.totalorder %v59_v46, %v4258_v14 }
 0x50b   :  { %v3631_v29 = vsel %vm109_vm5, 1.0, %v4171_v16  ;;  %v1170_v44 = vpop.permute.xlu1 %1169  ;;  %v1172_v18 = vpop.permute.xlu2 %1171  ;;  %v1235_v19 = vsel %vm211_vm1, %v1234_v32, %v1233_v39  ;;  %vm6195_vm5 = vcmask 261120  }
 0x50c   :  { %v1187_v20 = vmul.f32 %v1170_v44, %v1147_v42  ;;  %v1188_v40 = vmul.f32 %v1172_v18, %v1148_v54  ;;  %v1237_v43 = vsel %vm213_vm2, %v1236_v37, %v1235_v19  ;;  %v141_v25 = vsel %vm140_vm9, %v3631_v29, 0.0  ;;  %v4784_v29 = vld [vmem:[%s6181_s5 + $0x8] sm:$0xff] }
 0x50d   :  { %v142_v56 = vrot.slane %v141_v25, 4  ;;  %1260 = vmatpush.msrb.mxu0 %v4784_v29 }
 0x50e   :  { %v4739_v38 = vadd.f32 %v1210_v35, %v1187_v20  ;;  %v4741_v28 = vadd.f32 %v1211_v30, %v1188_v40  ;;  %v4793_v35 = vld [vmem:[%s6181_s5] sm:$0xff] }
 0x50f   :  { %v143_v49 = vadd.f32 %v142_v56, %v141_v25  ;;  %1261 = vmatpush.msrb.mxu0 %v4793_v35 }
 0x510   :  { %v1238_v60 = vrot.slane %v4739_v38, 3  ;;  %v1240_v61 = vrot.slane %v4741_v28, 2 }
 0x511   :  { %v80_v63 = vpop.permute.xlu0 %79  ;;  %v144_v26 = vrot.slane %v143_v49, 2 }
 0x512   :  { %vm112_vm10 = vcmp.eq.s32.totalorder %v80_v63, %v4258_v14  ;;  %v1239_v1 = vsel %vm215_vm3, %v1238_v60, %v1237_v43 }
 0x513   :  { %v3634_v52 = vsel %vm112_vm10, 1.0, %v4171_v16  ;;  %v73_v41 = vpop.permute.xlu2 %72  ;;  %v66_v11 = vpop.permute.xlu1 %65  ;;  %v1241_v33 = vsel %vm217_vm4, %v1240_v61, %v1239_v1  ;;  %v145_v30 = vadd.f32 %v144_v26, %v143_v49 }
 0x514   :  { %v162_v15 = vsel %vm140_vm9, %v3634_v52, 0.0  ;;  %vm111_vm0 = vcmp.eq.s32.totalorder %v73_v41, %v4258_v14  ;;  %vm110_vm11 = vcmp.eq.s32.totalorder %v66_v11, %v4258_v14  ;;  %1242 = vrot.lane.b32.xlu2 %v1241_v33, %s4173_s6 }
 0x515   :  { %v3633_v53 = vsel %vm111_vm0, 1.0, %v4171_v16  ;;  %v3632_v59 = vsel %vm110_vm11, 1.0, %v4171_v16  ;;  %v163_v7 = vrot.slane %v162_v15, 4  ;;  %v146_v61 = vrot.slane %v145_v30, 1 }
 0x516   :  { %v155_v55 = vsel %vm140_vm9, %v3633_v53, 0.0  ;;  %v148_v21 = vsel %vm140_vm9, %v3632_v59, 0.0 }
 0x517   :  { %v156_v24 = vrot.slane %v155_v55, 4  ;;  %v149_v6 = vrot.slane %v148_v21, 4  ;;  %v164_v5 = vadd.f32 %v163_v7, %v162_v15  ;;  %v147_v15 = vadd.f32 %v146_v61, %v145_v30 }
 0x519   :  { %v157_v2 = vadd.f32 %v156_v24, %v155_v55  ;;  %v150_v32 = vadd.f32 %v149_v6, %v148_v21  ;;  %v101_v31 = vpop.permute.xlu0 %100  ;;  %v165_v57 = vrot.slane %v164_v5, 2 }
 0x51a   :  { %vm115_vm12 = vcmp.eq.s32.totalorder %v101_v31, %v4258_v14 }
 0x51b   :  { %v158_v46 = vrot.slane %v157_v2, 2  ;;  %v151_v54 = vrot.slane %v150_v32, 2  ;;  %v3637_v37 = vsel %vm115_vm12, 1.0, %v4171_v16  ;;  %v94_v39 = vpop.permute.xlu2 %93  ;;  %v87_v42 = vpop.permute.xlu1 %86  ;;  %v166_v1 = vadd.f32 %v165_v57, %v164_v5 }
 0x51c   :  { %v183_v44 = vsel %vm140_vm9, %v3637_v37, 0.0  ;;  %vm114_vm6 = vcmp.eq.s32.totalorder %v94_v39, %v4258_v14  ;;  %vm113_vm7 = vcmp.eq.s32.totalorder %v87_v42, %v4258_v14 }
 0x51d   :  { %v152_v18 = vadd.f32 %v151_v54, %v150_v32  ;;  %v184_v19 = vrot.slane %v183_v44, 4  ;;  %v159_v20 = vadd.f32 %v158_v46, %v157_v2  ;;  %v3636_v40 = vsel %vm114_vm6, 1.0, %v4171_v16 }
 0x51e   :  { %v3635_v43 = vsel %vm113_vm7, 1.0, %v4171_v16  ;;  %v176_v23 = vsel %vm140_vm9, %v3636_v40, 0.0  ;;  %v167_v7 = vrot.slane %v166_v1, 1 }
 0x51f   :  { %v153_v10 = vrot.slane %v152_v18, 1  ;;  %v185_v25 = vadd.f32 %v184_v19, %v183_v44  ;;  %v169_v60 = vsel %vm140_vm9, %v3635_v43, 0.0  ;;  %v177_v56 = vrot.slane %v176_v23, 4 }
 0x520   :  { %v160_v63 = vrot.slane %v159_v20, 1  ;;  %v170_v0 = vrot.slane %v169_v60, 4  ;;  %v168_v54 = vadd.f32 %v167_v7, %v166_v1 }
 0x521   :  { %v154_v52 = vadd.f32 %v153_v10, %v152_v18  ;;  %v178_v41 = vadd.f32 %v177_v56, %v176_v23  ;;  %v186_v33 = vrot.slane %v185_v25, 2  ;;  %v4825_v56 = vld [vmem:[%s6183_s7] ss:$0 sm:$0xff] }
 0x522   :  { %v171_v13 = vadd.f32 %v170_v0, %v169_v60  ;;  %v161_v59 = vadd.f32 %v160_v63, %v159_v20 }
 0x523   :  { %v108_v11 = vpop.permute.xlu1 %107  ;;  %v179_v49 = vrot.slane %v178_v41, 2  ;;  %v206_v24 = vsel %vm205_vm13, %v154_v52, %v147_v15  ;;  %v187_v2 = vadd.f32 %v186_v33, %v185_v25 }
 0x524   :  { %vm116_vm8 = vcmp.eq.s32.totalorder %v108_v11, %v4258_v14  ;;  %v172_v55 = vrot.slane %v171_v13, 2  ;;  %v208_v14 = vsel %vm207_vm14, %v161_v59, %v206_v24 }
 0x525   :  { %v3638_v53 = vsel %vm116_vm8, 1.0, %v4171_v16  ;;  %v180_v6 = vadd.f32 %v179_v49, %v178_v41  ;;  %v188_v42 = vrot.slane %v187_v2, 1  ;;  %v210_v18 = vsel %vm209_vm15, %v168_v54, %v208_v14 }
 0x526   :  { %v190_v21 = vsel %vm140_vm9, %v3638_v53, 0.0  ;;  %v173_v32 = vadd.f32 %v172_v55, %v171_v13 }
 0x527   :  { %v191_v26 = vrot.slane %v190_v21, 4  ;;  %v181_v31 = vrot.slane %v180_v6, 1  ;;  %v189_v43 = vadd.f32 %v188_v42, %v187_v2 }
 0x528   :  { %v174_v46 = vrot.slane %v173_v32, 1 }
 0x529   :  { %v192_v5 = vadd.f32 %v191_v26, %v190_v21  ;;  %v182_v37 = vadd.f32 %v181_v31, %v180_v6 }
 0x52a   :  { %v175_v44 = vadd.f32 %v174_v46, %v173_v32 }
 0x52b   :  { %v193_v39 = vrot.slane %v192_v5, 2 }
 0x52c   :  { %v212_v19 = vsel %vm211_vm1, %v175_v44, %v210_v18 }
 0x52d   :  { %v194_v30 = vadd.f32 %v193_v39, %v192_v5  ;;  %v214_v40 = vsel %vm213_vm2, %v182_v37, %v212_v19 }
 0x52e   :  { %v216_v10 = vsel %vm215_vm3, %v189_v43, %v214_v40  ;;  %v1572_v43 = vrot.slane %v4711_v17, 7 }
 0x52f   :  { %v195_v20 = vrot.slane %v194_v30, 1 }
 0x531   :  { %v196_v57 = vadd.f32 %v195_v20, %v194_v30 }
 0x533   :  { %v218_v25 = vsel %vm217_vm4, %v196_v57, %v216_v10 }
 0x534   :  { %3641 = vmatmul.msk.f32.vlgmr.msra.gmra.mxu0 %vm140_vm9, %v218_v25 }
 0x535   :  { %2020 = vmatpush.msra.mxu0 %v4770_v8 }
 0x537   :  { %2021 = vmatpush.msra.mxu0 %v4776_v34 }
 0x539   :  { %2022 = vmatpush.msra.mxu0 %v4784_v29 }
 0x53b   :  { %2023 = vmatpush.msra.mxu0 %v4793_v35 }
 0x56e   :  { %v1243_v23 = vpop.permute.xlu2 %1242 }
 0x56f   :  { %3684 = vmatmul.msk.f32.vlgmr.msrb.gmra.mxu0 %vm6195_vm5, %v1243_v23  ;;  %v1574_v23 = vrot.slane %v4707_v3, 7 }
 0x570   :  { %2782 = vmatpush.msrb.mxu0 %v4770_v8 }
 0x572   :  { %2783 = vmatpush.msrb.mxu0 %v4776_v34 }
 0x574   :  { %2784 = vmatpush.msrb.mxu0 %v4784_v29 }
 0x576   :  { %2785 = vmatpush.msrb.mxu0 %v4793_v35 }
 0x5b1   :  { %v4820_v60 = vpop.f32.mrf.mxu0 }
 0x5ec   :  { %v1263_v61 = vpop.f32.mrf.mxu0 }
 0x5ed   :  { %v4828_v63 = vadd.f32 %v4825_v56, %v1263_v61 }
 0x5ef   :  { %1446 = vrot.lane.b32.xlu0 %v4828_v63, %s4172_s4  ;;  %v1269_v0 = vrot.slane %v4828_v63, 1  ;;  %v1268_v1 = vrot.slane %v4828_v63, 7  ;;  %v1271_v52 = vrot.slane %v4828_v63, 3  ;;  %v1267_v15 = vrot.slane %v4828_v63, 6 }
 0x5f0   :  { %v1270_v49 = vrot.slane %v4828_v63, 2  ;;  %v1272_v55 = vrot.slane %v4828_v63, 4  ;;  %v1273_v24 = vrot.slane %v4828_v63, 5 }
 0x5f1   :  { %1448 = vrot.lane.b32.xlu2 %v1269_v0, %s4172_s4  ;;  %v1285_v41 = vadd.f32 %v1269_v0, %v4382_v12  ;;  %1444 = vrot.lane.b32.xlu1 %v1268_v1, %s4172_s4  ;;  %v1287_v11 = vadd.f32 %v1271_v52, %v4399_v48  ;;  %v1284_v0 = vadd.f32 %v4828_v63, %v4378_v4 }
 0x5f2   :  { %v1282_v17 = vadd.f32 %v1267_v15, %v4369_v58  ;;  %v1289_v63 = vadd.f32 %v1273_v24, %v4419_v51 }
 0x5f3   :  { %v3688_v33 = vmul.f32 -1.442695, %v1285_v41  ;;  %v3690_v13 = vmul.f32 -1.442695, %v1287_v11  ;;  %v3687_v41 = vmul.f32 -1.442695, %v1284_v0 }
 0x5f5   :  { %3847 = vpow2.f32 %v3688_v33  ;;  %v1286_v33 = vadd.f32 %v1270_v49, %v4389_v36 }
 0x5f6   :  { %3849 = vpow2.f32 %v3690_v13  ;;  %v3685_v13 = vmul.f32 -1.442695, %v1282_v17 }
 0x5f7   :  { %1442 = vrot.lane.b32.xlu0 %v1267_v15, %s4172_s4 }
 0x5f9   :  { %1452 = vrot.lane.b32.xlu2 %v1271_v52, %s4172_s4  ;;  %1450 = vrot.lane.b32.xlu1 %v1270_v49, %s4172_s4  ;;  %v1283_v52 = vadd.f32 %v1268_v1, %v4374_v62 }
 0x5fb   :  { %v3848_v53 = vpop.eup %3847  ;;  %v3686_v11 = vmul.f32 -1.442695, %v1283_v52 }
 0x5fc   :  { %v1317_v59 = vadd.f32 1.0, %v3848_v53  ;;  %v3850_v21 = vpop.eup %3849 }
 0x5fd   :  { %v1319_v7 = vadd.f32 1.0, %v3850_v21  ;;  %v1288_v21 = vadd.f32 %v1272_v55, %v4409_v47 }
 0x5fe   :  { %3851 = vrcp.f32 %v1317_v59  ;;  %v1378_v37 = vand.u32 2147483648, %v1317_v59  ;;  %vm1372_vm10 = vweird.f32 %v1317_v59  ;;  %v1376_v39 = vand.u32 2147483647, %v1317_v59 }
 0x5ff   :  { %1454 = vrot.lane.b32.xlu0 %v1272_v55, %s4172_s4  ;;  %3853 = vrcp.f32 %v1319_v7  ;;  %v1408_v30 = vand.u32 2147483648, %v1319_v7  ;;  %vm1402_vm12 = vweird.f32 %v1319_v7  ;;  %v1406_v19 = vand.u32 2147483647, %v1319_v7 }
 0x600   :  { %v1379_v18 = vor.u32 1.1754944e-38, %v1378_v37  ;;  %vm1377_vm6 = vcmp.eq.f32.partialorder %v1376_v39, 8.507059e+37  ;;  %3855 = vpow2.f32 %v3687_v41 }
 0x601   :  { %1456 = vrot.lane.b32.xlu1 %v1273_v24, %s4172_s4  ;;  %v1409_v57 = vor.u32 1.1754944e-38, %v1408_v30  ;;  %vm1407_vm8 = vcmp.eq.f32.partialorder %v1406_v19, 8.507059e+37  ;;  %3857 = vpow2.f32 %v3686_v11 }
 0x602   :  { %3859 = vpow2.f32 %v3685_v13 }
 0x604   :  { %v3852_v6 = vpop.eup %3851 }
 0x605   :  { %v1368_v26 = vmul.f32 %v3852_v6, %v1317_v59  ;;  %v3854_v2 = vpop.eup %3853  ;;  %vm1373_vm9 = vweird.f32 %v3852_v6  ;;  %v3689_v59 = vmul.f32 -1.442695, %v1286_v33 }
 0x606   :  { %v1398_v31 = vmul.f32 %v3854_v2, %v1319_v7  ;;  %vm1374_vm0 = vmor %vm1372_vm10, %vm1373_vm9  ;;  %vm1403_vm11 = vweird.f32 %v3854_v2  ;;  %v3856_v53 = vpop.eup %3855 }
 0x607   :  { %v1369_v32 = vsub.f32 1.0, %v1368_v26  ;;  %vm1404_vm7 = vmor %vm1402_vm12, %vm1403_vm11  ;;  %v3858_v3 = vpop.eup %3857  ;;  %v1316_v7 = vadd.f32 1.0, %v3856_v53  ;;  %3861 = vpow2.f32 %v3689_v59  ;;  %v3692_v26 = vmul.f32 -1.442695, %v1289_v63 }
 0x608   :  { %v1399_v46 = vsub.f32 1.0, %v1398_v31  ;;  %v4867_v1 = vadd.f32 1.0, %v3858_v3  ;;  %v3860_v15 = vpop.eup %3859 }
 0x609   :  { %v1370_v5 = vmul.f32 %v3852_v6, %v1369_v32  ;;  %3863 = vrcp.f32 %v1316_v7  ;;  %vm1357_vm9 = vweird.f32 %v1316_v7  ;;  %v1363_v33 = vand.u32 2147483648, %v1316_v7 }
 0x60a   :  { %v1400_v14 = vmul.f32 %v3854_v2, %v1399_v46  ;;  %3865 = vrcp.f32 %v4867_v1  ;;  %v1361_v13 = vand.u32 2147483647, %v1316_v7  ;;  %v1348_v63 = vand.u32 2147483648, %v4867_v1 }
 0x60b   :  { %v1371_v54 = vadd.f32 %v3852_v6, %v1370_v5  ;;  %vm1342_vm11 = vweird.f32 %v4867_v1 }
 0x60c   :  { %v1401_v42 = vadd.f32 %v3854_v2, %v1400_v14 }
 0x60d   :  { %v1375_v44 = vsel %vm1374_vm0, %v3852_v6, %v1371_v54  ;;  %v3691_v6 = vmul.f32 -1.442695, %v1288_v21  ;;  %v3862_v49 = vpop.eup %3861  ;;  %v1346_v21 = vand.u32 2147483647, %v4867_v1 }
 0x60e   :  { %v4848_v20 = vsel %vm1377_vm6, %v1379_v18, %v1375_v44  ;;  %v1405_v40 = vsel %vm1404_vm7, %v3854_v2, %v1401_v42  ;;  %v4870_v2 = vadd.f32 1.0, %v3860_v15  ;;  %v4872_v31 = vadd.f32 1.0, %v3862_v49 }
 0x60f   :  { %v4851_v10 = vsel %vm1407_vm8, %v1409_v57, %v1405_v40  ;;  %v4854_v25 = vmul.f32 %v1572_v43, %v4848_v20  ;;  %3867 = vpow2.f32 %v3691_v6  ;;  %v3864_v32 = vpop.eup %3863  ;;  %v1364_v49 = vor.u32 1.1754944e-38, %v1363_v33 }
 0x610   :  { %v4858_v61 = vmul.f32 %v1574_v23, %v4851_v10  ;;  %3869 = vpow2.f32 %v3692_v26  ;;  %v3866_v24 = vpop.eup %3865  ;;  %v1353_v14 = vmul.f32 %v3864_v32, %v1316_v7  ;;  %vm1358_vm5 = vweird.f32 %v3864_v32 }
 0x611   :  { %3871 = vrcp.f32 %v4870_v2  ;;  %v1338_v37 = vmul.f32 %v3866_v24, %v4867_v1  ;;  %vm1343_vm10 = vweird.f32 %v3866_v24  ;;  %vm1359_vm0 = vmor %vm1357_vm9, %vm1358_vm5  ;;  %vm1362_vm6 = vcmp.eq.f32.partialorder %v1361_v13, 8.507059e+37 }
 0x612   :  { %3873 = vrcp.f32 %v4872_v31  ;;  %v1354_v42 = vsub.f32 1.0, %v1353_v14  ;;  %vm1344_vm12 = vmor %vm1342_vm11, %vm1343_vm10  ;;  %vm1347_vm7 = vcmp.eq.f32.partialorder %v1346_v21, 8.507059e+37  ;;  %vm1327_vm5 = vweird.f32 %v4870_v2 }
 0x613   :  { %v1339_v40 = vsub.f32 1.0, %v1338_v37 }
 0x614   :  { %v1355_v57 = vmul.f32 %v3864_v32, %v1354_v42 }
 0x615   :  { %v3868_v46 = vpop.eup %3867  ;;  %v1340_v0 = vmul.f32 %v3866_v24, %v1339_v40 }
 0x616   :  { %v3870_v54 = vpop.eup %3869  ;;  %v4879_v39 = vadd.f32 1.0, %v3868_v46  ;;  %v1356_v41 = vadd.f32 %v3864_v32, %v1355_v57 }
 0x617   :  { %v4881_v44 = vpop.eup %3871  ;;  %v4883_v30 = vadd.f32 1.0, %v3870_v54  ;;  %v1341_v53 = vadd.f32 %v3866_v24, %v1340_v0  ;;  %v1393_v0 = vand.u32 2147483648, %v4872_v31 }
 0x618   :  { %v4886_v43 = vpop.eup %3873  ;;  %3875 = vrcp.f32 %v4879_v39  ;;  %v1323_v23 = vmul.f32 %v4881_v44, %v4870_v2  ;;  %v1360_v6 = vsel %vm1359_vm0, %v3864_v32, %v1356_v41  ;;  %v1349_v32 = vor.u32 1.1754944e-38, %v1348_v63 }
 0x619   :  { %3877 = vrcp.f32 %v4883_v30  ;;  %v1383_v52 = vmul.f32 %v4886_v43, %v4872_v31  ;;  %v1345_v7 = vsel %vm1344_vm12, %v3866_v24, %v1341_v53  ;;  %v4908_v14 = vsel %vm1362_vm6, %v1364_v49, %v1360_v6 }
 0x61a   :  { %v1324_v11 = vsub.f32 1.0, %v1323_v23  ;;  %vm1328_vm8 = vweird.f32 %v4881_v44  ;;  %v1331_v24 = vand.u32 2147483647, %v4870_v2  ;;  %vm1388_vm9 = vweird.f32 %v4886_v43 }
 0x61b   :  { %v1384_v59 = vsub.f32 1.0, %v1383_v52  ;;  %vm1329_vm10 = vmor %vm1327_vm5, %vm1328_vm8  ;;  %vm1387_vm0 = vweird.f32 %v4872_v31  ;;  %v1394_v21 = vor.u32 1.1754944e-38, %v1393_v0  ;;  %vm1417_vm8 = vweird.f32 %v4879_v39 }
 0x61c   :  { %v1325_v15 = vmul.f32 %v4881_v44, %v1324_v11  ;;  %vm1389_vm11 = vmor %vm1387_vm0, %vm1388_vm9  ;;  %vm1332_vm12 = vcmp.eq.f32.partialorder %v1331_v24, 8.507059e+37 }
 0x61e   :  { %v4895_v17 = vpop.eup %3875  ;;  %v1326_v54 = vadd.f32 %v4881_v44, %v1325_v15 }
 0x61f   :  { %v4897_v3 = vpop.eup %3877  ;;  %v1413_v26 = vmul.f32 %v4895_v17, %v4879_v39 }
 0x620   :  { %v1330_v52 = vsel %vm1329_vm10, %v4881_v44, %v1326_v54  ;;  %vm1433_vm5 = vweird.f32 %v4897_v3  ;;  %vm1432_vm10 = vweird.f32 %v4883_v30 }
 0x621   :  { %v1414_v37 = vsub.f32 1.0, %v1413_v26  ;;  %v1421_v26 = vand.u32 2147483647, %v4879_v39  ;;  %vm1434_vm0 = vmor %vm1432_vm10, %vm1433_vm5 }
 0x623   :  { %v1415_v41 = vmul.f32 %v4895_v17, %v1414_v37 }
 0x625   :  { %v1416_v44 = vadd.f32 %v4895_v17, %v1415_v41 }
 0x64b   :  { %v1449_v55 = vpop.permute.xlu2 %1448 }
 0x64c   :  { %v1469_v5 = vmul.f32 %v1449_v55, %v4848_v20  ;;  %v1385_v55 = vmul.f32 %v4886_v43, %v1384_v59 }
 0x64e   :  { %1488 = vrot.lane.b32.xlu1 %v1469_v5, %s4172_s4  ;;  %v1428_v5 = vmul.f32 %v4897_v3, %v4883_v30  ;;  %v1386_v57 = vadd.f32 %v4886_v43, %v1385_v55 }
 0x650   :  { %v1429_v23 = vsub.f32 1.0, %v1428_v5  ;;  %v1390_v33 = vsel %vm1389_vm11, %v4886_v43, %v1386_v57  ;;  %v1423_v43 = vand.u32 2147483648, %v4879_v39  ;;  %v1436_v5 = vand.u32 2147483647, %v4883_v30 }
 0x651   :  { %vm1422_vm11 = vcmp.eq.f32.partialorder %v1421_v26, 8.507059e+37 }
 0x652   :  { %v1430_v13 = vmul.f32 %v4897_v3, %v1429_v23 }
 0x653   :  { %v1453_v18 = vpop.permute.xlu2 %1452 }
 0x654   :  { %v1471_v19 = vmul.f32 %v1453_v18, %v4851_v10  ;;  %v4913_v18 = vsel %vm1347_vm7, %v1349_v32, %v1345_v7  ;;  %vm1418_vm7 = vweird.f32 %v4895_v17  ;;  %v1431_v49 = vadd.f32 %v4897_v3, %v1430_v13 }
 0x655   :  { %vm1419_vm9 = vmor %vm1417_vm8, %vm1418_vm7  ;;  %v1438_v7 = vand.u32 2147483648, %v4883_v30 }
 0x656   :  { %1492 = vrot.lane.b32.xlu1 %v1471_v19, %s4172_s4  ;;  %v1333_v19 = vand.u32 2147483648, %v4870_v2  ;;  %v1391_v2 = vand.u32 2147483647, %v4872_v31  ;;  %v1420_v55 = vsel %vm1419_vm9, %v4895_v17, %v1416_v44  ;;  %v1435_v39 = vsel %vm1434_vm0, %v4897_v3, %v1431_v49 }
 0x657   :  { %v1439_v54 = vor.u32 1.1754944e-38, %v1438_v7 }
 0x658   :  { %v1334_v11 = vor.u32 1.1754944e-38, %v1333_v19  ;;  %vm1392_vm6 = vcmp.eq.f32.partialorder %v1391_v2, 8.507059e+37 }
 0x659   :  { %v4935_v31 = vsel %vm1392_vm6, %v1394_v21, %v1390_v33  ;;  %vm6196_vm6 = vcmask 261120  }
 0x65a   :  { %v4930_v59 = vsel %vm1332_vm12, %v1334_v11, %v1330_v52  ;;  %vm1437_vm12 = vcmp.eq.f32.partialorder %v1436_v5, 8.507059e+37 }
 0x661   :  { %v1447_v46 = vpop.permute.xlu0 %1446 }
 0x662   :  { %v1468_v1 = vmul.f32 %v1447_v46, %v4908_v14  ;;  %v1424_v46 = vor.u32 1.1754944e-38, %v1423_v43 }
 0x663   :  { %v1445_v42 = vpop.permute.xlu1 %1444 }
 0x664   :  { %v1467_v40 = vmul.f32 %v1445_v42, %v4913_v18  ;;  %1486 = vrot.lane.b32.xlu2 %v1468_v1, %s4172_s4  ;;  %v4950_v32 = vsel %vm1422_vm11, %v1424_v46, %v1420_v55  ;;  %v4953_v42 = vsel %vm1437_vm12, %v1439_v54, %v1435_v39  ;;  %v1525_v46 = vsub.f32 1.0, %v4848_v20 }
 0x665   :  { %v1524_v20 = vsub.f32 1.0, %v4908_v14 }
 0x666   :  { %1484 = vrot.lane.b32.xlu0 %v1467_v40, %s4172_s4 }
 0x669   :  { %v1443_v53 = vpop.permute.xlu0 %1442 }
 0x66a   :  { %v1466_v63 = vmul.f32 %v1443_v53, %v4930_v59 }
 0x66b   :  { %v1451_v6 = vpop.permute.xlu1 %1450 }
 0x66c   :  { %v1470_v15 = vmul.f32 %v1451_v6, %v4935_v31  ;;  %1482 = vrot.lane.b32.xlu2 %v1466_v63, %s4172_s4 }
 0x66e   :  { %1490 = vrot.lane.b32.xlu0 %v1470_v15, %s4172_s4 }
 0x671   :  { %v1455_v1 = vpop.permute.xlu0 %1454 }
 0x672   :  { %v1472_v37 = vmul.f32 %v1455_v1, %v4950_v32 }
 0x673   :  { %v1457_v24 = vpop.permute.xlu1 %1456 }
 0x674   :  { %v1473_v17 = vmul.f32 %v1457_v24, %v4953_v42  ;;  %1494 = vrot.lane.b32.xlu2 %v1472_v37, %s4172_s4  ;;  %v1523_v37 = vsub.f32 1.0, %v4913_v18  ;;  %v1571_v24 = vrot.slane %v4693_v22, 7 }
 0x676   :  { %1496 = vrot.lane.b32.xlu0 %v1473_v17, %s4172_s4 }
 0x6be   :  { %v1487_v30 = vpop.permute.xlu2 %1486 }
 0x6bf   :  { %v1508_v19 = vadd.f32 %v1487_v30, %v4378_v4 }
 0x6c0   :  { %v1489_v3 = vpop.permute.xlu1 %1488 }
 0x6c1   :  { %3879 = vtanh.f32 %v1508_v19  ;;  %v1509_v40 = vadd.f32 %v1489_v3, %v4382_v12  ;;  %v1570_v19 = vrot.slane %v4690_v50, 7  ;;  %v1586_v3 = vmul.f32 %v1571_v24, %v4913_v18 }
 0x6c3   :  { %3881 = vtanh.f32 %v1509_v40  ;;  %v1522_v40 = vsub.f32 1.0, %v4930_v59 }
 0x6c6   :  { %v1483_v57 = vpop.permute.xlu2 %1482 }
 0x6c7   :  { %v3880_v23 = vpop.eup %3879  ;;  %v1506_v0 = vadd.f32 %v1483_v57, %v4369_v58  ;;  %v1573_v57 = vrot.slane %v4713_v9, 7 }
 0x6c8   :  { %1542 = vrot.lane.b32.xlu1 %v3880_v23, %s4173_s6  ;;  %v1493_v52 = vpop.permute.xlu1 %1492  ;;  %v1585_v23 = vmul.f32 %v1570_v19, %v4930_v59  ;;  %v1587_v59 = vmul.f32 %v4908_v14, %v1230_v27  ;;  %v1528_v27 = vsub.f32 1.0, %v4950_v32  ;;  %v1576_v14 = vrot.slane %v4741_v28, 7 }
 0x6c9   :  { %v3882_v2 = vpop.eup %3881  ;;  %3883 = vtanh.f32 %v1506_v0  ;;  %v1511_v41 = vadd.f32 %v1493_v52, %v4399_v48  ;;  %v1589_v9 = vmul.f32 %v1573_v57, %v4935_v31 }
 0x6ca   :  { %1544 = vrot.lane.b32.xlu0 %v3882_v2, %s4173_s6  ;;  %v1526_v2 = vsub.f32 1.0, %v4935_v31  ;;  %v1592_v28 = vmul.f32 %v1576_v14, %v4953_v42 }
 0x6cb   :  { %3885 = vtanh.f32 %v1511_v41 }
 0x6ce   :  { %v1495_v11 = vpop.permute.xlu2 %1494 }
 0x6cf   :  { %v3884_v33 = vpop.eup %3883  ;;  %v1512_v13 = vadd.f32 %v1495_v11, %v4409_v47 }
 0x6d0   :  { %1538 = vrot.lane.b32.xlu1 %v3884_v33, %s4173_s6 }
 0x6d1   :  { %v3886_v53 = vpop.eup %3885  ;;  %3887 = vtanh.f32 %v1512_v13 }
 0x6d2   :  { %1548 = vrot.lane.b32.xlu0 %v3886_v53, %s4173_s6 }
 0x6d7   :  { %v3888_v21 = vpop.eup %3887 }
 0x6d8   :  { %v1485_v63 = vpop.permute.xlu0 %1484  ;;  %1550 = vrot.lane.b32.xlu1 %v3888_v21, %s4173_s6 }
 0x6d9   :  { %v1507_v44 = vadd.f32 %v1485_v63, %v4374_v62 }
 0x6db   :  { %3889 = vtanh.f32 %v1507_v44  ;;  %v1575_v44 = vrot.slane %v4739_v38, 7 }
 0x6e0   :  { %v1491_v6 = vpop.permute.xlu0 %1490 }
 0x6e1   :  { %v3890_v43 = vpop.eup %3889  ;;  %v1510_v15 = vadd.f32 %v1491_v6, %v4389_v36 }
 0x6e2   :  { %1540 = vrot.lane.b32.xlu2 %v3890_v43, %s4173_s6 }
 0x6e3   :  { %3891 = vtanh.f32 %v1510_v15  ;;  %v1591_v15 = vmul.f32 %v1575_v44, %v4950_v32 }
 0x6e8   :  { %v1497_v26 = vpop.permute.xlu0 %1496 }
 0x6e9   :  { %v3892_v49 = vpop.eup %3891  ;;  %v1513_v7 = vadd.f32 %v1497_v26, %v4419_v51 }
 0x6ea   :  { %1546 = vrot.lane.b32.xlu2 %v3892_v49, %s4173_s6 }
 0x6eb   :  { %3893 = vtanh.f32 %v1513_v7  ;;  %v1529_v7 = vsub.f32 1.0, %v4953_v42 }
 0x6f1   :  { %v3894_v55 = vpop.eup %3893 }
 0x6f2   :  { %1552 = vrot.lane.b32.xlu2 %v3894_v55, %s4173_s6 }
 0x73a   :  { %v1543_v5 = vpop.permute.xlu1 %1542 }
 0x73b   :  { %v1564_v41 = vmul.f32 %v1543_v5, %v1524_v20 }
 0x73c   :  { %v1545_v39 = vpop.permute.xlu0 %1544  ;;  %v1541_v1 = vpop.permute.xlu2 %1540 }
 0x73d   :  { %v1565_v54 = vmul.f32 %v1545_v39, %v1525_v46  ;;  %v1563_v30 = vmul.f32 %v1541_v1, %v1523_v37  ;;  %v5004_v6 = vadd.f32 %v1587_v59, %v1564_v41 }
 0x73f   :  { %v4978_v17 = vadd.f32 %v4854_v25, %v1565_v54  ;;  %v4986_v52 = vadd.f32 %v1586_v3, %v1563_v30  ;;  %v1527_v25 = vsub.f32 1.0, %v4851_v10 }
 0x741   :  { %v1610_v53 = vrot.slane %v4986_v52, 1  ;;  %v1613_v31 = vrot.slane %v4978_v17, 7 }
 0x742   :  { %v1539_v0 = vpop.permute.xlu1 %1538 }
 0x743   :  { %v1562_v22 = vmul.f32 %v1539_v0, %v1522_v40 }
 0x744   :  { %v1549_v50 = vpop.permute.xlu0 %1548  ;;  %v1547_v11 = vpop.permute.xlu2 %1546 }
 0x745   :  { %v4990_v18 = vadd.f32 %v1585_v23, %v1562_v22  ;;  %v1567_v33 = vmul.f32 %v1549_v50, %v1527_v25  ;;  %v1566_v13 = vmul.f32 %v1547_v11, %v1526_v2 }
 0x747   :  { %v1609_v21 = vrot.slane %v4990_v18, 2  ;;  %v4999_v10 = vadd.f32 %v4858_v61, %v1567_v33  ;;  %v5001_v63 = vadd.f32 %v1589_v9, %v1566_v13 }
 0x749   :  { %v1611_v43 = vsel %vm205_vm13, %v1610_v53, %v1609_v21  ;;  %v1615_v45 = vrot.slane %v5001_v63, 6  ;;  %v1617_v38 = vrot.slane %v4999_v10, 5 }
 0x74a   :  { %v1612_v61 = vsel %vm207_vm14, %v5004_v6, %v1611_v43  ;;  %v1551_v26 = vpop.permute.xlu1 %1550 }
 0x74b   :  { %v1568_v49 = vmul.f32 %v1551_v26, %v1528_v27  ;;  %v1614_v55 = vsel %vm209_vm15, %v1613_v31, %v1612_v61 }
 0x74c   :  { %v1553_v5 = vpop.permute.xlu2 %1552  ;;  %v1616_v46 = vsel %vm211_vm1, %v1615_v45, %v1614_v55 }
 0x74d   :  { %v5020_v39 = vadd.f32 %v1591_v15, %v1568_v49  ;;  %v1569_v1 = vmul.f32 %v1553_v5, %v1529_v7  ;;  %v1618_v32 = vsel %vm213_vm2, %v1617_v38, %v1616_v46  ;;  %v1952_v46 = vrot.slane %v4986_v52, 7 }
 0x74f   :  { %v1619_v54 = vrot.slane %v5020_v39, 4  ;;  %v5025_v37 = vadd.f32 %v1592_v28, %v1569_v1 }
 0x751   :  { %v1621_v24 = vrot.slane %v5025_v37, 3  ;;  %v1620_v30 = vsel %vm215_vm3, %v1619_v54, %v1618_v32  ;;  %v1957_v32 = vrot.slane %v5025_v37, 7 }
 0x753   :  { %v1622_v19 = vsel %vm217_vm4, %v1621_v24, %v1620_v30 }
 0x754   :  { %1623 = vrot.lane.b32.xlu0 %v1622_v19, %s4173_s6 }
 0x7c6   :  { %v1624_v3 = vpop.permute.xlu0 %1623 }
 0x7c7   :  { %3693 = vmatmul.msk.f32.vlgmr.msra.gmra.mxu3 %vm6196_vm6, %v1624_v3 }
 0x7c8   :  { %3163 = vmatpush.msra.mxu3 %v4770_v8 }
 0x7ca   :  { %3164 = vmatpush.msra.mxu3 %v4776_v34 }
 0x7cc   :  { %3165 = vmatpush.msra.mxu3 %v4784_v29 }
 0x7ce   :  { %3166 = vmatpush.msra.mxu3 %v4793_v35 }
 0x84a   :  { %v1644_v42 = vpop.f32.mrf.mxu3 }
 0x84b   :  { %v5037_v40 = vadd.f32 %v4825_v56, %v1644_v42 }
 0x84d   :  { %1829 = vrot.lane.b32.xlu2 %v5037_v40, %s4172_s4  ;;  %v1650_v57 = vrot.slane %v5037_v40, 7  ;;  %v1648_v20 = vrot.slane %v5037_v40, 5  ;;  %v1649_v23 = vrot.slane %v5037_v40, 6  ;;  %v1654_v8 = vrot.slane %v5037_v40, 4 }
 0x84e   :  { %v1652_v0 = vrot.slane %v5037_v40, 2  ;;  %v1651_v22 = vrot.slane %v5037_v40, 1  ;;  %v1653_v41 = vrot.slane %v5037_v40, 3  ;;  %v1666_v28 = vadd.f32 %v5037_v40, %v4382_v12 }
 0x84f   :  { %1827 = vrot.lane.b32.xlu0 %v1650_v57, %s4172_s4  ;;  %1823 = vrot.lane.b32.xlu1 %v1648_v20, %s4172_s4  ;;  %v1664_v34 = vadd.f32 %v1649_v23, %v4374_v62  ;;  %v1670_v29 = vadd.f32 %v1654_v8, %v4419_v51  ;;  %v1665_v52 = vadd.f32 %v1650_v57, %v4378_v4 }
 0x850   :  { %v3697_v24 = vmul.f32 -1.442695, %v1666_v28  ;;  %v1663_v42 = vadd.f32 %v1648_v20, %v4369_v58  ;;  %v1669_v40 = vadd.f32 %v1653_v41, %v4409_v47 }
 0x851   :  { %v3695_v35 = vmul.f32 -1.442695, %v1664_v34  ;;  %v3701_v56 = vmul.f32 -1.442695, %v1670_v29  ;;  %v1668_v29 = vadd.f32 %v1652_v0, %v4399_v48 }
 0x853   :  { %3895 = vpow2.f32 %v3695_v35  ;;  %v1667_v35 = vadd.f32 %v1651_v22, %v4389_v36 }
 0x854   :  { %3897 = vpow2.f32 %v3701_v56 }
 0x855   :  { %1825 = vrot.lane.b32.xlu2 %v1649_v23, %s4172_s4  ;;  %v3696_v23 = vmul.f32 -1.442695, %v1665_v52 }
 0x857   :  { %1833 = vrot.lane.b32.xlu0 %v1652_v0, %s4172_s4  ;;  %1831 = vrot.lane.b32.xlu1 %v1651_v22, %s4172_s4  ;;  %v3700_v22 = vmul.f32 -1.442695, %v1669_v40 }
 0x859   :  { %v3896_v25 = vpop.eup %3895 }
 0x85a   :  { %v1696_v2 = vadd.f32 1.0, %v3896_v25  ;;  %v3898_v50 = vpop.eup %3897  ;;  %v3699_v25 = vmul.f32 -1.442695, %v1668_v29 }
 0x85b   :  { %v1702_v11 = vadd.f32 1.0, %v3898_v50 }
 0x85c   :  { %3899 = vrcp.f32 %v1696_v2  ;;  %v1729_v27 = vand.u32 2147483648, %v1696_v2  ;;  %vm1723_vm8 = vweird.f32 %v1696_v2  ;;  %v1727_v14 = vand.u32 2147483647, %v1696_v2 }
 0x85d   :  { %1837 = vrot.lane.b32.xlu2 %v1654_v8, %s4172_s4  ;;  %3901 = vrcp.f32 %v1702_v11  ;;  %v1819_v15 = vand.u32 2147483648, %v1702_v11  ;;  %vm1813_vm10 = vweird.f32 %v1702_v11  ;;  %v1817_v38 = vand.u32 2147483647, %v1702_v11 }
 0x85e   :  { %v1730_v49 = vor.u32 1.1754944e-38, %v1729_v27  ;;  %vm1728_vm11 = vcmp.eq.f32.partialorder %v1727_v14, 8.507059e+37  ;;  %3903 = vpow2.f32 %v3697_v24  ;;  %v3694_v8 = vmul.f32 -1.442695, %v1663_v42 }
 0x85f   :  { %1835 = vrot.lane.b32.xlu1 %v1653_v41, %s4172_s4  ;;  %v1820_v5 = vor.u32 1.1754944e-38, %v1819_v15  ;;  %vm1818_vm12 = vcmp.eq.f32.partialorder %v1817_v38, 8.507059e+37 }
 0x862   :  { %v3900_v33 = vpop.eup %3899 }
 0x863   :  { %v1719_v9 = vmul.f32 %v3900_v33, %v1696_v2  ;;  %v3902_v13 = vpop.eup %3901  ;;  %vm1724_vm7 = vweird.f32 %v3900_v33  ;;  %v3698_v2 = vmul.f32 -1.442695, %v1667_v35 }
 0x864   :  { %v1809_v53 = vmul.f32 %v3902_v13, %v1702_v11  ;;  %vm1814_vm5 = vweird.f32 %v3902_v13  ;;  %vm1725_vm9 = vmor %vm1723_vm8, %vm1724_vm7  ;;  %v3904_v19 = vpop.eup %3903 }
 0x865   :  { %v1720_v59 = vsub.f32 1.0, %v1719_v9  ;;  %vm1815_vm0 = vmor %vm1813_vm10, %vm1814_vm5  ;;  %v1698_v3 = vadd.f32 1.0, %v3904_v19 }
 0x866   :  { %v1810_v44 = vsub.f32 1.0, %v1809_v53 }
 0x867   :  { %v1721_v21 = vmul.f32 %v3900_v33, %v1720_v59  ;;  %3905 = vrcp.f32 %v1698_v3  ;;  %v1759_v0 = vand.u32 2147483648, %v1698_v3  ;;  %vm1753_vm7 = vweird.f32 %v1698_v3 }
 0x868   :  { %v1811_v43 = vmul.f32 %v3902_v13, %v1810_v44  ;;  %3907 = vpow2.f32 %v3696_v23 }
 0x869   :  { %v1722_v45 = vadd.f32 %v3900_v33, %v1721_v21  ;;  %3909 = vpow2.f32 %v3694_v8  ;;  %v1760_v21 = vor.u32 1.1754944e-38, %v1759_v0 }
 0x86a   :  { %v1812_v61 = vadd.f32 %v3902_v13, %v1811_v43  ;;  %3911 = vpow2.f32 %v3699_v25 }
 0x86b   :  { %v1726_v26 = vsel %vm1725_vm9, %v3900_v33, %v1722_v45  ;;  %3913 = vpow2.f32 %v3698_v2 }
 0x86c   :  { %v1816_v7 = vsel %vm1815_vm0, %v3902_v13, %v1812_v61  ;;  %v5061_v55 = vsel %vm1728_vm11, %v1730_v49, %v1726_v26  ;;  %v1757_v13 = vand.u32 2147483647, %v1698_v3 }
 0x86d   :  { %v5066_v1 = vsel %vm1818_vm12, %v1820_v5, %v1816_v7  ;;  %v5070_v54 = vmul.f32 %v1952_v46, %v5061_v55  ;;  %v3906_v37 = vpop.eup %3905 }
 0x86e   :  { %v5073_v30 = vmul.f32 %v1957_v32, %v5066_v1  ;;  %v1749_v34 = vmul.f32 %v3906_v37, %v1698_v3  ;;  %v3908_v11 = vpop.eup %3907  ;;  %vm1754_vm6 = vweird.f32 %v3906_v37  ;;  %vm1758_vm5 = vcmp.eq.f32.partialorder %v1757_v13, 8.507059e+37 }
 0x86f   :  { %v3910_v57 = vpop.eup %3909  ;;  %v5084_v20 = vadd.f32 1.0, %v3908_v11  ;;  %vm1755_vm8 = vmor %vm1753_vm7, %vm1754_vm6  ;;  %v1910_v17 = vsub.f32 1.0, %v5066_v1 }
 0x870   :  { %v1750_v56 = vsub.f32 1.0, %v1749_v34  ;;  %v5086_v9 = vadd.f32 1.0, %v3910_v57  ;;  %v3912_v53 = vpop.eup %3911 }
 0x871   :  { %3915 = vrcp.f32 %v5084_v20  ;;  %v3914_v41 = vpop.eup %3913  ;;  %v5092_v45 = vadd.f32 1.0, %v3912_v53  ;;  %vm1738_vm0 = vweird.f32 %v5084_v20  ;;  %v1744_v2 = vand.u32 2147483648, %v5084_v20 }
 0x872   :  { %v1751_v50 = vmul.f32 %v3906_v37, %v1750_v56  ;;  %3917 = vrcp.f32 %v5086_v9  ;;  %v5095_v14 = vadd.f32 1.0, %v3914_v41  ;;  %v1742_v57 = vand.u32 2147483647, %v5084_v20 }
 0x873   :  { %3919 = vpow2.f32 %v3700_v22  ;;  %vm1708_vm12 = vweird.f32 %v5086_v9  ;;  %v1712_v40 = vand.u32 2147483647, %v5086_v9  ;;  %v1745_v53 = vor.u32 1.1754944e-38, %v1744_v2 }
 0x874   :  { %v1752_v33 = vadd.f32 %v3906_v37, %v1751_v50  ;;  %3921 = vrcp.f32 %v5092_v45  ;;  %v1714_v50 = vand.u32 2147483648, %v5086_v9  ;;  %vm1743_vm7 = vcmp.eq.f32.partialorder %v1742_v57, 8.507059e+37 }
 0x875   :  { %3923 = vrcp.f32 %v5095_v14 }
 0x876   :  { %v1756_v59 = vsel %vm1755_vm8, %v3906_v37, %v1752_v33  ;;  %vm1713_vm8 = vcmp.eq.f32.partialorder %v1712_v40, 8.507059e+37 }
 0x877   :  { %v5090_v43 = vsel %vm1758_vm5, %v1760_v21, %v1756_v59  ;;  %v3916_v61 = vpop.eup %3915  ;;  %v1715_v21 = vor.u32 1.1754944e-38, %v1714_v50 }
 0x878   :  { %v3918_v15 = vpop.eup %3917  ;;  %v1734_v38 = vmul.f32 %v3916_v61, %v5084_v20  ;;  %vm1739_vm9 = vweird.f32 %v3916_v61 }
 0x879   :  { %v3920_v26 = vpop.eup %3919  ;;  %v1704_v49 = vmul.f32 %v3918_v15, %v5086_v9  ;;  %vm1709_vm10 = vweird.f32 %v3918_v15  ;;  %vm5122_vm11 = vmor %vm1738_vm0, %vm1739_vm9 }
 0x87a   :  { %v5103_v46 = vadd.f32 1.0, %v3920_v26  ;;  %v5105_v28 = vpop.eup %3921  ;;  %v1735_v32 = vsub.f32 1.0, %v1734_v38  ;;  %vm1710_vm6 = vmor %vm1708_vm12, %vm1709_vm10  ;;  %vm1783_vm10 = vweird.f32 %v5092_v45 }
 0x87b   :  { %v1705_v24 = vsub.f32 1.0, %v1704_v49  ;;  %v5108_v19 = vpop.eup %3923  ;;  %v1779_v3 = vmul.f32 %v5105_v28, %v5092_v45  ;;  %vm1784_vm5 = vweird.f32 %v5105_v28  ;;  %v1789_v49 = vand.u32 2147483648, %v5092_v45 }
 0x87c   :  { %3925 = vrcp.f32 %v5103_v46  ;;  %v1736_v52 = vmul.f32 %v3916_v61, %v1735_v32  ;;  %v1764_v37 = vmul.f32 %v5108_v19, %v5095_v14  ;;  %vm1769_vm9 = vweird.f32 %v5108_v19  ;;  %vm1785_vm0 = vmor %vm1783_vm10, %vm1784_vm5 }
 0x87d   :  { %v1706_v42 = vmul.f32 %v3918_v15, %v1705_v24  ;;  %v1780_v34 = vsub.f32 1.0, %v1779_v3  ;;  %v1772_v32 = vand.u32 2147483647, %v5095_v14  ;;  %vm1798_vm5 = vweird.f32 %v5103_v46 }
 0x87e   :  { %v1737_v29 = vadd.f32 %v3916_v61, %v1736_v52  ;;  %v1765_v56 = vsub.f32 1.0, %v1764_v37 }
 0x87f   :  { %v1707_v35 = vadd.f32 %v3918_v15, %v1706_v42  ;;  %v1781_v33 = vmul.f32 %v5105_v28, %v1780_v34  ;;  %v1790_v42 = vor.u32 1.1754944e-38, %v1789_v49 }
 0x880   :  { %v1741_v0 = vsel %vm5122_vm11, %v3916_v61, %v1737_v29  ;;  %v1766_v22 = vmul.f32 %v5108_v19, %v1765_v56  ;;  %vm1768_vm11 = vweird.f32 %v5095_v14 }
 0x881   :  { %v1711_v13 = vsel %vm1710_vm6, %v3918_v15, %v1707_v35  ;;  %v5136_v9 = vsel %vm1743_vm7, %v1745_v53, %v1741_v0  ;;  %vm1770_vm12 = vmor %vm1768_vm11, %vm1769_vm9  ;;  %vm1773_vm7 = vcmp.eq.f32.partialorder %v1772_v32, 8.507059e+37  ;;  %v1802_v35 = vand.u32 2147483647, %v5103_v46 }
 0x882   :  { %v5117_v25 = vpop.eup %3925  ;;  %v1767_v26 = vadd.f32 %v5108_v19, %v1766_v22 }
 0x883   :  { %v1794_v59 = vmul.f32 %v5117_v25, %v5103_v46  ;;  %vm1803_vm10 = vcmp.eq.f32.partialorder %v1802_v35, 8.507059e+37 }
 0x884   :  { %v1771_v3 = vsel %vm1770_vm12, %v5108_v19, %v1767_v26  ;;  %v1804_v19 = vand.u32 2147483648, %v5103_v46 }
 0x885   :  { %v1795_v38 = vsub.f32 1.0, %v1794_v59 }
 0x886   :  { %v1805_v2 = vor.u32 1.1754944e-38, %v1804_v19  ;;  %v1953_v19 = vrot.slane %v5004_v6, 7 }
 0x887   :  { %v1796_v52 = vmul.f32 %v5117_v25, %v1795_v38 }
 0x8a7   :  { %v1830_v44 = vpop.permute.xlu2 %1829 }
 0x8a8   :  { %v1850_v27 = vmul.f32 %v1830_v44, %v5090_v43  ;;  %v5138_v44 = vsel %vm1713_vm8, %v1715_v21, %v1711_v13  ;;  %vm1799_vm8 = vweird.f32 %v5117_v25 }
 0x8a9   :  { %vm1800_vm9 = vmor %vm1798_vm5, %vm1799_vm8 }
 0x8aa   :  { %1869 = vrot.lane.b32.xlu1 %v1850_v27, %s4172_s4  ;;  %v1782_v27 = vadd.f32 %v5105_v28, %v1781_v33 }
 0x8ac   :  { %v1786_v24 = vsel %vm1785_vm0, %v5105_v28, %v1782_v27  ;;  %v1797_v28 = vadd.f32 %v5117_v25, %v1796_v52  ;;  %vm6199_vm0 = vcmask 261120  }
 0x8ae   :  { %v1801_v56 = vsel %vm1800_vm9, %v5117_v25, %v1797_v28 }
 0x8af   :  { %v1826_v7 = vpop.permute.xlu2 %1825  ;;  %v5172_v50 = vsel %vm1803_vm10, %v1805_v2, %v1801_v56  ;;  %v1904_v2 = vsub.f32 1.0, %v5061_v55 }
 0x8b0   :  { %v1848_v5 = vmul.f32 %v1826_v7, %v5061_v55  ;;  %v1774_v7 = vand.u32 2147483648, %v5095_v14 }
 0x8b2   :  { %1865 = vrot.lane.b32.xlu1 %v1848_v5, %s4172_s4  ;;  %v1787_v5 = vand.u32 2147483647, %v5092_v45  ;;  %v1775_v37 = vor.u32 1.1754944e-38, %v1774_v7 }
 0x8b4   :  { %vm1788_vm6 = vcmp.eq.f32.partialorder %v1787_v5, 8.507059e+37  ;;  %v5160_v34 = vsel %vm1773_vm7, %v1775_v37, %v1771_v3 }
 0x8b5   :  { %v1907_v6 = vsub.f32 1.0, %v5160_v34 }
 0x8b7   :  { %v1838_v23 = vpop.permute.xlu2 %1837 }
 0x8b8   :  { %v1854_v8 = vmul.f32 %v1838_v23, %v5066_v1  ;;  %v5158_v23 = vsel %vm1788_vm6, %v1790_v42, %v1786_v24 }
 0x8ba   :  { %1877 = vrot.lane.b32.xlu1 %v1854_v8, %s4172_s4 }
 0x8c1   :  { %v1828_v20 = vpop.permute.xlu0 %1827  ;;  %v1824_v41 = vpop.permute.xlu1 %1823 }
 0x8c2   :  { %v1849_v61 = vmul.f32 %v1828_v20, %v5136_v9  ;;  %v1847_v15 = vmul.f32 %v1824_v41, %v5138_v44 }
 0x8c4   :  { %1867 = vrot.lane.b32.xlu2 %v1849_v61, %s4172_s4  ;;  %1863 = vrot.lane.b32.xlu0 %v1847_v15, %s4172_s4 }
 0x8c9   :  { %v1834_v8 = vpop.permute.xlu0 %1833  ;;  %v1832_v45 = vpop.permute.xlu1 %1831 }
 0x8ca   :  { %v1852_v29 = vmul.f32 %v1834_v8, %v5158_v23  ;;  %v1851_v14 = vmul.f32 %v1832_v45, %v5160_v34  ;;  %v1903_v45 = vsub.f32 1.0, %v5138_v44 }
 0x8cc   :  { %1873 = vrot.lane.b32.xlu2 %v1852_v29, %s4172_s4  ;;  %1871 = vrot.lane.b32.xlu0 %v1851_v14, %s4172_s4  ;;  %v1905_v29 = vsub.f32 1.0, %v5136_v9  ;;  %v1951_v14 = vrot.slane %v4990_v18, 7 }
 0x8ce   :  { %v1966_v56 = vmul.f32 %v1951_v14, %v5138_v44 }
 0x8d1   :  { %v1836_v11 = vpop.permute.xlu1 %1835 }
 0x8d2   :  { %v1853_v57 = vmul.f32 %v1836_v11, %v5172_v50  ;;  %v1955_v11 = vrot.slane %v4999_v10, 7 }
 0x8d4   :  { %1875 = vrot.lane.b32.xlu0 %v1853_v57, %s4172_s4  ;;  %v1954_v57 = vrot.slane %v5001_v63, 7  ;;  %v1971_v55 = vmul.f32 %v1955_v11, %v5158_v23 }
 0x8d6   :  { %v1970_v10 = vmul.f32 %v1954_v57, %v5160_v34 }
 0x91c   :  { %v1870_v40 = vpop.permute.xlu1 %1869 }
 0x91d   :  { %v1890_v33 = vadd.f32 %v1870_v40, %v4382_v12  ;;  %v1906_v40 = vsub.f32 1.0, %v5090_v43 }
 0x91e   :  { %v1868_v0 = vpop.permute.xlu2 %1867 }
 0x91f   :  { %3927 = vtanh.f32 %v1890_v33  ;;  %v1889_v13 = vadd.f32 %v1868_v0, %v4378_v4  ;;  %v1968_v33 = vmul.f32 %v1953_v19, %v5136_v9 }
 0x921   :  { %3929 = vtanh.f32 %v1889_v13 }
 0x924   :  { %v1866_v46 = vpop.permute.xlu1 %1865 }
 0x925   :  { %v3928_v22 = vpop.eup %3927  ;;  %v1888_v25 = vadd.f32 %v1866_v46, %v4374_v62  ;;  %v1908_v46 = vsub.f32 1.0, %v5158_v23 }
 0x926   :  { %v1874_v59 = vpop.permute.xlu2 %1873  ;;  %1925 = vrot.lane.b32.xlu0 %v3928_v22, %s4173_s6 }
 0x927   :  { %v3930_v53 = vpop.eup %3929  ;;  %3931 = vtanh.f32 %v1888_v25  ;;  %v1892_v21 = vadd.f32 %v1874_v59, %v4399_v48 }
 0x928   :  { %1923 = vrot.lane.b32.xlu1 %v3930_v53, %s4173_s6 }
 0x929   :  { %3933 = vtanh.f32 %v1892_v21  ;;  %v1969_v21 = vmul.f32 %v5090_v43, %v1613_v31  ;;  %v1956_v31 = vrot.slane %v5020_v39, 7 }
 0x92b   :  { %v1972_v39 = vmul.f32 %v1956_v31, %v5172_v50 }
 0x92c   :  { %v1878_v20 = vpop.permute.xlu1 %1877 }
 0x92d   :  { %v3932_v41 = vpop.eup %3931  ;;  %v1894_v27 = vadd.f32 %v1878_v20, %v4419_v51 }
 0x92e   :  { %1921 = vrot.lane.b32.xlu0 %v3932_v41, %s4173_s6 }
 0x92f   :  { %v3934_v61 = vpop.eup %3933  ;;  %3935 = vtanh.f32 %v1894_v27 }
 0x930   :  { %1929 = vrot.lane.b32.xlu1 %v3934_v61, %s4173_s6 }
 0x935   :  { %v3936_v15 = vpop.eup %3935 }
 0x936   :  { %1933 = vrot.lane.b32.xlu0 %v3936_v15, %s4173_s6  ;;  %v1864_v26 = vpop.permute.xlu0 %1863 }
 0x937   :  { %v1887_v38 = vadd.f32 %v1864_v26, %v4369_v58 }
 0x939   :  { %3937 = vtanh.f32 %v1887_v38 }
 0x93e   :  { %v1872_v49 = vpop.permute.xlu0 %1871 }
 0x93f   :  { %v3938_v7 = vpop.eup %3937  ;;  %v1891_v5 = vadd.f32 %v1872_v49, %v4389_v36 }
 0x940   :  { %1919 = vrot.lane.b32.xlu2 %v3938_v7, %s4173_s6 }
 0x941   :  { %3939 = vtanh.f32 %v1891_v5  ;;  %v1909_v5 = vsub.f32 1.0, %v5172_v50  ;;  %v5253_v50 = vld [vmem:[%s6183_s7] ss:$0 sm:$0xff] }
 0x946   :  { %v1876_v32 = vpop.permute.xlu0 %1875 }
 0x947   :  { %v3940_v24 = vpop.eup %3939  ;;  %v1893_v3 = vadd.f32 %v1876_v32, %v4409_v47 }
 0x948   :  { %1927 = vrot.lane.b32.xlu2 %v3940_v24, %s4173_s6 }
 0x949   :  { %3941 = vtanh.f32 %v1893_v3 }
 0x94f   :  { %v3942_v52 = vpop.eup %3941 }
 0x950   :  { %1931 = vrot.lane.b32.xlu2 %v3942_v52, %s4173_s6 }
 0x998   :  { %v1926_v42 = vpop.permute.xlu0 %1925 }
 0x999   :  { %v1946_v25 = vmul.f32 %v1926_v42, %v1906_v40 }
 0x99a   :  { %v1924_v37 = vpop.permute.xlu1 %1923  ;;  %v1920_v8 = vpop.permute.xlu2 %1919 }
 0x99b   :  { %v1943_v28 = vmul.f32 %v1920_v8, %v1903_v45  ;;  %v1945_v35 = vmul.f32 %v1924_v37, %v1905_v29  ;;  %v5223_v61 = vadd.f32 %v1969_v21, %v1946_v25 }
 0x99d   :  { %v5202_v13 = vadd.f32 %v1966_v56, %v1943_v28  ;;  %v5206_v22 = vadd.f32 %v1968_v33, %v1945_v35 }
 0x99f   :  { %v1990_v20 = vrot.slane %v5202_v13, 3  ;;  %v1993_v34 = vrot.slane %v5206_v22, 1 }
 0x9a0   :  { %v1922_v0 = vpop.permute.xlu0 %1921 }
 0x9a1   :  { %v1944_v18 = vmul.f32 %v1922_v0, %v1904_v2 }
 0x9a2   :  { %v1930_v44 = vpop.permute.xlu1 %1929  ;;  %v1928_v63 = vpop.permute.xlu2 %1927 }
 0x9a3   :  { %v5211_v59 = vadd.f32 %v5070_v54, %v1944_v18  ;;  %v1948_v9 = vmul.f32 %v1930_v44, %v1908_v46  ;;  %v1947_v53 = vmul.f32 %v1928_v63, %v1907_v6 }
 0x9a5   :  { %v1991_v41 = vrot.slane %v5211_v59, 2  ;;  %v5218_v27 = vadd.f32 %v1971_v55, %v1948_v9  ;;  %v5220_v23 = vadd.f32 %v1970_v10, %v1947_v53 }
 0x9a7   :  { %v1992_v54 = vsel %vm205_vm13, %v1991_v41, %v1990_v20  ;;  %v1996_v15 = vrot.slane %v5220_v23, 7  ;;  %v1998_v38 = vrot.slane %v5218_v27, 6 }
 0x9a8   :  { %v1994_v43 = vsel %vm207_vm14, %v1993_v34, %v1992_v54  ;;  %v1934_v26 = vpop.permute.xlu0 %1933 }
 0x9a9   :  { %v1995_v49 = vsel %vm209_vm15, %v5223_v61, %v1994_v43  ;;  %v1950_v7 = vmul.f32 %v1934_v26, %v1910_v17 }
 0x9aa   :  { %v1997_v32 = vsel %vm211_vm1, %v1996_v15, %v1995_v49  ;;  %v1932_v24 = vpop.permute.xlu2 %1931 }
 0x9ab   :  { %v5238_v1 = vadd.f32 %v5073_v30, %v1950_v7  ;;  %v1949_v3 = vmul.f32 %v1932_v24, %v1909_v5  ;;  %v1999_v52 = vsel %vm213_vm2, %v1998_v38, %v1997_v32 }
 0x9ad   :  { %v5242_v42 = vadd.f32 %v1972_v39, %v1949_v3  ;;  %v2002_v8 = vrot.slane %v5238_v1, 4  ;;  %v2332_v39 = vrot.slane %v5202_v13, 7 }
 0x9af   :  { %v2000_v37 = vrot.slane %v5242_v42, 5 }
 0x9b1   :  { %v2001_v45 = vsel %vm215_vm3, %v2000_v37, %v1999_v52  ;;  %v2335_v52 = vrot.slane %v5223_v61, 7 }
 0x9b2   :  { %v2003_v29 = vsel %vm217_vm4, %v2002_v8, %v2001_v45 }
 0x9b3   :  { %2004 = vrot.lane.b32.xlu1 %v2003_v29, %s4173_s6 }
 0xa25   :  { %v2005_v14 = vpop.permute.xlu1 %2004 }
 0xa26   :  { %3702 = vmatmul.msk.f32.vlgmr.msra.gmra.mxu0 %vm6199_vm0, %v2005_v14 }
 0xaa3   :  { %v2025_v30 = vpop.f32.mrf.mxu0 }
 0xaa4   :  { %v5256_v28 = vadd.f32 %v5253_v50, %v2025_v30 }
 0xaa6   :  { %v2031_v19 = vrot.slane %v5256_v28, 6  ;;  %v2030_v35 = vrot.slane %v5256_v28, 5  ;;  %v2029_v56 = vrot.slane %v5256_v28, 4  ;;  %v2032_v2 = vrot.slane %v5256_v28, 7 }
 0xaa7   :  { %v2033_v0 = vrot.slane %v5256_v28, 1  ;;  %v2035_v55 = vrot.slane %v5256_v28, 3  ;;  %v2034_v10 = vrot.slane %v5256_v28, 2 }
 0xaa8   :  { %2208 = vrot.lane.b32.xlu1 %v2031_v19, %s4172_s4  ;;  %2206 = vrot.lane.b32.xlu0 %v2030_v35, %s4172_s4  ;;  %v2044_v11 = vadd.f32 %v2029_v56, %v4369_v58  ;;  %v2047_v57 = vadd.f32 %v2032_v2, %v4382_v12  ;;  %v2046_v14 = vadd.f32 %v2031_v19, %v4378_v4 }
 0xaa9   :  { %2204 = vrot.lane.b32.xlu2 %v2029_v56, %s4172_s4  ;;  %v2050_v45 = vadd.f32 %v2034_v10, %v4409_v47  ;;  %v2045_v30 = vadd.f32 %v2030_v35, %v4374_v62  ;;  %v2049_v61 = vadd.f32 %v2033_v0, %v4399_v48  ;;  %v2051_v19 = vadd.f32 %v2035_v55, %v4419_v51 }
 0xaaa   :  { %v3703_v40 = vmul.f32 -1.442695, %v2044_v11  ;;  %v3706_v33 = vmul.f32 -1.442695, %v2047_v57  ;;  %v3705_v56 = vmul.f32 -1.442695, %v2046_v14  ;;  %v2048_v11 = vadd.f32 %v5256_v28, %v4389_v36 }
 0xaab   :  { %v3709_v29 = vmul.f32 -1.442695, %v2050_v45  ;;  %v3704_v13 = vmul.f32 -1.442695, %v2045_v30 }
 0xaac   :  { %3943 = vpow2.f32 %v3703_v40  ;;  %v3708_v40 = vmul.f32 -1.442695, %v2049_v61 }
 0xaad   :  { %3945 = vpow2.f32 %v3706_v33  ;;  %v3707_v33 = vmul.f32 -1.442695, %v2048_v11 }
 0xab0   :  { %2212 = vrot.lane.b32.xlu1 %v5256_v28, %s4172_s4  ;;  %2214 = vrot.lane.b32.xlu0 %v2033_v0, %s4172_s4 }
 0xab1   :  { %2210 = vrot.lane.b32.xlu2 %v2032_v2, %s4172_s4 }
 0xab2   :  { %v3944_v18 = vpop.eup %3943 }
 0xab3   :  { %v2076_v46 = vadd.f32 1.0, %v3944_v18  ;;  %v3946_v6 = vpop.eup %3945 }
 0xab4   :  { %v2079_v44 = vadd.f32 1.0, %v3946_v6 }
 0xab5   :  { %3947 = vrcp.f32 %v2076_v46  ;;  %v2095_v17 = vand.u32 2147483648, %v2076_v46  ;;  %vm2089_vm6 = vweird.f32 %v2076_v46  ;;  %v2093_v43 = vand.u32 2147483647, %v2076_v46 }
 0xab6   :  { %3949 = vrcp.f32 %v2079_v44  ;;  %v2140_v26 = vand.u32 2147483648, %v2079_v44  ;;  %vm2134_vm8 = vweird.f32 %v2079_v44  ;;  %v2138_v38 = vand.u32 2147483647, %v2079_v44 }
 0xab7   :  { %v2096_v7 = vor.u32 1.1754944e-38, %v2095_v17  ;;  %vm2094_vm9 = vcmp.eq.f32.partialorder %v2093_v43, 8.507059e+37  ;;  %3951 = vpow2.f32 %v3709_v29 }
 0xab8   :  { %2218 = vrot.lane.b32.xlu0 %v2035_v55, %s4172_s4  ;;  %v2141_v32 = vor.u32 1.1754944e-38, %v2140_v26  ;;  %vm2139_vm10 = vcmp.eq.f32.partialorder %v2138_v38, 8.507059e+37  ;;  %3953 = vpow2.f32 %v3705_v56 }
 0xab9   :  { %2216 = vrot.lane.b32.xlu2 %v2034_v10, %s4172_s4  ;;  %3955 = vpow2.f32 %v3704_v13 }
 0xabb   :  { %v3948_v63 = vpop.eup %3947 }
 0xabc   :  { %v2085_v25 = vmul.f32 %v3948_v63, %v2076_v46  ;;  %v3950_v9 = vpop.eup %3949  ;;  %vm2090_vm11 = vweird.f32 %v3948_v63 }
 0xabd   :  { %v2130_v21 = vmul.f32 %v3950_v9, %v2079_v44  ;;  %vm2135_vm12 = vweird.f32 %v3950_v9  ;;  %vm2091_vm7 = vmor %vm2089_vm6, %vm2090_vm11  ;;  %v3952_v2 = vpop.eup %3951  ;;  %v3710_v44 = vmul.f32 -1.442695, %v2051_v19 }
 0xabe   :  { %v2086_v53 = vsub.f32 1.0, %v2085_v25  ;;  %vm2136_vm5 = vmor %vm2134_vm8, %vm2135_vm12  ;;  %v2082_v57 = vadd.f32 1.0, %v3952_v2  ;;  %v3954_v18 = vpop.eup %3953 }
 0xabf   :  { %v2131_v41 = vsub.f32 1.0, %v2130_v21  ;;  %v3956_v46 = vpop.eup %3955  ;;  %v5295_v35 = vadd.f32 1.0, %v3954_v18 }
 0xac0   :  { %v2087_v20 = vmul.f32 %v3948_v63, %v2086_v53  ;;  %3957 = vrcp.f32 %v2082_v57  ;;  %v5297_v6 = vadd.f32 1.0, %v3956_v46  ;;  %vm2179_vm11 = vweird.f32 %v2082_v57 }
 0xac1   :  { %v2132_v34 = vmul.f32 %v3950_v9, %v2131_v41  ;;  %3959 = vpow2.f32 %v3708_v40  ;;  %v2183_v45 = vand.u32 2147483647, %v2082_v57  ;;  %v2125_v61 = vand.u32 2147483648, %v5295_v35 }
 0xac2   :  { %v2088_v54 = vadd.f32 %v3948_v63, %v2087_v20  ;;  %3961 = vpow2.f32 %v3707_v33 }
 0xac3   :  { %v2133_v31 = vadd.f32 %v3950_v9, %v2132_v34  ;;  %3963 = vrcp.f32 %v5295_v35  ;;  %vm2184_vm6 = vcmp.eq.f32.partialorder %v2183_v45, 8.507059e+37 }
 0xac4   :  { %v2092_v49 = vsel %vm2091_vm7, %v3948_v63, %v2088_v54  ;;  %3965 = vrcp.f32 %v5297_v6 }
 0xac5   :  { %v2137_v5 = vsel %vm2136_vm5, %v3950_v9, %v2133_v31  ;;  %v5276_v24 = vsel %vm2094_vm9, %v2096_v7, %v2092_v49  ;;  %3967 = vpow2.f32 %v3710_v44  ;;  %vm2119_vm5 = vweird.f32 %v5295_v35 }
 0xac6   :  { %v5279_v3 = vsel %vm2139_vm10, %v2141_v32, %v2137_v5  ;;  %v5283_v37 = vmul.f32 %v2332_v39, %v5276_v24  ;;  %v3958_v0 = vpop.eup %3957  ;;  %vm2104_vm10 = vweird.f32 %v5297_v6 }
 0xac7   :  { %v5286_v8 = vmul.f32 %v2335_v52, %v5279_v3  ;;  %v3960_v10 = vpop.eup %3959  ;;  %v2175_v63 = vmul.f32 %v3958_v0, %v2082_v57  ;;  %vm2180_vm0 = vweird.f32 %v3958_v0  ;;  %v2185_v52 = vand.u32 2147483648, %v2082_v57 }
 0xac8   :  { %v3962_v28 = vpop.eup %3961  ;;  %v5301_v25 = vadd.f32 1.0, %v3960_v10  ;;  %vm2181_vm12 = vmor %vm2179_vm11, %vm2180_vm0  ;;  %v2110_v10 = vand.u32 2147483648, %v5297_v6 }
 0xac9   :  { %v5303_v9 = vadd.f32 1.0, %v3962_v28  ;;  %v5305_v55 = vpop.eup %3963  ;;  %v2176_v41 = vsub.f32 1.0, %v2175_v63  ;;  %v2186_v2 = vor.u32 1.1754944e-38, %v2185_v52  ;;  %v2108_v28 = vand.u32 2147483647, %v5297_v6 }
 0xaca   :  { %v5307_v21 = vpop.eup %3965  ;;  %3969 = vrcp.f32 %v5301_v25  ;;  %v2115_v54 = vmul.f32 %v5305_v55, %v5295_v35  ;;  %vm2120_vm7 = vweird.f32 %v5305_v55  ;;  %v2170_v52 = vand.u32 2147483648, %v5301_v25 }
 0xacb   :  { %v3968_v34 = vpop.eup %3967  ;;  %3971 = vrcp.f32 %v5303_v9  ;;  %v2100_v17 = vmul.f32 %v5307_v21, %v5297_v6  ;;  %v2177_v31 = vmul.f32 %v3958_v0, %v2176_v41  ;;  %vm2105_vm8 = vweird.f32 %v5307_v21  ;;  %vm2121_vm9 = vmor %vm2119_vm5, %vm2120_vm7 }
 0xacc   :  { %v5317_v43 = vadd.f32 1.0, %v3968_v34  ;;  %v2116_v26 = vsub.f32 1.0, %v2115_v54  ;;  %vm2106_vm0 = vmor %vm2104_vm10, %vm2105_vm8  ;;  %v2111_v54 = vor.u32 1.1754944e-38, %v2110_v10  ;;  %vm2149_vm8 = vweird.f32 %v5303_v9 }
 0xacd   :  { %v2101_v7 = vsub.f32 1.0, %v2100_v17  ;;  %v2178_v39 = vadd.f32 %v3958_v0, %v2177_v31  ;;  %v2153_v45 = vand.u32 2147483647, %v5303_v9 }
 0xace   :  { %3973 = vrcp.f32 %v5317_v43  ;;  %v2117_v29 = vmul.f32 %v5305_v55, %v2116_v26 }
 0xacf   :  { %v2102_v30 = vmul.f32 %v5307_v21, %v2101_v7  ;;  %v2182_v13 = vsel %vm2181_vm12, %v3958_v0, %v2178_v39  ;;  %v2123_v0 = vand.u32 2147483647, %v5295_v35  ;;  %vm2109_vm12 = vcmp.eq.f32.partialorder %v2108_v28, 8.507059e+37 }
 0xad0   :  { %v5319_v38 = vpop.eup %3969  ;;  %v2118_v11 = vadd.f32 %v5305_v55, %v2117_v29  ;;  %v5337_v33 = vsel %vm2184_vm6, %v2186_v2, %v2182_v13  ;;  %v2155_v39 = vand.u32 2147483648, %v5303_v9  ;;  %v2168_v29 = vand.u32 2147483647, %v5301_v25 }
 0xad1   :  { %v5321_v5 = vpop.eup %3971  ;;  %v2160_v14 = vmul.f32 %v5319_v38, %v5301_v25  ;;  %v2103_v46 = vadd.f32 %v5307_v21, %v2102_v30  ;;  %vm2124_vm11 = vcmp.eq.f32.partialorder %v2123_v0, 8.507059e+37  ;;  %vm2165_vm7 = vweird.f32 %v5319_v38 }
 0xad2   :  { %v2145_v56 = vmul.f32 %v5321_v5, %v5303_v9  ;;  %v2122_v63 = vsel %vm2121_vm9, %v5305_v55, %v2118_v11  ;;  %vm2150_vm6 = vweird.f32 %v5321_v5  ;;  %vm2164_vm9 = vweird.f32 %v5301_v25 }
 0xad3   :  { %v2161_v57 = vsub.f32 1.0, %v2160_v14  ;;  %v2107_v41 = vsel %vm2106_vm0, %v5307_v21, %v2103_v46  ;;  %vm2151_vm5 = vmor %vm2149_vm8, %vm2150_vm6  ;;  %v2156_v13 = vor.u32 1.1754944e-38, %v2155_v39  ;;  %v2171_v2 = vor.u32 1.1754944e-38, %v2170_v52 }
 0xad4   :  { %v5335_v40 = vpop.eup %3973  ;;  %v2146_v19 = vsub.f32 1.0, %v2145_v56  ;;  %v5356_v26 = vsel %vm2109_vm12, %v2111_v54, %v2107_v41  ;;  %vm2166_vm10 = vmor %vm2164_vm9, %vm2165_vm7  ;;  %vm2154_vm0 = vcmp.eq.f32.partialorder %v2153_v45, 8.507059e+37  ;;  %vm2194_vm6 = vweird.f32 %v5317_v43 }
 0xad5   :  { %v2190_v35 = vmul.f32 %v5335_v40, %v5317_v43  ;;  %vm2195_vm12 = vweird.f32 %v5335_v40  ;;  %v2198_v46 = vand.u32 2147483647, %v5317_v43 }
 0xad6   :  { %v2147_v34 = vmul.f32 %v5321_v5, %v2146_v19  ;;  %vm2196_vm7 = vmor %vm2194_vm6, %vm2195_vm12 }
 0xad7   :  { %vm2199_vm8 = vcmp.eq.f32.partialorder %v2198_v46, 8.507059e+37 }
 0xad8   :  { %v2148_v7 = vadd.f32 %v5321_v5, %v2147_v34 }
 0xada   :  { %v2152_v14 = vsel %vm2151_vm5, %v5321_v5, %v2148_v7  ;;  %vm6200_vm5 = vcmask 261120  }
 0xb03   :  { %v2205_v53 = vpop.permute.xlu2 %2204 }
 0xb04   :  { %v2228_v20 = vmul.f32 %v2205_v53, %v5276_v24  ;;  %v2162_v53 = vmul.f32 %v5319_v38, %v2161_v57 }
 0xb06   :  { %2244 = vrot.lane.b32.xlu1 %v2228_v20, %s4172_s4  ;;  %v2126_v20 = vor.u32 1.1754944e-38, %v2125_v61  ;;  %v2163_v55 = vadd.f32 %v5319_v38, %v2162_v53  ;;  %v5375_v61 = vsel %vm2154_vm0, %v2156_v13, %v2152_v14 }
 0xb08   :  { %v5354_v17 = vsel %vm2124_vm11, %v2126_v20, %v2122_v63  ;;  %v2167_v30 = vsel %vm2166_vm10, %v5319_v38, %v2163_v55  ;;  %vm2169_vm11 = vcmp.eq.f32.partialorder %v2168_v29, 8.507059e+37  ;;  %v2200_v38 = vand.u32 2147483648, %v5317_v43 }
 0xb09   :  { %v5377_v57 = vsel %vm2169_vm11, %v2171_v2, %v2167_v30  ;;  %v2334_v2 = vrot.slane %v5206_v22, 7 }
 0xb0b   :  { %v2211_v49 = vpop.permute.xlu2 %2210  ;;  %v2349_v46 = vmul.f32 %v2334_v2, %v5354_v17 }
 0xb0c   :  { %v2231_v32 = vmul.f32 %v2211_v49, %v5279_v3 }
 0xb0e   :  { %2250 = vrot.lane.b32.xlu1 %v2231_v32, %s4172_s4  ;;  %v2191_v32 = vsub.f32 1.0, %v2190_v35 }
 0xb10   :  { %v2192_v56 = vmul.f32 %v5335_v40, %v2191_v32 }
 0xb12   :  { %v2193_v5 = vadd.f32 %v5335_v40, %v2192_v56 }
 0xb13   :  { %v2217_v18 = vpop.permute.xlu2 %2216 }
 0xb14   :  { %v2234_v44 = vmul.f32 %v2217_v18, %v5337_v33  ;;  %v2197_v19 = vsel %vm2196_vm7, %v5335_v40, %v2193_v5  ;;  %v2284_v5 = vsub.f32 1.0, %v5276_v24 }
 0xb16   :  { %2256 = vrot.lane.b32.xlu1 %v2234_v44, %s4172_s4  ;;  %v2201_v44 = vor.u32 1.1754944e-38, %v2200_v38 }
 0xb18   :  { %v5389_v0 = vsel %vm2199_vm8, %v2201_v44, %v2197_v19 }
 0xb1a   :  { %v2209_v6 = vpop.permute.xlu1 %2208  ;;  %v2207_v31 = vpop.permute.xlu0 %2206 }
 0xb1b   :  { %v2230_v21 = vmul.f32 %v2209_v6, %v5354_v17  ;;  %v2229_v49 = vmul.f32 %v2207_v31, %v5356_v26 }
 0xb1d   :  { %2248 = vrot.lane.b32.xlu0 %v2230_v21, %s4172_s4  ;;  %2246 = vrot.lane.b32.xlu2 %v2229_v49, %s4172_s4 }
 0xb22   :  { %v2213_v11 = vpop.permute.xlu1 %2212  ;;  %v2215_v9 = vpop.permute.xlu0 %2214 }
 0xb23   :  { %v2232_v18 = vmul.f32 %v2213_v11, %v5375_v61  ;;  %v2233_v25 = vmul.f32 %v2215_v9, %v5377_v57  ;;  %v2333_v11 = vrot.slane %v5211_v59, 7  ;;  %v2286_v9 = vsub.f32 1.0, %v5354_v17 }
 0xb25   :  { %2252 = vrot.lane.b32.xlu0 %v2232_v18, %s4172_s4  ;;  %2254 = vrot.lane.b32.xlu2 %v2233_v25, %s4172_s4  ;;  %v2285_v18 = vsub.f32 1.0, %v5356_v26 }
 0xb2a   :  { %v2219_v10 = vpop.permute.xlu0 %2218 }
 0xb2b   :  { %v2235_v28 = vmul.f32 %v2219_v10, %v5389_v0  ;;  %v2348_v10 = vmul.f32 %v2333_v11, %v5356_v26 }
 0xb2d   :  { %2258 = vrot.lane.b32.xlu2 %v2235_v28, %s4172_s4 }
 0xb77   :  { %v2247_v63 = vpop.permute.xlu2 %2246 }
 0xb78   :  { %v2269_v53 = vadd.f32 %v2247_v63, %v4374_v62  ;;  %v2245_v20 = vpop.permute.xlu1 %2244 }
 0xb79   :  { %v2268_v41 = vadd.f32 %v2245_v20, %v4369_v58 }
 0xb7a   :  { %3975 = vtanh.f32 %v2269_v53 }
 0xb7b   :  { %3977 = vtanh.f32 %v2268_v41 }
 0xb7f   :  { %v2255_v43 = vpop.permute.xlu2 %2254 }
 0xb80   :  { %v3976_v34 = vpop.eup %3975  ;;  %v2273_v40 = vadd.f32 %v2255_v43, %v4399_v48  ;;  %v2251_v35 = vpop.permute.xlu1 %2250  ;;  %v2287_v43 = vsub.f32 1.0, %v5279_v3  ;;  %v2338_v3 = vrot.slane %v5238_v1, 7 }
 0xb81   :  { %v3978_v54 = vpop.eup %3977  ;;  %v2271_v6 = vadd.f32 %v2251_v35, %v4382_v12  ;;  %2302 = vrot.lane.b32.xlu1 %v3976_v34, %s4173_s6 }
 0xb82   :  { %3979 = vtanh.f32 %v2273_v40  ;;  %2300 = vrot.lane.b32.xlu0 %v3978_v54, %s4173_s6  ;;  %v2354_v1 = vmul.f32 %v2338_v3, %v5389_v0 }
 0xb83   :  { %3981 = vtanh.f32 %v2271_v6  ;;  %v2289_v6 = vsub.f32 1.0, %v5377_v57 }
 0xb87   :  { %v2259_v31 = vpop.permute.xlu2 %2258 }
 0xb88   :  { %v3980_v55 = vpop.eup %3979  ;;  %v2275_v21 = vadd.f32 %v2259_v31, %v4419_v51  ;;  %v2257_v49 = vpop.permute.xlu1 %2256 }
 0xb89   :  { %v3982_v7 = vpop.eup %3981  ;;  %v2274_v32 = vadd.f32 %v2257_v49, %v4409_v47  ;;  %2310 = vrot.lane.b32.xlu1 %v3980_v55, %s4173_s6  ;;  %v2336_v55 = vrot.slane %v5218_v27, 7  ;;  %v2290_v27 = vsub.f32 1.0, %v5337_v33 }
 0xb8a   :  { %3983 = vtanh.f32 %v2275_v21  ;;  %2306 = vrot.lane.b32.xlu0 %v3982_v7, %s4173_s6 }
 0xb8b   :  { %3985 = vtanh.f32 %v2274_v32  ;;  %v2352_v32 = vmul.f32 %v2336_v55, %v5377_v57 }
 0xb8f   :  { %v2249_v39 = vpop.permute.xlu0 %2248 }
 0xb90   :  { %v3984_v52 = vpop.eup %3983  ;;  %v2270_v45 = vadd.f32 %v2249_v39, %v4378_v4  ;;  %v2291_v39 = vsub.f32 1.0, %v5389_v0 }
 0xb91   :  { %v3986_v29 = vpop.eup %3985  ;;  %2314 = vrot.lane.b32.xlu1 %v3984_v52, %s4173_s6  ;;  %v2337_v52 = vrot.slane %v5242_v42, 7 }
 0xb92   :  { %3987 = vtanh.f32 %v2270_v45  ;;  %2312 = vrot.lane.b32.xlu0 %v3986_v29, %s4173_s6  ;;  %v2351_v45 = vmul.f32 %v5375_v61, %v1996_v15 }
 0xb97   :  { %v2253_v14 = vpop.permute.xlu0 %2252 }
 0xb98   :  { %v3988_v30 = vpop.eup %3987  ;;  %v2272_v56 = vadd.f32 %v2253_v14, %v4389_v36 }
 0xb99   :  { %2304 = vrot.lane.b32.xlu2 %v3988_v30, %s4173_s6 }
 0xb9a   :  { %3989 = vtanh.f32 %v2272_v56 }
 0xba0   :  { %v3990_v13 = vpop.eup %3989 }
 0xba1   :  { %2308 = vrot.lane.b32.xlu2 %v3990_v13, %s4173_s6  ;;  %v2353_v13 = vmul.f32 %v2337_v52, %v5337_v33 }
 0xbf3   :  { %v2305_v25 = vpop.permute.xlu2 %2304  ;;  %v2303_v38 = vpop.permute.xlu1 %2302 }
 0xbf4   :  { %v2326_v19 = vmul.f32 %v2305_v25, %v2286_v9  ;;  %v2301_v44 = vpop.permute.xlu0 %2300  ;;  %v2325_v28 = vmul.f32 %v2303_v38, %v2285_v18 }
 0xbf5   :  { %v2324_v63 = vmul.f32 %v2301_v44, %v2284_v5 }
 0xbf6   :  { %v5416_v53 = vadd.f32 %v2349_v46, %v2326_v19  ;;  %v5418_v22 = vadd.f32 %v2348_v10, %v2325_v28 }
 0xbf7   :  { %v5421_v59 = vadd.f32 %v5283_v37, %v2324_v63  ;;  %v2288_v37 = vsub.f32 1.0, %v5375_v61 }
 0xbf8   :  { %v2374_v20 = vrot.slane %v5416_v53, 2  ;;  %v2372_v24 = vrot.slane %v5418_v22, 3 }
 0xbf9   :  { %v2371_v41 = vrot.slane %v5421_v59, 4 }
 0xbfb   :  { %v2373_v17 = vsel %vm205_vm13, %v2372_v24, %v2371_v41  ;;  %v2311_v26 = vpop.permute.xlu1 %2310  ;;  %v2309_v54 = vpop.permute.xlu2 %2308 }
 0xbfc   :  { %v2307_v34 = vpop.permute.xlu0 %2306  ;;  %v2375_v40 = vsel %vm207_vm14, %v2374_v20, %v2373_v17  ;;  %v2329_v21 = vmul.f32 %v2311_v26, %v2289_v6  ;;  %v2328_v49 = vmul.f32 %v2309_v54, %v2288_v37 }
 0xbfd   :  { %v2327_v35 = vmul.f32 %v2307_v34, %v2287_v43 }
 0xbfe   :  { %v5445_v14 = vadd.f32 %v2352_v32, %v2329_v21  ;;  %v5448_v57 = vadd.f32 %v2351_v45, %v2328_v49 }
 0xbff   :  { %v5432_v31 = vadd.f32 %v5286_v8, %v2327_v35 }
 0xc00   :  { %v2379_v61 = vrot.slane %v5445_v14, 7 }
 0xc01   :  { %v2376_v7 = vrot.slane %v5432_v31, 1 }
 0xc03   :  { %v2377_v8 = vsel %vm209_vm15, %v2376_v7, %v2375_v40  ;;  %v2315_v29 = vpop.permute.xlu1 %2314 }
 0xc04   :  { %v2313_v30 = vpop.permute.xlu0 %2312  ;;  %v2331_v56 = vmul.f32 %v2315_v29, %v2291_v39  ;;  %v2378_v15 = vsel %vm211_vm1, %v5448_v57, %v2377_v8 }
 0xc05   :  { %v2330_v42 = vmul.f32 %v2313_v30, %v2290_v27  ;;  %v2380_v0 = vsel %vm213_vm2, %v2379_v61, %v2378_v15 }
 0xc06   :  { %v5451_v2 = vadd.f32 %v2354_v1, %v2331_v56  ;;  %v2715_v56 = vrot.slane %v5416_v53, 7 }
 0xc07   :  { %v5453_v23 = vadd.f32 %v2353_v13, %v2330_v42 }
 0xc08   :  { %v2383_v11 = vrot.slane %v5451_v2, 5 }
 0xc09   :  { %v2381_v9 = vrot.slane %v5453_v23, 6 }
 0xc0b   :  { %v2382_v33 = vsel %vm215_vm3, %v2381_v9, %v2380_v0 }
 0xc0c   :  { %v2384_v18 = vsel %vm217_vm4, %v2383_v11, %v2382_v33  ;;  %v2718_v11 = vrot.slane %v5453_v23, 7 }
 0xc0d   :  { %2385 = vrot.lane.b32.xlu2 %v2384_v18, %s4173_s6 }
 0xc67   :  { %v2386_v25 = vpop.permute.xlu2 %2385 }
 0xc68   :  { %3711 = vmatmul.msk.f32.vlgmr.msrb.gmra.mxu3 %vm6200_vm5, %v2386_v25 }
 0xceb   :  { %v2406_v5 = vpop.f32.mrf.mxu3 }
 0xcec   :  { %v5468_v38 = vadd.f32 %v5253_v50, %v2406_v5 }
 0xcee   :  { %v2412_v46 = vrot.slane %v5468_v38, 5  ;;  %v2411_v19 = vrot.slane %v5468_v38, 4  ;;  %v2410_v44 = vrot.slane %v5468_v38, 3  ;;  %v2415_v10 = vrot.slane %v5468_v38, 1 }
 0xcef   :  { %v2414_v24 = vrot.slane %v5468_v38, 7  ;;  %v2413_v41 = vrot.slane %v5468_v38, 6  ;;  %v2416_v40 = vrot.slane %v5468_v38, 2 }
 0xcf0   :  { %2589 = vrot.lane.b32.xlu2 %v2412_v46, %s4172_s4  ;;  %v2427_v28 = vadd.f32 %v2412_v46, %v4378_v4  ;;  %2587 = vrot.lane.b32.xlu1 %v2411_v19, %s4172_s4  ;;  %v2431_v63 = vadd.f32 %v2415_v10, %v4409_v47  ;;  %v2426_v0 = vadd.f32 %v2411_v19, %v4374_v62 }
 0xcf1   :  { %2585 = vrot.lane.b32.xlu0 %v2410_v44, %s4172_s4  ;;  %v2425_v33 = vadd.f32 %v2410_v44, %v4369_v58  ;;  %v2429_v53 = vadd.f32 %v2414_v24, %v4389_v36  ;;  %v2428_v5 = vadd.f32 %v2413_v41, %v4382_v12  ;;  %v2432_v23 = vadd.f32 %v2416_v40, %v4419_v51 }
 0xcf2   :  { %v3714_v50 = vmul.f32 -1.442695, %v2427_v28  ;;  %v3718_v20 = vmul.f32 -1.442695, %v2431_v63  ;;  %v3713_v18 = vmul.f32 -1.442695, %v2426_v0  ;;  %v2430_v19 = vadd.f32 %v5468_v38, %v4399_v48 }
 0xcf3   :  { %v3712_v25 = vmul.f32 -1.442695, %v2425_v33  ;;  %v3716_v46 = vmul.f32 -1.442695, %v2429_v53 }
 0xcf4   :  { %3991 = vpow2.f32 %v3714_v50 }
 0xcf5   :  { %3993 = vpow2.f32 %v3718_v20  ;;  %v3719_v20 = vmul.f32 -1.442695, %v2432_v23 }
 0xcf8   :  { %2597 = vrot.lane.b32.xlu2 %v2415_v10, %s4172_s4  ;;  %2593 = vrot.lane.b32.xlu1 %v2414_v24, %s4172_s4  ;;  %v3715_v10 = vmul.f32 -1.442695, %v2428_v5  ;;  %v3717_v24 = vmul.f32 -1.442695, %v2430_v19 }
 0xcf9   :  { %2591 = vrot.lane.b32.xlu0 %v2413_v41, %s4172_s4 }
 0xcfa   :  { %v3992_v17 = vpop.eup %3991 }
 0xcfb   :  { %v2459_v43 = vadd.f32 1.0, %v3992_v17  ;;  %v3994_v26 = vpop.eup %3993 }
 0xcfc   :  { %v2463_v34 = vadd.f32 1.0, %v3994_v26 }
 0xcfd   :  { %3995 = vrcp.f32 %v2459_v43  ;;  %v2506_v3 = vand.u32 2147483648, %v2459_v43  ;;  %vm2500_vm10 = vweird.f32 %v2459_v43  ;;  %v2504_v39 = vand.u32 2147483647, %v2459_v43 }
 0xcfe   :  { %3997 = vrcp.f32 %v2463_v34  ;;  %v2566_v8 = vand.u32 2147483648, %v2463_v34  ;;  %vm2560_vm12 = vweird.f32 %v2463_v34  ;;  %v2564_v29 = vand.u32 2147483647, %v2463_v34 }
 0xcff   :  { %v2507_v27 = vor.u32 1.1754944e-38, %v2506_v3  ;;  %vm2505_vm6 = vcmp.eq.f32.partialorder %v2504_v39, 8.507059e+37  ;;  %3999 = vpow2.f32 %v3713_v18 }
 0xd00   :  { %2599 = vrot.lane.b32.xlu1 %v2416_v40, %s4172_s4  ;;  %v2567_v13 = vor.u32 1.1754944e-38, %v2566_v8  ;;  %vm2565_vm8 = vcmp.eq.f32.partialorder %v2564_v29, 8.507059e+37  ;;  %4001 = vpow2.f32 %v3712_v25 }
 0xd01   :  { %2595 = vrot.lane.b32.xlu0 %v5468_v38, %s4172_s4  ;;  %4003 = vpow2.f32 %v3716_v46 }
 0xd02   :  { %4005 = vpow2.f32 %v3715_v10 }
 0xd03   :  { %v3996_v35 = vpop.eup %3995 }
 0xd04   :  { %v2496_v54 = vmul.f32 %v3996_v35, %v2459_v43  ;;  %v3998_v6 = vpop.eup %3997  ;;  %vm2501_vm9 = vweird.f32 %v3996_v35 }
 0xd05   :  { %v2556_v55 = vmul.f32 %v3998_v6, %v2463_v34  ;;  %vm2502_vm0 = vmor %vm2500_vm10, %vm2501_vm9  ;;  %vm2561_vm11 = vweird.f32 %v3998_v6  ;;  %v4000_v28 = vpop.eup %3999 }
 0xd06   :  { %v2497_v37 = vsub.f32 1.0, %v2496_v54  ;;  %vm2562_vm7 = vmor %vm2560_vm12, %vm2561_vm11  ;;  %v4002_v63 = vpop.eup %4001  ;;  %v5505_v50 = vadd.f32 1.0, %v4000_v28 }
 0xd07   :  { %v2557_v49 = vsub.f32 1.0, %v2556_v55  ;;  %v5509_v44 = vadd.f32 1.0, %v4002_v63  ;;  %v4004_v41 = vpop.eup %4003 }
 0xd08   :  { %v2498_v21 = vmul.f32 %v3996_v35, %v2497_v37  ;;  %4007 = vrcp.f32 %v5505_v50  ;;  %v4006_v17 = vpop.eup %4005  ;;  %v5513_v43 = vadd.f32 1.0, %v4004_v41  ;;  %v2491_v0 = vand.u32 2147483648, %v5505_v50 }
 0xd09   :  { %v2558_v32 = vmul.f32 %v3998_v6, %v2557_v49  ;;  %4009 = vrcp.f32 %v5509_v44  ;;  %v5515_v34 = vadd.f32 1.0, %v4006_v17  ;;  %vm2485_vm10 = vweird.f32 %v5505_v50 }
 0xd0a   :  { %v2499_v7 = vadd.f32 %v3996_v35, %v2498_v21  ;;  %4011 = vpow2.f32 %v3719_v20  ;;  %v2489_v53 = vand.u32 2147483647, %v5505_v50  ;;  %v2476_v5 = vand.u32 2147483648, %v5509_v44 }
 0xd0b   :  { %v2559_v52 = vadd.f32 %v3998_v6, %v2558_v32  ;;  %4013 = vpow2.f32 %v3717_v24  ;;  %vm2470_vm11 = vweird.f32 %v5509_v44  ;;  %v2474_v46 = vand.u32 2147483647, %v5509_v44 }
 0xd0c   :  { %v2503_v45 = vsel %vm2502_vm0, %v3996_v35, %v2499_v7  ;;  %4015 = vrcp.f32 %v5513_v43  ;;  %v2492_v19 = vor.u32 1.1754944e-38, %v2491_v0 }
 0xd0d   :  { %v5488_v30 = vsel %vm2505_vm6, %v2507_v27, %v2503_v45  ;;  %v2563_v1 = vsel %vm2562_vm7, %v3998_v6, %v2559_v52  ;;  %4017 = vrcp.f32 %v5515_v34  ;;  %vm2490_vm6 = vcmp.eq.f32.partialorder %v2489_v53, 8.507059e+37 }
 0xd0e   :  { %v5491_v42 = vsel %vm2565_vm8, %v2567_v13, %v2563_v1  ;;  %v5494_v15 = vmul.f32 %v2715_v56, %v5488_v30  ;;  %v4008_v38 = vpop.eup %4007  ;;  %vm2475_vm7 = vcmp.eq.f32.partialorder %v2474_v46, 8.507059e+37 }
 0xd0f   :  { %v5498_v9 = vmul.f32 %v2718_v11, %v5491_v42  ;;  %v4010_v35 = vpop.eup %4009  ;;  %v2481_v6 = vmul.f32 %v4008_v38, %v5505_v50  ;;  %vm2486_vm5 = vweird.f32 %v4008_v38 }
 0xd10   :  { %v4012_v54 = vpop.eup %4011  ;;  %v2466_v55 = vmul.f32 %v4010_v35, %v5509_v44  ;;  %vm2471_vm9 = vweird.f32 %v4010_v35  ;;  %vm2487_vm0 = vmor %vm2485_vm10, %vm2486_vm5  ;;  %v2477_v44 = vor.u32 1.1754944e-38, %v2476_v5 }
 0xd11   :  { %v4014_v37 = vpop.eup %4013  ;;  %v5523_v21 = vadd.f32 1.0, %v4012_v54  ;;  %v2482_v3 = vsub.f32 1.0, %v2481_v6  ;;  %vm5549_vm12 = vmor %vm2470_vm11, %vm2471_vm9  ;;  %vm2530_vm9 = vweird.f32 %v5513_v43 }
 0xd12   :  { %v5526_v32 = vadd.f32 1.0, %v4014_v37  ;;  %v5528_v39 = vpop.eup %4015  ;;  %v2467_v52 = vsub.f32 1.0, %v2466_v55 }
 0xd13   :  { %v5530_v45 = vpop.eup %4017  ;;  %4019 = vrcp.f32 %v5523_v21  ;;  %v2483_v8 = vmul.f32 %v4008_v38, %v2482_v3  ;;  %v2526_v27 = vmul.f32 %v5528_v39, %v5513_v43  ;;  %vm2531_vm8 = vweird.f32 %v5528_v39 }
 0xd14   :  { %4021 = vrcp.f32 %v5526_v32  ;;  %v2468_v29 = vmul.f32 %v4010_v35, %v2467_v52  ;;  %v2511_v1 = vmul.f32 %v5530_v45, %v5515_v34  ;;  %vm2516_vm5 = vweird.f32 %v5530_v45  ;;  %vm2532_vm10 = vmor %vm2530_vm9, %vm2531_vm8 }
 0xd15   :  { %v2484_v56 = vadd.f32 %v4008_v38, %v2483_v8  ;;  %v2527_v13 = vsub.f32 1.0, %v2526_v27  ;;  %v2521_v3 = vand.u32 2147483648, %v5515_v34  ;;  %v2519_v52 = vand.u32 2147483647, %v5515_v34 }
 0xd16   :  { %v2469_v33 = vadd.f32 %v4010_v35, %v2468_v29  ;;  %v2512_v18 = vsub.f32 1.0, %v2511_v1  ;;  %v2579_v46 = vand.u32 2147483647, %v5523_v21  ;;  %v2549_v28 = vand.u32 2147483647, %v5526_v32 }
 0xd17   :  { %v2488_v10 = vsel %vm2487_vm0, %v4008_v38, %v2484_v56  ;;  %v2528_v63 = vmul.f32 %v5528_v39, %v2527_v13  ;;  %vm2515_vm0 = vweird.f32 %v5515_v34  ;;  %v2522_v56 = vor.u32 1.1754944e-38, %v2521_v3 }
 0xd18   :  { %v2473_v50 = vsel %vm5549_vm12, %v4010_v35, %v2469_v33  ;;  %v2513_v20 = vmul.f32 %v5530_v45, %v2512_v18  ;;  %v5561_v17 = vsel %vm2490_vm6, %v2492_v19, %v2488_v10  ;;  %vm2517_vm11 = vmor %vm2515_vm0, %vm2516_vm5  ;;  %vm2520_vm6 = vcmp.eq.f32.partialorder %v2519_v52, 8.507059e+37 }
 0xd19   :  { %v5539_v11 = vpop.eup %4019  ;;  %v5566_v54 = vsel %vm2475_vm7, %v2477_v44, %v2473_v50  ;;  %v2529_v35 = vadd.f32 %v5528_v39, %v2528_v63  ;;  %vm2575_vm5 = vweird.f32 %v5523_v21  ;;  %v2551_v10 = vand.u32 2147483648, %v5526_v32 }
 0xd1a   :  { %v5542_v25 = vpop.eup %4021  ;;  %v2571_v23 = vmul.f32 %v5539_v11, %v5523_v21  ;;  %v2514_v55 = vadd.f32 %v5530_v45, %v2513_v20  ;;  %vm2576_vm7 = vweird.f32 %v5539_v11 }
 0xd1b   :  { %v2541_v24 = vmul.f32 %v5542_v25, %v5526_v32  ;;  %v2533_v8 = vsel %vm2532_vm10, %v5528_v39, %v2529_v35  ;;  %vm2546_vm8 = vweird.f32 %v5542_v25  ;;  %vm2577_vm9 = vmor %vm2575_vm5, %vm2576_vm7  ;;  %vm2545_vm10 = vweird.f32 %v5526_v32 }
 0xd1c   :  { %v2572_v6 = vsub.f32 1.0, %v2571_v23  ;;  %v2518_v1 = vsel %vm2517_vm11, %v5530_v45, %v2514_v55  ;;  %v2581_v45 = vand.u32 2147483648, %v5523_v21  ;;  %vm2547_vm0 = vmor %vm2545_vm10, %vm2546_vm8  ;;  %vm2580_vm11 = vcmp.eq.f32.partialorder %v2579_v46, 8.507059e+37 }
 0xd1d   :  { %v5588_v18 = vsel %vm2520_vm6, %v2522_v56, %v2518_v1  ;;  %v2552_v50 = vor.u32 1.1754944e-38, %v2551_v10  ;;  %v2666_v46 = vsub.f32 1.0, %v5561_v17  ;;  %v2713_v10 = vrot.slane %v5421_v59, 7 }
 0xd1e   :  { %v2573_v27 = vmul.f32 %v5539_v11, %v2572_v6  ;;  %v2582_v23 = vor.u32 1.1754944e-38, %v2581_v45  ;;  %v2714_v45 = vrot.slane %v5418_v22, 7  ;;  %vm6203_vm6 = vcmask 261120  }
 0xd20   :  { %v2574_v39 = vadd.f32 %v5539_v11, %v2573_v27 }
 0xd22   :  { %v2578_v63 = vsel %vm2577_vm9, %v5539_v11, %v2574_v39 }
 0xd23   :  { %v5605_v20 = vsel %vm2580_vm11, %v2582_v23, %v2578_v63  ;;  %v2665_v63 = vsub.f32 1.0, %v5566_v54 }
 0xd4a   :  { %v2590_v26 = vpop.permute.xlu2 %2589 }
 0xd4b   :  { %v2611_v40 = vmul.f32 %v2590_v26, %v5488_v30  ;;  %v2536_v26 = vand.u32 2147483648, %v5513_v43 }
 0xd4d   :  { %2629 = vrot.lane.b32.xlu1 %v2611_v40, %s4172_s4  ;;  %v2537_v29 = vor.u32 1.1754944e-38, %v2536_v26 }
 0xd52   :  { %v2598_v49 = vpop.permute.xlu2 %2597 }
 0xd53   :  { %v2615_v7 = vmul.f32 %v2598_v49, %v5491_v42  ;;  %v2542_v49 = vsub.f32 1.0, %v2541_v24 }
 0xd55   :  { %2637 = vrot.lane.b32.xlu1 %v2615_v7, %s4172_s4  ;;  %v2534_v7 = vand.u32 2147483647, %v5513_v43  ;;  %v2543_v43 = vmul.f32 %v5542_v25, %v2542_v49 }
 0xd57   :  { %vm2535_vm12 = vcmp.eq.f32.partialorder %v2534_v7, 8.507059e+37  ;;  %v2544_v5 = vadd.f32 %v5542_v25, %v2543_v43 }
 0xd58   :  { %v5585_v13 = vsel %vm2535_vm12, %v2537_v29, %v2533_v8  ;;  %vm2550_vm12 = vcmp.eq.f32.partialorder %v2549_v28, 8.507059e+37 }
 0xd59   :  { %v2548_v19 = vsel %vm2547_vm0, %v5542_v25, %v2544_v5  ;;  %v2667_v5 = vsub.f32 1.0, %v5488_v30 }
 0xd5a   :  { %v5608_v44 = vsel %vm2550_vm12, %v2552_v50, %v2548_v19 }
 0xd62   :  { %v2588_v41 = vpop.permute.xlu1 %2587 }
 0xd63   :  { %v2610_v40 = vmul.f32 %v2588_v41, %v5561_v17  ;;  %v2586_v38 = vpop.permute.xlu0 %2585 }
 0xd64   :  { %v2609_v37 = vmul.f32 %v2586_v38, %v5566_v54 }
 0xd65   :  { %2627 = vrot.lane.b32.xlu0 %v2610_v40, %s4172_s4 }
 0xd66   :  { %2625 = vrot.lane.b32.xlu2 %v2609_v37, %s4172_s4 }
 0xd6a   :  { %v2594_v0 = vpop.permute.xlu1 %2593 }
 0xd6b   :  { %v2613_v33 = vmul.f32 %v2594_v0, %v5585_v13  ;;  %v2592_v34 = vpop.permute.xlu0 %2591 }
 0xd6c   :  { %v2612_v53 = vmul.f32 %v2592_v34, %v5588_v18 }
 0xd6d   :  { %2633 = vrot.lane.b32.xlu0 %v2613_v33, %s4172_s4 }
 0xd6e   :  { %2631 = vrot.lane.b32.xlu2 %v2612_v53, %s4172_s4 }
 0xd72   :  { %v2600_v21 = vpop.permute.xlu1 %2599 }
 0xd73   :  { %v2616_v24 = vmul.f32 %v2600_v21, %v5605_v20  ;;  %v2596_v41 = vpop.permute.xlu0 %2595  ;;  %v2729_v21 = vmul.f32 %v2714_v45, %v5561_v17  ;;  %v2671_v17 = vsub.f32 1.0, %v5491_v42 }
 0xd74   :  { %v2614_v26 = vmul.f32 %v2596_v41, %v5608_v44  ;;  %v2728_v41 = vmul.f32 %v2713_v10, %v5566_v54  ;;  %v2669_v54 = vsub.f32 1.0, %v5585_v13 }
 0xd75   :  { %2639 = vrot.lane.b32.xlu0 %v2616_v24, %s4172_s4 }
 0xd76   :  { %2635 = vrot.lane.b32.xlu2 %v2614_v26, %s4172_s4 }
 0xdbf   :  { %v2630_v32 = vpop.permute.xlu1 %2629 }
 0xdc0   :  { %v2651_v11 = vadd.f32 %v2630_v32, %v4378_v4  ;;  %v2626_v25 = vpop.permute.xlu2 %2625 }
 0xdc1   :  { %v2649_v40 = vadd.f32 %v2626_v25, %v4369_v58 }
 0xdc2   :  { %4023 = vtanh.f32 %v2651_v11 }
 0xdc3   :  { %4025 = vtanh.f32 %v2649_v40  ;;  %v2717_v40 = vrot.slane %v5448_v57, 7 }
 0xdc7   :  { %v2638_v38 = vpop.permute.xlu1 %2637 }
 0xdc8   :  { %v4024_v35 = vpop.eup %4023  ;;  %v2655_v6 = vadd.f32 %v2638_v38, %v4409_v47  ;;  %v2632_v37 = vpop.permute.xlu2 %2631  ;;  %v2716_v38 = vrot.slane %v5432_v31, 7 }
 0xdc9   :  { %v4026_v55 = vpop.eup %4025  ;;  %v2652_v49 = vadd.f32 %v2632_v37, %v4382_v12  ;;  %2685 = vrot.lane.b32.xlu0 %v4024_v35, %s4173_s6 }
 0xdca   :  { %4027 = vtanh.f32 %v2655_v6  ;;  %2681 = vrot.lane.b32.xlu1 %v4026_v55, %s4173_s6  ;;  %v2668_v6 = vsub.f32 1.0, %v5588_v18  ;;  %v2731_v57 = vmul.f32 %v2716_v38, %v5588_v18  ;;  %v2670_v18 = vsub.f32 1.0, %v5608_v44 }
 0xdcb   :  { %4029 = vtanh.f32 %v2652_v49 }
 0xdd0   :  { %v4028_v7 = vpop.eup %4027  ;;  %v2636_v3 = vpop.permute.xlu2 %2635 }
 0xdd1   :  { %v4030_v52 = vpop.eup %4029  ;;  %v2654_v8 = vadd.f32 %v2636_v3, %v4399_v48  ;;  %2693 = vrot.lane.b32.xlu0 %v4028_v7, %s4173_s6  ;;  %v2732_v3 = vmul.f32 %v2717_v40, %v5585_v13 }
 0xdd2   :  { %2687 = vrot.lane.b32.xlu1 %v4030_v52, %s4173_s6 }
 0xdd3   :  { %4031 = vtanh.f32 %v2654_v8 }
 0xdd7   :  { %v2628_v27 = vpop.permute.xlu0 %2627 }
 0xdd8   :  { %v2650_v29 = vadd.f32 %v2628_v27, %v4374_v62 }
 0xdd9   :  { %v4032_v1 = vpop.eup %4031 }
 0xdda   :  { %4033 = vtanh.f32 %v2650_v29  ;;  %2691 = vrot.lane.b32.xlu1 %v4032_v1, %s4173_s6 }
 0xddf   :  { %v2634_v43 = vpop.permute.xlu0 %2633 }
 0xde0   :  { %v4034_v56 = vpop.eup %4033  ;;  %v2653_v0 = vadd.f32 %v2634_v43, %v4389_v36  ;;  %v2719_v43 = vrot.slane %v5451_v2, 7 }
 0xde1   :  { %2683 = vrot.lane.b32.xlu2 %v4034_v56, %s4173_s6  ;;  %v2672_v56 = vsub.f32 1.0, %v5605_v20 }
 0xde2   :  { %4035 = vtanh.f32 %v2653_v0 }
 0xde7   :  { %v2640_v33 = vpop.permute.xlu0 %2639 }
 0xde8   :  { %v4036_v34 = vpop.eup %4035  ;;  %v2656_v39 = vadd.f32 %v2640_v33, %v4419_v51 }
 0xde9   :  { %2689 = vrot.lane.b32.xlu2 %v4036_v34, %s4173_s6  ;;  %v2735_v34 = vmul.f32 %v2719_v43, %v5605_v20 }
 0xdea   :  { %4037 = vtanh.f32 %v2656_v39 }
 0xdf0   :  { %v4038_v53 = vpop.eup %4037 }
 0xdf1   :  { %2695 = vrot.lane.b32.xlu2 %v4038_v53, %s4173_s6  ;;  %v2733_v53 = vmul.f32 %v5608_v44, %v2379_v61 }
 0xe3b   :  { %v2686_v28 = vpop.permute.xlu0 %2685  ;;  %v2684_v23 = vpop.permute.xlu2 %2683 }
 0xe3c   :  { %v2707_v19 = vmul.f32 %v2686_v28, %v2667_v5  ;;  %v2682_v50 = vpop.permute.xlu1 %2681  ;;  %v2706_v24 = vmul.f32 %v2684_v23, %v2666_v46 }
 0xe3d   :  { %v2705_v26 = vmul.f32 %v2682_v50, %v2665_v63  ;;  %v5690_v63 = vld [vmem:[%s6183_s7] ss:$0 sm:$0xff] }
 0xe3e   :  { %v5637_v22 = vadd.f32 %v5494_v15, %v2707_v19  ;;  %v5639_v30 = vadd.f32 %v2729_v21, %v2706_v24 }
 0xe3f   :  { %v5641_v32 = vadd.f32 %v2728_v41, %v2705_v26 }
 0xe40   :  { %v2755_v59 = vrot.slane %v5637_v22, 3  ;;  %v2753_v11 = vrot.slane %v5639_v30, 4 }
 0xe41   :  { %v2752_v25 = vrot.slane %v5641_v32, 5 }
 0xe43   :  { %v2754_v15 = vsel %vm205_vm13, %v2753_v11, %v2752_v25  ;;  %v2694_v35 = vpop.permute.xlu0 %2693  ;;  %v2690_v37 = vpop.permute.xlu2 %2689 }
 0xe44   :  { %v2711_v55 = vmul.f32 %v2694_v35, %v2671_v17  ;;  %v2688_v49 = vpop.permute.xlu1 %2687  ;;  %v2756_v7 = vsel %vm207_vm14, %v2755_v59, %v2754_v15  ;;  %v2709_v52 = vmul.f32 %v2690_v37, %v2669_v54 }
 0xe45   :  { %v2708_v42 = vmul.f32 %v2688_v49, %v2668_v6 }
 0xe46   :  { %v5656_v8 = vadd.f32 %v5498_v9, %v2711_v55  ;;  %v5658_v31 = vadd.f32 %v2732_v3, %v2709_v52 }
 0xe47   :  { %v5660_v27 = vadd.f32 %v2731_v57, %v2708_v42 }
 0xe48   :  { %v2759_v29 = vrot.slane %v5658_v31, 1  ;;  %v2762_v46 = vrot.slane %v5656_v8, 7 }
 0xe49   :  { %v2757_v1 = vrot.slane %v5660_v27, 2 }
 0xe4b   :  { %v2758_v13 = vsel %vm209_vm15, %v2757_v1, %v2756_v7  ;;  %v2696_v0 = vpop.permute.xlu2 %2695 }
 0xe4c   :  { %v2760_v9 = vsel %vm211_vm1, %v2759_v29, %v2758_v13  ;;  %v2692_v33 = vpop.permute.xlu1 %2691  ;;  %v2712_v39 = vmul.f32 %v2696_v0, %v2672_v56 }
 0xe4d   :  { %v2710_v45 = vmul.f32 %v2692_v33, %v2670_v18 }
 0xe4e   :  { %v5673_v5 = vadd.f32 %v2735_v34, %v2712_v39  ;;  %v3095_v39 = vrot.slane %v5639_v30, 7 }
 0xe4f   :  { %v5675_v2 = vadd.f32 %v2733_v53, %v2710_v45  ;;  %v3098_v45 = vrot.slane %v5658_v31, 7 }
 0xe50   :  { %v2764_v10 = vrot.slane %v5673_v5, 6 }
 0xe51   :  { %v2761_v28 = vsel %vm213_vm2, %v5675_v2, %v2760_v9 }
 0xe52   :  { %v2763_v20 = vsel %vm215_vm3, %v2762_v46, %v2761_v28 }
 0xe53   :  { %v2765_v14 = vsel %vm217_vm4, %v2764_v10, %v2763_v20 }
 0xe54   :  { %2766 = vrot.lane.b32.xlu0 %v2765_v14, %s4173_s6 }
 0xec6   :  { %v2767_v61 = vpop.permute.xlu0 %2766 }
 0xec7   :  { %3720 = vmatmul.msk.f32.vlgmr.msrb.gmra.mxu0 %vm6203_vm6, %v2767_v61 }
 0xf44   :  { %v2787_v44 = vpop.f32.mrf.mxu0 }
 0xf45   :  { %v5693_v23 = vadd.f32 %v5690_v63, %v2787_v44 }
 0xf47   :  { %v2793_v19 = vrot.slane %v5693_v23, 4  ;;  %v2792_v50 = vrot.slane %v5693_v23, 3  ;;  %v2791_v21 = vrot.slane %v5693_v23, 2  ;;  %v2795_v24 = vrot.slane %v5693_v23, 6 }
 0xf48   :  { %v2796_v25 = vrot.slane %v5693_v23, 7  ;;  %v2794_v40 = vrot.slane %v5693_v23, 5  ;;  %v2797_v35 = vrot.slane %v5693_v23, 1  ;;  %v2812_v20 = vadd.f32 %v5693_v23, %v4409_v47 }
 0xf49   :  { %2970 = vrot.lane.b32.xlu0 %v2793_v19, %s4172_s4  ;;  %2968 = vrot.lane.b32.xlu2 %v2792_v50, %s4172_s4  ;;  %v2807_v41 = vadd.f32 %v2792_v50, %v4374_v62  ;;  %v2810_v26 = vadd.f32 %v2795_v24, %v4389_v36  ;;  %v2808_v61 = vadd.f32 %v2793_v19, %v4378_v4 }
 0xf4a   :  { %2966 = vrot.lane.b32.xlu1 %v2791_v21, %s4172_s4  ;;  %v3727_v14 = vmul.f32 -1.442695, %v2812_v20  ;;  %v2806_v30 = vadd.f32 %v2791_v21, %v4369_v58  ;;  %v2811_v31 = vadd.f32 %v2796_v25, %v4399_v48  ;;  %v2813_v19 = vadd.f32 %v2797_v35, %v4419_v51 }
 0xf4b   :  { %v3722_v59 = vmul.f32 -1.442695, %v2807_v41  ;;  %v3725_v11 = vmul.f32 -1.442695, %v2810_v26  ;;  %v3723_v44 = vmul.f32 -1.442695, %v2808_v61  ;;  %v2809_v41 = vadd.f32 %v2794_v40, %v4382_v12 }
 0xf4c   :  { %v3721_v50 = vmul.f32 -1.442695, %v2806_v30 }
 0xf4d   :  { %4039 = vpow2.f32 %v3722_v59  ;;  %v3726_v59 = vmul.f32 -1.442695, %v2811_v31 }
 0xf4e   :  { %4041 = vpow2.f32 %v3725_v11  ;;  %v3724_v11 = vmul.f32 -1.442695, %v2809_v41 }
 0xf51   :  { %2976 = vrot.lane.b32.xlu0 %v2796_v25, %s4172_s4  ;;  %2974 = vrot.lane.b32.xlu2 %v2795_v24, %s4172_s4 }
 0xf52   :  { %2972 = vrot.lane.b32.xlu1 %v2794_v40, %s4172_s4 }
 0xf53   :  { %v4040_v17 = vpop.eup %4039 }
 0xf54   :  { %v2839_v54 = vadd.f32 1.0, %v4040_v17  ;;  %v4042_v38 = vpop.eup %4041 }
 0xf55   :  { %v2842_v15 = vadd.f32 1.0, %v4042_v38 }
 0xf56   :  { %4043 = vrcp.f32 %v2839_v54  ;;  %v2872_v29 = vand.u32 2147483648, %v2839_v54  ;;  %vm2866_vm8 = vweird.f32 %v2839_v54  ;;  %v2870_v1 = vand.u32 2147483647, %v2839_v54 }
 0xf57   :  { %4045 = vrcp.f32 %v2842_v15  ;;  %v2917_v56 = vand.u32 2147483648, %v2842_v15  ;;  %vm2911_vm10 = vweird.f32 %v2842_v15  ;;  %v2915_v18 = vand.u32 2147483647, %v2842_v15 }
 0xf58   :  { %v2873_v0 = vor.u32 1.1754944e-38, %v2872_v29  ;;  %vm2871_vm11 = vcmp.eq.f32.partialorder %v2870_v1, 8.507059e+37  ;;  %4047 = vpow2.f32 %v3727_v14 }
 0xf59   :  { %2978 = vrot.lane.b32.xlu2 %v5693_v23, %s4172_s4  ;;  %v2918_v34 = vor.u32 1.1754944e-38, %v2917_v56  ;;  %vm2916_vm12 = vcmp.eq.f32.partialorder %v2915_v18, 8.507059e+37  ;;  %4049 = vpow2.f32 %v3723_v44 }
 0xf5a   :  { %2980 = vrot.lane.b32.xlu1 %v2797_v35, %s4172_s4  ;;  %4051 = vpow2.f32 %v3721_v50 }
 0xf5c   :  { %v4044_v6 = vpop.eup %4043 }
 0xf5d   :  { %v2862_v37 = vmul.f32 %v4044_v6, %v2839_v54  ;;  %v4046_v55 = vpop.eup %4045  ;;  %vm2867_vm7 = vweird.f32 %v4044_v6 }
 0xf5e   :  { %v2907_v7 = vmul.f32 %v4046_v55, %v2842_v15  ;;  %vm2912_vm5 = vweird.f32 %v4046_v55  ;;  %vm2868_vm9 = vmor %vm2866_vm8, %vm2867_vm7  ;;  %v4048_v24 = vpop.eup %4047  ;;  %v3728_v15 = vmul.f32 -1.442695, %v2813_v19 }
 0xf5f   :  { %v2863_v49 = vsub.f32 1.0, %v2862_v37  ;;  %vm2913_vm0 = vmor %vm2911_vm10, %vm2912_vm5  ;;  %v2844_v26 = vadd.f32 1.0, %v4048_v24  ;;  %v4050_v23 = vpop.eup %4049 }
 0xf60   :  { %v2908_v52 = vsub.f32 1.0, %v2907_v7  ;;  %v4052_v17 = vpop.eup %4051  ;;  %v5732_v54 = vadd.f32 1.0, %v4050_v23 }
 0xf61   :  { %v2864_v3 = vmul.f32 %v4044_v6, %v2863_v49  ;;  %4053 = vrcp.f32 %v2844_v26  ;;  %v5734_v21 = vadd.f32 1.0, %v4052_v17  ;;  %vm2941_vm7 = vweird.f32 %v2844_v26 }
 0xf62   :  { %v2909_v57 = vmul.f32 %v4046_v55, %v2908_v52  ;;  %4055 = vpow2.f32 %v3726_v59  ;;  %v2945_v20 = vand.u32 2147483647, %v2844_v26  ;;  %v2887_v23 = vand.u32 2147483648, %v5732_v54 }
 0xf63   :  { %v2865_v42 = vadd.f32 %v4044_v6, %v2864_v3  ;;  %4057 = vpow2.f32 %v3724_v11 }
 0xf64   :  { %v2910_v43 = vadd.f32 %v4046_v55, %v2909_v57  ;;  %4059 = vrcp.f32 %v5732_v54  ;;  %vm2946_vm5 = vcmp.eq.f32.partialorder %v2945_v20, 8.507059e+37 }
 0xf65   :  { %v2869_v13 = vsel %vm2868_vm9, %v4044_v6, %v2865_v42  ;;  %4061 = vrcp.f32 %v5734_v21 }
 0xf66   :  { %v2914_v9 = vsel %vm2913_vm0, %v4046_v55, %v2910_v43  ;;  %v5713_v33 = vsel %vm2871_vm11, %v2873_v0, %v2869_v13  ;;  %4063 = vpow2.f32 %v3728_v15  ;;  %vm2881_vm0 = vweird.f32 %v5732_v54 }
 0xf67   :  { %v5716_v53 = vsel %vm2916_vm12, %v2918_v34, %v2914_v9  ;;  %v5720_v10 = vmul.f32 %v3095_v39, %v5713_v33  ;;  %v4054_v38 = vpop.eup %4053  ;;  %v2947_v34 = vand.u32 2147483648, %v2844_v26  ;;  %v2885_v15 = vand.u32 2147483647, %v5732_v54 }
 0xf68   :  { %v5723_v28 = vmul.f32 %v3098_v45, %v5716_v53  ;;  %v4056_v25 = vpop.eup %4055  ;;  %v2937_v40 = vmul.f32 %v4054_v38, %v2844_v26  ;;  %vm2942_vm6 = vweird.f32 %v4054_v38  ;;  %vm2851_vm12 = vweird.f32 %v5734_v21 }
 0xf69   :  { %v4058_v6 = vpop.eup %4057  ;;  %v5738_v37 = vadd.f32 1.0, %v4056_v25  ;;  %vm2943_vm8 = vmor %vm2941_vm7, %vm2942_vm6  ;;  %v2948_v44 = vor.u32 1.1754944e-38, %v2947_v34  ;;  %v2857_v25 = vand.u32 2147483648, %v5734_v21  ;;  %vm2886_vm7 = vcmp.eq.f32.partialorder %v2885_v15, 8.507059e+37 }
 0xf6a   :  { %v5740_v49 = vadd.f32 1.0, %v4058_v6  ;;  %v2938_v7 = vsub.f32 1.0, %v2937_v40  ;;  %v4060_v3 = vpop.eup %4059  ;;  %v2855_v40 = vand.u32 2147483647, %v5734_v21 }
 0xf6b   :  { %v5743_v52 = vpop.eup %4061  ;;  %4065 = vrcp.f32 %v5738_v37  ;;  %v2877_v29 = vmul.f32 %v4060_v3, %v5732_v54  ;;  %vm2882_vm9 = vweird.f32 %v4060_v3  ;;  %v2858_v54 = vor.u32 1.1754944e-38, %v2857_v25 }
 0xf6c   :  { %v4064_v57 = vpop.eup %4063  ;;  %4067 = vrcp.f32 %v5740_v49  ;;  %v2939_v42 = vmul.f32 %v4054_v38, %v2938_v7  ;;  %v2847_v1 = vmul.f32 %v5743_v52, %v5734_v21  ;;  %vm2852_vm10 = vweird.f32 %v5743_v52  ;;  %vm2883_vm11 = vmor %vm2881_vm0, %vm2882_vm9 }
 0xf6d   :  { %v5751_v43 = vadd.f32 1.0, %v4064_v57  ;;  %v2878_v0 = vsub.f32 1.0, %v2877_v29  ;;  %vm2853_vm6 = vmor %vm2851_vm12, %vm2852_vm10  ;;  %vm2926_vm10 = vweird.f32 %v5738_v37  ;;  %v2902_v20 = vand.u32 2147483648, %v5740_v49 }
 0xf6e   :  { %v2940_v18 = vadd.f32 %v4054_v38, %v2939_v42  ;;  %v2848_v39 = vsub.f32 1.0, %v2847_v1 }
 0xf6f   :  { %4069 = vrcp.f32 %v5751_v43  ;;  %v2879_v61 = vmul.f32 %v4060_v3, %v2878_v0 }
 0xf70   :  { %v2944_v14 = vsel %vm2943_vm8, %v4054_v38, %v2940_v18  ;;  %v2849_v50 = vmul.f32 %v5743_v52, %v2848_v39  ;;  %vm2856_vm8 = vcmp.eq.f32.partialorder %v2855_v40, 8.507059e+37  ;;  %v2930_v39 = vand.u32 2147483647, %v5738_v37 }
 0xf71   :  { %v5754_v9 = vpop.eup %4065  ;;  %v5765_v31 = vsel %vm2946_vm5, %v2948_v44, %v2944_v14  ;;  %v2880_v59 = vadd.f32 %v4060_v3, %v2879_v61  ;;  %v2900_v14 = vand.u32 2147483647, %v5740_v49 }
 0xf72   :  { %v5756_v45 = vpop.eup %4067  ;;  %v2922_v30 = vmul.f32 %v5754_v9, %v5738_v37  ;;  %v2850_v17 = vadd.f32 %v5743_v52, %v2849_v50  ;;  %vm2927_vm5 = vweird.f32 %v5754_v9 }
 0xf73   :  { %v2892_v24 = vmul.f32 %v5756_v45, %v5740_v49  ;;  %v2884_v6 = vsel %vm2883_vm11, %v4060_v3, %v2880_v59  ;;  %vm2897_vm9 = vweird.f32 %v5756_v45  ;;  %vm2928_vm0 = vmor %vm2926_vm10, %vm2927_vm5  ;;  %vm2896_vm11 = vweird.f32 %v5740_v49 }
 0xf74   :  { %v2923_v11 = vsub.f32 1.0, %v2922_v30  ;;  %v2854_v7 = vsel %vm2853_vm6, %v5743_v52, %v2850_v17  ;;  %vm2898_vm12 = vmor %vm2896_vm11, %vm2897_vm9  ;;  %vm2931_vm6 = vcmp.eq.f32.partialorder %v2930_v39, 8.507059e+37  ;;  %vm2956_vm5 = vweird.f32 %v5751_v43 }
 0xf75   :  { %v2893_v19 = vsub.f32 1.0, %v2892_v24  ;;  %v5771_v38 = vpop.eup %4069 }
 0xf76   :  { %v2952_v42 = vmul.f32 %v5771_v38, %v5751_v43 }
 0xf77   :  { %v2894_v57 = vmul.f32 %v5756_v45, %v2893_v19 }
 0xf78   :  { %v2953_v34 = vsub.f32 1.0, %v2952_v42 }
 0xf79   :  { %v2895_v0 = vadd.f32 %v5756_v45, %v2894_v57 }
 0xf7a   :  { %v2954_v50 = vmul.f32 %v5771_v38, %v2953_v34 }
 0xf7b   :  { %v2899_v44 = vsel %vm2898_vm12, %v5756_v45, %v2895_v0  ;;  %v2962_v45 = vand.u32 2147483648, %v5751_v43 }
 0xf7d   :  { %v2963_v19 = vor.u32 1.1754944e-38, %v2962_v45 }
 0xfa3   :  { %v2969_v55 = vpop.permute.xlu2 %2968 }
 0xfa4   :  { %v2991_v35 = vmul.f32 %v2969_v55, %v5713_v33  ;;  %v2924_v55 = vmul.f32 %v5754_v9, %v2923_v11 }
 0xfa6   :  { %3008 = vrot.lane.b32.xlu1 %v2991_v35, %s4172_s4  ;;  %v2888_v35 = vor.u32 1.1754944e-38, %v2887_v23  ;;  %v2925_v52 = vadd.f32 %v5754_v9, %v2924_v55  ;;  %v2960_v23 = vand.u32 2147483647, %v5751_v43 }
 0xfa8   :  { %v5784_v1 = vsel %vm2886_vm7, %v2888_v35, %v2884_v6  ;;  %v2929_v61 = vsel %vm2928_vm0, %v5754_v9, %v2925_v52  ;;  %vm2901_vm7 = vcmp.eq.f32.partialorder %v2900_v14, 8.507059e+37  ;;  %v2955_v9 = vadd.f32 %v5771_v38, %v2954_v50 }
 0xfa9   :  { %vm2961_vm10 = vcmp.eq.f32.partialorder %v2960_v23, 8.507059e+37  ;;  %vm3546_vm0 = vcmask 523264  }
 0xfab   :  { %v2975_v56 = vpop.permute.xlu2 %2974 }
 0xfac   :  { %v2994_v13 = vmul.f32 %v2975_v56, %v5716_v53  ;;  %v5788_v56 = vsel %vm2856_vm8, %v2858_v54, %v2854_v7  ;;  %vm2957_vm8 = vweird.f32 %v5771_v38 }
 0xfad   :  { %vm2958_vm9 = vmor %vm2956_vm5, %vm2957_vm8 }
 0xfae   :  { %3014 = vrot.lane.b32.xlu1 %v2994_v13, %s4172_s4  ;;  %v2932_v13 = vand.u32 2147483648, %v5738_v37  ;;  %v2903_v37 = vor.u32 1.1754944e-38, %v2902_v20  ;;  %v2959_v17 = vsel %vm2958_vm9, %v5771_v38, %v2955_v9  ;;  %v3047_v9 = vsub.f32 1.0, %v5713_v33 }
 0xfaf   :  { %v5821_v15 = vsel %vm2961_vm10, %v2963_v19, %v2959_v17 }
 0xfb0   :  { %v2933_v30 = vor.u32 1.1754944e-38, %v2932_v13  ;;  %v5810_v59 = vsel %vm2901_vm7, %v2903_v37, %v2899_v44  ;;  %v3096_v37 = vrot.slane %v5637_v22, 7 }
 0xfb2   :  { %v5807_v24 = vsel %vm2931_vm6, %v2933_v30, %v2929_v61  ;;  %v3111_v45 = vmul.f32 %v3096_v37, %v5784_v1 }
 0xfb3   :  { %v2979_v41 = vpop.permute.xlu2 %2978 }
 0xfb4   :  { %v2996_v26 = vmul.f32 %v2979_v41, %v5765_v31 }
 0xfb6   :  { %3018 = vrot.lane.b32.xlu1 %v2996_v26, %s4172_s4 }
 0xfbb   :  { %v2971_v29 = vpop.permute.xlu0 %2970 }
 0xfbc   :  { %v2992_v21 = vmul.f32 %v2971_v29, %v5784_v1  ;;  %v2967_v3 = vpop.permute.xlu1 %2966 }
 0xfbd   :  { %v2990_v18 = vmul.f32 %v2967_v3, %v5788_v56 }
 0xfbe   :  { %3010 = vrot.lane.b32.xlu2 %v2992_v21, %s4172_s4 }
 0xfbf   :  { %3006 = vrot.lane.b32.xlu0 %v2990_v18, %s4172_s4 }
 0xfc3   :  { %v2977_v41 = vpop.permute.xlu0 %2976 }
 0xfc4   :  { %v2995_v26 = vmul.f32 %v2977_v41, %v5807_v24  ;;  %v2973_v11 = vpop.permute.xlu1 %2972  ;;  %v3048_v41 = vsub.f32 1.0, %v5784_v1 }
 0xfc5   :  { %v2993_v49 = vmul.f32 %v2973_v11, %v5810_v59 }
 0xfc6   :  { %3016 = vrot.lane.b32.xlu2 %v2995_v26, %s4172_s4  ;;  %v3094_v26 = vrot.slane %v5641_v32, 7 }
 0xfc7   :  { %3012 = vrot.lane.b32.xlu0 %v2993_v49, %s4172_s4  ;;  %v3046_v49 = vsub.f32 1.0, %v5788_v56 }
 0xfcc   :  { %v2981_v25 = vpop.permute.xlu1 %2980 }
 0xfcd   :  { %v2997_v40 = vmul.f32 %v2981_v25, %v5821_v15  ;;  %v3109_v25 = vmul.f32 %v3094_v26, %v5788_v56  ;;  %v3099_v56 = vrot.slane %v5675_v2, 7 }
 0xfcf   :  { %3020 = vrot.lane.b32.xlu0 %v2997_v40, %s4172_s4 }
0x1018   :  { %v3011_v6 = vpop.permute.xlu2 %3010  ;;  %v3009_v55 = vpop.permute.xlu1 %3008 }
0x1019   :  { %v3032_v35 = vadd.f32 %v3011_v6, %v4378_v4  ;;  %v3031_v7 = vadd.f32 %v3009_v55, %v4374_v62 }
0x101b   :  { %4071 = vtanh.f32 %v3032_v35 }
0x101c   :  { %4073 = vtanh.f32 %v3031_v7  ;;  %v3097_v7 = vrot.slane %v5660_v27, 7 }
0x101e   :  { %v3112_v27 = vmul.f32 %v3097_v7, %v5810_v59 }
0x1020   :  { %v3017_v43 = vpop.permute.xlu2 %3016  ;;  %v3015_v57 = vpop.permute.xlu1 %3014 }
0x1021   :  { %v4072_v38 = vpop.eup %4071  ;;  %v3035_v42 = vadd.f32 %v3017_v43, %v4399_v48  ;;  %v3034_v54 = vadd.f32 %v3015_v57, %v4389_v36  ;;  %v3051_v43 = vsub.f32 1.0, %v5807_v24 }
0x1022   :  { %v4074_v29 = vpop.eup %4073  ;;  %3066 = vrot.lane.b32.xlu1 %v4072_v38, %s4173_s6 }
0x1023   :  { %4075 = vtanh.f32 %v3035_v42  ;;  %3064 = vrot.lane.b32.xlu0 %v4074_v29, %s4173_s6  ;;  %v3049_v42 = vsub.f32 1.0, %v5810_v59  ;;  %v3053_v59 = vsub.f32 1.0, %v5821_v15 }
0x1024   :  { %4077 = vtanh.f32 %v3034_v54 }
0x1028   :  { %v3019_v21 = vpop.permute.xlu1 %3018 }
0x1029   :  { %v4076_v3 = vpop.eup %4075  ;;  %v3036_v52 = vadd.f32 %v3019_v21, %v4409_v47 }
0x102a   :  { %v4078_v13 = vpop.eup %4077  ;;  %3072 = vrot.lane.b32.xlu1 %v4076_v3, %s4173_s6 }
0x102b   :  { %4079 = vtanh.f32 %v3036_v52  ;;  %3070 = vrot.lane.b32.xlu0 %v4078_v13, %s4173_s6  ;;  %v3114_v52 = vmul.f32 %v3099_v56, %v5807_v24 }
0x1031   :  { %v4080_v18 = vpop.eup %4079  ;;  %v3007_v0 = vpop.permute.xlu0 %3006 }
0x1032   :  { %v3030_v34 = vadd.f32 %v3007_v0, %v4369_v58 }
0x1033   :  { %3074 = vrot.lane.b32.xlu0 %v4080_v18, %s4173_s6 }
0x1034   :  { %4081 = vtanh.f32 %v3030_v34 }
0x1039   :  { %v3013_v39 = vpop.permute.xlu0 %3012 }
0x103a   :  { %v4082_v20 = vpop.eup %4081  ;;  %v3033_v14 = vadd.f32 %v3013_v39, %v4382_v12 }
0x103b   :  { %3062 = vrot.lane.b32.xlu2 %v4082_v20, %s4173_s6  ;;  %v3100_v20 = vrot.slane %v5673_v5, 7 }
0x103c   :  { %4083 = vtanh.f32 %v3033_v14 }
0x103d   :  { %v3116_v37 = vmul.f32 %v3100_v20, %v5821_v15  ;;  %v3539_v15 = vld [vmem:[%s6185_s9 + $0x28] sm:$0xff] }
0x1041   :  { %v3021_v61 = vpop.permute.xlu0 %3020 }
0x1042   :  { %v4084_v30 = vpop.eup %4083  ;;  %v3037_v44 = vadd.f32 %v3021_v61, %v4419_v51  ;;  %v3052_v61 = vsub.f32 1.0, %v5765_v31 }
0x1043   :  { %3068 = vrot.lane.b32.xlu2 %v4084_v30, %s4173_s6 }
0x1044   :  { %4085 = vtanh.f32 %v3037_v44 }
0x104a   :  { %v4086_v50 = vpop.eup %4085 }
0x104b   :  { %3076 = vrot.lane.b32.xlu2 %v4086_v50, %s4173_s6 }
0x1094   :  { %v3067_v11 = vpop.permute.xlu1 %3066 }
0x1095   :  { %v3088_v23 = vmul.f32 %v3067_v11, %v3048_v41  ;;  %v3063_v17 = vpop.permute.xlu2 %3062  ;;  %v3065_v19 = vpop.permute.xlu0 %3064 }
0x1096   :  { %v3086_v40 = vmul.f32 %v3063_v17, %v3046_v49  ;;  %v3087_v6 = vmul.f32 %v3065_v19, %v3047_v9  ;;  %v3537_v17 = vld [vmem:[%s6185_s9 + $0x18] sm:$0xff]  ;;  %v3536_v19 = vld [vmem:[%s6185_s9 + $0x10] sm:$0xff] }
0x1097   :  { %v5848_v55 = vadd.f32 %v3111_v45, %v3088_v23  ;;  %v3538_v23 = vld [vmem:[%s6185_s9 + $0x20] sm:$0xff] }
0x1098   :  { %v5850_v22 = vadd.f32 %v3109_v25, %v3086_v40  ;;  %v5853_v32 = vadd.f32 %v5720_v10, %v3087_v6  ;;  %v3050_v10 = vsub.f32 1.0, %v5716_v53  ;;  %v3535_v40 = vld [vmem:[%s6185_s9 + $0x8] sm:$0xff]  ;;  %v3534_v6 = vld [vmem:[%s6185_s9] sm:$0xff] }
0x1099   :  { %v3136_v35 = vrot.slane %v5848_v55, 4 }
0x109a   :  { %v3133_v33 = vrot.slane %v5850_v22, 6  ;;  %v3134_v1 = vrot.slane %v5853_v32, 5 }
0x109c   :  { %v3135_v57 = vsel %vm205_vm13, %v3134_v1, %v3133_v33  ;;  %v3073_v38 = vpop.permute.xlu1 %3072 }
0x109d   :  { %v3091_v54 = vmul.f32 %v3073_v38, %v3051_v43  ;;  %v3069_v29 = vpop.permute.xlu2 %3068  ;;  %v3137_v21 = vsel %vm207_vm14, %v3136_v35, %v3135_v57  ;;  %v3071_v3 = vpop.permute.xlu0 %3070  ;;  %v3533_v35 = vld [vmem:[%s6184_s8] sm:$0xff] }
0x109e   :  { %v3089_v13 = vmul.f32 %v3069_v29, %v3049_v42  ;;  %v3090_v18 = vmul.f32 %v3071_v3, %v3050_v10 }
0x109f   :  { %v5867_v0 = vadd.f32 %v3114_v52, %v3091_v54 }
0x10a0   :  { %v5869_v2 = vadd.f32 %v3112_v27, %v3089_v13  ;;  %v5872_v34 = vadd.f32 %v5723_v28, %v3090_v18  ;;  %v3115_v28 = vmul.f32 %v5765_v31, %v2762_v46  ;;  %v3541_v46 = vld [vmem:[%s6185_s9 + $0x38] sm:$0xff]  ;;  %v3540_v31 = vld [vmem:[%s6185_s9 + $0x30] sm:$0xff] }
0x10a1   :  { %v3142_v14 = vrot.slane %v5867_v0, 1  ;;  %3558 = vmatpush.msra.mxu0 %v3541_v46 }
0x10a2   :  { %v3138_v53 = vrot.slane %v5869_v2, 3  ;;  %v3140_v39 = vrot.slane %v5872_v34, 2 }
0x10a3   :  { %3559 = vmatpush.msra.mxu0 %v3540_v31  ;;  %v3479_v31 = vrot.slane %v5872_v34, 7 }
0x10a4   :  { %v3139_v24 = vsel %vm209_vm15, %v3138_v53, %v3137_v21 }
0x10a5   :  { %v3141_v30 = vsel %vm211_vm1, %v3140_v39, %v3139_v24  ;;  %v3077_v44 = vpop.permute.xlu2 %3076  ;;  %v3075_v50 = vpop.permute.xlu0 %3074  ;;  %3560 = vmatpush.msra.mxu0 %v3539_v15 }
0x10a6   :  { %v3093_v41 = vmul.f32 %v3077_v44, %v3053_v59  ;;  %v3092_v5 = vmul.f32 %v3075_v50, %v3052_v61  ;;  %v3143_v26 = vsel %vm213_vm2, %v3142_v14, %v3141_v30 }
0x10a7   :  { %3561 = vmatpush.msra.mxu0 %v3538_v23  ;;  %v3476_v23 = vrot.slane %v5853_v32, 7 }
0x10a8   :  { %v5887_v11 = vadd.f32 %v3116_v37, %v3093_v41  ;;  %v5889_v49 = vadd.f32 %v3115_v28, %v3092_v5 }
0x10a9   :  { %3562 = vmatpush.msra.mxu0 %v3537_v17 }
0x10aa   :  { %v3145_v9 = vrot.slane %v5887_v11, 7  ;;  %v3144_v45 = vsel %vm215_vm3, %v5889_v49, %v3143_v26 }
0x10ab   :  { %3563 = vmatpush.msra.mxu0 %v3536_v19 }
0x10ac   :  { %v3146_v8 = vsel %vm217_vm4, %v3145_v9, %v3144_v45  ;;  %vm6204_vm4 = vcmask 261120  }
0x10ad   :  { %3147 = vrot.lane.b32.xlu1 %v3146_v8, %s4173_s6  ;;  %3564 = vmatpush.msra.mxu0 %v3535_v40 }
0x10af   :  { %3565 = vmatpush.msra.mxu0 %v3534_v6 }
0x10b0   :  { %3738 = vmatmul.msk.f32.vlgmr.msra.gmra.mxu0 %vm3546_vm0, %v3533_v35 }
0x111f   :  { %v3148_v25 = vpop.permute.xlu1 %3147 }
0x1120   :  { %3729 = vmatmul.msk.f32.vlgmr.msra.gmra.mxu3 %vm6204_vm4, %v3148_v25 }
0x11a3   :  { %v3168_v33 = vpop.f32.mrf.mxu3 }
0x11a4   :  { %v5928_v1 = vadd.f32 %v5690_v63, %v3168_v33 }
0x11a6   :  { %v3175_v7 = vrot.slane %v5928_v1, 4  ;;  %v3174_v43 = vrot.slane %v5928_v1, 3  ;;  %v3173_v56 = vrot.slane %v5928_v1, 2  ;;  %v3176_v57 = vrot.slane %v5928_v1, 5 }
0x11a7   :  { %v3178_v54 = vrot.slane %v5928_v1, 7  ;;  %v3177_v29 = vrot.slane %v5928_v1, 6  ;;  %v3172_v52 = vrot.slane %v5928_v1, 1  ;;  %v3194_v25 = vadd.f32 %v5928_v1, %v4419_v51 }
0x11a8   :  { %3353 = vrot.lane.b32.xlu1 %v3175_v7, %s4172_s4  ;;  %3351 = vrot.lane.b32.xlu0 %v3174_v43, %s4172_s4  ;;  %v3188_v38 = vadd.f32 %v3173_v56, %v4374_v62  ;;  %v3191_v42 = vadd.f32 %v3176_v57, %v4389_v36  ;;  %v3190_v6 = vadd.f32 %v3175_v7, %v4382_v12  ;;  %v3578_v7 = vld [vmem:[%s6187_s11 + $0x38] sm:$0xff] }
0x11a9   :  { %3349 = vrot.lane.b32.xlu2 %v3173_v56, %s4172_s4  ;;  %v3737_v40 = vmul.f32 -1.442695, %v3194_v25  ;;  %v3189_v35 = vadd.f32 %v3174_v43, %v4378_v4  ;;  %v3193_v32 = vadd.f32 %v3178_v54, %v4409_v47  ;;  %3594 = vmatpush.msrb.mxu3 %v3578_v7 }
0x11aa   :  { %v3731_v63 = vmul.f32 -1.442695, %v3188_v38  ;;  %v3734_v10 = vmul.f32 -1.442695, %v3191_v42  ;;  %v3733_v34 = vmul.f32 -1.442695, %v3190_v6 }
0x11ab   :  { %v3732_v33 = vmul.f32 -1.442695, %v3189_v35  ;;  %v3736_v42 = vmul.f32 -1.442695, %v3193_v32 }
0x11ac   :  { %4087 = vpow2.f32 %v3731_v63 }
0x11ad   :  { %4089 = vpow2.f32 %v3734_v10 }
0x11b0   :  { %3359 = vrot.lane.b32.xlu1 %v3178_v54, %s4172_s4  ;;  %3357 = vrot.lane.b32.xlu0 %v3177_v29, %s4172_s4  ;;  %v3187_v54 = vadd.f32 %v3172_v52, %v4369_v58 }
0x11b1   :  { %3355 = vrot.lane.b32.xlu2 %v3176_v57, %s4172_s4  ;;  %v3192_v57 = vadd.f32 %v3177_v29, %v4399_v48 }
0x11b2   :  { %v4088_v21 = vpop.eup %4087 }
0x11b3   :  { %v3220_v3 = vadd.f32 1.0, %v4088_v21  ;;  %v4090_v27 = vpop.eup %4089  ;;  %v3735_v63 = vmul.f32 -1.442695, %v3192_v57  ;;  %v3577_v21 = vld [vmem:[%s6187_s11 + $0x30] sm:$0xff] }
0x11b4   :  { %v3223_v13 = vadd.f32 1.0, %v4090_v27  ;;  %3595 = vmatpush.msrb.mxu3 %v3577_v21  ;;  %v3730_v27 = vmul.f32 -1.442695, %v3187_v54 }
0x11b5   :  { %4091 = vrcp.f32 %v3220_v3  ;;  %v3253_v28 = vand.u32 2147483648, %v3220_v3  ;;  %vm3247_vm7 = vweird.f32 %v3220_v3  ;;  %v3251_v41 = vand.u32 2147483647, %v3220_v3 }
0x11b6   :  { %4093 = vrcp.f32 %v3223_v13  ;;  %v3298_v44 = vand.u32 2147483648, %v3223_v13  ;;  %vm3292_vm6 = vweird.f32 %v3223_v13  ;;  %v3296_v37 = vand.u32 2147483647, %v3223_v13 }
0x11b7   :  { %v3254_v8 = vor.u32 1.1754944e-38, %v3253_v28  ;;  %vm3252_vm10 = vcmp.eq.f32.partialorder %v3251_v41, 8.507059e+37  ;;  %4095 = vpow2.f32 %v3737_v40  ;;  %v3567_v41 = vpop.f32.mrf.mxu0 }
0x11b8   :  { %3347 = vrot.lane.b32.xlu0 %v3172_v52, %s4172_s4  ;;  %v3299_v45 = vor.u32 1.1754944e-38, %v3298_v44  ;;  %vm3297_vm9 = vcmp.eq.f32.partialorder %v3296_v37, 8.507059e+37  ;;  %4097 = vpow2.f32 %v3733_v34  ;;  %v3575_v52 = vld [vmem:[%s6187_s11 + $0x20] sm:$0xff]  ;;  %v3573_v44 = vld [vmem:[%s6187_s11 + $0x10] sm:$0xff] }
0x11b9   :  { %3361 = vrot.lane.b32.xlu2 %v5928_v1, %s4172_s4  ;;  %4099 = vpow2.f32 %v3732_v33 }
0x11bb   :  { %v4092_v18 = vpop.eup %4091 }
0x11bc   :  { %v3243_v53 = vmul.f32 %v4092_v18, %v3220_v3  ;;  %v4094_v39 = vpop.eup %4093  ;;  %vm3248_vm12 = vweird.f32 %v4092_v18 }
0x11bd   :  { %v3288_v14 = vmul.f32 %v4094_v39, %v3223_v13  ;;  %vm3293_vm11 = vweird.f32 %v4094_v39  ;;  %vm3249_vm5 = vmor %vm3247_vm7, %vm3248_vm12  ;;  %v4096_v56 = vpop.eup %4095  ;;  %v3576_v13 = vld [vmem:[%s6187_s11 + $0x28] sm:$0xff] }
0x11be   :  { %v3244_v20 = vsub.f32 1.0, %v3243_v53  ;;  %vm3294_vm8 = vmor %vm3292_vm6, %vm3293_vm11  ;;  %v5966_v38 = vadd.f32 1.0, %v4096_v56  ;;  %v4098_v1 = vpop.eup %4097  ;;  %3596 = vmatpush.msrb.mxu3 %v3576_v13 }
0x11bf   :  { %v3289_v59 = vsub.f32 1.0, %v3288_v14  ;;  %v4100_v43 = vpop.eup %4099  ;;  %v5972_v10 = vadd.f32 1.0, %v4098_v1 }
0x11c0   :  { %v3245_v24 = vmul.f32 %v4092_v18, %v3244_v20  ;;  %4101 = vrcp.f32 %v5966_v38  ;;  %v5975_v29 = vadd.f32 1.0, %v4100_v43  ;;  %3597 = vmatpush.msrb.mxu3 %v3575_v52  ;;  %v3341_v1 = vand.u32 2147483647, %v5966_v38 }
0x11c1   :  { %v3290_v61 = vmul.f32 %v4094_v39, %v3289_v59  ;;  %4103 = vpow2.f32 %v3736_v42 }
0x11c2   :  { %v3246_v30 = vadd.f32 %v4092_v18, %v3245_v24  ;;  %4105 = vpow2.f32 %v3735_v63  ;;  %v3343_v63 = vand.u32 2147483648, %v5966_v38  ;;  %vm3342_vm12 = vcmp.eq.f32.partialorder %v3341_v1, 8.507059e+37 }
0x11c3   :  { %v3291_v50 = vadd.f32 %v4094_v39, %v3290_v61  ;;  %4107 = vrcp.f32 %v5972_v10 }
0x11c4   :  { %v3250_v26 = vsel %vm3249_vm5, %v4092_v18, %v3246_v30  ;;  %4109 = vrcp.f32 %v5975_v29  ;;  %v3749_v30 = vld [vmem:[%s6186_s10] ss:$0 sm:$0xff]  ;;  %v3344_v13 = vor.u32 1.1754944e-38, %v3343_v63 }
0x11c5   :  { %v3295_v5 = vsel %vm3294_vm8, %v4094_v39, %v3291_v50  ;;  %v5951_v15 = vsel %vm3252_vm10, %v3254_v8, %v3250_v26  ;;  %v3574_v39 = vld [vmem:[%s6187_s11 + $0x18] sm:$0xff]  ;;  %4111 = vpow2.f32 %v3730_v27  ;;  %v3571_v26 = vld [vmem:[%s6187_s11] sm:$0xff]  ;;  %vm3277_vm8 = vweird.f32 %v5972_v10 }
0x11c6   :  { %v5948_v46 = vsel %vm3297_vm9, %v3299_v45, %v3295_v5  ;;  %v5958_v19 = vmul.f32 %v3476_v23, %v5951_v15  ;;  %v5980_v3 = vpop.eup %4101  ;;  %3598 = vmatpush.msrb.mxu3 %v3574_v39  ;;  %v3572_v5 = vld [vmem:[%s6187_s11 + $0x8] sm:$0xff]  ;;  %v3568_v45 = vadd.f32 %v3749_v30, %v3567_v41  ;;  %vm3262_vm9 = vweird.f32 %v5975_v29 }
0x11c7   :  { %v5955_v17 = vmul.f32 %v3479_v31, %v5948_v46  ;;  %v4104_v18 = vpop.eup %4103  ;;  %v3333_v20 = vmul.f32 %v5980_v3, %v5966_v38  ;;  %vm3338_vm4 = vweird.f32 %v5980_v3  ;;  %v3266_v41 = vand.u32 2147483647, %v5975_v29 }
0x11c8   :  { %v4106_v53 = vpop.eup %4105  ;;  %v5995_v14 = vadd.f32 1.0, %v4104_v18  ;;  %3599 = vmatpush.msrb.mxu3 %v3573_v44  ;;  %v3570_v40 = vmax.f32 %v3568_v45, 0.0  ;;  %v3268_v44 = vand.u32 2147483648, %v5975_v29 }
0x11c9   :  { %v5997_v24 = vadd.f32 1.0, %v4106_v53  ;;  %v5999_v59 = vpop.eup %4107  ;;  %v3334_v37 = vsub.f32 1.0, %v3333_v20 }
0x11ca   :  { %v6007_v28 = vpop.eup %4109  ;;  %4113 = vrcp.f32 %v5995_v14  ;;  %3600 = vmatpush.msrb.mxu3 %v3572_v5  ;;  %v3273_v31 = vmul.f32 %v5999_v59, %v5972_v10  ;;  %vm3278_vm6 = vweird.f32 %v5999_v59  ;;  %v3326_v1 = vand.u32 2147483647, %v5995_v14 }
0x11cb   :  { %4115 = vrcp.f32 %v5997_v24  ;;  %v4112_v8 = vpop.eup %4111  ;;  %v3258_v23 = vmul.f32 %v6007_v28, %v5975_v29  ;;  %v3335_v25 = vmul.f32 %v5980_v3, %v3334_v37  ;;  %vm3263_vm7 = vweird.f32 %v6007_v28  ;;  %vm6058_vm5 = vmor %vm3277_vm8, %vm3278_vm6 }
0x11cc   :  { %3601 = vmatpush.msrb.mxu3 %v3571_v26  ;;  %v6024_v6 = vadd.f32 1.0, %v4112_v8  ;;  %v3274_v33 = vsub.f32 1.0, %v3273_v31  ;;  %v3281_v37 = vand.u32 2147483647, %v5972_v10  ;;  %vm3264_vm10 = vmor %vm3262_vm9, %vm3263_vm7  ;;  %v3269_v29 = vor.u32 1.1754944e-38, %v3268_v44 }
0x11cd   :  { %3739 = vmatmul.msk.f32.vlgmr.msrb.gmra.mxu3 %vm3546_vm0, %v3570_v40  ;;  %v3259_v56 = vsub.f32 1.0, %v3258_v23  ;;  %v3336_v42 = vadd.f32 %v5980_v3, %v3335_v25  ;;  %vm3337_vm0 = vweird.f32 %v5966_v38  ;;  %vm3322_vm6 = vweird.f32 %v5995_v14 }
0x11ce   :  { %4117 = vrcp.f32 %v6024_v6  ;;  %vm3339_vm11 = vmor %vm3337_vm0, %vm3338_vm4  ;;  %v3275_v43 = vmul.f32 %v5999_v59, %v3274_v33  ;;  %vm3282_vm4 = vcmp.eq.f32.partialorder %v3281_v37, 8.507059e+37  ;;  %vm3267_vm0 = vcmp.eq.f32.partialorder %v3266_v41, 8.507059e+37  ;;  %v4144_v41 = vld [vmem:[%s6176_s0] sm:$0xff] }
0x11cf   :  { %v3260_v54 = vmul.f32 %v6007_v28, %v3259_v56  ;;  %v3340_v27 = vsel %vm3339_vm11, %v5980_v3, %v3336_v42  ;;  %v3283_v3 = vand.u32 2147483648, %v5972_v10  ;;  %v3328_v42 = vand.u32 2147483648, %v5995_v14 }
0x11d0   :  { %v6027_v35 = vpop.eup %4113  ;;  %v6048_v52 = vsel %vm3342_vm12, %v3344_v13, %v3340_v27  ;;  %v3276_v53 = vadd.f32 %v5999_v59, %v3275_v43  ;;  %v3313_v63 = vand.u32 2147483648, %v5997_v24  ;;  %vm3307_vm8 = vweird.f32 %v5997_v24 }
0x11d1   :  { %v6029_v32 = vpop.eup %4115  ;;  %v3318_v7 = vmul.f32 %v6027_v35, %v5995_v14  ;;  %v3261_v39 = vadd.f32 %v6007_v28, %v3260_v54  ;;  %v3284_v31 = vor.u32 1.1754944e-38, %v3283_v3  ;;  %vm3323_vm11 = vweird.f32 %v6027_v35 }
0x11d2   :  { %v3303_v21 = vmul.f32 %v6029_v32, %v5997_v24  ;;  %v3280_v26 = vsel %vm6058_vm5, %v5999_v59, %v3276_v53  ;;  %vm3308_vm12 = vweird.f32 %v6029_v32  ;;  %vm3324_vm7 = vmor %vm3322_vm6, %vm3323_vm11  ;;  %v3329_v27 = vor.u32 1.1754944e-38, %v3328_v42 }
0x11d3   :  { %v3319_v38 = vsub.f32 1.0, %v3318_v7  ;;  %v3265_v45 = vsel %vm3264_vm10, %v6007_v28, %v3261_v39  ;;  %v6077_v25 = vsel %vm3282_vm4, %v3284_v31, %v3280_v26  ;;  %v3311_v7 = vand.u32 2147483647, %v5997_v24  ;;  %vm3309_vm5 = vmor %vm3307_vm8, %vm3308_vm12 }
0x11d4   :  { %v3304_v20 = vsub.f32 1.0, %v3303_v21  ;;  %v3314_v13 = vor.u32 1.1754944e-38, %v3313_v63  ;;  %vm3327_vm9 = vcmp.eq.f32.partialorder %v3326_v1, 8.507059e+37  ;;  %vm133_vm6 = vcmp.ne.s32.totalorder %v4144_v41, 0 }
0x11d5   :  { %v3320_v5 = vmul.f32 %v6027_v35, %v3319_v38  ;;  %vm3312_vm10 = vcmp.eq.f32.partialorder %v3311_v7, 8.507059e+37  ;;  %v3431_v41 = vsub.f32 1.0, %v5948_v46 }
0x11d6   :  { %v3305_v8 = vmul.f32 %v6029_v32, %v3304_v20  ;;  %v3236_v20 = vand.u32 2147483647, %v6024_v6 }
0x11d7   :  { %v3321_v59 = vadd.f32 %v6027_v35, %v3320_v5  ;;  %v3639_v5 = vsel %vm133_vm6, 1.0, %v4171_v16 }
0x11d8   :  { %v3306_v56 = vadd.f32 %v6029_v32, %v3305_v8  ;;  %vm3237_vm12 = vcmp.eq.f32.partialorder %v3236_v20, 8.507059e+37 }
0x11d9   :  { %v3325_v43 = vsel %vm3324_vm7, %v6027_v35, %v3321_v59  ;;  %vm136_vm7 = vcmask 64512  }
0x11da   :  { %v3310_v54 = vsel %vm3309_vm5, %v6029_v32, %v3306_v56  ;;  %v6099_v38 = vsel %vm3327_vm9, %v3329_v27, %v3325_v43  ;;  %v3238_v32 = vand.u32 2147483648, %v6024_v6 }
0x11db   :  { %v6101_v53 = vsel %vm3312_vm10, %v3314_v13, %v3310_v54 }
0x11dc   :  { %v3239_v3 = vor.u32 1.1754944e-38, %v3238_v32 }
0x1203   :  { %v3350_v61 = vpop.permute.xlu2 %3349 }
0x1204   :  { %v3372_v50 = vmul.f32 %v3350_v61, %v5951_v15  ;;  %v6052_v61 = vpop.eup %4117 }
0x1205   :  { %v3228_v10 = vmul.f32 %v6052_v61, %v6024_v6  ;;  %vm3233_vm4 = vweird.f32 %v6052_v61 }
0x1206   :  { %3389 = vrot.lane.b32.xlu1 %v3372_v50, %s4172_s4 }
0x120b   :  { %v3356_v34 = vpop.permute.xlu2 %3355 }
0x120c   :  { %v3375_v57 = vmul.f32 %v3356_v34, %v5948_v46  ;;  %v6079_v34 = vsel %vm3267_vm0, %v3269_v29, %v3265_v45  ;;  %vm3232_vm0 = vweird.f32 %v6024_v6  ;;  %v137_v6 = vsel %vm136_vm7, %v3639_v5, 0.0 }
0x120d   :  { %vm3234_vm11 = vmor %vm3232_vm0, %vm3233_vm4  ;;  %vm6207_vm4 = vcmask 261120   ;;  %vm3529_vm0 = vcmask 523527  }
0x120e   :  { %3395 = vrot.lane.b32.xlu1 %v3375_v57, %s4172_s4  ;;  %v3229_v57 = vsub.f32 1.0, %v3228_v10 }
0x1210   :  { %v3230_v21 = vmul.f32 %v6052_v61, %v3229_v57 }
0x1212   :  { %v3231_v35 = vadd.f32 %v6052_v61, %v3230_v21 }
0x1213   :  { %v3362_v18 = vpop.permute.xlu2 %3361 }
0x1214   :  { %v3378_v30 = vmul.f32 %v3362_v18, %v6048_v52 }
0x1216   :  { %3401 = vrot.lane.b32.xlu1 %v3378_v30, %s4172_s4  ;;  %v3235_v30 = vsel %vm3234_vm11, %v6052_v61, %v3231_v35 }
0x1217   :  { %v6113_v50 = vsel %vm3237_vm12, %v3239_v3, %v3235_v30 }
0x121a   :  { %v3354_v23 = vpop.permute.xlu1 %3353  ;;  %v3352_v40 = vpop.permute.xlu0 %3351 }
0x121b   :  { %v3374_v28 = vmul.f32 %v3354_v23, %v6077_v25  ;;  %v3373_v33 = vmul.f32 %v3352_v40, %v6079_v34 }
0x121d   :  { %3391 = vrot.lane.b32.xlu2 %v3373_v33, %s4172_s4  ;;  %3393 = vrot.lane.b32.xlu0 %v3374_v28, %s4172_s4 }
0x1222   :  { %v3360_v18 = vpop.permute.xlu1 %3359  ;;  %v3358_v14 = vpop.permute.xlu0 %3357 }
0x1223   :  { %v3377_v39 = vmul.f32 %v3360_v18, %v6099_v38  ;;  %v3376_v24 = vmul.f32 %v3358_v14, %v6101_v53 }
0x1225   :  { %3397 = vrot.lane.b32.xlu2 %v3376_v24, %s4172_s4  ;;  %3399 = vrot.lane.b32.xlu0 %v3377_v39, %s4172_s4 }
0x122a   :  { %v3348_v44 = vpop.permute.xlu0 %3347 }
0x122b   :  { %v3371_v37 = vmul.f32 %v3348_v44, %v6113_v50 }
0x122d   :  { %3387 = vrot.lane.b32.xlu2 %v3371_v37, %s4172_s4 }
0x124f   :  { %138 = vadd.xlane.f32.xlu0 %v137_v6 }
0x1277   :  { %v3392_v61 = vpop.permute.xlu2 %3391 }
0x1278   :  { %v3413_v26 = vadd.f32 %v3392_v61, %v4378_v4  ;;  %v3390_v45 = vpop.permute.xlu1 %3389 }
0x1279   :  { %v3412_v8 = vadd.f32 %v3390_v45, %v4374_v62  ;;  %v3477_v45 = vrot.slane %v5848_v55, 7 }
0x127a   :  { %4119 = vtanh.f32 %v3413_v26  ;;  %v3429_v26 = vsub.f32 1.0, %v6079_v34 }
0x127b   :  { %4121 = vtanh.f32 %v3412_v8 }
0x127f   :  { %v3398_v4 = vpop.permute.xlu2 %3397 }
0x1280   :  { %v4120_v10 = vpop.eup %4119  ;;  %v3396_v31 = vpop.permute.xlu1 %3395  ;;  %v3416_v62 = vadd.f32 %v3398_v4, %v4399_v48 }
0x1281   :  { %v4122_v29 = vpop.eup %4121  ;;  %v3415_v23 = vadd.f32 %v3396_v31, %v4389_v36  ;;  %3447 = vrot.lane.b32.xlu2 %v4120_v10, %s4173_s6  ;;  %v3603_v48 = vpop.f32.mrf.mxu3  ;;  %v3492_v10 = vmul.f32 %v3477_v45, %v6079_v34  ;;  %v3428_v31 = vsub.f32 1.0, %v5951_v15 }
0x1282   :  { %3445 = vrot.lane.b32.xlu1 %v4122_v29, %s4173_s6 }
0x1283   :  { %4123 = vtanh.f32 %v3415_v23 }
0x1287   :  { %v3388_v36 = vpop.permute.xlu2 %3387 }
0x1288   :  { %v3402_v42 = vpop.permute.xlu1 %3401  ;;  %v3411_v63 = vadd.f32 %v3388_v36, %v4369_v58 }
0x1289   :  { %v4124_v40 = vpop.eup %4123  ;;  %v3418_v1 = vadd.f32 %v3402_v42, %v4419_v51 }
0x128a   :  { %3451 = vrot.lane.b32.xlu2 %v4124_v40, %s4173_s6 }
0x128f   :  { %v3394_v59 = vpop.permute.xlu0 %3393 }
0x1290   :  { %v3414_v28 = vadd.f32 %v3394_v59, %v4382_v12  ;;  %v3750_v12 = vld [vmem:[%s6188_s12] ss:$0 sm:$0xff]  ;;  %s4174_s12 = smov [#allocation2]  }
0x1291   :  { %v3604_v58 = vadd.f32 %v3750_v12, %v3603_v48  ;;  %v3480_v12 = vrot.slane %v5867_v0, 7  ;;  %v3434_v0 = vsub.f32 1.0, %v6048_v52 }
0x1292   :  { %4125 = vtanh.f32 %v3414_v28 }
0x1293   :  { %4127 = vtanh.f32 %v3416_v62  ;;  %v3606_v51 = vmax.f32 %v3604_v58, 0.0  ;;  %v3427_v62 = vsub.f32 1.0, %v6113_v50  ;;  %v3495_v58 = vmul.f32 %v3480_v12, %v6101_v53 }
0x1297   :  { %v3400_v33 = vpop.permute.xlu0 %3399 }
0x1298   :  { %v4126_v56 = vpop.eup %4125  ;;  %v3417_v57 = vadd.f32 %v3400_v33, %v4409_v47 }
0x1299   :  { %3449 = vrot.lane.b32.xlu1 %v4126_v56, %s4173_s6  ;;  %v4128_v7 = vpop.eup %4127  ;;  %v3478_v56 = vrot.slane %v5869_v2, 7  ;;  %v3432_v2 = vsub.f32 1.0, %v6101_v53 }
0x129a   :  { %4129 = vtanh.f32 %v3417_v57 }
0x129b   :  { %4131 = vtanh.f32 %v3411_v63  ;;  %v3493_v36 = vmul.f32 %v3478_v56, %v6077_v25 }
0x129c   :  { %4133 = vtanh.f32 %v3418_v1 }
0x12a0   :  { %v4130_v43 = vpop.eup %4129 }
0x12a1   :  { %3453 = vrot.lane.b32.xlu1 %v4128_v7, %s4173_s6  ;;  %3455 = vrot.lane.b32.xlu2 %v4130_v43, %s4173_s6  ;;  %v4132_v47 = vpop.eup %4131  ;;  %v3481_v7 = vrot.slane %v5889_v49, 7 }
0x12a2   :  { %v4134_v54 = vpop.eup %4133 }
0x12a9   :  { %3457 = vrot.lane.b32.xlu1 %v4134_v54, %s4173_s6  ;;  %3443 = vrot.lane.b32.xlu2 %v4132_v47, %s4173_s6  ;;  %v3496_v47 = vmul.f32 %v3481_v7, %v6099_v38 }
0x12b1   :  { %3608 = vrot.lane.b32.xlu1 %v3606_v51, %s4172_s4  ;;  %s3620_s4 = sshll.u32 %s4174_s12, 4  ;;  %s3621_s4 = int_to_ptr.vmem [resolvable:$true] %s3620_s4 }
0x12c2   :  { %v139_v21 = vpop.xlane.xlu0 %138 }
0x12c3   :  { %v245_v27 = vmax.f32 %v139_v21, 1e-09 }
0x12c5   :  { %4135 = vrcp.f32 %v245_v27  ;;  %v257_v14 = vand.u32 2147483648, %v245_v27  ;;  %vm251_vm8 = vweird.f32 %v245_v27  ;;  %v255_v24 = vand.u32 2147483647, %v245_v27 }
0x12c7   :  { %v258_v32 = vor.u32 1.1754944e-38, %v257_v14  ;;  %vm256_vm10 = vcmp.eq.f32.partialorder %v255_v24, 8.507059e+37 }
0x12cb   :  { %v4136_v13 = vpop.eup %4135 }
0x12cc   :  { %v247_v18 = vmul.f32 %v4136_v13, %v245_v27  ;;  %vm252_vm5 = vweird.f32 %v4136_v13 }
0x12cd   :  { %vm253_vm9 = vmor %vm251_vm8, %vm252_vm5 }
0x12ce   :  { %v248_v39 = vsub.f32 1.0, %v247_v18 }
0x12d0   :  { %v249_v35 = vmul.f32 %v4136_v13, %v248_v39 }
0x12d2   :  { %v250_v20 = vadd.f32 %v4136_v13, %v249_v35 }
0x12d4   :  { %v254_v30 = vsel %vm253_vm9, %v4136_v13, %v250_v20 }
0x12d5   :  { %v259_v3 = vsel %vm256_vm10, %v258_v32, %v254_v30 }
0x12d6   :  { %v260_v44 = vmul.f32 %v259_v3, %v4820_v60 }
0x12d8   :  { %262 = vst.msk [vmem:[#allocation2] sm:$0xff] %vm6207_vm4, %v260_v44 }
0x12db   :  { %v3448_v37 = vpop.permute.xlu2 %3447 }
0x12dc   :  { %v3469_v8 = vmul.f32 %v3448_v37, %v3429_v26 }
0x12de   :  { %v3500_v60 = vadd.f32 %v3492_v10, %v3469_v8 }
0x12e0   :  { %v3515_v59 = vrot.slane %v3500_v60, 6 }
0x12e4   :  { %v3452_v5 = vpop.permute.xlu2 %3451 }
0x12e5   :  { %v3471_v6 = vmul.f32 %v3452_v5, %v3431_v41 }
0x12e7   :  { %v3502_v61 = vadd.f32 %v5955_v17, %v3471_v6  ;;  %v3475_v17 = vrot.slane %v5850_v22, 7  ;;  %v3433_v22 = vsub.f32 1.0, %v6099_v38  ;;  %v3497_v38 = vmul.f32 %v6048_v52, %v3145_v9 }
0x12e9   :  { %v3490_v33 = vmul.f32 %v3475_v17, %v6113_v50  ;;  %v3519_v43 = vrot.slane %v3502_v61, 4 }
0x12f4   :  { %v3446_v29 = vpop.permute.xlu1 %3445 }
0x12f5   :  { %v3468_v23 = vmul.f32 %v3446_v29, %v3428_v31 }
0x12f7   :  { %v3499_v40 = vadd.f32 %v5958_v19, %v3468_v23  ;;  %v3430_v19 = vsub.f32 1.0, %v6077_v25 }
0x12f9   :  { %v3514_v46 = vrot.slane %v3499_v40, 7 }
0x12fb   :  { %v3516_v4 = vsel %vm205_vm13, %v3515_v59, %v3514_v46  ;;  %v3456_v28 = vpop.permute.xlu2 %3455  ;;  %vm3531_vm13 = vcmask 522496  }
0x12fc   :  { %v3473_v50 = vmul.f32 %v3456_v28, %v3433_v22 }
0x12fe   :  { %v3504_v21 = vadd.f32 %v3496_v47, %v3473_v50 }
0x1300   :  { %v3523_v49 = vrot.slane %v3504_v21, 2 }
0x1303   :  { %v3444_v55 = vpop.permute.xlu2 %3443 }
0x1304   :  { %v3467_v34 = vmul.f32 %v3444_v55, %v3427_v62 }
0x1306   :  { %v3498_v15 = vadd.f32 %v3490_v33, %v3467_v34 }
0x1308   :  { %3530 = vst.msk [vmem:[#allocation2 - $0x7] sm:$0x80] %vm3529_vm0, %v3498_v15 }
0x130b   :  { %v3450_v57 = vpop.permute.xlu1 %3449 }
0x130c   :  { %v3470_v42 = vmul.f32 %v3450_v57, %v3430_v19 }
0x130e   :  { %v3501_v63 = vadd.f32 %v3493_v36, %v3470_v42 }
0x1310   :  { %v3517_v1 = vrot.slane %v3501_v63, 5 }
0x1312   :  { %v3518_v48 = vsel %vm207_vm14, %v3517_v1, %v3516_v4  ;;  %vm3611_vm14 = vcmask 785920  }
0x1313   :  { %v3454_v54 = vpop.permute.xlu1 %3453  ;;  %v3520_v25 = vsel %vm209_vm15, %v3519_v43, %v3518_v48  ;;  %vm3613_vm15 = vcmask 1048320  }
0x1314   :  { %v3472_v51 = vmul.f32 %v3454_v54, %v3432_v2 }
0x1316   :  { %v3503_v27 = vadd.f32 %v3495_v58, %v3472_v51 }
0x1318   :  { %v3521_v13 = vrot.slane %v3503_v27, 3 }
0x131a   :  { %v3522_v18 = vsel %vm211_vm1, %v3521_v13, %v3520_v25 }
0x131b   :  { %v3458_v14 = vpop.permute.xlu1 %3457  ;;  %v3524_v39 = vsel %vm213_vm2, %v3523_v49, %v3522_v18 }
0x131c   :  { %v3474_v24 = vmul.f32 %v3458_v14, %v3434_v0 }
0x131e   :  { %v3505_v35 = vadd.f32 %v3497_v38, %v3474_v24 }
0x1320   :  { %v3525_v32 = vrot.slane %v3505_v35, 1 }
0x1322   :  { %v3526_v53 = vsel %vm215_vm3, %v3525_v32, %v3524_v39 }
0x1323   :  { %v3609_v20 = vpop.permute.xlu1 %3608  ;;  %3532 = vst.msk [vmem:[#allocation2 + $0x1] sm:$0x7f] %vm3531_vm13, %v3526_v53 }
0x1324   :  { %3612 = vst.msk [vmem:[#allocation2] sm:$0xff] %vm3611_vm14, %v3609_v20 }
0x1325   :  { %3614 = vst.msk [vmem:[#allocation2] sm:$0xff] %vm3613_vm15, %v4171_v16 }
0x1326   :  { %3625 = dma.vmem_to_hbm [thread:$0]  %s3621_s4, 128, %s3623_s28, [#allocation3]  }
0x1327   :  { %4169 = dma.done.wait [#allocation3], 128  }
0x1328   :  { %4170 = vsyncadd [#allocation3], 4294967168 }
0x1329   :  { %3630 = vsyncpa [#allocation3], 1 }

// kernel: tpu_custom_call.1
= control target key start
LH: loop header
LB: loop body
LE: loop exit
PB: predicated region body
PF: predicated region fallthrough
CT: control target
= control target key end

     0   :  { %v51_v0 = vlaneseq  ;;  %vm221_vm0 = vcmask 1040384   ;;  %s6176_s0 = inlined_call_operand.vmem [shape: s32[8,8], index: 0, kind: input, shape index: {}]   ;;  %s6177_s1 = inlined_call_operand.vmem [shape: f32[33,32], index: 1, kind: input, shape index: {}]   ;;  %s6178_s2 = inlined_call_operand.vmem [shape: s32[8,8], index: 2, kind: input, shape index: {}]   ;;  %s6179_s3 = inlined_call_operand.vmem [shape: f32[17,16], index: 3, kind: input, shape index: {}]   ;;  %s6180_s4 = inlined_call_operand.vmem [shape: f32[16,96], index: 4, kind: input, shape index: {}]   ;;  %s6181_s5 = inlined_call_operand.vmem [shape: f32[32,96], index: 5, kind: input, shape index: {}]   ;;  %s6182_s6 = inlined_call_operand.vmem [shape: f32[1,96], index: 6, kind: input, shape index: {}]   ;;  %s6183_s7 = inlined_call_operand.vmem [shape: f32[1,96], index: 7, kind: input, shape index: {}]   ;;  %s6184_s8 = inlined_call_operand.vmem [shape: f32[8,64], index: 8, kind: input, shape index: {}]   ;;  %s6185_s9 = inlined_call_operand.vmem [shape: f32[64,64], index: 9, kind: input, shape index: {}]   ;;  %s6186_s10 = inlined_call_operand.vmem [shape: f32[1,64], index: 10, kind: input, shape index: {}]   ;;  %s6187_s11 = inlined_call_operand.vmem [shape: f32[64,32], index: 11, kind: input, shape index: {}]   ;;  %s6188_s12 = inlined_call_operand.vmem [shape: f32[1,32], index: 12, kind: input, shape index: {}]   ;;  %s6189_s13 = inlined_call_operand.hbm [shape: f32[8,128], index: 13, kind: output, shape index: {}]  }
   0x1   :  { %v266_v1 = vld [vmem:[%s6179_s3 + $0x10] sm:$0x1]  ;;  %v265_v2 = vld [vmem:[%s6179_s3 + $0x8] sm:$0xff] }
   0x2   :  { %3650 = vmatpush.msk.msra.mxu1 %vm221_vm0, %v266_v1  ;;  %v55_v3 = vshrl.u32 %v51_v0, 7 }
   0x4   :  { %389 = vmatpush.msra.mxu1 %v265_v2  ;;  %3745 = vset.pattern.permute.xlu1 %v55_v3 }
   0x5   :  { %3744 = vset.pattern.permute.xlu0 %v55_v3 }
   0x6   :  { %18 = vsyncpa [#allocation3], 0  ;;  %v263_v4 = vld [vmem:[%s6178_s2] sm:$0xff]  ;;  %3746 = vset.pattern.permute.xlu2 %v55_v3  ;;  %v4258_v14 = vand.u32 127, %v51_v0  ;;  %vm347_vm1 = vcmask 138240   ;;  %v4171_v16 = vmov 0.0  }
   0x7   :  { %v281_v5 = vperm.slane %v263_v4, 2  ;;  %v267_v6 = vperm.slane %v263_v4, 0  ;;  %v295_v7 = vperm.slane %v263_v4, 4  ;;  %v288_v8 = vperm.slane %v263_v4, 3  ;;  %v264_v13 = vld [vmem:[%s6179_s3] sm:$0xff]  ;;  %v4266_v18 = vld [vmem:[%s6181_s5 + $0x18] sm:$0xff] }
   0x8   :  { %v274_v9 = vperm.slane %v263_v4, 1  ;;  %v302_v10 = vperm.slane %v263_v4, 5  ;;  %v316_v11 = vperm.slane %v263_v4, 7  ;;  %v309_v12 = vperm.slane %v263_v4, 6  ;;  %390 = vmatpush.msra.mxu1 %v264_v13  ;;  %v4271_v19 = vld [vmem:[%s6181_s5 + $0x10] sm:$0xff]  ;;  %511 = vmatpush.msra.mxu3 %v4266_v18  ;;  %v4277_v20 = vld [vmem:[%s6181_s5 + $0x8] sm:$0xff] }
   0x9   :  { %v4286_v23 = vld [vmem:[%s6181_s5] sm:$0xff]  ;;  %v417_v29 = vld [vmem:[%s6180_s4 + $0x8] sm:$0xff]  ;;  %vm422_vm10 = vcmask 130048   ;;  %s3622_s28 = sshll.u32 %s6189_s13, 4  ;;  %s3623_s28 = int_to_ptr.hbm [resolvable:$true] %s3622_s28 }
   0xa   :  { %512 = vmatpush.msra.mxu3 %v4271_v19  ;;  %461 = vmatpush.msra.mxu2 %v417_v29  ;;  %v416_v37 = vld [vmem:[%s6180_s4] sm:$0xff]  ;;  %s4172_s4 = smov 64  }
   0xb   :  { %v4328_v40 = vld [vmem:[%s6183_s7] ss:$0 sm:$0xff] }
   0xc   :  { %286 = vperm.xlu1 %3745, %v281_v5   ;;  %513 = vmatpush.msra.mxu3 %v4277_v20  ;;  %v4366_v56 = vld [vmem:[%s6182_s6] ss:$0 sm:$0xff]  ;;  %s4173_s6 = smov 96  }
   0xd   :  { %272 = vperm.xlu0 %3744, %v267_v6   ;;  %462 = vmatpush.msra.mxu2 %v416_v37 }
   0xe   :  { %300 = vperm.xlu2 %3746, %v295_v7   ;;  %514 = vmatpush.msra.mxu3 %v4286_v23 }
   0xf   :  { %515 = vmatmul.f32.vlgmr.msra.gmra.mxu3 %v4171_v16 }
  0x10   :  { %877 = vmatpush.msrb.mxu3 %v4266_v18 }
  0x12   :  { %878 = vmatpush.msrb.mxu3 %v4271_v19 }
  0x14   :  { %293 = vperm.xlu1 %3745, %v288_v8   ;;  %879 = vmatpush.msrb.mxu3 %v4277_v20 }
  0x15   :  { %279 = vperm.xlu0 %3744, %v274_v9  }
  0x16   :  { %307 = vperm.xlu2 %3746, %v302_v10   ;;  %880 = vmatpush.msrb.mxu3 %v4286_v23 }
  0x18   :  { %1639 = vmatpush.msra.mxu3 %v4266_v18 }
  0x1a   :  { %1640 = vmatpush.msra.mxu3 %v4271_v19 }
  0x1c   :  { %321 = vperm.xlu1 %3745, %v316_v11   ;;  %1641 = vmatpush.msra.mxu3 %v4277_v20 }
  0x1d   :  { %314 = vperm.xlu0 %3744, %v309_v12  }
  0x1e   :  { %1642 = vmatpush.msra.mxu3 %v4286_v23 }
  0x68   :  { %v301_v27 = vpop.permute.xlu2 %300 }
  0x69   :  { %vm327_vm6 = vcmp.eq.s32.totalorder %v301_v27, %v4258_v14 }
  0x6a   :  { %v3646_v30 = vsel %vm327_vm6, 1.0, %v4171_v16 }
  0x70   :  { %v308_v31 = vpop.permute.xlu2 %307 }
  0x71   :  { %vm328_vm7 = vcmp.eq.s32.totalorder %v308_v31, %v4258_v14 }
  0x72   :  { %v3647_v32 = vsel %vm328_vm7, 1.0, %v4171_v16 }
  0x7e   :  { %v287_v24 = vpop.permute.xlu1 %286 }
  0x7f   :  { %v273_v15 = vpop.permute.xlu0 %272  ;;  %vm325_vm4 = vcmp.eq.s32.totalorder %v287_v24, %v4258_v14 }
  0x80   :  { %vm323_vm2 = vcmp.eq.s32.totalorder %v273_v15, %v4258_v14  ;;  %v3644_v25 = vsel %vm325_vm4, 1.0, %v4171_v16 }
  0x81   :  { %v3642_v17 = vsel %vm323_vm2, 1.0, %v4171_v16 }
  0x82   :  { %3651 = vmatmul.msk.f32.vlgmr.msra.gmra.mxu1 %vm347_vm1, %v3642_v17 }
  0x86   :  { %v294_v26 = vpop.permute.xlu1 %293 }
  0x87   :  { %v280_v21 = vpop.permute.xlu0 %279  ;;  %vm326_vm5 = vcmp.eq.s32.totalorder %v294_v26, %v4258_v14 }
  0x88   :  { %vm324_vm3 = vcmp.eq.s32.totalorder %v280_v21, %v4258_v14  ;;  %v3645_v28 = vsel %vm326_vm5, 1.0, %v4171_v16 }
  0x89   :  { %v3643_v22 = vsel %vm324_vm3, 1.0, %v4171_v16 }
  0x8a   :  { %3652 = vmatmul.msk.f32.gmra.mxu1 %vm347_vm1, %v3643_v22 }
  0x8e   :  { %v322_v35 = vpop.permute.xlu1 %321 }
  0x8f   :  { %v315_v33 = vpop.permute.xlu0 %314  ;;  %vm330_vm9 = vcmp.eq.s32.totalorder %v322_v35, %v4258_v14 }
  0x90   :  { %vm329_vm8 = vcmp.eq.s32.totalorder %v315_v33, %v4258_v14  ;;  %v3649_v36 = vsel %vm330_vm9, 1.0, %v4171_v16 }
  0x91   :  { %v3648_v34 = vsel %vm329_vm8, 1.0, %v4171_v16 }
  0x92   :  { %3653 = vmatmul.msk.f32.gmra.mxu1 %vm347_vm1, %v3644_v25  ;;  %v516_v41 = vpop.f32.mrf.mxu3 }
  0x93   :  { %v4331_v43 = vadd.f32 %v4328_v40, %v516_v41 }
  0x95   :  { %695 = vrot.lane.b32.xlu1 %v4331_v43, %s4172_s4  ;;  %v521_v45 = vrot.slane %v4331_v43, 2  ;;  %v520_v46 = vrot.slane %v4331_v43, 1  ;;  %v524_v47 = vrot.slane %v4331_v43, 5  ;;  %v523_v48 = vrot.slane %v4331_v43, 4 }
  0x96   :  { %v522_v49 = vrot.slane %v4331_v43, 3  ;;  %v525_v51 = vrot.slane %v4331_v43, 6  ;;  %v526_v52 = vrot.slane %v4331_v43, 7 }
  0x97   :  { %699 = vrot.lane.b32.xlu0 %v521_v45, %s4172_s4  ;;  %697 = vrot.lane.b32.xlu2 %v520_v46, %s4172_s4 }
  0x9a   :  { %3654 = vmatmul.msk.f32.gmra.mxu1 %vm347_vm1, %v3645_v28 }
  0x9d   :  { %705 = vrot.lane.b32.xlu1 %v524_v47, %s4172_s4 }
  0x9f   :  { %703 = vrot.lane.b32.xlu0 %v523_v48, %s4172_s4  ;;  %701 = vrot.lane.b32.xlu2 %v522_v49, %s4172_s4 }
  0xa2   :  { %3655 = vmatmul.msk.f32.gmra.mxu1 %vm347_vm1, %v3646_v30 }
  0xa7   :  { %707 = vrot.lane.b32.xlu2 %v525_v51, %s4172_s4  ;;  %709 = vrot.lane.b32.xlu0 %v526_v52, %s4172_s4 }
  0xaa   :  { %3656 = vmatmul.msk.f32.gmra.mxu1 %vm347_vm1, %v3647_v32 }
  0xb2   :  { %3657 = vmatmul.msk.f32.gmra.mxu1 %vm347_vm1, %v3648_v34 }
  0xba   :  { %3658 = vmatmul.msk.f32.gmra.mxu1 %vm347_vm1, %v3649_v36 }
  0xff   :  { %v392_v38 = vpop.f32.mrf.mxu1 }
 0x100   :  { %3659 = vmatmul.msk.f32.vlgmr.msra.gmra.mxu2 %vm422_vm10, %v392_v38 }
 0x107   :  { %v395_v39 = vpop.f32.mrf.mxu1  ;;  %v696_v28 = vpop.permute.xlu1 %695 }
 0x108   :  { %3660 = vmatmul.msk.f32.gmra.mxu2 %vm422_vm10, %v395_v39 }
 0x10f   :  { %v398_v42 = vpop.f32.mrf.mxu1 }
 0x110   :  { %3661 = vmatmul.msk.f32.gmra.mxu2 %vm422_vm10, %v398_v42 }
 0x117   :  { %v401_v44 = vpop.f32.mrf.mxu1 }
 0x118   :  { %3662 = vmatmul.msk.f32.gmra.mxu2 %vm422_vm10, %v401_v44 }
 0x11f   :  { %v404_v50 = vpop.f32.mrf.mxu1 }
 0x120   :  { %3663 = vmatmul.msk.f32.gmra.mxu2 %vm422_vm10, %v404_v50  ;;  %v698_v50 = vpop.permute.xlu2 %697 }
 0x127   :  { %v407_v53 = vpop.f32.mrf.mxu1 }
 0x128   :  { %3664 = vmatmul.msk.f32.gmra.mxu2 %vm422_vm10, %v407_v53 }
 0x12f   :  { %v410_v54 = vpop.f32.mrf.mxu1 }
 0x130   :  { %3665 = vmatmul.msk.f32.gmra.mxu2 %vm422_vm10, %v410_v54 }
 0x137   :  { %v413_v55 = vpop.f32.mrf.mxu1 }
 0x138   :  { %3666 = vmatmul.msk.f32.gmra.mxu2 %vm422_vm10, %v413_v55 }
 0x183   :  { %v464_v57 = vpop.f32.mrf.mxu2 }
 0x184   :  { %v4369_v58 = vadd.f32 %v4366_v56, %v464_v57 }
 0x186   :  { %v535_v59 = vadd.f32 %v4331_v43, %v4369_v58 }
 0x188   :  { %v3667_v60 = vmul.f32 -1.442695, %v535_v59 }
 0x18a   :  { %3751 = vpow2.f32 %v3667_v60 }
 0x18b   :  { %v467_v61 = vpop.f32.mrf.mxu2 }
 0x18c   :  { %v4374_v62 = vadd.f32 %v4366_v56, %v467_v61 }
 0x18e   :  { %v536_v63 = vadd.f32 %v520_v46, %v4374_v62 }
 0x190   :  { %v3752_v0 = vpop.eup %3751  ;;  %v3668_v1 = vmul.f32 -1.442695, %v536_v63 }
 0x191   :  { %v567_v2 = vadd.f32 1.0, %v3752_v0 }
 0x192   :  { %3753 = vpow2.f32 %v3668_v1 }
 0x193   :  { %v470_v3 = vpop.f32.mrf.mxu2  ;;  %3755 = vrcp.f32 %v567_v2  ;;  %v586_v15 = vand.u32 2147483648, %v567_v2  ;;  %v584_v21 = vand.u32 2147483647, %v567_v2  ;;  %vm580_vm12 = vweird.f32 %v567_v2 }
 0x194   :  { %v4378_v4 = vadd.f32 %v4366_v56, %v470_v3 }
 0x195   :  { %v587_v29 = vor.u32 1.1754944e-38, %v586_v15  ;;  %vm585_vm14 = vcmp.eq.f32.partialorder %v584_v21, 8.507059e+37 }
 0x196   :  { %v537_v5 = vadd.f32 %v521_v45, %v4378_v4 }
 0x198   :  { %v3754_v6 = vpop.eup %3753  ;;  %v3669_v7 = vmul.f32 -1.442695, %v537_v5 }
 0x199   :  { %v3756_v8 = vpop.eup %3755  ;;  %v568_v9 = vadd.f32 1.0, %v3754_v6 }
 0x19a   :  { %v576_v10 = vmul.f32 %v3756_v8, %v567_v2  ;;  %3757 = vpow2.f32 %v3669_v7  ;;  %vm581_vm11 = vweird.f32 %v3756_v8 }
 0x19b   :  { %v473_v11 = vpop.f32.mrf.mxu2  ;;  %3759 = vrcp.f32 %v568_v9  ;;  %vm582_vm13 = vmor %vm580_vm12, %vm581_vm11  ;;  %v601_v38 = vand.u32 2147483648, %v568_v9  ;;  %v599_v41 = vand.u32 2147483647, %v568_v9  ;;  %vm595_vm1 = vweird.f32 %v568_v9 }
 0x19c   :  { %v4382_v12 = vadd.f32 %v4366_v56, %v473_v11  ;;  %v577_v13 = vsub.f32 1.0, %v576_v10 }
 0x19d   :  { %v602_v53 = vor.u32 1.1754944e-38, %v601_v38  ;;  %vm600_vm3 = vcmp.eq.f32.partialorder %v599_v41, 8.507059e+37 }
 0x19e   :  { %v578_v17 = vmul.f32 %v3756_v8, %v577_v13  ;;  %v538_v22 = vadd.f32 %v522_v49, %v4382_v12 }
 0x1a0   :  { %v3758_v24 = vpop.eup %3757  ;;  %v579_v25 = vadd.f32 %v3756_v8, %v578_v17  ;;  %v3670_v26 = vmul.f32 -1.442695, %v538_v22 }
 0x1a1   :  { %v3760_v27 = vpop.eup %3759  ;;  %v569_v30 = vadd.f32 1.0, %v3758_v24 }
 0x1a2   :  { %v583_v31 = vsel %vm582_vm13, %v3756_v8, %v579_v25  ;;  %v591_v32 = vmul.f32 %v3760_v27, %v568_v9  ;;  %3761 = vpow2.f32 %v3670_v26  ;;  %vm596_vm15 = vweird.f32 %v3760_v27  ;;  %v700_v9 = vpop.permute.xlu0 %699 }
 0x1a3   :  { %v4385_v33 = vsel %vm585_vm14, %v587_v29, %v583_v31  ;;  %v476_v34 = vpop.f32.mrf.mxu2  ;;  %3763 = vrcp.f32 %v569_v30  ;;  %vm597_vm2 = vmor %vm595_vm1, %vm596_vm15  ;;  %v616_v0 = vand.u32 2147483648, %v569_v30  ;;  %v614_v2 = vand.u32 2147483647, %v569_v30 }
 0x1a4   :  { %v719_v35 = vmul.f32 %v696_v28, %v4385_v33  ;;  %v4389_v36 = vadd.f32 %v4366_v56, %v476_v34  ;;  %v592_v37 = vsub.f32 1.0, %v591_v32  ;;  %vm610_vm5 = vweird.f32 %v569_v30  ;;  %v702_v34 = vpop.permute.xlu2 %701 }
 0x1a5   :  { %v617_v10 = vor.u32 1.1754944e-38, %v616_v0  ;;  %vm615_vm7 = vcmp.eq.f32.partialorder %v614_v2, 8.507059e+37 }
 0x1a6   :  { %735 = vrot.lane.b32.xlu0 %v719_v35, %s4172_s4  ;;  %v593_v39 = vmul.f32 %v3760_v27, %v592_v37  ;;  %v539_v42 = vadd.f32 %v523_v48, %v4389_v36 }
 0x1a8   :  { %v3762_v44 = vpop.eup %3761  ;;  %v594_v45 = vadd.f32 %v3760_v27, %v593_v39  ;;  %v3671_v46 = vmul.f32 -1.442695, %v539_v42 }
 0x1a9   :  { %v3764_v49 = vpop.eup %3763  ;;  %v570_v54 = vadd.f32 1.0, %v3762_v44 }
 0x1aa   :  { %v598_v55 = vsel %vm597_vm2, %v3760_v27, %v594_v45  ;;  %v606_v57 = vmul.f32 %v3764_v49, %v569_v30  ;;  %3765 = vpow2.f32 %v3671_v46  ;;  %vm611_vm4 = vweird.f32 %v3764_v49 }
 0x1ab   :  { %v4395_v59 = vsel %vm600_vm3, %v602_v53, %v598_v55  ;;  %v479_v60 = vpop.f32.mrf.mxu2  ;;  %3767 = vrcp.f32 %v570_v54  ;;  %vm612_vm6 = vmor %vm610_vm5, %vm611_vm4  ;;  %v631_v25 = vand.u32 2147483648, %v570_v54  ;;  %v629_v27 = vand.u32 2147483647, %v570_v54 }
 0x1ac   :  { %v720_v61 = vmul.f32 %v698_v50, %v4395_v59  ;;  %v4399_v48 = vadd.f32 %v4366_v56, %v479_v60  ;;  %v607_v63 = vsub.f32 1.0, %v606_v57  ;;  %vm625_vm9 = vweird.f32 %v570_v54 }
 0x1ad   :  { %v632_v35 = vor.u32 1.1754944e-38, %v631_v25  ;;  %vm630_vm11 = vcmp.eq.f32.partialorder %v629_v27, 8.507059e+37 }
 0x1ae   :  { %737 = vrot.lane.b32.xlu1 %v720_v61, %s4172_s4  ;;  %v608_v1 = vmul.f32 %v3764_v49, %v607_v63  ;;  %v540_v3 = vadd.f32 %v524_v47, %v4399_v48 }
 0x1b0   :  { %v3766_v5 = vpop.eup %3765  ;;  %v609_v6 = vadd.f32 %v3764_v49, %v608_v1  ;;  %v3672_v7 = vmul.f32 -1.442695, %v540_v3 }
 0x1b1   :  { %v3768_v8 = vpop.eup %3767  ;;  %v571_v11 = vadd.f32 1.0, %v3766_v5 }
 0x1b2   :  { %v613_v13 = vsel %vm612_vm6, %v3764_v49, %v609_v6  ;;  %v621_v15 = vmul.f32 %v3768_v8, %v570_v54  ;;  %3769 = vpow2.f32 %v3672_v7  ;;  %vm626_vm8 = vweird.f32 %v3768_v8 }
 0x1b3   :  { %v4405_v17 = vsel %vm615_vm7, %v617_v10, %v613_v13  ;;  %v482_v21 = vpop.f32.mrf.mxu2  ;;  %3771 = vrcp.f32 %v571_v11  ;;  %vm627_vm10 = vmor %vm625_vm9, %vm626_vm8  ;;  %v646_v49 = vand.u32 2147483648, %v571_v11  ;;  %v644_v53 = vand.u32 2147483647, %v571_v11  ;;  %v706_v10 = vpop.permute.xlu1 %705 }
 0x1b4   :  { %v721_v22 = vmul.f32 %v700_v9, %v4405_v17  ;;  %v4409_v47 = vadd.f32 %v4366_v56, %v482_v21  ;;  %v622_v24 = vsub.f32 1.0, %v621_v15  ;;  %vm640_vm13 = vweird.f32 %v571_v11 }
 0x1b5   :  { %v647_v0 = vor.u32 1.1754944e-38, %v646_v49  ;;  %vm645_vm15 = vcmp.eq.f32.partialorder %v644_v53, 8.507059e+37 }
 0x1b6   :  { %739 = vrot.lane.b32.xlu2 %v721_v22, %s4172_s4  ;;  %v623_v26 = vmul.f32 %v3768_v8, %v622_v24  ;;  %v541_v28 = vadd.f32 %v525_v51, %v4409_v47 }
 0x1b8   :  { %v3770_v29 = vpop.eup %3769  ;;  %v624_v30 = vadd.f32 %v3768_v8, %v623_v26  ;;  %v3673_v31 = vmul.f32 -1.442695, %v541_v28 }
 0x1b9   :  { %v3772_v32 = vpop.eup %3771  ;;  %v572_v37 = vadd.f32 1.0, %v3770_v29 }
 0x1ba   :  { %v628_v38 = vsel %vm627_vm10, %v3768_v8, %v624_v30  ;;  %3773 = vpow2.f32 %v3673_v31  ;;  %v636_v39 = vmul.f32 %v3772_v32, %v571_v11  ;;  %vm641_vm12 = vweird.f32 %v3772_v32 }
 0x1bb   :  { %v4415_v41 = vsel %vm630_vm11, %v632_v35, %v628_v38  ;;  %v485_v42 = vpop.f32.mrf.mxu2  ;;  %3775 = vrcp.f32 %v572_v37  ;;  %vm642_vm14 = vmor %vm640_vm13, %vm641_vm12  ;;  %v659_v6 = vand.u32 2147483647, %v572_v37  ;;  %vm655_vm2 = vweird.f32 %v572_v37  ;;  %v708_v35 = vpop.permute.xlu2 %707 }
 0x1bc   :  { %v722_v44 = vmul.f32 %v702_v34, %v4415_v41  ;;  %v4419_v51 = vadd.f32 %v4366_v56, %v485_v42  ;;  %v637_v45 = vsub.f32 1.0, %v636_v39  ;;  %v704_v56 = vpop.permute.xlu0 %703  ;;  %vm205_vm13 = vcmask 1041409  }
 0x1bd   :  { %vm660_vm4 = vcmp.eq.f32.partialorder %v659_v6, 8.507059e+37 }
 0x1be   :  { %741 = vrot.lane.b32.xlu1 %v722_v44, %s4172_s4  ;;  %v638_v46 = vmul.f32 %v3772_v32, %v637_v45  ;;  %v542_v50 = vadd.f32 %v526_v52, %v4419_v51  ;;  %v661_v52 = vand.u32 2147483648, %v572_v37 }
 0x1c0   :  { %v3774_v54 = vpop.eup %3773  ;;  %v639_v55 = vadd.f32 %v3772_v32, %v638_v46  ;;  %v3674_v57 = vmul.f32 -1.442695, %v542_v50  ;;  %v662_v11 = vor.u32 1.1754944e-38, %v661_v52 }
 0x1c1   :  { %v3776_v60 = vpop.eup %3775  ;;  %v573_v61 = vadd.f32 1.0, %v3774_v54 }
 0x1c2   :  { %v643_v63 = vsel %vm642_vm14, %v3772_v32, %v639_v55  ;;  %v651_v1 = vmul.f32 %v3776_v60, %v572_v37  ;;  %3777 = vpow2.f32 %v3674_v57  ;;  %vm656_vm1 = vweird.f32 %v3776_v60 }
 0x1c3   :  { %3779 = vrcp.f32 %v573_v61  ;;  %v4425_v2 = vsel %vm645_vm15, %v647_v0, %v643_v63  ;;  %vm657_vm3 = vmor %vm655_vm2, %vm656_vm1  ;;  %v676_v26 = vand.u32 2147483648, %v573_v61  ;;  %v674_v28 = vand.u32 2147483647, %v573_v61 }
 0x1c4   :  { %v652_v3 = vsub.f32 1.0, %v651_v1  ;;  %v723_v43 = vmul.f32 %v704_v56, %v4425_v2  ;;  %vm670_vm6 = vweird.f32 %v573_v61  ;;  %v710_v49 = vpop.permute.xlu0 %709  ;;  %vm207_vm14 = vcmask 1042434  }
 0x1c5   :  { %v677_v31 = vor.u32 1.1754944e-38, %v676_v26  ;;  %vm675_vm8 = vcmp.eq.f32.partialorder %v674_v28, 8.507059e+37  ;;  %vm209_vm15 = vcmask 1043459   ;;  %vm211_vm1 = vcmask 1044484  }
 0x1c6   :  { %v653_v5 = vmul.f32 %v3776_v60, %v652_v3  ;;  %743 = vrot.lane.b32.xlu2 %v723_v43, %s4172_s4  ;;  %vm213_vm2 = vcmask 1045509  }
 0x1c8   :  { %v3778_v7 = vpop.eup %3777  ;;  %v654_v8 = vadd.f32 %v3776_v60, %v653_v5 }
 0x1c9   :  { %v3780_v9 = vpop.eup %3779  ;;  %v574_v13 = vadd.f32 1.0, %v3778_v7 }
 0x1ca   :  { %v666_v15 = vmul.f32 %v3780_v9, %v573_v61  ;;  %v658_v21 = vsel %vm657_vm3, %v3776_v60, %v654_v8  ;;  %vm671_vm5 = vweird.f32 %v3780_v9  ;;  %vm215_vm3 = vcmask 1046534  }
 0x1cb   :  { %v4429_v22 = vsel %vm660_vm4, %v662_v11, %v658_v21  ;;  %3781 = vrcp.f32 %v574_v13  ;;  %vm672_vm7 = vmor %vm670_vm6, %vm671_vm5  ;;  %v691_v42 = vand.u32 2147483648, %v574_v13  ;;  %v689_v45 = vand.u32 2147483647, %v574_v13 }
 0x1cc   :  { %v667_v24 = vsub.f32 1.0, %v666_v15  ;;  %v724_v25 = vmul.f32 %v706_v10, %v4429_v22  ;;  %vm685_vm10 = vweird.f32 %v574_v13  ;;  %vm217_vm4 = vcmask 1047559  }
 0x1cd   :  { %v692_v50 = vor.u32 1.1754944e-38, %v691_v42  ;;  %vm690_vm12 = vcmp.eq.f32.partialorder %v689_v45, 8.507059e+37  ;;  %v824_v42 = vmul.f32 0.0, %v4395_v59  ;;  %vm6190_vm5 = vcmask 261120  }
 0x1ce   :  { %v668_v27 = vmul.f32 %v3780_v9, %v667_v24  ;;  %745 = vrot.lane.b32.xlu0 %v724_v25, %s4172_s4 }
 0x1d0   :  { %v669_v29 = vadd.f32 %v3780_v9, %v668_v27 }
 0x1d1   :  { %v3782_v30 = vpop.eup %3781 }
 0x1d2   :  { %v673_v32 = vsel %vm672_vm7, %v3780_v9, %v669_v29  ;;  %v681_v34 = vmul.f32 %v3782_v30, %v574_v13  ;;  %vm686_vm9 = vweird.f32 %v3782_v30  ;;  %v777_v29 = vsub.f32 1.0, %v4405_v17 }
 0x1d3   :  { %v4433_v37 = vsel %vm675_vm8, %v677_v31, %v673_v32  ;;  %vm687_vm11 = vmor %vm685_vm10, %vm686_vm9  ;;  %v775_v32 = vsub.f32 1.0, %v4385_v33 }
 0x1d4   :  { %v725_v38 = vmul.f32 %v708_v35, %v4433_v37  ;;  %v682_v39 = vsub.f32 1.0, %v681_v34  ;;  %v776_v34 = vsub.f32 1.0, %v4395_v59  ;;  %v825_v35 = vmul.f32 0.0, %v4405_v17 }
 0x1d6   :  { %747 = vrot.lane.b32.xlu1 %v725_v38, %s4172_s4  ;;  %v683_v44 = vmul.f32 %v3782_v30, %v682_v39 }
 0x1d8   :  { %v684_v46 = vadd.f32 %v3782_v30, %v683_v44 }
 0x1da   :  { %v688_v53 = vsel %vm687_vm11, %v3782_v30, %v684_v46  ;;  %v823_v46 = vmul.f32 0.0, %v4385_v33  ;;  %v779_v33 = vsub.f32 1.0, %v4425_v2 }
 0x1db   :  { %v4437_v54 = vsel %vm690_vm12, %v692_v50, %v688_v53 }
 0x1dc   :  { %v726_v55 = vmul.f32 %v710_v49, %v4437_v54 }
 0x1de   :  { %749 = vrot.lane.b32.xlu2 %v726_v55, %s4172_s4 }
 0x210   :  { %v740_v57 = vpop.permute.xlu2 %739 }
 0x211   :  { %v761_v60 = vadd.f32 %v740_v57, %v4378_v4 }
 0x213   :  { %3783 = vtanh.f32 %v761_v60 }
 0x218   :  { %v736_v61 = vpop.permute.xlu0 %735 }
 0x219   :  { %v3784_v56 = vpop.eup %3783  ;;  %v759_v63 = vadd.f32 %v736_v61, %v4369_v58  ;;  %v780_v61 = vsub.f32 1.0, %v4429_v22 }
 0x21a   :  { %795 = vrot.lane.b32.xlu1 %v3784_v56, %s4173_s6 }
 0x21b   :  { %3785 = vtanh.f32 %v759_v63 }
 0x220   :  { %v738_v0 = vpop.permute.xlu1 %737  ;;  %v744_v43 = vpop.permute.xlu2 %743 }
 0x221   :  { %v3786_v1 = vpop.eup %3785  ;;  %v760_v3 = vadd.f32 %v738_v0, %v4374_v62  ;;  %v763_v52 = vadd.f32 %v744_v43, %v4389_v36  ;;  %v778_v0 = vsub.f32 1.0, %v4415_v41  ;;  %v828_v43 = vmul.f32 0.0, %v4429_v22 }
 0x222   :  { %791 = vrot.lane.b32.xlu2 %v3786_v1, %s4173_s6  ;;  %v827_v1 = vmul.f32 0.0, %v4425_v2 }
 0x223   :  { %3787 = vtanh.f32 %v760_v3 }
 0x224   :  { %3789 = vtanh.f32 %v763_v52  ;;  %v826_v52 = vmul.f32 0.0, %v4415_v41 }
 0x229   :  { %v3788_v5 = vpop.eup %3787 }
 0x22a   :  { %v3790_v6 = vpop.eup %3789  ;;  %793 = vrot.lane.b32.xlu0 %v3788_v5, %s4173_s6 }
 0x22b   :  { %799 = vrot.lane.b32.xlu1 %v3790_v6, %s4173_s6 }
 0x230   :  { %v742_v7 = vpop.permute.xlu1 %741 }
 0x231   :  { %v762_v8 = vadd.f32 %v742_v7, %v4382_v12 }
 0x233   :  { %3791 = vtanh.f32 %v762_v8 }
 0x238   :  { %v750_v9 = vpop.permute.xlu2 %749 }
 0x239   :  { %v3792_v10 = vpop.eup %3791  ;;  %v766_v11 = vadd.f32 %v750_v9, %v4419_v51 }
 0x23a   :  { %797 = vrot.lane.b32.xlu0 %v3792_v10, %s4173_s6 }
 0x23b   :  { %3793 = vtanh.f32 %v766_v11 }
 0x240   :  { %v746_v13 = vpop.permute.xlu0 %745 }
 0x241   :  { %v3794_v15 = vpop.eup %3793  ;;  %v764_v21 = vadd.f32 %v746_v13, %v4399_v48 }
 0x242   :  { %805 = vrot.lane.b32.xlu1 %v3794_v15, %s4173_s6  ;;  %v782_v15 = vsub.f32 1.0, %v4437_v54 }
 0x243   :  { %3795 = vtanh.f32 %v764_v21 }
 0x248   :  { %v748_v24 = vpop.permute.xlu1 %747 }
 0x249   :  { %v3796_v25 = vpop.eup %3795  ;;  %v765_v26 = vadd.f32 %v748_v24, %v4409_v47  ;;  %v781_v24 = vsub.f32 1.0, %v4433_v37 }
 0x24a   :  { %801 = vrot.lane.b32.xlu2 %v3796_v25, %s4173_s6  ;;  %v830_v25 = vmul.f32 0.0, %v4437_v54 }
 0x24b   :  { %3797 = vtanh.f32 %v765_v26 }
 0x251   :  { %v3798_v27 = vpop.eup %3797 }
 0x252   :  { %803 = vrot.lane.b32.xlu0 %v3798_v27, %s4173_s6  ;;  %v829_v27 = vmul.f32 0.0, %v4433_v37 }
 0x27c   :  { %v792_v30 = vpop.permute.xlu2 %791 }
 0x27d   :  { %v815_v39 = vmul.f32 %v792_v30, %v775_v32 }
 0x27f   :  { %v4467_v50 = vadd.f32 %v823_v46, %v815_v39 }
 0x28c   :  { %v796_v28 = vpop.permute.xlu1 %795 }
 0x28d   :  { %v817_v31 = vmul.f32 %v796_v28, %v777_v29 }
 0x28f   :  { %v4462_v45 = vadd.f32 %v825_v35, %v817_v31 }
 0x291   :  { %v849_v55 = vrot.slane %v4462_v45, 6 }
 0x29c   :  { %v794_v38 = vpop.permute.xlu0 %793 }
 0x29d   :  { %v816_v44 = vmul.f32 %v794_v38, %v776_v34  ;;  %v800_v57 = vpop.permute.xlu1 %799 }
 0x29e   :  { %v819_v56 = vmul.f32 %v800_v57, %v779_v33 }
 0x29f   :  { %v4465_v49 = vadd.f32 %v824_v42, %v816_v44 }
 0x2a0   :  { %v4482_v6 = vadd.f32 %v827_v1, %v819_v56 }
 0x2a1   :  { %v847_v53 = vrot.slane %v4465_v49, 7 }
 0x2a2   :  { %v853_v10 = vrot.slane %v4482_v6, 4 }
 0x2a3   :  { %v848_v59 = vsel %vm205_vm13, %v847_v53, %v4467_v50 }
 0x2a4   :  { %v850_v17 = vsel %vm207_vm14, %v849_v55, %v848_v59  ;;  %v802_v60 = vpop.permute.xlu2 %801 }
 0x2a5   :  { %v820_v63 = vmul.f32 %v802_v60, %v780_v61 }
 0x2a7   :  { %v4484_v7 = vadd.f32 %v828_v43, %v820_v63 }
 0x2a9   :  { %v855_v2 = vrot.slane %v4484_v7, 3  ;;  %v1193_v43 = vrot.slane %v4484_v7, 7 }
 0x2ac   :  { %v798_v3 = vpop.permute.xlu0 %797 }
 0x2ad   :  { %v818_v5 = vmul.f32 %v798_v3, %v778_v0 }
 0x2af   :  { %v4486_v8 = vadd.f32 %v826_v52, %v818_v5 }
 0x2b1   :  { %v851_v9 = vrot.slane %v4486_v8, 5 }
 0x2b3   :  { %v852_v22 = vsel %vm209_vm15, %v851_v9, %v850_v17 }
 0x2b4   :  { %v854_v41 = vsel %vm211_vm1, %v853_v10, %v852_v22  ;;  %v806_v13 = vpop.permute.xlu1 %805 }
 0x2b5   :  { %v856_v11 = vsel %vm213_vm2, %v855_v2, %v854_v41  ;;  %v822_v21 = vmul.f32 %v806_v13, %v782_v15 }
 0x2b7   :  { %v4498_v29 = vadd.f32 %v830_v25, %v822_v21 }
 0x2b9   :  { %v859_v32 = vrot.slane %v4498_v29, 1 }
 0x2c4   :  { %v804_v26 = vpop.permute.xlu0 %803 }
 0x2c5   :  { %v821_v28 = vmul.f32 %v804_v26, %v781_v24 }
 0x2c7   :  { %v4500_v30 = vadd.f32 %v829_v27, %v821_v28 }
 0x2c9   :  { %v857_v31 = vrot.slane %v4500_v30, 2 }
 0x2cb   :  { %v858_v34 = vsel %vm215_vm3, %v857_v31, %v856_v11 }
 0x2cc   :  { %v860_v35 = vsel %vm217_vm4, %v859_v32, %v858_v34 }
 0x2cd   :  { %861 = vrot.lane.b32.xlu2 %v860_v35, %s4173_s6 }
 0x327   :  { %v862_v54 = vpop.permute.xlu2 %861 }
 0x328   :  { %3675 = vmatmul.msk.f32.vlgmr.msrb.gmra.mxu3 %vm6190_vm5, %v862_v54 }
 0x329   :  { %2401 = vmatpush.msrb.mxu3 %v4266_v18 }
 0x32b   :  { %2402 = vmatpush.msrb.mxu3 %v4271_v19 }
 0x32d   :  { %2403 = vmatpush.msrb.mxu3 %v4277_v20 }
 0x32f   :  { %2404 = vmatpush.msrb.mxu3 %v4286_v23 }
 0x3ab   :  { %v882_v37 = vpop.f32.mrf.mxu3 }
 0x3ac   :  { %v4513_v38 = vadd.f32 %v4328_v40, %v882_v37 }
 0x3ae   :  { %1063 = vrot.lane.b32.xlu2 %v4513_v38, %s4172_s4  ;;  %v887_v39 = vrot.slane %v4513_v38, 1  ;;  %v886_v42 = vrot.slane %v4513_v38, 7  ;;  %v890_v44 = vrot.slane %v4513_v38, 4  ;;  %v889_v20 = vrot.slane %v4513_v38, 3 }
 0x3af   :  { %v888_v23 = vrot.slane %v4513_v38, 2  ;;  %v892_v55 = vrot.slane %v4513_v38, 6  ;;  %v891_v59 = vrot.slane %v4513_v38, 5  ;;  %v902_v52 = vadd.f32 %v4513_v38, %v4374_v62 }
 0x3b0   :  { %1065 = vrot.lane.b32.xlu1 %v887_v39, %s4172_s4  ;;  %1061 = vrot.lane.b32.xlu0 %v886_v42, %s4172_s4  ;;  %v906_v18 = vadd.f32 %v890_v44, %v4399_v48  ;;  %v903_v22 = vadd.f32 %v887_v39, %v4378_v4  ;;  %v901_v41 = vadd.f32 %v886_v42, %v4369_v58 }
 0x3b1   :  { %v3677_v9 = vmul.f32 -1.442695, %v902_v52  ;;  %v905_v7 = vadd.f32 %v889_v20, %v4389_v36  ;;  %v904_v24 = vadd.f32 %v888_v23, %v4382_v12  ;;  %v908_v34 = vadd.f32 %v892_v55, %v4419_v51 }
 0x3b2   :  { %v3681_v19 = vmul.f32 -1.442695, %v906_v18  ;;  %v3678_v13 = vmul.f32 -1.442695, %v903_v22  ;;  %v3676_v15 = vmul.f32 -1.442695, %v901_v41  ;;  %v907_v54 = vadd.f32 %v891_v59, %v4409_v47 }
 0x3b3   :  { %v3680_v26 = vmul.f32 -1.442695, %v905_v7  ;;  %v3679_v27 = vmul.f32 -1.442695, %v904_v24 }
 0x3b4   :  { %3799 = vpow2.f32 %v3681_v19  ;;  %v3682_v19 = vmul.f32 -1.442695, %v907_v54 }
 0x3b6   :  { %1071 = vrot.lane.b32.xlu2 %v890_v44, %s4172_s4  ;;  %v3683_v44 = vmul.f32 -1.442695, %v908_v34 }
 0x3b8   :  { %1069 = vrot.lane.b32.xlu1 %v889_v20, %s4172_s4  ;;  %1067 = vrot.lane.b32.xlu0 %v888_v23, %s4172_s4 }
 0x3ba   :  { %v3800_v40 = vpop.eup %3799 }
 0x3bb   :  { %v938_v46 = vadd.f32 1.0, %v3800_v40 }
 0x3bd   :  { %3801 = vrcp.f32 %v938_v46  ;;  %v1027_v56 = vand.u32 2147483648, %v938_v46  ;;  %vm1021_vm7 = vweird.f32 %v938_v46  ;;  %v1025_v63 = vand.u32 2147483647, %v938_v46 }
 0x3be   :  { %3803 = vpow2.f32 %v3677_v9 }
 0x3bf   :  { %v1028_v1 = vor.u32 1.1754944e-38, %v1027_v56  ;;  %vm1026_vm9 = vcmp.eq.f32.partialorder %v1025_v63, 8.507059e+37 }
 0x3c0   :  { %1075 = vrot.lane.b32.xlu1 %v892_v55, %s4172_s4  ;;  %1073 = vrot.lane.b32.xlu0 %v891_v59, %s4172_s4 }
 0x3c3   :  { %v3802_v17 = vpop.eup %3801 }
 0x3c4   :  { %v1017_v57 = vmul.f32 %v3802_v17, %v938_v46  ;;  %vm1022_vm6 = vweird.f32 %v3802_v17  ;;  %v3804_v10 = vpop.eup %3803 }
 0x3c5   :  { %vm1023_vm8 = vmor %vm1021_vm7, %vm1022_vm6  ;;  %v934_v2 = vadd.f32 1.0, %v3804_v10 }
 0x3c6   :  { %v1018_v33 = vsub.f32 1.0, %v1017_v57 }
 0x3c7   :  { %3805 = vrcp.f32 %v934_v2  ;;  %v967_v39 = vand.u32 2147483648, %v934_v2  ;;  %vm961_vm11 = vweird.f32 %v934_v2  ;;  %v965_v42 = vand.u32 2147483647, %v934_v2 }
 0x3c8   :  { %v1019_v60 = vmul.f32 %v3802_v17, %v1018_v33  ;;  %3807 = vpow2.f32 %v3678_v13 }
 0x3c9   :  { %3809 = vpow2.f32 %v3676_v15  ;;  %v968_v40 = vor.u32 1.1754944e-38, %v967_v39  ;;  %vm966_vm6 = vcmp.eq.f32.partialorder %v965_v42, 8.507059e+37 }
 0x3ca   :  { %v1020_v61 = vadd.f32 %v3802_v17, %v1019_v60  ;;  %3811 = vpow2.f32 %v3680_v26 }
 0x3cb   :  { %3813 = vpow2.f32 %v3679_v27 }
 0x3cc   :  { %v1024_v0 = vsel %vm1023_vm8, %v3802_v17, %v1020_v61 }
 0x3cd   :  { %v4532_v3 = vsel %vm1026_vm9, %v1028_v1, %v1024_v0  ;;  %v3806_v11 = vpop.eup %3805 }
 0x3ce   :  { %v4538_v5 = vmul.f32 %v1193_v43, %v4532_v3  ;;  %v957_v21 = vmul.f32 %v3806_v11, %v934_v2  ;;  %v3808_v31 = vpop.eup %3807  ;;  %vm962_vm10 = vweird.f32 %v3806_v11 }
 0x3cf   :  { %v3810_v32 = vpop.eup %3809  ;;  %v4545_v35 = vadd.f32 1.0, %v3808_v31  ;;  %vm963_vm12 = vmor %vm961_vm11, %vm962_vm10 }
 0x3d0   :  { %v958_v25 = vsub.f32 1.0, %v957_v21  ;;  %v4548_v38 = vadd.f32 1.0, %v3810_v32  ;;  %v3812_v18 = vpop.eup %3811 }
 0x3d1   :  { %3815 = vrcp.f32 %v4545_v35  ;;  %v3814_v23 = vpop.eup %3813  ;;  %v4552_v46 = vadd.f32 1.0, %v3812_v18  ;;  %vm976_vm9 = vweird.f32 %v4545_v35  ;;  %v982_v31 = vand.u32 2147483648, %v4545_v35 }
 0x3d2   :  { %v959_v28 = vmul.f32 %v3806_v11, %v958_v25  ;;  %3817 = vrcp.f32 %v4548_v38  ;;  %v4556_v17 = vadd.f32 1.0, %v3814_v23  ;;  %v952_v32 = vand.u32 2147483648, %v4548_v38 }
 0x3d3   :  { %3819 = vpow2.f32 %v3683_v44  ;;  %v980_v54 = vand.u32 2147483647, %v4545_v35  ;;  %vm946_vm11 = vweird.f32 %v4548_v38 }
 0x3d4   :  { %v960_v37 = vadd.f32 %v3806_v11, %v959_v28  ;;  %3821 = vpow2.f32 %v3682_v19  ;;  %v953_v23 = vor.u32 1.1754944e-38, %v952_v32 }
 0x3d5   :  { %3823 = vrcp.f32 %v4552_v46 }
 0x3d6   :  { %v964_v20 = vsel %vm963_vm12, %v3806_v11, %v960_v37  ;;  %3825 = vrcp.f32 %v4556_v17  ;;  %v950_v37 = vand.u32 2147483647, %v4548_v38 }
 0x3d7   :  { %v4554_v59 = vsel %vm966_vm6, %v968_v40, %v964_v20  ;;  %v3816_v33 = vpop.eup %3815  ;;  %v983_v20 = vor.u32 1.1754944e-38, %v982_v31  ;;  %vm981_vm6 = vcmp.eq.f32.partialorder %v980_v54, 8.507059e+37 }
 0x3d8   :  { %v3818_v60 = vpop.eup %3817  ;;  %v972_v63 = vmul.f32 %v3816_v33, %v4545_v35  ;;  %vm977_vm7 = vweird.f32 %v3816_v33 }
 0x3d9   :  { %v3820_v61 = vpop.eup %3819  ;;  %v942_v0 = vmul.f32 %v3818_v60, %v4548_v38  ;;  %vm947_vm8 = vweird.f32 %v3818_v60  ;;  %vm4587_vm10 = vmor %vm976_vm9, %vm977_vm7  ;;  %vm951_vm7 = vcmp.eq.f32.partialorder %v950_v37, 8.507059e+37 }
 0x3da   :  { %v3822_v56 = vpop.eup %3821  ;;  %v4564_v43 = vadd.f32 1.0, %v3820_v61  ;;  %v973_v22 = vsub.f32 1.0, %v972_v63  ;;  %vm4594_vm12 = vmor %vm946_vm11, %vm947_vm8 }
 0x3db   :  { %v4567_v9 = vpop.eup %3823  ;;  %v4569_v10 = vadd.f32 1.0, %v3822_v56  ;;  %v943_v41 = vsub.f32 1.0, %v942_v0 }
 0x3dc   :  { %v4571_v2 = vpop.eup %3825  ;;  %3827 = vrcp.f32 %v4564_v43  ;;  %v1002_v11 = vmul.f32 %v4567_v9, %v4552_v46  ;;  %v974_v15 = vmul.f32 %v3816_v33, %v973_v22  ;;  %vm1007_vm8 = vweird.f32 %v4567_v9 }
 0x3dd   :  { %3829 = vrcp.f32 %v4569_v10  ;;  %v987_v13 = vmul.f32 %v4571_v2, %v4556_v17  ;;  %v944_v21 = vmul.f32 %v3818_v60, %v943_v41  ;;  %vm992_vm9 = vweird.f32 %v4571_v2 }
 0x3de   :  { %v1003_v7 = vsub.f32 1.0, %v1002_v11  ;;  %v975_v26 = vadd.f32 %v3816_v33, %v974_v15  ;;  %v997_v22 = vand.u32 2147483648, %v4556_v17  ;;  %v1010_v41 = vand.u32 2147483647, %v4552_v46 }
 0x3df   :  { %v988_v24 = vsub.f32 1.0, %v987_v13  ;;  %v945_v27 = vadd.f32 %v3818_v60, %v944_v21  ;;  %v995_v11 = vand.u32 2147483647, %v4556_v17  ;;  %v1057_v54 = vand.u32 2147483648, %v4564_v43 }
 0x3e0   :  { %v1004_v42 = vmul.f32 %v4567_v9, %v1003_v7  ;;  %v979_v18 = vsel %vm4587_vm10, %v3816_v33, %v975_v26  ;;  %vm1006_vm10 = vweird.f32 %v4552_v46  ;;  %v998_v26 = vor.u32 1.1754944e-38, %v997_v22 }
 0x3e1   :  { %v989_v44 = vmul.f32 %v4571_v2, %v988_v24  ;;  %v949_v19 = vsel %vm4594_vm12, %v3818_v60, %v945_v27  ;;  %vm1008_vm11 = vmor %vm1006_vm10, %vm1007_vm8  ;;  %vm991_vm12 = vweird.f32 %v4556_v17  ;;  %vm996_vm8 = vcmp.eq.f32.partialorder %v995_v11, 8.507059e+37 }
 0x3e2   :  { %v4580_v25 = vpop.eup %3827  ;;  %v4612_v33 = vsel %vm951_vm7, %v953_v23, %v949_v19  ;;  %v1005_v60 = vadd.f32 %v4567_v9, %v1004_v42  ;;  %vm1011_vm7 = vcmp.eq.f32.partialorder %v1010_v41, 8.507059e+37  ;;  %v1042_v37 = vand.u32 2147483648, %v4569_v10 }
 0x3e3   :  { %v4582_v28 = vpop.eup %3829  ;;  %v1047_v35 = vmul.f32 %v4580_v25, %v4564_v43  ;;  %v990_v61 = vadd.f32 %v4571_v2, %v989_v44  ;;  %v1055_v39 = vand.u32 2147483647, %v4564_v43  ;;  %v1040_v42 = vand.u32 2147483647, %v4569_v10 }
 0x3e4   :  { %v1032_v38 = vmul.f32 %v4582_v28, %v4569_v10  ;;  %v1009_v13 = vsel %vm1008_vm11, %v4567_v9, %v1005_v60  ;;  %vm1037_vm10 = vweird.f32 %v4582_v28  ;;  %vm1051_vm11 = vweird.f32 %v4564_v43 }
 0x3e5   :  { %v1048_v0 = vsub.f32 1.0, %v1047_v35  ;;  %v1058_v19 = vor.u32 1.1754944e-38, %v1057_v54  ;;  %v1043_v35 = vor.u32 1.1754944e-38, %v1042_v37  ;;  %vm1041_vm5 = vcmp.eq.f32.partialorder %v1040_v42, 8.507059e+37 }
 0x3e7   :  { %v1049_v21 = vmul.f32 %v4580_v25, %v1048_v0 }
 0x3e9   :  { %v1050_v32 = vadd.f32 %v4580_v25, %v1049_v21 }
 0x408   :  { %v1064_v55 = vpop.permute.xlu2 %1063 }
 0x409   :  { %v1086_v57 = vmul.f32 %v1064_v55, %v4554_v59  ;;  %v4610_v55 = vsel %vm981_vm6, %v983_v20, %v979_v18  ;;  %vm993_vm6 = vmor %vm991_vm12, %vm992_vm9  ;;  %vm1052_vm9 = vweird.f32 %v4580_v25 }
 0x40a   :  { %v994_v15 = vsel %vm993_vm6, %v4571_v2, %v990_v61  ;;  %vm1053_vm12 = vmor %vm1051_vm11, %vm1052_vm9  ;;  %vm1036_vm6 = vweird.f32 %v4569_v10  ;;  %vm140_vm9 = vcmask 269312  }
 0x40b   :  { %1103 = vrot.lane.b32.xlu1 %v1086_v57, %s4172_s4  ;;  %v4636_v31 = vsel %vm996_vm8, %v998_v26, %v994_v15  ;;  %v1054_v44 = vsel %vm1053_vm12, %v4580_v25, %v1050_v32  ;;  %vm1056_vm8 = vcmp.eq.f32.partialorder %v1055_v39, 8.507059e+37  ;;  %v45_v15 = vld [vmem:[%s6176_s0] sm:$0xff] }
 0x40c   :  { %v53_v21 = vperm.slane %v45_v15, 0  ;;  %v81_v54 = vperm.slane %v45_v15, 4 }
 0x410   :  { %v1072_v1 = vpop.permute.xlu2 %1071 }
 0x411   :  { %v1090_v52 = vmul.f32 %v1072_v1, %v4532_v3  ;;  %v1033_v1 = vsub.f32 1.0, %v1032_v38  ;;  %v4654_v38 = vsel %vm1056_vm8, %v1058_v19, %v1054_v44  ;;  %v102_v44 = vperm.slane %v45_v15, 7 }
 0x412   :  { %v67_v19 = vperm.slane %v45_v15, 2 }
 0x413   :  { %1111 = vrot.lane.b32.xlu1 %v1090_v52, %s4172_s4  ;;  %v1012_v52 = vand.u32 2147483648, %v4552_v46  ;;  %v1034_v7 = vmul.f32 %v4582_v28, %v1033_v1 }
 0x415   :  { %v1013_v24 = vor.u32 1.1754944e-38, %v1012_v52  ;;  %v1035_v34 = vadd.f32 %v4582_v28, %v1034_v7 }
 0x417   :  { %v4634_v46 = vsel %vm1011_vm7, %v1013_v24, %v1009_v13  ;;  %vm1038_vm7 = vmor %vm1036_vm6, %vm1037_vm10 }
 0x418   :  { %v1039_v18 = vsel %vm1038_vm7, %v4582_v28, %v1035_v34  ;;  %v95_v34 = vperm.slane %v45_v15, 6 }
 0x419   :  { %v4656_v23 = vsel %vm1041_vm5, %v1043_v35, %v1039_v18  ;;  %v88_v35 = vperm.slane %v45_v15, 5 }
 0x422   :  { %v1066_v40 = vpop.permute.xlu1 %1065  ;;  %v1062_v57 = vpop.permute.xlu0 %1061 }
 0x423   :  { %v1087_v56 = vmul.f32 %v1066_v40, %v4610_v55  ;;  %v1085_v63 = vmul.f32 %v1062_v57, %v4612_v33 }
 0x425   :  { %1105 = vrot.lane.b32.xlu0 %v1087_v56, %s4172_s4  ;;  %1101 = vrot.lane.b32.xlu2 %v1085_v63, %s4172_s4 }
 0x42a   :  { %v1070_v27 = vpop.permute.xlu1 %1069  ;;  %v1068_v17 = vpop.permute.xlu0 %1067 }
 0x42b   :  { %v1089_v9 = vmul.f32 %v1070_v27, %v4634_v46  ;;  %v1088_v2 = vmul.f32 %v1068_v17, %v4636_v31  ;;  %v74_v27 = vperm.slane %v45_v15, 3  ;;  %v60_v17 = vperm.slane %v45_v15, 1 }
 0x42d   :  { %1109 = vrot.lane.b32.xlu0 %v1089_v9, %s4172_s4  ;;  %1107 = vrot.lane.b32.xlu2 %v1088_v2, %s4172_s4 }
 0x432   :  { %v1076_v20 = vpop.permute.xlu1 %1075  ;;  %v1074_v40 = vpop.permute.xlu0 %1073 }
 0x433   :  { %v1092_v43 = vmul.f32 %v1076_v20, %v4654_v38  ;;  %v1091_v57 = vmul.f32 %v1074_v40, %v4656_v23  ;;  %v1189_v40 = vrot.slane %v4467_v50, 7 }
 0x435   :  { %1115 = vrot.lane.b32.xlu0 %v1092_v43, %s4172_s4  ;;  %1113 = vrot.lane.b32.xlu2 %v1091_v57, %s4172_s4  ;;  %v1142_v43 = vsub.f32 1.0, %v4554_v59  ;;  %v1141_v57 = vsub.f32 1.0, %v4612_v33 }
 0x47d   :  { %v1104_v10 = vpop.permute.xlu1 %1103 }
 0x47e   :  { %v1126_v25 = vadd.f32 %v1104_v10, %v4374_v62 }
 0x47f   :  { %v1102_v28 = vpop.permute.xlu2 %1101 }
 0x480   :  { %3831 = vtanh.f32 %v1126_v25  ;;  %v1125_v60 = vadd.f32 %v1102_v28, %v4369_v58  ;;  %v1143_v25 = vsub.f32 1.0, %v4610_v55 }
 0x482   :  { %3833 = vtanh.f32 %v1125_v60 }
 0x485   :  { %v1112_v61 = vpop.permute.xlu1 %1111 }
 0x486   :  { %v3832_v56 = vpop.eup %3831  ;;  %v1130_v63 = vadd.f32 %v1112_v61, %v4399_v48  ;;  %v1204_v61 = vmul.f32 %v1189_v40, %v4612_v33  ;;  %v1192_v33 = vrot.slane %v4482_v6, 7 }
 0x487   :  { %1159 = vrot.lane.b32.xlu0 %v3832_v56, %s4173_s6  ;;  %v1108_v0 = vpop.permute.xlu2 %1107 }
 0x488   :  { %v3834_v1 = vpop.eup %3833  ;;  %3835 = vtanh.f32 %v1130_v63  ;;  %v1128_v52 = vadd.f32 %v1108_v0, %v4382_v12  ;;  %v1190_v63 = vrot.slane %v4462_v45, 7 }
 0x489   :  { %1157 = vrot.lane.b32.xlu1 %v3834_v1, %s4173_s6  ;;  %v1205_v1 = vmul.f32 %v4554_v59, %v847_v53  ;;  %v1144_v59 = vsub.f32 1.0, %v4636_v31 }
 0x48a   :  { %3837 = vtanh.f32 %v1128_v52  ;;  %v1206_v52 = vmul.f32 %v1190_v63, %v4610_v55  ;;  %v1145_v55 = vsub.f32 1.0, %v4634_v46 }
 0x48e   :  { %v3836_v22 = vpop.eup %3835 }
 0x48f   :  { %1167 = vrot.lane.b32.xlu0 %v3836_v22, %s4173_s6  ;;  %v1114_v41 = vpop.permute.xlu2 %1113 }
 0x490   :  { %v3838_v11 = vpop.eup %3837  ;;  %v1131_v13 = vadd.f32 %v1114_v41, %v4409_v47 }
 0x491   :  { %1163 = vrot.lane.b32.xlu1 %v3838_v11, %s4173_s6  ;;  %v1146_v11 = vsub.f32 1.0, %v4532_v3 }
 0x492   :  { %3839 = vtanh.f32 %v1131_v13  ;;  %v1191_v13 = vrot.slane %v4486_v8, 7  ;;  %v1208_v8 = vmul.f32 %v1192_v33, %v4634_v46 }
 0x497   :  { %v1106_v7 = vpop.permute.xlu0 %1105  ;;  %58 = vperm.xlu0 %3744, %v53_v21   ;;  %v1207_v21 = vmul.f32 %v1191_v13, %v4636_v31  ;;  %v1195_v31 = vrot.slane %v4498_v29, 7  ;;  %v46_v13 = vld [vmem:[%s6177_s1] sm:$0xff] }
 0x498   :  { %v3840_v24 = vpop.eup %3839  ;;  %v1127_v26 = vadd.f32 %v1106_v7, %v4378_v4 }
 0x499   :  { %1169 = vrot.lane.b32.xlu1 %v3840_v24, %s4173_s6 }
 0x49a   :  { %3841 = vtanh.f32 %v1127_v26 }
 0x49f   :  { %v1110_v9 = vpop.permute.xlu0 %1109  ;;  %79 = vperm.xlu0 %3744, %v74_v27  }
 0x4a0   :  { %v3842_v2 = vpop.eup %3841  ;;  %v1129_v32 = vadd.f32 %v1110_v9, %v4389_v36 }
 0x4a1   :  { %1161 = vrot.lane.b32.xlu2 %v3842_v2, %s4173_s6  ;;  %65 = vperm.xlu1 %3745, %v60_v17  }
 0x4a2   :  { %3843 = vtanh.f32 %v1129_v32 }
 0x4a7   :  { %v1116_v37 = vpop.permute.xlu0 %1115  ;;  %100 = vperm.xlu0 %3744, %v95_v34   ;;  %v1194_v34 = vrot.slane %v4500_v30, 7  ;;  %v1211_v30 = vmul.f32 %v1195_v31, %v4654_v38 }
 0x4a8   :  { %v3844_v39 = vpop.eup %3843  ;;  %v1132_v42 = vadd.f32 %v1116_v37, %v4419_v51 }
 0x4a9   :  { %1165 = vrot.lane.b32.xlu2 %v3844_v39, %s4173_s6  ;;  %86 = vperm.xlu1 %3745, %v81_v54   ;;  %v1148_v54 = vsub.f32 1.0, %v4654_v38 }
 0x4aa   :  { %3845 = vtanh.f32 %v1132_v42  ;;  %v1147_v42 = vsub.f32 1.0, %v4656_v23 }
 0x4b0   :  { %v3846_v18 = vpop.eup %3845 }
 0x4b1   :  { %1171 = vrot.lane.b32.xlu2 %v3846_v18, %s4173_s6  ;;  %107 = vperm.xlu1 %3745, %v102_v44  }
 0x4b9   :  { %72 = vperm.xlu2 %3746, %v67_v19  }
 0x4c1   :  { %93 = vperm.xlu2 %3746, %v88_v35   ;;  %v1210_v35 = vmul.f32 %v1194_v34, %v4656_v23  ;;  %v48_v23 = vld [vmem:[%s6177_s1 + $0x10] sm:$0xff] }
 0x4c2   :  { %v4776_v34 = vld [vmem:[%s6181_s5 + $0x10] sm:$0xff] }
 0x4f9   :  { %v1160_v20 = vpop.permute.xlu0 %1159 }
 0x4fa   :  { %v1182_v60 = vmul.f32 %v1160_v20, %v1142_v43 }
 0x4fb   :  { %v1158_v10 = vpop.permute.xlu1 %1157  ;;  %v1162_v28 = vpop.permute.xlu2 %1161 }
 0x4fc   :  { %v1181_v56 = vmul.f32 %v1158_v10, %v1141_v57  ;;  %v1183_v0 = vmul.f32 %v1162_v28, %v1143_v25  ;;  %v4693_v22 = vadd.f32 %v1205_v1, %v1182_v60  ;;  %v50_v57 = vld [vmem:[%s6177_s1 + $0x20] sm:$0x1]  ;;  %v49_v10 = vld [vmem:[%s6177_s1 + $0x18] sm:$0xff] }
 0x4fd   :  { %3640 = vmatpush.msk.msra.mxu0 %vm221_vm0, %v50_v57 }
 0x4fe   :  { %v4690_v50 = vadd.f32 %v1204_v61, %v1181_v56  ;;  %v4699_v45 = vadd.f32 %v1206_v52, %v1183_v0  ;;  %v47_v0 = vld [vmem:[%s6177_s1 + $0x8] sm:$0xff] }
 0x4ff   :  { %237 = vmatpush.msra.mxu0 %v49_v10 }
 0x500   :  { %v1228_v41 = vrot.slane %v4690_v50, 1  ;;  %v1230_v27 = vrot.slane %v4699_v45, 7 }
 0x501   :  { %v1168_v15 = vpop.permute.xlu0 %1167  ;;  %238 = vmatpush.msra.mxu0 %v48_v23 }
 0x502   :  { %v1229_v49 = vsel %vm205_vm13, %v4693_v22, %v1228_v41  ;;  %v1186_v53 = vmul.f32 %v1168_v15, %v1146_v11 }
 0x503   :  { %v1164_v7 = vpop.permute.xlu1 %1163  ;;  %v1166_v24 = vpop.permute.xlu2 %1165  ;;  %239 = vmatpush.msra.mxu0 %v47_v0 }
 0x504   :  { %v4707_v3 = vadd.f32 %v4538_v5, %v1186_v53  ;;  %v1184_v6 = vmul.f32 %v1164_v7, %v1144_v59  ;;  %v1185_v26 = vmul.f32 %v1166_v24, %v1145_v55  ;;  %v1231_v5 = vsel %vm207_vm14, %v1230_v27, %v1229_v49 }
 0x505   :  { %240 = vmatpush.msra.mxu0 %v46_v13 }
 0x506   :  { %v4711_v17 = vadd.f32 %v1207_v21, %v1184_v6  ;;  %v4713_v9 = vadd.f32 %v1208_v8, %v1185_v26  ;;  %v1236_v37 = vrot.slane %v4707_v3, 4  ;;  %v4770_v8 = vld [vmem:[%s6181_s5 + $0x18] sm:$0xff] }
 0x507   :  { %1258 = vmatpush.msrb.mxu0 %v4770_v8 }
 0x508   :  { %v1232_v2 = vrot.slane %v4711_v17, 6  ;;  %v1234_v32 = vrot.slane %v4713_v9, 5 }
 0x509   :  { %v59_v46 = vpop.permute.xlu0 %58  ;;  %1259 = vmatpush.msrb.mxu0 %v4776_v34 }
 0x50a   :  { %v1233_v39 = vsel %vm209_vm15, %v1232_v2, %v1231_v5  ;;  %vm109_vm5 = vcmp.eq.s32.totalorder %v59_v46, %v4258_v14 }
 0x50b   :  { %v3631_v29 = vsel %vm109_vm5, 1.0, %v4171_v16  ;;  %v1170_v44 = vpop.permute.xlu1 %1169  ;;  %v1172_v18 = vpop.permute.xlu2 %1171  ;;  %v1235_v19 = vsel %vm211_vm1, %v1234_v32, %v1233_v39  ;;  %vm6195_vm5 = vcmask 261120  }
 0x50c   :  { %v1187_v20 = vmul.f32 %v1170_v44, %v1147_v42  ;;  %v1188_v40 = vmul.f32 %v1172_v18, %v1148_v54  ;;  %v1237_v43 = vsel %vm213_vm2, %v1236_v37, %v1235_v19  ;;  %v141_v25 = vsel %vm140_vm9, %v3631_v29, 0.0  ;;  %v4784_v29 = vld [vmem:[%s6181_s5 + $0x8] sm:$0xff] }
 0x50d   :  { %v142_v56 = vrot.slane %v141_v25, 4  ;;  %1260 = vmatpush.msrb.mxu0 %v4784_v29 }
 0x50e   :  { %v4739_v38 = vadd.f32 %v1210_v35, %v1187_v20  ;;  %v4741_v28 = vadd.f32 %v1211_v30, %v1188_v40  ;;  %v4793_v35 = vld [vmem:[%s6181_s5] sm:$0xff] }
 0x50f   :  { %v143_v49 = vadd.f32 %v142_v56, %v141_v25  ;;  %1261 = vmatpush.msrb.mxu0 %v4793_v35 }
 0x510   :  { %v1238_v60 = vrot.slane %v4739_v38, 3  ;;  %v1240_v61 = vrot.slane %v4741_v28, 2 }
 0x511   :  { %v80_v63 = vpop.permute.xlu0 %79  ;;  %v144_v26 = vrot.slane %v143_v49, 2 }
 0x512   :  { %vm112_vm10 = vcmp.eq.s32.totalorder %v80_v63, %v4258_v14  ;;  %v1239_v1 = vsel %vm215_vm3, %v1238_v60, %v1237_v43 }
 0x513   :  { %v3634_v52 = vsel %vm112_vm10, 1.0, %v4171_v16  ;;  %v73_v41 = vpop.permute.xlu2 %72  ;;  %v66_v11 = vpop.permute.xlu1 %65  ;;  %v1241_v33 = vsel %vm217_vm4, %v1240_v61, %v1239_v1  ;;  %v145_v30 = vadd.f32 %v144_v26, %v143_v49 }
 0x514   :  { %v162_v15 = vsel %vm140_vm9, %v3634_v52, 0.0  ;;  %vm111_vm0 = vcmp.eq.s32.totalorder %v73_v41, %v4258_v14  ;;  %vm110_vm11 = vcmp.eq.s32.totalorder %v66_v11, %v4258_v14  ;;  %1242 = vrot.lane.b32.xlu2 %v1241_v33, %s4173_s6 }
 0x515   :  { %v3633_v53 = vsel %vm111_vm0, 1.0, %v4171_v16  ;;  %v3632_v59 = vsel %vm110_vm11, 1.0, %v4171_v16  ;;  %v163_v7 = vrot.slane %v162_v15, 4  ;;  %v146_v61 = vrot.slane %v145_v30, 1 }
 0x516   :  { %v155_v55 = vsel %vm140_vm9, %v3633_v53, 0.0  ;;  %v148_v21 = vsel %vm140_vm9, %v3632_v59, 0.0 }
 0x517   :  { %v156_v24 = vrot.slane %v155_v55, 4  ;;  %v149_v6 = vrot.slane %v148_v21, 4  ;;  %v164_v5 = vadd.f32 %v163_v7, %v162_v15  ;;  %v147_v15 = vadd.f32 %v146_v61, %v145_v30 }
 0x519   :  { %v157_v2 = vadd.f32 %v156_v24, %v155_v55  ;;  %v150_v32 = vadd.f32 %v149_v6, %v148_v21  ;;  %v101_v31 = vpop.permute.xlu0 %100  ;;  %v165_v57 = vrot.slane %v164_v5, 2 }
 0x51a   :  { %vm115_vm12 = vcmp.eq.s32.totalorder %v101_v31, %v4258_v14 }
 0x51b   :  { %v158_v46 = vrot.slane %v157_v2, 2  ;;  %v151_v54 = vrot.slane %v150_v32, 2  ;;  %v3637_v37 = vsel %vm115_vm12, 1.0, %v4171_v16  ;;  %v94_v39 = vpop.permute.xlu2 %93  ;;  %v87_v42 = vpop.permute.xlu1 %86  ;;  %v166_v1 = vadd.f32 %v165_v57, %v164_v5 }
 0x51c   :  { %v183_v44 = vsel %vm140_vm9, %v3637_v37, 0.0  ;;  %vm114_vm6 = vcmp.eq.s32.totalorder %v94_v39, %v4258_v14  ;;  %vm113_vm7 = vcmp.eq.s32.totalorder %v87_v42, %v4258_v14 }
 0x51d   :  { %v152_v18 = vadd.f32 %v151_v54, %v150_v32  ;;  %v184_v19 = vrot.slane %v183_v44, 4  ;;  %v159_v20 = vadd.f32 %v158_v46, %v157_v2  ;;  %v3636_v40 = vsel %vm114_vm6, 1.0, %v4171_v16 }
 0x51e   :  { %v3635_v43 = vsel %vm113_vm7, 1.0, %v4171_v16  ;;  %v176_v23 = vsel %vm140_vm9, %v3636_v40, 0.0  ;;  %v167_v7 = vrot.slane %v166_v1, 1 }
 0x51f   :  { %v153_v10 = vrot.slane %v152_v18, 1  ;;  %v185_v25 = vadd.f32 %v184_v19, %v183_v44  ;;  %v169_v60 = vsel %vm140_vm9, %v3635_v43, 0.0  ;;  %v177_v56 = vrot.slane %v176_v23, 4 }
 0x520   :  { %v160_v63 = vrot.slane %v159_v20, 1  ;;  %v170_v0 = vrot.slane %v169_v60, 4  ;;  %v168_v54 = vadd.f32 %v167_v7, %v166_v1 }
 0x521   :  { %v154_v52 = vadd.f32 %v153_v10, %v152_v18  ;;  %v178_v41 = vadd.f32 %v177_v56, %v176_v23  ;;  %v186_v33 = vrot.slane %v185_v25, 2  ;;  %v4825_v56 = vld [vmem:[%s6183_s7] ss:$0 sm:$0xff] }
 0x522   :  { %v171_v13 = vadd.f32 %v170_v0, %v169_v60  ;;  %v161_v59 = vadd.f32 %v160_v63, %v159_v20 }
 0x523   :  { %v108_v11 = vpop.permute.xlu1 %107  ;;  %v179_v49 = vrot.slane %v178_v41, 2  ;;  %v206_v24 = vsel %vm205_vm13, %v154_v52, %v147_v15  ;;  %v187_v2 = vadd.f32 %v186_v33, %v185_v25 }
 0x524   :  { %vm116_vm8 = vcmp.eq.s32.totalorder %v108_v11, %v4258_v14  ;;  %v172_v55 = vrot.slane %v171_v13, 2  ;;  %v208_v14 = vsel %vm207_vm14, %v161_v59, %v206_v24 }
 0x525   :  { %v3638_v53 = vsel %vm116_vm8, 1.0, %v4171_v16  ;;  %v180_v6 = vadd.f32 %v179_v49, %v178_v41  ;;  %v188_v42 = vrot.slane %v187_v2, 1  ;;  %v210_v18 = vsel %vm209_vm15, %v168_v54, %v208_v14 }
 0x526   :  { %v190_v21 = vsel %vm140_vm9, %v3638_v53, 0.0  ;;  %v173_v32 = vadd.f32 %v172_v55, %v171_v13 }
 0x527   :  { %v191_v26 = vrot.slane %v190_v21, 4  ;;  %v181_v31 = vrot.slane %v180_v6, 1  ;;  %v189_v43 = vadd.f32 %v188_v42, %v187_v2 }
 0x528   :  { %v174_v46 = vrot.slane %v173_v32, 1 }
 0x529   :  { %v192_v5 = vadd.f32 %v191_v26, %v190_v21  ;;  %v182_v37 = vadd.f32 %v181_v31, %v180_v6 }
 0x52a   :  { %v175_v44 = vadd.f32 %v174_v46, %v173_v32 }
 0x52b   :  { %v193_v39 = vrot.slane %v192_v5, 2 }
 0x52c   :  { %v212_v19 = vsel %vm211_vm1, %v175_v44, %v210_v18 }
 0x52d   :  { %v194_v30 = vadd.f32 %v193_v39, %v192_v5  ;;  %v214_v40 = vsel %vm213_vm2, %v182_v37, %v212_v19 }
 0x52e   :  { %v216_v10 = vsel %vm215_vm3, %v189_v43, %v214_v40  ;;  %v1572_v43 = vrot.slane %v4711_v17, 7 }
 0x52f   :  { %v195_v20 = vrot.slane %v194_v30, 1 }
 0x531   :  { %v196_v57 = vadd.f32 %v195_v20, %v194_v30 }
 0x533   :  { %v218_v25 = vsel %vm217_vm4, %v196_v57, %v216_v10 }
 0x534   :  { %3641 = vmatmul.msk.f32.vlgmr.msra.gmra.mxu0 %vm140_vm9, %v218_v25 }
 0x535   :  { %2020 = vmatpush.msra.mxu0 %v4770_v8 }
 0x537   :  { %2021 = vmatpush.msra.mxu0 %v4776_v34 }
 0x539   :  { %2022 = vmatpush.msra.mxu0 %v4784_v29 }
 0x53b   :  { %2023 = vmatpush.msra.mxu0 %v4793_v35 }
 0x56e   :  { %v1243_v23 = vpop.permute.xlu2 %1242 }
 0x56f   :  { %3684 = vmatmul.msk.f32.vlgmr.msrb.gmra.mxu0 %vm6195_vm5, %v1243_v23  ;;  %v1574_v23 = vrot.slane %v4707_v3, 7 }
 0x570   :  { %2782 = vmatpush.msrb.mxu0 %v4770_v8 }
 0x572   :  { %2783 = vmatpush.msrb.mxu0 %v4776_v34 }
 0x574   :  { %2784 = vmatpush.msrb.mxu0 %v4784_v29 }
 0x576   :  { %2785 = vmatpush.msrb.mxu0 %v4793_v35 }
 0x5b1   :  { %v4820_v60 = vpop.f32.mrf.mxu0 }
 0x5ec   :  { %v1263_v61 = vpop.f32.mrf.mxu0 }
 0x5ed   :  { %v4828_v63 = vadd.f32 %v4825_v56, %v1263_v61 }
 0x5ef   :  { %1446 = vrot.lane.b32.xlu0 %v4828_v63, %s4172_s4  ;;  %v1269_v0 = vrot.slane %v4828_v63, 1  ;;  %v1268_v1 = vrot.slane %v4828_v63, 7  ;;  %v1271_v52 = vrot.slane %v4828_v63, 3  ;;  %v1267_v15 = vrot.slane %v4828_v63, 6 }
 0x5f0   :  { %v1270_v49 = vrot.slane %v4828_v63, 2  ;;  %v1272_v55 = vrot.slane %v4828_v63, 4  ;;  %v1273_v24 = vrot.slane %v4828_v63, 5 }
 0x5f1   :  { %1448 = vrot.lane.b32.xlu2 %v1269_v0, %s4172_s4  ;;  %v1285_v41 = vadd.f32 %v1269_v0, %v4382_v12  ;;  %1444 = vrot.lane.b32.xlu1 %v1268_v1, %s4172_s4  ;;  %v1287_v11 = vadd.f32 %v1271_v52, %v4399_v48  ;;  %v1284_v0 = vadd.f32 %v4828_v63, %v4378_v4 }
 0x5f2   :  { %v1282_v17 = vadd.f32 %v1267_v15, %v4369_v58  ;;  %v1289_v63 = vadd.f32 %v1273_v24, %v4419_v51 }
 0x5f3   :  { %v3688_v33 = vmul.f32 -1.442695, %v1285_v41  ;;  %v3690_v13 = vmul.f32 -1.442695, %v1287_v11  ;;  %v3687_v41 = vmul.f32 -1.442695, %v1284_v0 }
 0x5f5   :  { %3847 = vpow2.f32 %v3688_v33  ;;  %v1286_v33 = vadd.f32 %v1270_v49, %v4389_v36 }
 0x5f6   :  { %3849 = vpow2.f32 %v3690_v13  ;;  %v3685_v13 = vmul.f32 -1.442695, %v1282_v17 }
 0x5f7   :  { %1442 = vrot.lane.b32.xlu0 %v1267_v15, %s4172_s4 }
 0x5f9   :  { %1452 = vrot.lane.b32.xlu2 %v1271_v52, %s4172_s4  ;;  %1450 = vrot.lane.b32.xlu1 %v1270_v49, %s4172_s4  ;;  %v1283_v52 = vadd.f32 %v1268_v1, %v4374_v62 }
 0x5fb   :  { %v3848_v53 = vpop.eup %3847  ;;  %v3686_v11 = vmul.f32 -1.442695, %v1283_v52 }
 0x5fc   :  { %v1317_v59 = vadd.f32 1.0, %v3848_v53  ;;  %v3850_v21 = vpop.eup %3849 }
 0x5fd   :  { %v1319_v7 = vadd.f32 1.0, %v3850_v21  ;;  %v1288_v21 = vadd.f32 %v1272_v55, %v4409_v47 }
 0x5fe   :  { %3851 = vrcp.f32 %v1317_v59  ;;  %v1378_v37 = vand.u32 2147483648, %v1317_v59  ;;  %vm1372_vm10 = vweird.f32 %v1317_v59  ;;  %v1376_v39 = vand.u32 2147483647, %v1317_v59 }
 0x5ff   :  { %1454 = vrot.lane.b32.xlu0 %v1272_v55, %s4172_s4  ;;  %3853 = vrcp.f32 %v1319_v7  ;;  %v1408_v30 = vand.u32 2147483648, %v1319_v7  ;;  %vm1402_vm12 = vweird.f32 %v1319_v7  ;;  %v1406_v19 = vand.u32 2147483647, %v1319_v7 }
 0x600   :  { %v1379_v18 = vor.u32 1.1754944e-38, %v1378_v37  ;;  %vm1377_vm6 = vcmp.eq.f32.partialorder %v1376_v39, 8.507059e+37  ;;  %3855 = vpow2.f32 %v3687_v41 }
 0x601   :  { %1456 = vrot.lane.b32.xlu1 %v1273_v24, %s4172_s4  ;;  %v1409_v57 = vor.u32 1.1754944e-38, %v1408_v30  ;;  %vm1407_vm8 = vcmp.eq.f32.partialorder %v1406_v19, 8.507059e+37  ;;  %3857 = vpow2.f32 %v3686_v11 }
 0x602   :  { %3859 = vpow2.f32 %v3685_v13 }
 0x604   :  { %v3852_v6 = vpop.eup %3851 }
 0x605   :  { %v1368_v26 = vmul.f32 %v3852_v6, %v1317_v59  ;;  %v3854_v2 = vpop.eup %3853  ;;  %vm1373_vm9 = vweird.f32 %v3852_v6  ;;  %v3689_v59 = vmul.f32 -1.442695, %v1286_v33 }
 0x606   :  { %v1398_v31 = vmul.f32 %v3854_v2, %v1319_v7  ;;  %vm1374_vm0 = vmor %vm1372_vm10, %vm1373_vm9  ;;  %vm1403_vm11 = vweird.f32 %v3854_v2  ;;  %v3856_v53 = vpop.eup %3855 }
 0x607   :  { %v1369_v32 = vsub.f32 1.0, %v1368_v26  ;;  %vm1404_vm7 = vmor %vm1402_vm12, %vm1403_vm11  ;;  %v3858_v3 = vpop.eup %3857  ;;  %v1316_v7 = vadd.f32 1.0, %v3856_v53  ;;  %3861 = vpow2.f32 %v3689_v59  ;;  %v3692_v26 = vmul.f32 -1.442695, %v1289_v63 }
 0x608   :  { %v1399_v46 = vsub.f32 1.0, %v1398_v31  ;;  %v4867_v1 = vadd.f32 1.0, %v3858_v3  ;;  %v3860_v15 = vpop.eup %3859 }
 0x609   :  { %v1370_v5 = vmul.f32 %v3852_v6, %v1369_v32  ;;  %3863 = vrcp.f32 %v1316_v7  ;;  %vm1357_vm9 = vweird.f32 %v1316_v7  ;;  %v1363_v33 = vand.u32 2147483648, %v1316_v7 }
 0x60a   :  { %v1400_v14 = vmul.f32 %v3854_v2, %v1399_v46  ;;  %3865 = vrcp.f32 %v4867_v1  ;;  %v1361_v13 = vand.u32 2147483647, %v1316_v7  ;;  %v1348_v63 = vand.u32 2147483648, %v4867_v1 }
 0x60b   :  { %v1371_v54 = vadd.f32 %v3852_v6, %v1370_v5  ;;  %vm1342_vm11 = vweird.f32 %v4867_v1 }
 0x60c   :  { %v1401_v42 = vadd.f32 %v3854_v2, %v1400_v14 }
 0x60d   :  { %v1375_v44 = vsel %vm1374_vm0, %v3852_v6, %v1371_v54  ;;  %v3691_v6 = vmul.f32 -1.442695, %v1288_v21  ;;  %v3862_v49 = vpop.eup %3861  ;;  %v1346_v21 = vand.u32 2147483647, %v4867_v1 }
 0x60e   :  { %v4848_v20 = vsel %vm1377_vm6, %v1379_v18, %v1375_v44  ;;  %v1405_v40 = vsel %vm1404_vm7, %v3854_v2, %v1401_v42  ;;  %v4870_v2 = vadd.f32 1.0, %v3860_v15  ;;  %v4872_v31 = vadd.f32 1.0, %v3862_v49 }
 0x60f   :  { %v4851_v10 = vsel %vm1407_vm8, %v1409_v57, %v1405_v40  ;;  %v4854_v25 = vmul.f32 %v1572_v43, %v4848_v20  ;;  %3867 = vpow2.f32 %v3691_v6  ;;  %v3864_v32 = vpop.eup %3863  ;;  %v1364_v49 = vor.u32 1.1754944e-38, %v1363_v33 }
 0x610   :  { %v4858_v61 = vmul.f32 %v1574_v23, %v4851_v10  ;;  %3869 = vpow2.f32 %v3692_v26  ;;  %v3866_v24 = vpop.eup %3865  ;;  %v1353_v14 = vmul.f32 %v3864_v32, %v1316_v7  ;;  %vm1358_vm5 = vweird.f32 %v3864_v32 }
 0x611   :  { %3871 = vrcp.f32 %v4870_v2  ;;  %v1338_v37 = vmul.f32 %v3866_v24, %v4867_v1  ;;  %vm1343_vm10 = vweird.f32 %v3866_v24  ;;  %vm1359_vm0 = vmor %vm1357_vm9, %vm1358_vm5  ;;  %vm1362_vm6 = vcmp.eq.f32.partialorder %v1361_v13, 8.507059e+37 }
 0x612   :  { %3873 = vrcp.f32 %v4872_v31  ;;  %v1354_v42 = vsub.f32 1.0, %v1353_v14  ;;  %vm1344_vm12 = vmor %vm1342_vm11, %vm1343_vm10  ;;  %vm1347_vm7 = vcmp.eq.f32.partialorder %v1346_v21, 8.507059e+37  ;;  %vm1327_vm5 = vweird.f32 %v4870_v2 }
 0x613   :  { %v1339_v40 = vsub.f32 1.0, %v1338_v37 }
 0x614   :  { %v1355_v57 = vmul.f32 %v3864_v32, %v1354_v42 }
 0x615   :  { %v3868_v46 = vpop.eup %3867  ;;  %v1340_v0 = vmul.f32 %v3866_v24, %v1339_v40 }
 0x616   :  { %v3870_v54 = vpop.eup %3869  ;;  %v4879_v39 = vadd.f32 1.0, %v3868_v46  ;;  %v1356_v41 = vadd.f32 %v3864_v32, %v1355_v57 }
 0x617   :  { %v4881_v44 = vpop.eup %3871  ;;  %v4883_v30 = vadd.f32 1.0, %v3870_v54  ;;  %v1341_v53 = vadd.f32 %v3866_v24, %v1340_v0  ;;  %v1393_v0 = vand.u32 2147483648, %v4872_v31 }
 0x618   :  { %v4886_v43 = vpop.eup %3873  ;;  %3875 = vrcp.f32 %v4879_v39  ;;  %v1323_v23 = vmul.f32 %v4881_v44, %v4870_v2  ;;  %v1360_v6 = vsel %vm1359_vm0, %v3864_v32, %v1356_v41  ;;  %v1349_v32 = vor.u32 1.1754944e-38, %v1348_v63 }
 0x619   :  { %3877 = vrcp.f32 %v4883_v30  ;;  %v1383_v52 = vmul.f32 %v4886_v43, %v4872_v31  ;;  %v1345_v7 = vsel %vm1344_vm12, %v3866_v24, %v1341_v53  ;;  %v4908_v14 = vsel %vm1362_vm6, %v1364_v49, %v1360_v6 }
 0x61a   :  { %v1324_v11 = vsub.f32 1.0, %v1323_v23  ;;  %vm1328_vm8 = vweird.f32 %v4881_v44  ;;  %v1331_v24 = vand.u32 2147483647, %v4870_v2  ;;  %vm1388_vm9 = vweird.f32 %v4886_v43 }
 0x61b   :  { %v1384_v59 = vsub.f32 1.0, %v1383_v52  ;;  %vm1329_vm10 = vmor %vm1327_vm5, %vm1328_vm8  ;;  %vm1387_vm0 = vweird.f32 %v4872_v31  ;;  %v1394_v21 = vor.u32 1.1754944e-38, %v1393_v0  ;;  %vm1417_vm8 = vweird.f32 %v4879_v39 }
 0x61c   :  { %v1325_v15 = vmul.f32 %v4881_v44, %v1324_v11  ;;  %vm1389_vm11 = vmor %vm1387_vm0, %vm1388_vm9  ;;  %vm1332_vm12 = vcmp.eq.f32.partialorder %v1331_v24, 8.507059e+37 }
 0x61e   :  { %v4895_v17 = vpop.eup %3875  ;;  %v1326_v54 = vadd.f32 %v4881_v44, %v1325_v15 }
 0x61f   :  { %v4897_v3 = vpop.eup %3877  ;;  %v1413_v26 = vmul.f32 %v4895_v17, %v4879_v39 }
 0x620   :  { %v1330_v52 = vsel %vm1329_vm10, %v4881_v44, %v1326_v54  ;;  %vm1433_vm5 = vweird.f32 %v4897_v3  ;;  %vm1432_vm10 = vweird.f32 %v4883_v30 }
 0x621   :  { %v1414_v37 = vsub.f32 1.0, %v1413_v26  ;;  %v1421_v26 = vand.u32 2147483647, %v4879_v39  ;;  %vm1434_vm0 = vmor %vm1432_vm10, %vm1433_vm5 }
 0x623   :  { %v1415_v41 = vmul.f32 %v4895_v17, %v1414_v37 }
 0x625   :  { %v1416_v44 = vadd.f32 %v4895_v17, %v1415_v41 }
 0x64b   :  { %v1449_v55 = vpop.permute.xlu2 %1448 }
 0x64c   :  { %v1469_v5 = vmul.f32 %v1449_v55, %v4848_v20  ;;  %v1385_v55 = vmul.f32 %v4886_v43, %v1384_v59 }
 0x64e   :  { %1488 = vrot.lane.b32.xlu1 %v1469_v5, %s4172_s4  ;;  %v1428_v5 = vmul.f32 %v4897_v3, %v4883_v30  ;;  %v1386_v57 = vadd.f32 %v4886_v43, %v1385_v55 }
 0x650   :  { %v1429_v23 = vsub.f32 1.0, %v1428_v5  ;;  %v1390_v33 = vsel %vm1389_vm11, %v4886_v43, %v1386_v57  ;;  %v1423_v43 = vand.u32 2147483648, %v4879_v39  ;;  %v1436_v5 = vand.u32 2147483647, %v4883_v30 }
 0x651   :  { %vm1422_vm11 = vcmp.eq.f32.partialorder %v1421_v26, 8.507059e+37 }
 0x652   :  { %v1430_v13 = vmul.f32 %v4897_v3, %v1429_v23 }
 0x653   :  { %v1453_v18 = vpop.permute.xlu2 %1452 }
 0x654   :  { %v1471_v19 = vmul.f32 %v1453_v18, %v4851_v10  ;;  %v4913_v18 = vsel %vm1347_vm7, %v1349_v32, %v1345_v7  ;;  %vm1418_vm7 = vweird.f32 %v4895_v17  ;;  %v1431_v49 = vadd.f32 %v4897_v3, %v1430_v13 }
 0x655   :  { %vm1419_vm9 = vmor %vm1417_vm8, %vm1418_vm7  ;;  %v1438_v7 = vand.u32 2147483648, %v4883_v30 }
 0x656   :  { %1492 = vrot.lane.b32.xlu1 %v1471_v19, %s4172_s4  ;;  %v1333_v19 = vand.u32 2147483648, %v4870_v2  ;;  %v1391_v2 = vand.u32 2147483647, %v4872_v31  ;;  %v1420_v55 = vsel %vm1419_vm9, %v4895_v17, %v1416_v44  ;;  %v1435_v39 = vsel %vm1434_vm0, %v4897_v3, %v1431_v49 }
 0x657   :  { %v1439_v54 = vor.u32 1.1754944e-38, %v1438_v7 }
 0x658   :  { %v1334_v11 = vor.u32 1.1754944e-38, %v1333_v19  ;;  %vm1392_vm6 = vcmp.eq.f32.partialorder %v1391_v2, 8.507059e+37 }
 0x659   :  { %v4935_v31 = vsel %vm1392_vm6, %v1394_v21, %v1390_v33  ;;  %vm6196_vm6 = vcmask 261120  }
 0x65a   :  { %v4930_v59 = vsel %vm1332_vm12, %v1334_v11, %v1330_v52  ;;  %vm1437_vm12 = vcmp.eq.f32.partialorder %v1436_v5, 8.507059e+37 }
 0x661   :  { %v1447_v46 = vpop.permute.xlu0 %1446 }
 0x662   :  { %v1468_v1 = vmul.f32 %v1447_v46, %v4908_v14  ;;  %v1424_v46 = vor.u32 1.1754944e-38, %v1423_v43 }
 0x663   :  { %v1445_v42 = vpop.permute.xlu1 %1444 }
 0x664   :  { %v1467_v40 = vmul.f32 %v1445_v42, %v4913_v18  ;;  %1486 = vrot.lane.b32.xlu2 %v1468_v1, %s4172_s4  ;;  %v4950_v32 = vsel %vm1422_vm11, %v1424_v46, %v1420_v55  ;;  %v4953_v42 = vsel %vm1437_vm12, %v1439_v54, %v1435_v39  ;;  %v1525_v46 = vsub.f32 1.0, %v4848_v20 }
 0x665   :  { %v1524_v20 = vsub.f32 1.0, %v4908_v14 }
 0x666   :  { %1484 = vrot.lane.b32.xlu0 %v1467_v40, %s4172_s4 }
 0x669   :  { %v1443_v53 = vpop.permute.xlu0 %1442 }
 0x66a   :  { %v1466_v63 = vmul.f32 %v1443_v53, %v4930_v59 }
 0x66b   :  { %v1451_v6 = vpop.permute.xlu1 %1450 }
 0x66c   :  { %v1470_v15 = vmul.f32 %v1451_v6, %v4935_v31  ;;  %1482 = vrot.lane.b32.xlu2 %v1466_v63, %s4172_s4 }
 0x66e   :  { %1490 = vrot.lane.b32.xlu0 %v1470_v15, %s4172_s4 }
 0x671   :  { %v1455_v1 = vpop.permute.xlu0 %1454 }
 0x672   :  { %v1472_v37 = vmul.f32 %v1455_v1, %v4950_v32 }
 0x673   :  { %v1457_v24 = vpop.permute.xlu1 %1456 }
 0x674   :  { %v1473_v17 = vmul.f32 %v1457_v24, %v4953_v42  ;;  %1494 = vrot.lane.b32.xlu2 %v1472_v37, %s4172_s4  ;;  %v1523_v37 = vsub.f32 1.0, %v4913_v18  ;;  %v1571_v24 = vrot.slane %v4693_v22, 7 }
 0x676   :  { %1496 = vrot.lane.b32.xlu0 %v1473_v17, %s4172_s4 }
 0x6be   :  { %v1487_v30 = vpop.permute.xlu2 %1486 }
 0x6bf   :  { %v1508_v19 = vadd.f32 %v1487_v30, %v4378_v4 }
 0x6c0   :  { %v1489_v3 = vpop.permute.xlu1 %1488 }
 0x6c1   :  { %3879 = vtanh.f32 %v1508_v19  ;;  %v1509_v40 = vadd.f32 %v1489_v3, %v4382_v12  ;;  %v1570_v19 = vrot.slane %v4690_v50, 7  ;;  %v1586_v3 = vmul.f32 %v1571_v24, %v4913_v18 }
 0x6c3   :  { %3881 = vtanh.f32 %v1509_v40  ;;  %v1522_v40 = vsub.f32 1.0, %v4930_v59 }
 0x6c6   :  { %v1483_v57 = vpop.permute.xlu2 %1482 }
 0x6c7   :  { %v3880_v23 = vpop.eup %3879  ;;  %v1506_v0 = vadd.f32 %v1483_v57, %v4369_v58  ;;  %v1573_v57 = vrot.slane %v4713_v9, 7 }
 0x6c8   :  { %1542 = vrot.lane.b32.xlu1 %v3880_v23, %s4173_s6  ;;  %v1493_v52 = vpop.permute.xlu1 %1492  ;;  %v1585_v23 = vmul.f32 %v1570_v19, %v4930_v59  ;;  %v1587_v59 = vmul.f32 %v4908_v14, %v1230_v27  ;;  %v1528_v27 = vsub.f32 1.0, %v4950_v32  ;;  %v1576_v14 = vrot.slane %v4741_v28, 7 }
 0x6c9   :  { %v3882_v2 = vpop.eup %3881  ;;  %3883 = vtanh.f32 %v1506_v0  ;;  %v1511_v41 = vadd.f32 %v1493_v52, %v4399_v48  ;;  %v1589_v9 = vmul.f32 %v1573_v57, %v4935_v31 }
 0x6ca   :  { %1544 = vrot.lane.b32.xlu0 %v3882_v2, %s4173_s6  ;;  %v1526_v2 = vsub.f32 1.0, %v4935_v31  ;;  %v1592_v28 = vmul.f32 %v1576_v14, %v4953_v42 }
 0x6cb   :  { %3885 = vtanh.f32 %v1511_v41 }
 0x6ce   :  { %v1495_v11 = vpop.permute.xlu2 %1494 }
 0x6cf   :  { %v3884_v33 = vpop.eup %3883  ;;  %v1512_v13 = vadd.f32 %v1495_v11, %v4409_v47 }
 0x6d0   :  { %1538 = vrot.lane.b32.xlu1 %v3884_v33, %s4173_s6 }
 0x6d1   :  { %v3886_v53 = vpop.eup %3885  ;;  %3887 = vtanh.f32 %v1512_v13 }
 0x6d2   :  { %1548 = vrot.lane.b32.xlu0 %v3886_v53, %s4173_s6 }
 0x6d7   :  { %v3888_v21 = vpop.eup %3887 }
 0x6d8   :  { %v1485_v63 = vpop.permute.xlu0 %1484  ;;  %1550 = vrot.lane.b32.xlu1 %v3888_v21, %s4173_s6 }
 0x6d9   :  { %v1507_v44 = vadd.f32 %v1485_v63, %v4374_v62 }
 0x6db   :  { %3889 = vtanh.f32 %v1507_v44  ;;  %v1575_v44 = vrot.slane %v4739_v38, 7 }
 0x6e0   :  { %v1491_v6 = vpop.permute.xlu0 %1490 }
 0x6e1   :  { %v3890_v43 = vpop.eup %3889  ;;  %v1510_v15 = vadd.f32 %v1491_v6, %v4389_v36 }
 0x6e2   :  { %1540 = vrot.lane.b32.xlu2 %v3890_v43, %s4173_s6 }
 0x6e3   :  { %3891 = vtanh.f32 %v1510_v15  ;;  %v1591_v15 = vmul.f32 %v1575_v44, %v4950_v32 }
 0x6e8   :  { %v1497_v26 = vpop.permute.xlu0 %1496 }
 0x6e9   :  { %v3892_v49 = vpop.eup %3891  ;;  %v1513_v7 = vadd.f32 %v1497_v26, %v4419_v51 }
 0x6ea   :  { %1546 = vrot.lane.b32.xlu2 %v3892_v49, %s4173_s6 }
 0x6eb   :  { %3893 = vtanh.f32 %v1513_v7  ;;  %v1529_v7 = vsub.f32 1.0, %v4953_v42 }
 0x6f1   :  { %v3894_v55 = vpop.eup %3893 }
 0x6f2   :  { %1552 = vrot.lane.b32.xlu2 %v3894_v55, %s4173_s6 }
 0x73a   :  { %v1543_v5 = vpop.permute.xlu1 %1542 }
 0x73b   :  { %v1564_v41 = vmul.f32 %v1543_v5, %v1524_v20 }
 0x73c   :  { %v1545_v39 = vpop.permute.xlu0 %1544  ;;  %v1541_v1 = vpop.permute.xlu2 %1540 }
 0x73d   :  { %v1565_v54 = vmul.f32 %v1545_v39, %v1525_v46  ;;  %v1563_v30 = vmul.f32 %v1541_v1, %v1523_v37  ;;  %v5004_v6 = vadd.f32 %v1587_v59, %v1564_v41 }
 0x73f   :  { %v4978_v17 = vadd.f32 %v4854_v25, %v1565_v54  ;;  %v4986_v52 = vadd.f32 %v1586_v3, %v1563_v30  ;;  %v1527_v25 = vsub.f32 1.0, %v4851_v10 }
 0x741   :  { %v1610_v53 = vrot.slane %v4986_v52, 1  ;;  %v1613_v31 = vrot.slane %v4978_v17, 7 }
 0x742   :  { %v1539_v0 = vpop.permute.xlu1 %1538 }
 0x743   :  { %v1562_v22 = vmul.f32 %v1539_v0, %v1522_v40 }
 0x744   :  { %v1549_v50 = vpop.permute.xlu0 %1548  ;;  %v1547_v11 = vpop.permute.xlu2 %1546 }
 0x745   :  { %v4990_v18 = vadd.f32 %v1585_v23, %v1562_v22  ;;  %v1567_v33 = vmul.f32 %v1549_v50, %v1527_v25  ;;  %v1566_v13 = vmul.f32 %v1547_v11, %v1526_v2 }
 0x747   :  { %v1609_v21 = vrot.slane %v4990_v18, 2  ;;  %v4999_v10 = vadd.f32 %v4858_v61, %v1567_v33  ;;  %v5001_v63 = vadd.f32 %v1589_v9, %v1566_v13 }
 0x749   :  { %v1611_v43 = vsel %vm205_vm13, %v1610_v53, %v1609_v21  ;;  %v1615_v45 = vrot.slane %v5001_v63, 6  ;;  %v1617_v38 = vrot.slane %v4999_v10, 5 }
 0x74a   :  { %v1612_v61 = vsel %vm207_vm14, %v5004_v6, %v1611_v43  ;;  %v1551_v26 = vpop.permute.xlu1 %1550 }
 0x74b   :  { %v1568_v49 = vmul.f32 %v1551_v26, %v1528_v27  ;;  %v1614_v55 = vsel %vm209_vm15, %v1613_v31, %v1612_v61 }
 0x74c   :  { %v1553_v5 = vpop.permute.xlu2 %1552  ;;  %v1616_v46 = vsel %vm211_vm1, %v1615_v45, %v1614_v55 }
 0x74d   :  { %v5020_v39 = vadd.f32 %v1591_v15, %v1568_v49  ;;  %v1569_v1 = vmul.f32 %v1553_v5, %v1529_v7  ;;  %v1618_v32 = vsel %vm213_vm2, %v1617_v38, %v1616_v46  ;;  %v1952_v46 = vrot.slane %v4986_v52, 7 }
 0x74f   :  { %v1619_v54 = vrot.slane %v5020_v39, 4  ;;  %v5025_v37 = vadd.f32 %v1592_v28, %v1569_v1 }
 0x751   :  { %v1621_v24 = vrot.slane %v5025_v37, 3  ;;  %v1620_v30 = vsel %vm215_vm3, %v1619_v54, %v1618_v32  ;;  %v1957_v32 = vrot.slane %v5025_v37, 7 }
 0x753   :  { %v1622_v19 = vsel %vm217_vm4, %v1621_v24, %v1620_v30 }
 0x754   :  { %1623 = vrot.lane.b32.xlu0 %v1622_v19, %s4173_s6 }
 0x7c6   :  { %v1624_v3 = vpop.permute.xlu0 %1623 }
 0x7c7   :  { %3693 = vmatmul.msk.f32.vlgmr.msra.gmra.mxu3 %vm6196_vm6, %v1624_v3 }
 0x7c8   :  { %3163 = vmatpush.msra.mxu3 %v4770_v8 }
 0x7ca   :  { %3164 = vmatpush.msra.mxu3 %v4776_v34 }
 0x7cc   :  { %3165 = vmatpush.msra.mxu3 %v4784_v29 }
 0x7ce   :  { %3166 = vmatpush.msra.mxu3 %v4793_v35 }
 0x84a   :  { %v1644_v42 = vpop.f32.mrf.mxu3 }
 0x84b   :  { %v5037_v40 = vadd.f32 %v4825_v56, %v1644_v42 }
 0x84d   :  { %1829 = vrot.lane.b32.xlu2 %v5037_v40, %s4172_s4  ;;  %v1650_v57 = vrot.slane %v5037_v40, 7  ;;  %v1648_v20 = vrot.slane %v5037_v40, 5  ;;  %v1649_v23 = vrot.slane %v5037_v40, 6  ;;  %v1654_v8 = vrot.slane %v5037_v40, 4 }
 0x84e   :  { %v1652_v0 = vrot.slane %v5037_v40, 2  ;;  %v1651_v22 = vrot.slane %v5037_v40, 1  ;;  %v1653_v41 = vrot.slane %v5037_v40, 3  ;;  %v1666_v28 = vadd.f32 %v5037_v40, %v4382_v12 }
 0x84f   :  { %1827 = vrot.lane.b32.xlu0 %v1650_v57, %s4172_s4  ;;  %1823 = vrot.lane.b32.xlu1 %v1648_v20, %s4172_s4  ;;  %v1664_v34 = vadd.f32 %v1649_v23, %v4374_v62  ;;  %v1670_v29 = vadd.f32 %v1654_v8, %v4419_v51  ;;  %v1665_v52 = vadd.f32 %v1650_v57, %v4378_v4 }
 0x850   :  { %v3697_v24 = vmul.f32 -1.442695, %v1666_v28  ;;  %v1663_v42 = vadd.f32 %v1648_v20, %v4369_v58  ;;  %v1669_v40 = vadd.f32 %v1653_v41, %v4409_v47 }
 0x851   :  { %v3695_v35 = vmul.f32 -1.442695, %v1664_v34  ;;  %v3701_v56 = vmul.f32 -1.442695, %v1670_v29  ;;  %v1668_v29 = vadd.f32 %v1652_v0, %v4399_v48 }
 0x853   :  { %3895 = vpow2.f32 %v3695_v35  ;;  %v1667_v35 = vadd.f32 %v1651_v22, %v4389_v36 }
 0x854   :  { %3897 = vpow2.f32 %v3701_v56 }
 0x855   :  { %1825 = vrot.lane.b32.xlu2 %v1649_v23, %s4172_s4  ;;  %v3696_v23 = vmul.f32 -1.442695, %v1665_v52 }
 0x857   :  { %1833 = vrot.lane.b32.xlu0 %v1652_v0, %s4172_s4  ;;  %1831 = vrot.lane.b32.xlu1 %v1651_v22, %s4172_s4  ;;  %v3700_v22 = vmul.f32 -1.442695, %v1669_v40 }
 0x859   :  { %v3896_v25 = vpop.eup %3895 }
 0x85a   :  { %v1696_v2 = vadd.f32 1.0, %v3896_v25  ;;  %v3898_v50 = vpop.eup %3897  ;;  %v3699_v25 = vmul.f32 -1.442695, %v1668_v29 }
 0x85b   :  { %v1702_v11 = vadd.f32 1.0, %v3898_v50 }
 0x85c   :  { %3899 = vrcp.f32 %v1696_v2  ;;  %v1729_v27 = vand.u32 2147483648, %v1696_v2  ;;  %vm1723_vm8 = vweird.f32 %v1696_v2  ;;  %v1727_v14 = vand.u32 2147483647, %v1696_v2 }
 0x85d   :  { %1837 = vrot.lane.b32.xlu2 %v1654_v8, %s4172_s4  ;;  %3901 = vrcp.f32 %v1702_v11  ;;  %v1819_v15 = vand.u32 2147483648, %v1702_v11  ;;  %vm1813_vm10 = vweird.f32 %v1702_v11  ;;  %v1817_v38 = vand.u32 2147483647, %v1702_v11 }
 0x85e   :  { %v1730_v49 = vor.u32 1.1754944e-38, %v1729_v27  ;;  %vm1728_vm11 = vcmp.eq.f32.partialorder %v1727_v14, 8.507059e+37  ;;  %3903 = vpow2.f32 %v3697_v24  ;;  %v3694_v8 = vmul.f32 -1.442695, %v1663_v42 }
 0x85f   :  { %1835 = vrot.lane.b32.xlu1 %v1653_v41, %s4172_s4  ;;  %v1820_v5 = vor.u32 1.1754944e-38, %v1819_v15  ;;  %vm1818_vm12 = vcmp.eq.f32.partialorder %v1817_v38, 8.507059e+37 }
 0x862   :  { %v3900_v33 = vpop.eup %3899 }
 0x863   :  { %v1719_v9 = vmul.f32 %v3900_v33, %v1696_v2  ;;  %v3902_v13 = vpop.eup %3901  ;;  %vm1724_vm7 = vweird.f32 %v3900_v33  ;;  %v3698_v2 = vmul.f32 -1.442695, %v1667_v35 }
 0x864   :  { %v1809_v53 = vmul.f32 %v3902_v13, %v1702_v11  ;;  %vm1814_vm5 = vweird.f32 %v3902_v13  ;;  %vm1725_vm9 = vmor %vm1723_vm8, %vm1724_vm7  ;;  %v3904_v19 = vpop.eup %3903 }
 0x865   :  { %v1720_v59 = vsub.f32 1.0, %v1719_v9  ;;  %vm1815_vm0 = vmor %vm1813_vm10, %vm1814_vm5  ;;  %v1698_v3 = vadd.f32 1.0, %v3904_v19 }
 0x866   :  { %v1810_v44 = vsub.f32 1.0, %v1809_v53 }
 0x867   :  { %v1721_v21 = vmul.f32 %v3900_v33, %v1720_v59  ;;  %3905 = vrcp.f32 %v1698_v3  ;;  %v1759_v0 = vand.u32 2147483648, %v1698_v3  ;;  %vm1753_vm7 = vweird.f32 %v1698_v3 }
 0x868   :  { %v1811_v43 = vmul.f32 %v3902_v13, %v1810_v44  ;;  %3907 = vpow2.f32 %v3696_v23 }
 0x869   :  { %v1722_v45 = vadd.f32 %v3900_v33, %v1721_v21  ;;  %3909 = vpow2.f32 %v3694_v8  ;;  %v1760_v21 = vor.u32 1.1754944e-38, %v1759_v0 }
 0x86a   :  { %v1812_v61 = vadd.f32 %v3902_v13, %v1811_v43  ;;  %3911 = vpow2.f32 %v3699_v25 }
 0x86b   :  { %v1726_v26 = vsel %vm1725_vm9, %v3900_v33, %v1722_v45  ;;  %3913 = vpow2.f32 %v3698_v2 }
 0x86c   :  { %v1816_v7 = vsel %vm1815_vm0, %v3902_v13, %v1812_v61  ;;  %v5061_v55 = vsel %vm1728_vm11, %v1730_v49, %v1726_v26  ;;  %v1757_v13 = vand.u32 2147483647, %v1698_v3 }
 0x86d   :  { %v5066_v1 = vsel %vm1818_vm12, %v1820_v5, %v1816_v7  ;;  %v5070_v54 = vmul.f32 %v1952_v46, %v5061_v55  ;;  %v3906_v37 = vpop.eup %3905 }
 0x86e   :  { %v5073_v30 = vmul.f32 %v1957_v32, %v5066_v1  ;;  %v1749_v34 = vmul.f32 %v3906_v37, %v1698_v3  ;;  %v3908_v11 = vpop.eup %3907  ;;  %vm1754_vm6 = vweird.f32 %v3906_v37  ;;  %vm1758_vm5 = vcmp.eq.f32.partialorder %v1757_v13, 8.507059e+37 }
 0x86f   :  { %v3910_v57 = vpop.eup %3909  ;;  %v5084_v20 = vadd.f32 1.0, %v3908_v11  ;;  %vm1755_vm8 = vmor %vm1753_vm7, %vm1754_vm6  ;;  %v1910_v17 = vsub.f32 1.0, %v5066_v1 }
 0x870   :  { %v1750_v56 = vsub.f32 1.0, %v1749_v34  ;;  %v5086_v9 = vadd.f32 1.0, %v3910_v57  ;;  %v3912_v53 = vpop.eup %3911 }
 0x871   :  { %3915 = vrcp.f32 %v5084_v20  ;;  %v3914_v41 = vpop.eup %3913  ;;  %v5092_v45 = vadd.f32 1.0, %v3912_v53  ;;  %vm1738_vm0 = vweird.f32 %v5084_v20  ;;  %v1744_v2 = vand.u32 2147483648, %v5084_v20 }
 0x872   :  { %v1751_v50 = vmul.f32 %v3906_v37, %v1750_v56  ;;  %3917 = vrcp.f32 %v5086_v9  ;;  %v5095_v14 = vadd.f32 1.0, %v3914_v41  ;;  %v1742_v57 = vand.u32 2147483647, %v5084_v20 }
 0x873   :  { %3919 = vpow2.f32 %v3700_v22  ;;  %vm1708_vm12 = vweird.f32 %v5086_v9  ;;  %v1712_v40 = vand.u32 2147483647, %v5086_v9  ;;  %v1745_v53 = vor.u32 1.1754944e-38, %v1744_v2 }
 0x874   :  { %v1752_v33 = vadd.f32 %v3906_v37, %v1751_v50  ;;  %3921 = vrcp.f32 %v5092_v45  ;;  %v1714_v50 = vand.u32 2147483648, %v5086_v9  ;;  %vm1743_vm7 = vcmp.eq.f32.partialorder %v1742_v57, 8.507059e+37 }
 0x875   :  { %3923 = vrcp.f32 %v5095_v14 }
 0x876   :  { %v1756_v59 = vsel %vm1755_vm8, %v3906_v37, %v1752_v33  ;;  %vm1713_vm8 = vcmp.eq.f32.partialorder %v1712_v40, 8.507059e+37 }
 0x877   :  { %v5090_v43 = vsel %vm1758_vm5, %v1760_v21, %v1756_v59  ;;  %v3916_v61 = vpop.eup %3915  ;;  %v1715_v21 = vor.u32 1.1754944e-38, %v1714_v50 }
 0x878   :  { %v3918_v15 = vpop.eup %3917  ;;  %v1734_v38 = vmul.f32 %v3916_v61, %v5084_v20  ;;  %vm1739_vm9 = vweird.f32 %v3916_v61 }
 0x879   :  { %v3920_v26 = vpop.eup %3919  ;;  %v1704_v49 = vmul.f32 %v3918_v15, %v5086_v9  ;;  %vm1709_vm10 = vweird.f32 %v3918_v15  ;;  %vm5122_vm11 = vmor %vm1738_vm0, %vm1739_vm9 }
 0x87a   :  { %v5103_v46 = vadd.f32 1.0, %v3920_v26  ;;  %v5105_v28 = vpop.eup %3921  ;;  %v1735_v32 = vsub.f32 1.0, %v1734_v38  ;;  %vm1710_vm6 = vmor %vm1708_vm12, %vm1709_vm10  ;;  %vm1783_vm10 = vweird.f32 %v5092_v45 }
 0x87b   :  { %v1705_v24 = vsub.f32 1.0, %v1704_v49  ;;  %v5108_v19 = vpop.eup %3923  ;;  %v1779_v3 = vmul.f32 %v5105_v28, %v5092_v45  ;;  %vm1784_vm5 = vweird.f32 %v5105_v28  ;;  %v1789_v49 = vand.u32 2147483648, %v5092_v45 }
 0x87c   :  { %3925 = vrcp.f32 %v5103_v46  ;;  %v1736_v52 = vmul.f32 %v3916_v61, %v1735_v32  ;;  %v1764_v37 = vmul.f32 %v5108_v19, %v5095_v14  ;;  %vm1769_vm9 = vweird.f32 %v5108_v19  ;;  %vm1785_vm0 = vmor %vm1783_vm10, %vm1784_vm5 }
 0x87d   :  { %v1706_v42 = vmul.f32 %v3918_v15, %v1705_v24  ;;  %v1780_v34 = vsub.f32 1.0, %v1779_v3  ;;  %v1772_v32 = vand.u32 2147483647, %v5095_v14  ;;  %vm1798_vm5 = vweird.f32 %v5103_v46 }
 0x87e   :  { %v1737_v29 = vadd.f32 %v3916_v61, %v1736_v52  ;;  %v1765_v56 = vsub.f32 1.0, %v1764_v37 }
 0x87f   :  { %v1707_v35 = vadd.f32 %v3918_v15, %v1706_v42  ;;  %v1781_v33 = vmul.f32 %v5105_v28, %v1780_v34  ;;  %v1790_v42 = vor.u32 1.1754944e-38, %v1789_v49 }
 0x880   :  { %v1741_v0 = vsel %vm5122_vm11, %v3916_v61, %v1737_v29  ;;  %v1766_v22 = vmul.f32 %v5108_v19, %v1765_v56  ;;  %vm1768_vm11 = vweird.f32 %v5095_v14 }
 0x881   :  { %v1711_v13 = vsel %vm1710_vm6, %v3918_v15, %v1707_v35  ;;  %v5136_v9 = vsel %vm1743_vm7, %v1745_v53, %v1741_v0  ;;  %vm1770_vm12 = vmor %vm1768_vm11, %vm1769_vm9  ;;  %vm1773_vm7 = vcmp.eq.f32.partialorder %v1772_v32, 8.507059e+37  ;;  %v1802_v35 = vand.u32 2147483647, %v5103_v46 }
 0x882   :  { %v5117_v25 = vpop.eup %3925  ;;  %v1767_v26 = vadd.f32 %v5108_v19, %v1766_v22 }
 0x883   :  { %v1794_v59 = vmul.f32 %v5117_v25, %v5103_v46  ;;  %vm1803_vm10 = vcmp.eq.f32.partialorder %v1802_v35, 8.507059e+37 }
 0x884   :  { %v1771_v3 = vsel %vm1770_vm12, %v5108_v19, %v1767_v26  ;;  %v1804_v19 = vand.u32 2147483648, %v5103_v46 }
 0x885   :  { %v1795_v38 = vsub.f32 1.0, %v1794_v59 }
 0x886   :  { %v1805_v2 = vor.u32 1.1754944e-38, %v1804_v19  ;;  %v1953_v19 = vrot.slane %v5004_v6, 7 }
 0x887   :  { %v1796_v52 = vmul.f32 %v5117_v25, %v1795_v38 }
 0x8a7   :  { %v1830_v44 = vpop.permute.xlu2 %1829 }
 0x8a8   :  { %v1850_v27 = vmul.f32 %v1830_v44, %v5090_v43  ;;  %v5138_v44 = vsel %vm1713_vm8, %v1715_v21, %v1711_v13  ;;  %vm1799_vm8 = vweird.f32 %v5117_v25 }
 0x8a9   :  { %vm1800_vm9 = vmor %vm1798_vm5, %vm1799_vm8 }
 0x8aa   :  { %1869 = vrot.lane.b32.xlu1 %v1850_v27, %s4172_s4  ;;  %v1782_v27 = vadd.f32 %v5105_v28, %v1781_v33 }
 0x8ac   :  { %v1786_v24 = vsel %vm1785_vm0, %v5105_v28, %v1782_v27  ;;  %v1797_v28 = vadd.f32 %v5117_v25, %v1796_v52  ;;  %vm6199_vm0 = vcmask 261120  }
 0x8ae   :  { %v1801_v56 = vsel %vm1800_vm9, %v5117_v25, %v1797_v28 }
 0x8af   :  { %v1826_v7 = vpop.permute.xlu2 %1825  ;;  %v5172_v50 = vsel %vm1803_vm10, %v1805_v2, %v1801_v56  ;;  %v1904_v2 = vsub.f32 1.0, %v5061_v55 }
 0x8b0   :  { %v1848_v5 = vmul.f32 %v1826_v7, %v5061_v55  ;;  %v1774_v7 = vand.u32 2147483648, %v5095_v14 }
 0x8b2   :  { %1865 = vrot.lane.b32.xlu1 %v1848_v5, %s4172_s4  ;;  %v1787_v5 = vand.u32 2147483647, %v5092_v45  ;;  %v1775_v37 = vor.u32 1.1754944e-38, %v1774_v7 }
 0x8b4   :  { %vm1788_vm6 = vcmp.eq.f32.partialorder %v1787_v5, 8.507059e+37  ;;  %v5160_v34 = vsel %vm1773_vm7, %v1775_v37, %v1771_v3 }
 0x8b5   :  { %v1907_v6 = vsub.f32 1.0, %v5160_v34 }
 0x8b7   :  { %v1838_v23 = vpop.permute.xlu2 %1837 }
 0x8b8   :  { %v1854_v8 = vmul.f32 %v1838_v23, %v5066_v1  ;;  %v5158_v23 = vsel %vm1788_vm6, %v1790_v42, %v1786_v24 }
 0x8ba   :  { %1877 = vrot.lane.b32.xlu1 %v1854_v8, %s4172_s4 }
 0x8c1   :  { %v1828_v20 = vpop.permute.xlu0 %1827  ;;  %v1824_v41 = vpop.permute.xlu1 %1823 }
 0x8c2   :  { %v1849_v61 = vmul.f32 %v1828_v20, %v5136_v9  ;;  %v1847_v15 = vmul.f32 %v1824_v41, %v5138_v44 }
 0x8c4   :  { %1867 = vrot.lane.b32.xlu2 %v1849_v61, %s4172_s4  ;;  %1863 = vrot.lane.b32.xlu0 %v1847_v15, %s4172_s4 }
 0x8c9   :  { %v1834_v8 = vpop.permute.xlu0 %1833  ;;  %v1832_v45 = vpop.permute.xlu1 %1831 }
 0x8ca   :  { %v1852_v29 = vmul.f32 %v1834_v8, %v5158_v23  ;;  %v1851_v14 = vmul.f32 %v1832_v45, %v5160_v34  ;;  %v1903_v45 = vsub.f32 1.0, %v5138_v44 }
 0x8cc   :  { %1873 = vrot.lane.b32.xlu2 %v1852_v29, %s4172_s4  ;;  %1871 = vrot.lane.b32.xlu0 %v1851_v14, %s4172_s4  ;;  %v1905_v29 = vsub.f32 1.0, %v5136_v9  ;;  %v1951_v14 = vrot.slane %v4990_v18, 7 }
 0x8ce   :  { %v1966_v56 = vmul.f32 %v1951_v14, %v5138_v44 }
 0x8d1   :  { %v1836_v11 = vpop.permute.xlu1 %1835 }
 0x8d2   :  { %v1853_v57 = vmul.f32 %v1836_v11, %v5172_v50  ;;  %v1955_v11 = vrot.slane %v4999_v10, 7 }
 0x8d4   :  { %1875 = vrot.lane.b32.xlu0 %v1853_v57, %s4172_s4  ;;  %v1954_v57 = vrot.slane %v5001_v63, 7  ;;  %v1971_v55 = vmul.f32 %v1955_v11, %v5158_v23 }
 0x8d6   :  { %v1970_v10 = vmul.f32 %v1954_v57, %v5160_v34 }
 0x91c   :  { %v1870_v40 = vpop.permute.xlu1 %1869 }
 0x91d   :  { %v1890_v33 = vadd.f32 %v1870_v40, %v4382_v12  ;;  %v1906_v40 = vsub.f32 1.0, %v5090_v43 }
 0x91e   :  { %v1868_v0 = vpop.permute.xlu2 %1867 }
 0x91f   :  { %3927 = vtanh.f32 %v1890_v33  ;;  %v1889_v13 = vadd.f32 %v1868_v0, %v4378_v4  ;;  %v1968_v33 = vmul.f32 %v1953_v19, %v5136_v9 }
 0x921   :  { %3929 = vtanh.f32 %v1889_v13 }
 0x924   :  { %v1866_v46 = vpop.permute.xlu1 %1865 }
 0x925   :  { %v3928_v22 = vpop.eup %3927  ;;  %v1888_v25 = vadd.f32 %v1866_v46, %v4374_v62  ;;  %v1908_v46 = vsub.f32 1.0, %v5158_v23 }
 0x926   :  { %v1874_v59 = vpop.permute.xlu2 %1873  ;;  %1925 = vrot.lane.b32.xlu0 %v3928_v22, %s4173_s6 }
 0x927   :  { %v3930_v53 = vpop.eup %3929  ;;  %3931 = vtanh.f32 %v1888_v25  ;;  %v1892_v21 = vadd.f32 %v1874_v59, %v4399_v48 }
 0x928   :  { %1923 = vrot.lane.b32.xlu1 %v3930_v53, %s4173_s6 }
 0x929   :  { %3933 = vtanh.f32 %v1892_v21  ;;  %v1969_v21 = vmul.f32 %v5090_v43, %v1613_v31  ;;  %v1956_v31 = vrot.slane %v5020_v39, 7 }
 0x92b   :  { %v1972_v39 = vmul.f32 %v1956_v31, %v5172_v50 }
 0x92c   :  { %v1878_v20 = vpop.permute.xlu1 %1877 }
 0x92d   :  { %v3932_v41 = vpop.eup %3931  ;;  %v1894_v27 = vadd.f32 %v1878_v20, %v4419_v51 }
 0x92e   :  { %1921 = vrot.lane.b32.xlu0 %v3932_v41, %s4173_s6 }
 0x92f   :  { %v3934_v61 = vpop.eup %3933  ;;  %3935 = vtanh.f32 %v1894_v27 }
 0x930   :  { %1929 = vrot.lane.b32.xlu1 %v3934_v61, %s4173_s6 }
 0x935   :  { %v3936_v15 = vpop.eup %3935 }
 0x936   :  { %1933 = vrot.lane.b32.xlu0 %v3936_v15, %s4173_s6  ;;  %v1864_v26 = vpop.permute.xlu0 %1863 }
 0x937   :  { %v1887_v38 = vadd.f32 %v1864_v26, %v4369_v58 }
 0x939   :  { %3937 = vtanh.f32 %v1887_v38 }
 0x93e   :  { %v1872_v49 = vpop.permute.xlu0 %1871 }
 0x93f   :  { %v3938_v7 = vpop.eup %3937  ;;  %v1891_v5 = vadd.f32 %v1872_v49, %v4389_v36 }
 0x940   :  { %1919 = vrot.lane.b32.xlu2 %v3938_v7, %s4173_s6 }
 0x941   :  { %3939 = vtanh.f32 %v1891_v5  ;;  %v1909_v5 = vsub.f32 1.0, %v5172_v50  ;;  %v5253_v50 = vld [vmem:[%s6183_s7] ss:$0 sm:$0xff] }
 0x946   :  { %v1876_v32 = vpop.permute.xlu0 %1875 }
 0x947   :  { %v3940_v24 = vpop.eup %3939  ;;  %v1893_v3 = vadd.f32 %v1876_v32, %v4409_v47 }
 0x948   :  { %1927 = vrot.lane.b32.xlu2 %v3940_v24, %s4173_s6 }
 0x949   :  { %3941 = vtanh.f32 %v1893_v3 }
 0x94f   :  { %v3942_v52 = vpop.eup %3941 }
 0x950   :  { %1931 = vrot.lane.b32.xlu2 %v3942_v52, %s4173_s6 }
 0x998   :  { %v1926_v42 = vpop.permute.xlu0 %1925 }
 0x999   :  { %v1946_v25 = vmul.f32 %v1926_v42, %v1906_v40 }
 0x99a   :  { %v1924_v37 = vpop.permute.xlu1 %1923  ;;  %v1920_v8 = vpop.permute.xlu2 %1919 }
 0x99b   :  { %v1943_v28 = vmul.f32 %v1920_v8, %v1903_v45  ;;  %v1945_v35 = vmul.f32 %v1924_v37, %v1905_v29  ;;  %v5223_v61 = vadd.f32 %v1969_v21, %v1946_v25 }
 0x99d   :  { %v5202_v13 = vadd.f32 %v1966_v56, %v1943_v28  ;;  %v5206_v22 = vadd.f32 %v1968_v33, %v1945_v35 }
 0x99f   :  { %v1990_v20 = vrot.slane %v5202_v13, 3  ;;  %v1993_v34 = vrot.slane %v5206_v22, 1 }
 0x9a0   :  { %v1922_v0 = vpop.permute.xlu0 %1921 }
 0x9a1   :  { %v1944_v18 = vmul.f32 %v1922_v0, %v1904_v2 }
 0x9a2   :  { %v1930_v44 = vpop.permute.xlu1 %1929  ;;  %v1928_v63 = vpop.permute.xlu2 %1927 }
 0x9a3   :  { %v5211_v59 = vadd.f32 %v5070_v54, %v1944_v18  ;;  %v1948_v9 = vmul.f32 %v1930_v44, %v1908_v46  ;;  %v1947_v53 = vmul.f32 %v1928_v63, %v1907_v6 }
 0x9a5   :  { %v1991_v41 = vrot.slane %v5211_v59, 2  ;;  %v5218_v27 = vadd.f32 %v1971_v55, %v1948_v9  ;;  %v5220_v23 = vadd.f32 %v1970_v10, %v1947_v53 }
 0x9a7   :  { %v1992_v54 = vsel %vm205_vm13, %v1991_v41, %v1990_v20  ;;  %v1996_v15 = vrot.slane %v5220_v23, 7  ;;  %v1998_v38 = vrot.slane %v5218_v27, 6 }
 0x9a8   :  { %v1994_v43 = vsel %vm207_vm14, %v1993_v34, %v1992_v54  ;;  %v1934_v26 = vpop.permute.xlu0 %1933 }
 0x9a9   :  { %v1995_v49 = vsel %vm209_vm15, %v5223_v61, %v1994_v43  ;;  %v1950_v7 = vmul.f32 %v1934_v26, %v1910_v17 }
 0x9aa   :  { %v1997_v32 = vsel %vm211_vm1, %v1996_v15, %v1995_v49  ;;  %v1932_v24 = vpop.permute.xlu2 %1931 }
 0x9ab   :  { %v5238_v1 = vadd.f32 %v5073_v30, %v1950_v7  ;;  %v1949_v3 = vmul.f32 %v1932_v24, %v1909_v5  ;;  %v1999_v52 = vsel %vm213_vm2, %v1998_v38, %v1997_v32 }
 0x9ad   :  { %v5242_v42 = vadd.f32 %v1972_v39, %v1949_v3  ;;  %v2002_v8 = vrot.slane %v5238_v1, 4  ;;  %v2332_v39 = vrot.slane %v5202_v13, 7 }
 0x9af   :  { %v2000_v37 = vrot.slane %v5242_v42, 5 }
 0x9b1   :  { %v2001_v45 = vsel %vm215_vm3, %v2000_v37, %v1999_v52  ;;  %v2335_v52 = vrot.slane %v5223_v61, 7 }
 0x9b2   :  { %v2003_v29 = vsel %vm217_vm4, %v2002_v8, %v2001_v45 }
 0x9b3   :  { %2004 = vrot.lane.b32.xlu1 %v2003_v29, %s4173_s6 }
 0xa25   :  { %v2005_v14 = vpop.permute.xlu1 %2004 }
 0xa26   :  { %3702 = vmatmul.msk.f32.vlgmr.msra.gmra.mxu0 %vm6199_vm0, %v2005_v14 }
 0xaa3   :  { %v2025_v30 = vpop.f32.mrf.mxu0 }
 0xaa4   :  { %v5256_v28 = vadd.f32 %v5253_v50, %v2025_v30 }
 0xaa6   :  { %v2031_v19 = vrot.slane %v5256_v28, 6  ;;  %v2030_v35 = vrot.slane %v5256_v28, 5  ;;  %v2029_v56 = vrot.slane %v5256_v28, 4  ;;  %v2032_v2 = vrot.slane %v5256_v28, 7 }
 0xaa7   :  { %v2033_v0 = vrot.slane %v5256_v28, 1  ;;  %v2035_v55 = vrot.slane %v5256_v28, 3  ;;  %v2034_v10 = vrot.slane %v5256_v28, 2 }
 0xaa8   :  { %2208 = vrot.lane.b32.xlu1 %v2031_v19, %s4172_s4  ;;  %2206 = vrot.lane.b32.xlu0 %v2030_v35, %s4172_s4  ;;  %v2044_v11 = vadd.f32 %v2029_v56, %v4369_v58  ;;  %v2047_v57 = vadd.f32 %v2032_v2, %v4382_v12  ;;  %v2046_v14 = vadd.f32 %v2031_v19, %v4378_v4 }
 0xaa9   :  { %2204 = vrot.lane.b32.xlu2 %v2029_v56, %s4172_s4  ;;  %v2050_v45 = vadd.f32 %v2034_v10, %v4409_v47  ;;  %v2045_v30 = vadd.f32 %v2030_v35, %v4374_v62  ;;  %v2049_v61 = vadd.f32 %v2033_v0, %v4399_v48  ;;  %v2051_v19 = vadd.f32 %v2035_v55, %v4419_v51 }
 0xaaa   :  { %v3703_v40 = vmul.f32 -1.442695, %v2044_v11  ;;  %v3706_v33 = vmul.f32 -1.442695, %v2047_v57  ;;  %v3705_v56 = vmul.f32 -1.442695, %v2046_v14  ;;  %v2048_v11 = vadd.f32 %v5256_v28, %v4389_v36 }
 0xaab   :  { %v3709_v29 = vmul.f32 -1.442695, %v2050_v45  ;;  %v3704_v13 = vmul.f32 -1.442695, %v2045_v30 }
 0xaac   :  { %3943 = vpow2.f32 %v3703_v40  ;;  %v3708_v40 = vmul.f32 -1.442695, %v2049_v61 }
 0xaad   :  { %3945 = vpow2.f32 %v3706_v33  ;;  %v3707_v33 = vmul.f32 -1.442695, %v2048_v11 }
 0xab0   :  { %2212 = vrot.lane.b32.xlu1 %v5256_v28, %s4172_s4  ;;  %2214 = vrot.lane.b32.xlu0 %v2033_v0, %s4172_s4 }
 0xab1   :  { %2210 = vrot.lane.b32.xlu2 %v2032_v2, %s4172_s4 }
 0xab2   :  { %v3944_v18 = vpop.eup %3943 }
 0xab3   :  { %v2076_v46 = vadd.f32 1.0, %v3944_v18  ;;  %v3946_v6 = vpop.eup %3945 }
 0xab4   :  { %v2079_v44 = vadd.f32 1.0, %v3946_v6 }
 0xab5   :  { %3947 = vrcp.f32 %v2076_v46  ;;  %v2095_v17 = vand.u32 2147483648, %v2076_v46  ;;  %vm2089_vm6 = vweird.f32 %v2076_v46  ;;  %v2093_v43 = vand.u32 2147483647, %v2076_v46 }
 0xab6   :  { %3949 = vrcp.f32 %v2079_v44  ;;  %v2140_v26 = vand.u32 2147483648, %v2079_v44  ;;  %vm2134_vm8 = vweird.f32 %v2079_v44  ;;  %v2138_v38 = vand.u32 2147483647, %v2079_v44 }
 0xab7   :  { %v2096_v7 = vor.u32 1.1754944e-38, %v2095_v17  ;;  %vm2094_vm9 = vcmp.eq.f32.partialorder %v2093_v43, 8.507059e+37  ;;  %3951 = vpow2.f32 %v3709_v29 }
 0xab8   :  { %2218 = vrot.lane.b32.xlu0 %v2035_v55, %s4172_s4  ;;  %v2141_v32 = vor.u32 1.1754944e-38, %v2140_v26  ;;  %vm2139_vm10 = vcmp.eq.f32.partialorder %v2138_v38, 8.507059e+37  ;;  %3953 = vpow2.f32 %v3705_v56 }
 0xab9   :  { %2216 = vrot.lane.b32.xlu2 %v2034_v10, %s4172_s4  ;;  %3955 = vpow2.f32 %v3704_v13 }
 0xabb   :  { %v3948_v63 = vpop.eup %3947 }
 0xabc   :  { %v2085_v25 = vmul.f32 %v3948_v63, %v2076_v46  ;;  %v3950_v9 = vpop.eup %3949  ;;  %vm2090_vm11 = vweird.f32 %v3948_v63 }
 0xabd   :  { %v2130_v21 = vmul.f32 %v3950_v9, %v2079_v44  ;;  %vm2135_vm12 = vweird.f32 %v3950_v9  ;;  %vm2091_vm7 = vmor %vm2089_vm6, %vm2090_vm11  ;;  %v3952_v2 = vpop.eup %3951  ;;  %v3710_v44 = vmul.f32 -1.442695, %v2051_v19 }
 0xabe   :  { %v2086_v53 = vsub.f32 1.0, %v2085_v25  ;;  %vm2136_vm5 = vmor %vm2134_vm8, %vm2135_vm12  ;;  %v2082_v57 = vadd.f32 1.0, %v3952_v2  ;;  %v3954_v18 = vpop.eup %3953 }
 0xabf   :  { %v2131_v41 = vsub.f32 1.0, %v2130_v21  ;;  %v3956_v46 = vpop.eup %3955  ;;  %v5295_v35 = vadd.f32 1.0, %v3954_v18 }
 0xac0   :  { %v2087_v20 = vmul.f32 %v3948_v63, %v2086_v53  ;;  %3957 = vrcp.f32 %v2082_v57  ;;  %v5297_v6 = vadd.f32 1.0, %v3956_v46  ;;  %vm2179_vm11 = vweird.f32 %v2082_v57 }
 0xac1   :  { %v2132_v34 = vmul.f32 %v3950_v9, %v2131_v41  ;;  %3959 = vpow2.f32 %v3708_v40  ;;  %v2183_v45 = vand.u32 2147483647, %v2082_v57  ;;  %v2125_v61 = vand.u32 2147483648, %v5295_v35 }
 0xac2   :  { %v2088_v54 = vadd.f32 %v3948_v63, %v2087_v20  ;;  %3961 = vpow2.f32 %v3707_v33 }
 0xac3   :  { %v2133_v31 = vadd.f32 %v3950_v9, %v2132_v34  ;;  %3963 = vrcp.f32 %v5295_v35  ;;  %vm2184_vm6 = vcmp.eq.f32.partialorder %v2183_v45, 8.507059e+37 }
 0xac4   :  { %v2092_v49 = vsel %vm2091_vm7, %v3948_v63, %v2088_v54  ;;  %3965 = vrcp.f32 %v5297_v6 }
 0xac5   :  { %v2137_v5 = vsel %vm2136_vm5, %v3950_v9, %v2133_v31  ;;  %v5276_v24 = vsel %vm2094_vm9, %v2096_v7, %v2092_v49  ;;  %3967 = vpow2.f32 %v3710_v44  ;;  %vm2119_vm5 = vweird.f32 %v5295_v35 }
 0xac6   :  { %v5279_v3 = vsel %vm2139_vm10, %v2141_v32, %v2137_v5  ;;  %v5283_v37 = vmul.f32 %v2332_v39, %v5276_v24  ;;  %v3958_v0 = vpop.eup %3957  ;;  %vm2104_vm10 = vweird.f32 %v5297_v6 }
 0xac7   :  { %v5286_v8 = vmul.f32 %v2335_v52, %v5279_v3  ;;  %v3960_v10 = vpop.eup %3959  ;;  %v2175_v63 = vmul.f32 %v3958_v0, %v2082_v57  ;;  %vm2180_vm0 = vweird.f32 %v3958_v0  ;;  %v2185_v52 = vand.u32 2147483648, %v2082_v57 }
 0xac8   :  { %v3962_v28 = vpop.eup %3961  ;;  %v5301_v25 = vadd.f32 1.0, %v3960_v10  ;;  %vm2181_vm12 = vmor %vm2179_vm11, %vm2180_vm0  ;;  %v2110_v10 = vand.u32 2147483648, %v5297_v6 }
 0xac9   :  { %v5303_v9 = vadd.f32 1.0, %v3962_v28  ;;  %v5305_v55 = vpop.eup %3963  ;;  %v2176_v41 = vsub.f32 1.0, %v2175_v63  ;;  %v2186_v2 = vor.u32 1.1754944e-38, %v2185_v52  ;;  %v2108_v28 = vand.u32 2147483647, %v5297_v6 }
 0xaca   :  { %v5307_v21 = vpop.eup %3965  ;;  %3969 = vrcp.f32 %v5301_v25  ;;  %v2115_v54 = vmul.f32 %v5305_v55, %v5295_v35  ;;  %vm2120_vm7 = vweird.f32 %v5305_v55  ;;  %v2170_v52 = vand.u32 2147483648, %v5301_v25 }
 0xacb   :  { %v3968_v34 = vpop.eup %3967  ;;  %3971 = vrcp.f32 %v5303_v9  ;;  %v2100_v17 = vmul.f32 %v5307_v21, %v5297_v6  ;;  %v2177_v31 = vmul.f32 %v3958_v0, %v2176_v41  ;;  %vm2105_vm8 = vweird.f32 %v5307_v21  ;;  %vm2121_vm9 = vmor %vm2119_vm5, %vm2120_vm7 }
 0xacc   :  { %v5317_v43 = vadd.f32 1.0, %v3968_v34  ;;  %v2116_v26 = vsub.f32 1.0, %v2115_v54  ;;  %vm2106_vm0 = vmor %vm2104_vm10, %vm2105_vm8  ;;  %v2111_v54 = vor.u32 1.1754944e-38, %v2110_v10  ;;  %vm2149_vm8 = vweird.f32 %v5303_v9 }
 0xacd   :  { %v2101_v7 = vsub.f32 1.0, %v2100_v17  ;;  %v2178_v39 = vadd.f32 %v3958_v0, %v2177_v31  ;;  %v2153_v45 = vand.u32 2147483647, %v5303_v9 }
 0xace   :  { %3973 = vrcp.f32 %v5317_v43  ;;  %v2117_v29 = vmul.f32 %v5305_v55, %v2116_v26 }
 0xacf   :  { %v2102_v30 = vmul.f32 %v5307_v21, %v2101_v7  ;;  %v2182_v13 = vsel %vm2181_vm12, %v3958_v0, %v2178_v39  ;;  %v2123_v0 = vand.u32 2147483647, %v5295_v35  ;;  %vm2109_vm12 = vcmp.eq.f32.partialorder %v2108_v28, 8.507059e+37 }
 0xad0   :  { %v5319_v38 = vpop.eup %3969  ;;  %v2118_v11 = vadd.f32 %v5305_v55, %v2117_v29  ;;  %v5337_v33 = vsel %vm2184_vm6, %v2186_v2, %v2182_v13  ;;  %v2155_v39 = vand.u32 2147483648, %v5303_v9  ;;  %v2168_v29 = vand.u32 2147483647, %v5301_v25 }
 0xad1   :  { %v5321_v5 = vpop.eup %3971  ;;  %v2160_v14 = vmul.f32 %v5319_v38, %v5301_v25  ;;  %v2103_v46 = vadd.f32 %v5307_v21, %v2102_v30  ;;  %vm2124_vm11 = vcmp.eq.f32.partialorder %v2123_v0, 8.507059e+37  ;;  %vm2165_vm7 = vweird.f32 %v5319_v38 }
 0xad2   :  { %v2145_v56 = vmul.f32 %v5321_v5, %v5303_v9  ;;  %v2122_v63 = vsel %vm2121_vm9, %v5305_v55, %v2118_v11  ;;  %vm2150_vm6 = vweird.f32 %v5321_v5  ;;  %vm2164_vm9 = vweird.f32 %v5301_v25 }
 0xad3   :  { %v2161_v57 = vsub.f32 1.0, %v2160_v14  ;;  %v2107_v41 = vsel %vm2106_vm0, %v5307_v21, %v2103_v46  ;;  %vm2151_vm5 = vmor %vm2149_vm8, %vm2150_vm6  ;;  %v2156_v13 = vor.u32 1.1754944e-38, %v2155_v39  ;;  %v2171_v2 = vor.u32 1.1754944e-38, %v2170_v52 }
 0xad4   :  { %v5335_v40 = vpop.eup %3973  ;;  %v2146_v19 = vsub.f32 1.0, %v2145_v56  ;;  %v5356_v26 = vsel %vm2109_vm12, %v2111_v54, %v2107_v41  ;;  %vm2166_vm10 = vmor %vm2164_vm9, %vm2165_vm7  ;;  %vm2154_vm0 = vcmp.eq.f32.partialorder %v2153_v45, 8.507059e+37  ;;  %vm2194_vm6 = vweird.f32 %v5317_v43 }
 0xad5   :  { %v2190_v35 = vmul.f32 %v5335_v40, %v5317_v43  ;;  %vm2195_vm12 = vweird.f32 %v5335_v40  ;;  %v2198_v46 = vand.u32 2147483647, %v5317_v43 }
 0xad6   :  { %v2147_v34 = vmul.f32 %v5321_v5, %v2146_v19  ;;  %vm2196_vm7 = vmor %vm2194_vm6, %vm2195_vm12 }
 0xad7   :  { %vm2199_vm8 = vcmp.eq.f32.partialorder %v2198_v46, 8.507059e+37 }
 0xad8   :  { %v2148_v7 = vadd.f32 %v5321_v5, %v2147_v34 }
 0xada   :  { %v2152_v14 = vsel %vm2151_vm5, %v5321_v5, %v2148_v7  ;;  %vm6200_vm5 = vcmask 261120  }
 0xb03   :  { %v2205_v53 = vpop.permute.xlu2 %2204 }
 0xb04   :  { %v2228_v20 = vmul.f32 %v2205_v53, %v5276_v24  ;;  %v2162_v53 = vmul.f32 %v5319_v38, %v2161_v57 }
 0xb06   :  { %2244 = vrot.lane.b32.xlu1 %v2228_v20, %s4172_s4  ;;  %v2126_v20 = vor.u32 1.1754944e-38, %v2125_v61  ;;  %v2163_v55 = vadd.f32 %v5319_v38, %v2162_v53  ;;  %v5375_v61 = vsel %vm2154_vm0, %v2156_v13, %v2152_v14 }
 0xb08   :  { %v5354_v17 = vsel %vm2124_vm11, %v2126_v20, %v2122_v63  ;;  %v2167_v30 = vsel %vm2166_vm10, %v5319_v38, %v2163_v55  ;;  %vm2169_vm11 = vcmp.eq.f32.partialorder %v2168_v29, 8.507059e+37  ;;  %v2200_v38 = vand.u32 2147483648, %v5317_v43 }
 0xb09   :  { %v5377_v57 = vsel %vm2169_vm11, %v2171_v2, %v2167_v30  ;;  %v2334_v2 = vrot.slane %v5206_v22, 7 }
 0xb0b   :  { %v2211_v49 = vpop.permute.xlu2 %2210  ;;  %v2349_v46 = vmul.f32 %v2334_v2, %v5354_v17 }
 0xb0c   :  { %v2231_v32 = vmul.f32 %v2211_v49, %v5279_v3 }
 0xb0e   :  { %2250 = vrot.lane.b32.xlu1 %v2231_v32, %s4172_s4  ;;  %v2191_v32 = vsub.f32 1.0, %v2190_v35 }
 0xb10   :  { %v2192_v56 = vmul.f32 %v5335_v40, %v2191_v32 }
 0xb12   :  { %v2193_v5 = vadd.f32 %v5335_v40, %v2192_v56 }
 0xb13   :  { %v2217_v18 = vpop.permute.xlu2 %2216 }
 0xb14   :  { %v2234_v44 = vmul.f32 %v2217_v18, %v5337_v33  ;;  %v2197_v19 = vsel %vm2196_vm7, %v5335_v40, %v2193_v5  ;;  %v2284_v5 = vsub.f32 1.0, %v5276_v24 }
 0xb16   :  { %2256 = vrot.lane.b32.xlu1 %v2234_v44, %s4172_s4  ;;  %v2201_v44 = vor.u32 1.1754944e-38, %v2200_v38 }
 0xb18   :  { %v5389_v0 = vsel %vm2199_vm8, %v2201_v44, %v2197_v19 }
 0xb1a   :  { %v2209_v6 = vpop.permute.xlu1 %2208  ;;  %v2207_v31 = vpop.permute.xlu0 %2206 }
 0xb1b   :  { %v2230_v21 = vmul.f32 %v2209_v6, %v5354_v17  ;;  %v2229_v49 = vmul.f32 %v2207_v31, %v5356_v26 }
 0xb1d   :  { %2248 = vrot.lane.b32.xlu0 %v2230_v21, %s4172_s4  ;;  %2246 = vrot.lane.b32.xlu2 %v2229_v49, %s4172_s4 }
 0xb22   :  { %v2213_v11 = vpop.permute.xlu1 %2212  ;;  %v2215_v9 = vpop.permute.xlu0 %2214 }
 0xb23   :  { %v2232_v18 = vmul.f32 %v2213_v11, %v5375_v61  ;;  %v2233_v25 = vmul.f32 %v2215_v9, %v5377_v57  ;;  %v2333_v11 = vrot.slane %v5211_v59, 7  ;;  %v2286_v9 = vsub.f32 1.0, %v5354_v17 }
 0xb25   :  { %2252 = vrot.lane.b32.xlu0 %v2232_v18, %s4172_s4  ;;  %2254 = vrot.lane.b32.xlu2 %v2233_v25, %s4172_s4  ;;  %v2285_v18 = vsub.f32 1.0, %v5356_v26 }
 0xb2a   :  { %v2219_v10 = vpop.permute.xlu0 %2218 }
 0xb2b   :  { %v2235_v28 = vmul.f32 %v2219_v10, %v5389_v0  ;;  %v2348_v10 = vmul.f32 %v2333_v11, %v5356_v26 }
 0xb2d   :  { %2258 = vrot.lane.b32.xlu2 %v2235_v28, %s4172_s4 }
 0xb77   :  { %v2247_v63 = vpop.permute.xlu2 %2246 }
 0xb78   :  { %v2269_v53 = vadd.f32 %v2247_v63, %v4374_v62  ;;  %v2245_v20 = vpop.permute.xlu1 %2244 }
 0xb79   :  { %v2268_v41 = vadd.f32 %v2245_v20, %v4369_v58 }
 0xb7a   :  { %3975 = vtanh.f32 %v2269_v53 }
 0xb7b   :  { %3977 = vtanh.f32 %v2268_v41 }
 0xb7f   :  { %v2255_v43 = vpop.permute.xlu2 %2254 }
 0xb80   :  { %v3976_v34 = vpop.eup %3975  ;;  %v2273_v40 = vadd.f32 %v2255_v43, %v4399_v48  ;;  %v2251_v35 = vpop.permute.xlu1 %2250  ;;  %v2287_v43 = vsub.f32 1.0, %v5279_v3  ;;  %v2338_v3 = vrot.slane %v5238_v1, 7 }
 0xb81   :  { %v3978_v54 = vpop.eup %3977  ;;  %v2271_v6 = vadd.f32 %v2251_v35, %v4382_v12  ;;  %2302 = vrot.lane.b32.xlu1 %v3976_v34, %s4173_s6 }
 0xb82   :  { %3979 = vtanh.f32 %v2273_v40  ;;  %2300 = vrot.lane.b32.xlu0 %v3978_v54, %s4173_s6  ;;  %v2354_v1 = vmul.f32 %v2338_v3, %v5389_v0 }
 0xb83   :  { %3981 = vtanh.f32 %v2271_v6  ;;  %v2289_v6 = vsub.f32 1.0, %v5377_v57 }
 0xb87   :  { %v2259_v31 = vpop.permute.xlu2 %2258 }
 0xb88   :  { %v3980_v55 = vpop.eup %3979  ;;  %v2275_v21 = vadd.f32 %v2259_v31, %v4419_v51  ;;  %v2257_v49 = vpop.permute.xlu1 %2256 }
 0xb89   :  { %v3982_v7 = vpop.eup %3981  ;;  %v2274_v32 = vadd.f32 %v2257_v49, %v4409_v47  ;;  %2310 = vrot.lane.b32.xlu1 %v3980_v55, %s4173_s6  ;;  %v2336_v55 = vrot.slane %v5218_v27, 7  ;;  %v2290_v27 = vsub.f32 1.0, %v5337_v33 }
 0xb8a   :  { %3983 = vtanh.f32 %v2275_v21  ;;  %2306 = vrot.lane.b32.xlu0 %v3982_v7, %s4173_s6 }
 0xb8b   :  { %3985 = vtanh.f32 %v2274_v32  ;;  %v2352_v32 = vmul.f32 %v2336_v55, %v5377_v57 }
 0xb8f   :  { %v2249_v39 = vpop.permute.xlu0 %2248 }
 0xb90   :  { %v3984_v52 = vpop.eup %3983  ;;  %v2270_v45 = vadd.f32 %v2249_v39, %v4378_v4  ;;  %v2291_v39 = vsub.f32 1.0, %v5389_v0 }
 0xb91   :  { %v3986_v29 = vpop.eup %3985  ;;  %2314 = vrot.lane.b32.xlu1 %v3984_v52, %s4173_s6  ;;  %v2337_v52 = vrot.slane %v5242_v42, 7 }
 0xb92   :  { %3987 = vtanh.f32 %v2270_v45  ;;  %2312 = vrot.lane.b32.xlu0 %v3986_v29, %s4173_s6  ;;  %v2351_v45 = vmul.f32 %v5375_v61, %v1996_v15 }
 0xb97   :  { %v2253_v14 = vpop.permute.xlu0 %2252 }
 0xb98   :  { %v3988_v30 = vpop.eup %3987  ;;  %v2272_v56 = vadd.f32 %v2253_v14, %v4389_v36 }
 0xb99   :  { %2304 = vrot.lane.b32.xlu2 %v3988_v30, %s4173_s6 }
 0xb9a   :  { %3989 = vtanh.f32 %v2272_v56 }
 0xba0   :  { %v3990_v13 = vpop.eup %3989 }
 0xba1   :  { %2308 = vrot.lane.b32.xlu2 %v3990_v13, %s4173_s6  ;;  %v2353_v13 = vmul.f32 %v2337_v52, %v5337_v33 }
 0xbf3   :  { %v2305_v25 = vpop.permute.xlu2 %2304  ;;  %v2303_v38 = vpop.permute.xlu1 %2302 }
 0xbf4   :  { %v2326_v19 = vmul.f32 %v2305_v25, %v2286_v9  ;;  %v2301_v44 = vpop.permute.xlu0 %2300  ;;  %v2325_v28 = vmul.f32 %v2303_v38, %v2285_v18 }
 0xbf5   :  { %v2324_v63 = vmul.f32 %v2301_v44, %v2284_v5 }
 0xbf6   :  { %v5416_v53 = vadd.f32 %v2349_v46, %v2326_v19  ;;  %v5418_v22 = vadd.f32 %v2348_v10, %v2325_v28 }
 0xbf7   :  { %v5421_v59 = vadd.f32 %v5283_v37, %v2324_v63  ;;  %v2288_v37 = vsub.f32 1.0, %v5375_v61 }
 0xbf8   :  { %v2374_v20 = vrot.slane %v5416_v53, 2  ;;  %v2372_v24 = vrot.slane %v5418_v22, 3 }
 0xbf9   :  { %v2371_v41 = vrot.slane %v5421_v59, 4 }
 0xbfb   :  { %v2373_v17 = vsel %vm205_vm13, %v2372_v24, %v2371_v41  ;;  %v2311_v26 = vpop.permute.xlu1 %2310  ;;  %v2309_v54 = vpop.permute.xlu2 %2308 }
 0xbfc   :  { %v2307_v34 = vpop.permute.xlu0 %2306  ;;  %v2375_v40 = vsel %vm207_vm14, %v2374_v20, %v2373_v17  ;;  %v2329_v21 = vmul.f32 %v2311_v26, %v2289_v6  ;;  %v2328_v49 = vmul.f32 %v2309_v54, %v2288_v37 }
 0xbfd   :  { %v2327_v35 = vmul.f32 %v2307_v34, %v2287_v43 }
 0xbfe   :  { %v5445_v14 = vadd.f32 %v2352_v32, %v2329_v21  ;;  %v5448_v57 = vadd.f32 %v2351_v45, %v2328_v49 }
 0xbff   :  { %v5432_v31 = vadd.f32 %v5286_v8, %v2327_v35 }
 0xc00   :  { %v2379_v61 = vrot.slane %v5445_v14, 7 }
 0xc01   :  { %v2376_v7 = vrot.slane %v5432_v31, 1 }
 0xc03   :  { %v2377_v8 = vsel %vm209_vm15, %v2376_v7, %v2375_v40  ;;  %v2315_v29 = vpop.permute.xlu1 %2314 }
 0xc04   :  { %v2313_v30 = vpop.permute.xlu0 %2312  ;;  %v2331_v56 = vmul.f32 %v2315_v29, %v2291_v39  ;;  %v2378_v15 = vsel %vm211_vm1, %v5448_v57, %v2377_v8 }
 0xc05   :  { %v2330_v42 = vmul.f32 %v2313_v30, %v2290_v27  ;;  %v2380_v0 = vsel %vm213_vm2, %v2379_v61, %v2378_v15 }
 0xc06   :  { %v5451_v2 = vadd.f32 %v2354_v1, %v2331_v56  ;;  %v2715_v56 = vrot.slane %v5416_v53, 7 }
 0xc07   :  { %v5453_v23 = vadd.f32 %v2353_v13, %v2330_v42 }
 0xc08   :  { %v2383_v11 = vrot.slane %v5451_v2, 5 }
 0xc09   :  { %v2381_v9 = vrot.slane %v5453_v23, 6 }
 0xc0b   :  { %v2382_v33 = vsel %vm215_vm3, %v2381_v9, %v2380_v0 }
 0xc0c   :  { %v2384_v18 = vsel %vm217_vm4, %v2383_v11, %v2382_v33  ;;  %v2718_v11 = vrot.slane %v5453_v23, 7 }
 0xc0d   :  { %2385 = vrot.lane.b32.xlu2 %v2384_v18, %s4173_s6 }
 0xc67   :  { %v2386_v25 = vpop.permute.xlu2 %2385 }
 0xc68   :  { %3711 = vmatmul.msk.f32.vlgmr.msrb.gmra.mxu3 %vm6200_vm5, %v2386_v25 }
 0xceb   :  { %v2406_v5 = vpop.f32.mrf.mxu3 }
 0xcec   :  { %v5468_v38 = vadd.f32 %v5253_v50, %v2406_v5 }
 0xcee   :  { %v2412_v46 = vrot.slane %v5468_v38, 5  ;;  %v2411_v19 = vrot.slane %v5468_v38, 4  ;;  %v2410_v44 = vrot.slane %v5468_v38, 3  ;;  %v2415_v10 = vrot.slane %v5468_v38, 1 }
 0xcef   :  { %v2414_v24 = vrot.slane %v5468_v38, 7  ;;  %v2413_v41 = vrot.slane %v5468_v38, 6  ;;  %v2416_v40 = vrot.slane %v5468_v38, 2 }
 0xcf0   :  { %2589 = vrot.lane.b32.xlu2 %v2412_v46, %s4172_s4  ;;  %v2427_v28 = vadd.f32 %v2412_v46, %v4378_v4  ;;  %2587 = vrot.lane.b32.xlu1 %v2411_v19, %s4172_s4  ;;  %v2431_v63 = vadd.f32 %v2415_v10, %v4409_v47  ;;  %v2426_v0 = vadd.f32 %v2411_v19, %v4374_v62 }
 0xcf1   :  { %2585 = vrot.lane.b32.xlu0 %v2410_v44, %s4172_s4  ;;  %v2425_v33 = vadd.f32 %v2410_v44, %v4369_v58  ;;  %v2429_v53 = vadd.f32 %v2414_v24, %v4389_v36  ;;  %v2428_v5 = vadd.f32 %v2413_v41, %v4382_v12  ;;  %v2432_v23 = vadd.f32 %v2416_v40, %v4419_v51 }
 0xcf2   :  { %v3714_v50 = vmul.f32 -1.442695, %v2427_v28  ;;  %v3718_v20 = vmul.f32 -1.442695, %v2431_v63  ;;  %v3713_v18 = vmul.f32 -1.442695, %v2426_v0  ;;  %v2430_v19 = vadd.f32 %v5468_v38, %v4399_v48 }
 0xcf3   :  { %v3712_v25 = vmul.f32 -1.442695, %v2425_v33  ;;  %v3716_v46 = vmul.f32 -1.442695, %v2429_v53 }
 0xcf4   :  { %3991 = vpow2.f32 %v3714_v50 }
 0xcf5   :  { %3993 = vpow2.f32 %v3718_v20  ;;  %v3719_v20 = vmul.f32 -1.442695, %v2432_v23 }
 0xcf8   :  { %2597 = vrot.lane.b32.xlu2 %v2415_v10, %s4172_s4  ;;  %2593 = vrot.lane.b32.xlu1 %v2414_v24, %s4172_s4  ;;  %v3715_v10 = vmul.f32 -1.442695, %v2428_v5  ;;  %v3717_v24 = vmul.f32 -1.442695, %v2430_v19 }
 0xcf9   :  { %2591 = vrot.lane.b32.xlu0 %v2413_v41, %s4172_s4 }
 0xcfa   :  { %v3992_v17 = vpop.eup %3991 }
 0xcfb   :  { %v2459_v43 = vadd.f32 1.0, %v3992_v17  ;;  %v3994_v26 = vpop.eup %3993 }
 0xcfc   :  { %v2463_v34 = vadd.f32 1.0, %v3994_v26 }
 0xcfd   :  { %3995 = vrcp.f32 %v2459_v43  ;;  %v2506_v3 = vand.u32 2147483648, %v2459_v43  ;;  %vm2500_vm10 = vweird.f32 %v2459_v43  ;;  %v2504_v39 = vand.u32 2147483647, %v2459_v43 }
 0xcfe   :  { %3997 = vrcp.f32 %v2463_v34  ;;  %v2566_v8 = vand.u32 2147483648, %v2463_v34  ;;  %vm2560_vm12 = vweird.f32 %v2463_v34  ;;  %v2564_v29 = vand.u32 2147483647, %v2463_v34 }
 0xcff   :  { %v2507_v27 = vor.u32 1.1754944e-38, %v2506_v3  ;;  %vm2505_vm6 = vcmp.eq.f32.partialorder %v2504_v39, 8.507059e+37  ;;  %3999 = vpow2.f32 %v3713_v18 }
 0xd00   :  { %2599 = vrot.lane.b32.xlu1 %v2416_v40, %s4172_s4  ;;  %v2567_v13 = vor.u32 1.1754944e-38, %v2566_v8  ;;  %vm2565_vm8 = vcmp.eq.f32.partialorder %v2564_v29, 8.507059e+37  ;;  %4001 = vpow2.f32 %v3712_v25 }
 0xd01   :  { %2595 = vrot.lane.b32.xlu0 %v5468_v38, %s4172_s4  ;;  %4003 = vpow2.f32 %v3716_v46 }
 0xd02   :  { %4005 = vpow2.f32 %v3715_v10 }
 0xd03   :  { %v3996_v35 = vpop.eup %3995 }
 0xd04   :  { %v2496_v54 = vmul.f32 %v3996_v35, %v2459_v43  ;;  %v3998_v6 = vpop.eup %3997  ;;  %vm2501_vm9 = vweird.f32 %v3996_v35 }
 0xd05   :  { %v2556_v55 = vmul.f32 %v3998_v6, %v2463_v34  ;;  %vm2502_vm0 = vmor %vm2500_vm10, %vm2501_vm9  ;;  %vm2561_vm11 = vweird.f32 %v3998_v6  ;;  %v4000_v28 = vpop.eup %3999 }
 0xd06   :  { %v2497_v37 = vsub.f32 1.0, %v2496_v54  ;;  %vm2562_vm7 = vmor %vm2560_vm12, %vm2561_vm11  ;;  %v4002_v63 = vpop.eup %4001  ;;  %v5505_v50 = vadd.f32 1.0, %v4000_v28 }
 0xd07   :  { %v2557_v49 = vsub.f32 1.0, %v2556_v55  ;;  %v5509_v44 = vadd.f32 1.0, %v4002_v63  ;;  %v4004_v41 = vpop.eup %4003 }
 0xd08   :  { %v2498_v21 = vmul.f32 %v3996_v35, %v2497_v37  ;;  %4007 = vrcp.f32 %v5505_v50  ;;  %v4006_v17 = vpop.eup %4005  ;;  %v5513_v43 = vadd.f32 1.0, %v4004_v41  ;;  %v2491_v0 = vand.u32 2147483648, %v5505_v50 }
 0xd09   :  { %v2558_v32 = vmul.f32 %v3998_v6, %v2557_v49  ;;  %4009 = vrcp.f32 %v5509_v44  ;;  %v5515_v34 = vadd.f32 1.0, %v4006_v17  ;;  %vm2485_vm10 = vweird.f32 %v5505_v50 }
 0xd0a   :  { %v2499_v7 = vadd.f32 %v3996_v35, %v2498_v21  ;;  %4011 = vpow2.f32 %v3719_v20  ;;  %v2489_v53 = vand.u32 2147483647, %v5505_v50  ;;  %v2476_v5 = vand.u32 2147483648, %v5509_v44 }
 0xd0b   :  { %v2559_v52 = vadd.f32 %v3998_v6, %v2558_v32  ;;  %4013 = vpow2.f32 %v3717_v24  ;;  %vm2470_vm11 = vweird.f32 %v5509_v44  ;;  %v2474_v46 = vand.u32 2147483647, %v5509_v44 }
 0xd0c   :  { %v2503_v45 = vsel %vm2502_vm0, %v3996_v35, %v2499_v7  ;;  %4015 = vrcp.f32 %v5513_v43  ;;  %v2492_v19 = vor.u32 1.1754944e-38, %v2491_v0 }
 0xd0d   :  { %v5488_v30 = vsel %vm2505_vm6, %v2507_v27, %v2503_v45  ;;  %v2563_v1 = vsel %vm2562_vm7, %v3998_v6, %v2559_v52  ;;  %4017 = vrcp.f32 %v5515_v34  ;;  %vm2490_vm6 = vcmp.eq.f32.partialorder %v2489_v53, 8.507059e+37 }
 0xd0e   :  { %v5491_v42 = vsel %vm2565_vm8, %v2567_v13, %v2563_v1  ;;  %v5494_v15 = vmul.f32 %v2715_v56, %v5488_v30  ;;  %v4008_v38 = vpop.eup %4007  ;;  %vm2475_vm7 = vcmp.eq.f32.partialorder %v2474_v46, 8.507059e+37 }
 0xd0f   :  { %v5498_v9 = vmul.f32 %v2718_v11, %v5491_v42  ;;  %v4010_v35 = vpop.eup %4009  ;;  %v2481_v6 = vmul.f32 %v4008_v38, %v5505_v50  ;;  %vm2486_vm5 = vweird.f32 %v4008_v38 }
 0xd10   :  { %v4012_v54 = vpop.eup %4011  ;;  %v2466_v55 = vmul.f32 %v4010_v35, %v5509_v44  ;;  %vm2471_vm9 = vweird.f32 %v4010_v35  ;;  %vm2487_vm0 = vmor %vm2485_vm10, %vm2486_vm5  ;;  %v2477_v44 = vor.u32 1.1754944e-38, %v2476_v5 }
 0xd11   :  { %v4014_v37 = vpop.eup %4013  ;;  %v5523_v21 = vadd.f32 1.0, %v4012_v54  ;;  %v2482_v3 = vsub.f32 1.0, %v2481_v6  ;;  %vm5549_vm12 = vmor %vm2470_vm11, %vm2471_vm9  ;;  %vm2530_vm9 = vweird.f32 %v5513_v43 }
 0xd12   :  { %v5526_v32 = vadd.f32 1.0, %v4014_v37  ;;  %v5528_v39 = vpop.eup %4015  ;;  %v2467_v52 = vsub.f32 1.0, %v2466_v55 }
 0xd13   :  { %v5530_v45 = vpop.eup %4017  ;;  %4019 = vrcp.f32 %v5523_v21  ;;  %v2483_v8 = vmul.f32 %v4008_v38, %v2482_v3  ;;  %v2526_v27 = vmul.f32 %v5528_v39, %v5513_v43  ;;  %vm2531_vm8 = vweird.f32 %v5528_v39 }
 0xd14   :  { %4021 = vrcp.f32 %v5526_v32  ;;  %v2468_v29 = vmul.f32 %v4010_v35, %v2467_v52  ;;  %v2511_v1 = vmul.f32 %v5530_v45, %v5515_v34  ;;  %vm2516_vm5 = vweird.f32 %v5530_v45  ;;  %vm2532_vm10 = vmor %vm2530_vm9, %vm2531_vm8 }
 0xd15   :  { %v2484_v56 = vadd.f32 %v4008_v38, %v2483_v8  ;;  %v2527_v13 = vsub.f32 1.0, %v2526_v27  ;;  %v2521_v3 = vand.u32 2147483648, %v5515_v34  ;;  %v2519_v52 = vand.u32 2147483647, %v5515_v34 }
 0xd16   :  { %v2469_v33 = vadd.f32 %v4010_v35, %v2468_v29  ;;  %v2512_v18 = vsub.f32 1.0, %v2511_v1  ;;  %v2579_v46 = vand.u32 2147483647, %v5523_v21  ;;  %v2549_v28 = vand.u32 2147483647, %v5526_v32 }
 0xd17   :  { %v2488_v10 = vsel %vm2487_vm0, %v4008_v38, %v2484_v56  ;;  %v2528_v63 = vmul.f32 %v5528_v39, %v2527_v13  ;;  %vm2515_vm0 = vweird.f32 %v5515_v34  ;;  %v2522_v56 = vor.u32 1.1754944e-38, %v2521_v3 }
 0xd18   :  { %v2473_v50 = vsel %vm5549_vm12, %v4010_v35, %v2469_v33  ;;  %v2513_v20 = vmul.f32 %v5530_v45, %v2512_v18  ;;  %v5561_v17 = vsel %vm2490_vm6, %v2492_v19, %v2488_v10  ;;  %vm2517_vm11 = vmor %vm2515_vm0, %vm2516_vm5  ;;  %vm2520_vm6 = vcmp.eq.f32.partialorder %v2519_v52, 8.507059e+37 }
 0xd19   :  { %v5539_v11 = vpop.eup %4019  ;;  %v5566_v54 = vsel %vm2475_vm7, %v2477_v44, %v2473_v50  ;;  %v2529_v35 = vadd.f32 %v5528_v39, %v2528_v63  ;;  %vm2575_vm5 = vweird.f32 %v5523_v21  ;;  %v2551_v10 = vand.u32 2147483648, %v5526_v32 }
 0xd1a   :  { %v5542_v25 = vpop.eup %4021  ;;  %v2571_v23 = vmul.f32 %v5539_v11, %v5523_v21  ;;  %v2514_v55 = vadd.f32 %v5530_v45, %v2513_v20  ;;  %vm2576_vm7 = vweird.f32 %v5539_v11 }
 0xd1b   :  { %v2541_v24 = vmul.f32 %v5542_v25, %v5526_v32  ;;  %v2533_v8 = vsel %vm2532_vm10, %v5528_v39, %v2529_v35  ;;  %vm2546_vm8 = vweird.f32 %v5542_v25  ;;  %vm2577_vm9 = vmor %vm2575_vm5, %vm2576_vm7  ;;  %vm2545_vm10 = vweird.f32 %v5526_v32 }
 0xd1c   :  { %v2572_v6 = vsub.f32 1.0, %v2571_v23  ;;  %v2518_v1 = vsel %vm2517_vm11, %v5530_v45, %v2514_v55  ;;  %v2581_v45 = vand.u32 2147483648, %v5523_v21  ;;  %vm2547_vm0 = vmor %vm2545_vm10, %vm2546_vm8  ;;  %vm2580_vm11 = vcmp.eq.f32.partialorder %v2579_v46, 8.507059e+37 }
 0xd1d   :  { %v5588_v18 = vsel %vm2520_vm6, %v2522_v56, %v2518_v1  ;;  %v2552_v50 = vor.u32 1.1754944e-38, %v2551_v10  ;;  %v2666_v46 = vsub.f32 1.0, %v5561_v17  ;;  %v2713_v10 = vrot.slane %v5421_v59, 7 }
 0xd1e   :  { %v2573_v27 = vmul.f32 %v5539_v11, %v2572_v6  ;;  %v2582_v23 = vor.u32 1.1754944e-38, %v2581_v45  ;;  %v2714_v45 = vrot.slane %v5418_v22, 7  ;;  %vm6203_vm6 = vcmask 261120  }
 0xd20   :  { %v2574_v39 = vadd.f32 %v5539_v11, %v2573_v27 }
 0xd22   :  { %v2578_v63 = vsel %vm2577_vm9, %v5539_v11, %v2574_v39 }
 0xd23   :  { %v5605_v20 = vsel %vm2580_vm11, %v2582_v23, %v2578_v63  ;;  %v2665_v63 = vsub.f32 1.0, %v5566_v54 }
 0xd4a   :  { %v2590_v26 = vpop.permute.xlu2 %2589 }
 0xd4b   :  { %v2611_v40 = vmul.f32 %v2590_v26, %v5488_v30  ;;  %v2536_v26 = vand.u32 2147483648, %v5513_v43 }
 0xd4d   :  { %2629 = vrot.lane.b32.xlu1 %v2611_v40, %s4172_s4  ;;  %v2537_v29 = vor.u32 1.1754944e-38, %v2536_v26 }
 0xd52   :  { %v2598_v49 = vpop.permute.xlu2 %2597 }
 0xd53   :  { %v2615_v7 = vmul.f32 %v2598_v49, %v5491_v42  ;;  %v2542_v49 = vsub.f32 1.0, %v2541_v24 }
 0xd55   :  { %2637 = vrot.lane.b32.xlu1 %v2615_v7, %s4172_s4  ;;  %v2534_v7 = vand.u32 2147483647, %v5513_v43  ;;  %v2543_v43 = vmul.f32 %v5542_v25, %v2542_v49 }
 0xd57   :  { %vm2535_vm12 = vcmp.eq.f32.partialorder %v2534_v7, 8.507059e+37  ;;  %v2544_v5 = vadd.f32 %v5542_v25, %v2543_v43 }
 0xd58   :  { %v5585_v13 = vsel %vm2535_vm12, %v2537_v29, %v2533_v8  ;;  %vm2550_vm12 = vcmp.eq.f32.partialorder %v2549_v28, 8.507059e+37 }
 0xd59   :  { %v2548_v19 = vsel %vm2547_vm0, %v5542_v25, %v2544_v5  ;;  %v2667_v5 = vsub.f32 1.0, %v5488_v30 }
 0xd5a   :  { %v5608_v44 = vsel %vm2550_vm12, %v2552_v50, %v2548_v19 }
 0xd62   :  { %v2588_v41 = vpop.permute.xlu1 %2587 }
 0xd63   :  { %v2610_v40 = vmul.f32 %v2588_v41, %v5561_v17  ;;  %v2586_v38 = vpop.permute.xlu0 %2585 }
 0xd64   :  { %v2609_v37 = vmul.f32 %v2586_v38, %v5566_v54 }
 0xd65   :  { %2627 = vrot.lane.b32.xlu0 %v2610_v40, %s4172_s4 }
 0xd66   :  { %2625 = vrot.lane.b32.xlu2 %v2609_v37, %s4172_s4 }
 0xd6a   :  { %v2594_v0 = vpop.permute.xlu1 %2593 }
 0xd6b   :  { %v2613_v33 = vmul.f32 %v2594_v0, %v5585_v13  ;;  %v2592_v34 = vpop.permute.xlu0 %2591 }
 0xd6c   :  { %v2612_v53 = vmul.f32 %v2592_v34, %v5588_v18 }
 0xd6d   :  { %2633 = vrot.lane.b32.xlu0 %v2613_v33, %s4172_s4 }
 0xd6e   :  { %2631 = vrot.lane.b32.xlu2 %v2612_v53, %s4172_s4 }
 0xd72   :  { %v2600_v21 = vpop.permute.xlu1 %2599 }
 0xd73   :  { %v2616_v24 = vmul.f32 %v2600_v21, %v5605_v20  ;;  %v2596_v41 = vpop.permute.xlu0 %2595  ;;  %v2729_v21 = vmul.f32 %v2714_v45, %v5561_v17  ;;  %v2671_v17 = vsub.f32 1.0, %v5491_v42 }
 0xd74   :  { %v2614_v26 = vmul.f32 %v2596_v41, %v5608_v44  ;;  %v2728_v41 = vmul.f32 %v2713_v10, %v5566_v54  ;;  %v2669_v54 = vsub.f32 1.0, %v5585_v13 }
 0xd75   :  { %2639 = vrot.lane.b32.xlu0 %v2616_v24, %s4172_s4 }
 0xd76   :  { %2635 = vrot.lane.b32.xlu2 %v2614_v26, %s4172_s4 }
 0xdbf   :  { %v2630_v32 = vpop.permute.xlu1 %2629 }
 0xdc0   :  { %v2651_v11 = vadd.f32 %v2630_v32, %v4378_v4  ;;  %v2626_v25 = vpop.permute.xlu2 %2625 }
 0xdc1   :  { %v2649_v40 = vadd.f32 %v2626_v25, %v4369_v58 }
 0xdc2   :  { %4023 = vtanh.f32 %v2651_v11 }
 0xdc3   :  { %4025 = vtanh.f32 %v2649_v40  ;;  %v2717_v40 = vrot.slane %v5448_v57, 7 }
 0xdc7   :  { %v2638_v38 = vpop.permute.xlu1 %2637 }
 0xdc8   :  { %v4024_v35 = vpop.eup %4023  ;;  %v2655_v6 = vadd.f32 %v2638_v38, %v4409_v47  ;;  %v2632_v37 = vpop.permute.xlu2 %2631  ;;  %v2716_v38 = vrot.slane %v5432_v31, 7 }
 0xdc9   :  { %v4026_v55 = vpop.eup %4025  ;;  %v2652_v49 = vadd.f32 %v2632_v37, %v4382_v12  ;;  %2685 = vrot.lane.b32.xlu0 %v4024_v35, %s4173_s6 }
 0xdca   :  { %4027 = vtanh.f32 %v2655_v6  ;;  %2681 = vrot.lane.b32.xlu1 %v4026_v55, %s4173_s6  ;;  %v2668_v6 = vsub.f32 1.0, %v5588_v18  ;;  %v2731_v57 = vmul.f32 %v2716_v38, %v5588_v18  ;;  %v2670_v18 = vsub.f32 1.0, %v5608_v44 }
 0xdcb   :  { %4029 = vtanh.f32 %v2652_v49 }
 0xdd0   :  { %v4028_v7 = vpop.eup %4027  ;;  %v2636_v3 = vpop.permute.xlu2 %2635 }
 0xdd1   :  { %v4030_v52 = vpop.eup %4029  ;;  %v2654_v8 = vadd.f32 %v2636_v3, %v4399_v48  ;;  %2693 = vrot.lane.b32.xlu0 %v4028_v7, %s4173_s6  ;;  %v2732_v3 = vmul.f32 %v2717_v40, %v5585_v13 }
 0xdd2   :  { %2687 = vrot.lane.b32.xlu1 %v4030_v52, %s4173_s6 }
 0xdd3   :  { %4031 = vtanh.f32 %v2654_v8 }
 0xdd7   :  { %v2628_v27 = vpop.permute.xlu0 %2627 }
 0xdd8   :  { %v2650_v29 = vadd.f32 %v2628_v27, %v4374_v62 }
 0xdd9   :  { %v4032_v1 = vpop.eup %4031 }
 0xdda   :  { %4033 = vtanh.f32 %v2650_v29  ;;  %2691 = vrot.lane.b32.xlu1 %v4032_v1, %s4173_s6 }
 0xddf   :  { %v2634_v43 = vpop.permute.xlu0 %2633 }
 0xde0   :  { %v4034_v56 = vpop.eup %4033  ;;  %v2653_v0 = vadd.f32 %v2634_v43, %v4389_v36  ;;  %v2719_v43 = vrot.slane %v5451_v2, 7 }
 0xde1   :  { %2683 = vrot.lane.b32.xlu2 %v4034_v56, %s4173_s6  ;;  %v2672_v56 = vsub.f32 1.0, %v5605_v20 }
 0xde2   :  { %4035 = vtanh.f32 %v2653_v0 }
 0xde7   :  { %v2640_v33 = vpop.permute.xlu0 %2639 }
 0xde8   :  { %v4036_v34 = vpop.eup %4035  ;;  %v2656_v39 = vadd.f32 %v2640_v33, %v4419_v51 }
 0xde9   :  { %2689 = vrot.lane.b32.xlu2 %v4036_v34, %s4173_s6  ;;  %v2735_v34 = vmul.f32 %v2719_v43, %v5605_v20 }
 0xdea   :  { %4037 = vtanh.f32 %v2656_v39 }
 0xdf0   :  { %v4038_v53 = vpop.eup %4037 }
 0xdf1   :  { %2695 = vrot.lane.b32.xlu2 %v4038_v53, %s4173_s6  ;;  %v2733_v53 = vmul.f32 %v5608_v44, %v2379_v61 }
 0xe3b   :  { %v2686_v28 = vpop.permute.xlu0 %2685  ;;  %v2684_v23 = vpop.permute.xlu2 %2683 }
 0xe3c   :  { %v2707_v19 = vmul.f32 %v2686_v28, %v2667_v5  ;;  %v2682_v50 = vpop.permute.xlu1 %2681  ;;  %v2706_v24 = vmul.f32 %v2684_v23, %v2666_v46 }
 0xe3d   :  { %v2705_v26 = vmul.f32 %v2682_v50, %v2665_v63  ;;  %v5690_v63 = vld [vmem:[%s6183_s7] ss:$0 sm:$0xff] }
 0xe3e   :  { %v5637_v22 = vadd.f32 %v5494_v15, %v2707_v19  ;;  %v5639_v30 = vadd.f32 %v2729_v21, %v2706_v24 }
 0xe3f   :  { %v5641_v32 = vadd.f32 %v2728_v41, %v2705_v26 }
 0xe40   :  { %v2755_v59 = vrot.slane %v5637_v22, 3  ;;  %v2753_v11 = vrot.slane %v5639_v30, 4 }
 0xe41   :  { %v2752_v25 = vrot.slane %v5641_v32, 5 }
 0xe43   :  { %v2754_v15 = vsel %vm205_vm13, %v2753_v11, %v2752_v25  ;;  %v2694_v35 = vpop.permute.xlu0 %2693  ;;  %v2690_v37 = vpop.permute.xlu2 %2689 }
 0xe44   :  { %v2711_v55 = vmul.f32 %v2694_v35, %v2671_v17  ;;  %v2688_v49 = vpop.permute.xlu1 %2687  ;;  %v2756_v7 = vsel %vm207_vm14, %v2755_v59, %v2754_v15  ;;  %v2709_v52 = vmul.f32 %v2690_v37, %v2669_v54 }
 0xe45   :  { %v2708_v42 = vmul.f32 %v2688_v49, %v2668_v6 }
 0xe46   :  { %v5656_v8 = vadd.f32 %v5498_v9, %v2711_v55  ;;  %v5658_v31 = vadd.f32 %v2732_v3, %v2709_v52 }
 0xe47   :  { %v5660_v27 = vadd.f32 %v2731_v57, %v2708_v42 }
 0xe48   :  { %v2759_v29 = vrot.slane %v5658_v31, 1  ;;  %v2762_v46 = vrot.slane %v5656_v8, 7 }
 0xe49   :  { %v2757_v1 = vrot.slane %v5660_v27, 2 }
 0xe4b   :  { %v2758_v13 = vsel %vm209_vm15, %v2757_v1, %v2756_v7  ;;  %v2696_v0 = vpop.permute.xlu2 %2695 }
 0xe4c   :  { %v2760_v9 = vsel %vm211_vm1, %v2759_v29, %v2758_v13  ;;  %v2692_v33 = vpop.permute.xlu1 %2691  ;;  %v2712_v39 = vmul.f32 %v2696_v0, %v2672_v56 }
 0xe4d   :  { %v2710_v45 = vmul.f32 %v2692_v33, %v2670_v18 }
 0xe4e   :  { %v5673_v5 = vadd.f32 %v2735_v34, %v2712_v39  ;;  %v3095_v39 = vrot.slane %v5639_v30, 7 }
 0xe4f   :  { %v5675_v2 = vadd.f32 %v2733_v53, %v2710_v45  ;;  %v3098_v45 = vrot.slane %v5658_v31, 7 }
 0xe50   :  { %v2764_v10 = vrot.slane %v5673_v5, 6 }
 0xe51   :  { %v2761_v28 = vsel %vm213_vm2, %v5675_v2, %v2760_v9 }
 0xe52   :  { %v2763_v20 = vsel %vm215_vm3, %v2762_v46, %v2761_v28 }
 0xe53   :  { %v2765_v14 = vsel %vm217_vm4, %v2764_v10, %v2763_v20 }
 0xe54   :  { %2766 = vrot.lane.b32.xlu0 %v2765_v14, %s4173_s6 }
 0xec6   :  { %v2767_v61 = vpop.permute.xlu0 %2766 }
 0xec7   :  { %3720 = vmatmul.msk.f32.vlgmr.msrb.gmra.mxu0 %vm6203_vm6, %v2767_v61 }
 0xf44   :  { %v2787_v44 = vpop.f32.mrf.mxu0 }
 0xf45   :  { %v5693_v23 = vadd.f32 %v5690_v63, %v2787_v44 }
 0xf47   :  { %v2793_v19 = vrot.slane %v5693_v23, 4  ;;  %v2792_v50 = vrot.slane %v5693_v23, 3  ;;  %v2791_v21 = vrot.slane %v5693_v23, 2  ;;  %v2795_v24 = vrot.slane %v5693_v23, 6 }
 0xf48   :  { %v2796_v25 = vrot.slane %v5693_v23, 7  ;;  %v2794_v40 = vrot.slane %v5693_v23, 5  ;;  %v2797_v35 = vrot.slane %v5693_v23, 1  ;;  %v2812_v20 = vadd.f32 %v5693_v23, %v4409_v47 }
 0xf49   :  { %2970 = vrot.lane.b32.xlu0 %v2793_v19, %s4172_s4  ;;  %2968 = vrot.lane.b32.xlu2 %v2792_v50, %s4172_s4  ;;  %v2807_v41 = vadd.f32 %v2792_v50, %v4374_v62  ;;  %v2810_v26 = vadd.f32 %v2795_v24, %v4389_v36  ;;  %v2808_v61 = vadd.f32 %v2793_v19, %v4378_v4 }
 0xf4a   :  { %2966 = vrot.lane.b32.xlu1 %v2791_v21, %s4172_s4  ;;  %v3727_v14 = vmul.f32 -1.442695, %v2812_v20  ;;  %v2806_v30 = vadd.f32 %v2791_v21, %v4369_v58  ;;  %v2811_v31 = vadd.f32 %v2796_v25, %v4399_v48  ;;  %v2813_v19 = vadd.f32 %v2797_v35, %v4419_v51 }
 0xf4b   :  { %v3722_v59 = vmul.f32 -1.442695, %v2807_v41  ;;  %v3725_v11 = vmul.f32 -1.442695, %v2810_v26  ;;  %v3723_v44 = vmul.f32 -1.442695, %v2808_v61  ;;  %v2809_v41 = vadd.f32 %v2794_v40, %v4382_v12 }
 0xf4c   :  { %v3721_v50 = vmul.f32 -1.442695, %v2806_v30 }
 0xf4d   :  { %4039 = vpow2.f32 %v3722_v59  ;;  %v3726_v59 = vmul.f32 -1.442695, %v2811_v31 }
 0xf4e   :  { %4041 = vpow2.f32 %v3725_v11  ;;  %v3724_v11 = vmul.f32 -1.442695, %v2809_v41 }
 0xf51   :  { %2976 = vrot.lane.b32.xlu0 %v2796_v25, %s4172_s4  ;;  %2974 = vrot.lane.b32.xlu2 %v2795_v24, %s4172_s4 }
 0xf52   :  { %2972 = vrot.lane.b32.xlu1 %v2794_v40, %s4172_s4 }
 0xf53   :  { %v4040_v17 = vpop.eup %4039 }
 0xf54   :  { %v2839_v54 = vadd.f32 1.0, %v4040_v17  ;;  %v4042_v38 = vpop.eup %4041 }
 0xf55   :  { %v2842_v15 = vadd.f32 1.0, %v4042_v38 }
 0xf56   :  { %4043 = vrcp.f32 %v2839_v54  ;;  %v2872_v29 = vand.u32 2147483648, %v2839_v54  ;;  %vm2866_vm8 = vweird.f32 %v2839_v54  ;;  %v2870_v1 = vand.u32 2147483647, %v2839_v54 }
 0xf57   :  { %4045 = vrcp.f32 %v2842_v15  ;;  %v2917_v56 = vand.u32 2147483648, %v2842_v15  ;;  %vm2911_vm10 = vweird.f32 %v2842_v15  ;;  %v2915_v18 = vand.u32 2147483647, %v2842_v15 }
 0xf58   :  { %v2873_v0 = vor.u32 1.1754944e-38, %v2872_v29  ;;  %vm2871_vm11 = vcmp.eq.f32.partialorder %v2870_v1, 8.507059e+37  ;;  %4047 = vpow2.f32 %v3727_v14 }
 0xf59   :  { %2978 = vrot.lane.b32.xlu2 %v5693_v23, %s4172_s4  ;;  %v2918_v34 = vor.u32 1.1754944e-38, %v2917_v56  ;;  %vm2916_vm12 = vcmp.eq.f32.partialorder %v2915_v18, 8.507059e+37  ;;  %4049 = vpow2.f32 %v3723_v44 }
 0xf5a   :  { %2980 = vrot.lane.b32.xlu1 %v2797_v35, %s4172_s4  ;;  %4051 = vpow2.f32 %v3721_v50 }
 0xf5c   :  { %v4044_v6 = vpop.eup %4043 }
 0xf5d   :  { %v2862_v37 = vmul.f32 %v4044_v6, %v2839_v54  ;;  %v4046_v55 = vpop.eup %4045  ;;  %vm2867_vm7 = vweird.f32 %v4044_v6 }
 0xf5e   :  { %v2907_v7 = vmul.f32 %v4046_v55, %v2842_v15  ;;  %vm2912_vm5 = vweird.f32 %v4046_v55  ;;  %vm2868_vm9 = vmor %vm2866_vm8, %vm2867_vm7  ;;  %v4048_v24 = vpop.eup %4047  ;;  %v3728_v15 = vmul.f32 -1.442695, %v2813_v19 }
 0xf5f   :  { %v2863_v49 = vsub.f32 1.0, %v2862_v37  ;;  %vm2913_vm0 = vmor %vm2911_vm10, %vm2912_vm5  ;;  %v2844_v26 = vadd.f32 1.0, %v4048_v24  ;;  %v4050_v23 = vpop.eup %4049 }
 0xf60   :  { %v2908_v52 = vsub.f32 1.0, %v2907_v7  ;;  %v4052_v17 = vpop.eup %4051  ;;  %v5732_v54 = vadd.f32 1.0, %v4050_v23 }
 0xf61   :  { %v2864_v3 = vmul.f32 %v4044_v6, %v2863_v49  ;;  %4053 = vrcp.f32 %v2844_v26  ;;  %v5734_v21 = vadd.f32 1.0, %v4052_v17  ;;  %vm2941_vm7 = vweird.f32 %v2844_v26 }
 0xf62   :  { %v2909_v57 = vmul.f32 %v4046_v55, %v2908_v52  ;;  %4055 = vpow2.f32 %v3726_v59  ;;  %v2945_v20 = vand.u32 2147483647, %v2844_v26  ;;  %v2887_v23 = vand.u32 2147483648, %v5732_v54 }
 0xf63   :  { %v2865_v42 = vadd.f32 %v4044_v6, %v2864_v3  ;;  %4057 = vpow2.f32 %v3724_v11 }
 0xf64   :  { %v2910_v43 = vadd.f32 %v4046_v55, %v2909_v57  ;;  %4059 = vrcp.f32 %v5732_v54  ;;  %vm2946_vm5 = vcmp.eq.f32.partialorder %v2945_v20, 8.507059e+37 }
 0xf65   :  { %v2869_v13 = vsel %vm2868_vm9, %v4044_v6, %v2865_v42  ;;  %4061 = vrcp.f32 %v5734_v21 }
 0xf66   :  { %v2914_v9 = vsel %vm2913_vm0, %v4046_v55, %v2910_v43  ;;  %v5713_v33 = vsel %vm2871_vm11, %v2873_v0, %v2869_v13  ;;  %4063 = vpow2.f32 %v3728_v15  ;;  %vm2881_vm0 = vweird.f32 %v5732_v54 }
 0xf67   :  { %v5716_v53 = vsel %vm2916_vm12, %v2918_v34, %v2914_v9  ;;  %v5720_v10 = vmul.f32 %v3095_v39, %v5713_v33  ;;  %v4054_v38 = vpop.eup %4053  ;;  %v2947_v34 = vand.u32 2147483648, %v2844_v26  ;;  %v2885_v15 = vand.u32 2147483647, %v5732_v54 }
 0xf68   :  { %v5723_v28 = vmul.f32 %v3098_v45, %v5716_v53  ;;  %v4056_v25 = vpop.eup %4055  ;;  %v2937_v40 = vmul.f32 %v4054_v38, %v2844_v26  ;;  %vm2942_vm6 = vweird.f32 %v4054_v38  ;;  %vm2851_vm12 = vweird.f32 %v5734_v21 }
 0xf69   :  { %v4058_v6 = vpop.eup %4057  ;;  %v5738_v37 = vadd.f32 1.0, %v4056_v25  ;;  %vm2943_vm8 = vmor %vm2941_vm7, %vm2942_vm6  ;;  %v2948_v44 = vor.u32 1.1754944e-38, %v2947_v34  ;;  %v2857_v25 = vand.u32 2147483648, %v5734_v21  ;;  %vm2886_vm7 = vcmp.eq.f32.partialorder %v2885_v15, 8.507059e+37 }
 0xf6a   :  { %v5740_v49 = vadd.f32 1.0, %v4058_v6  ;;  %v2938_v7 = vsub.f32 1.0, %v2937_v40  ;;  %v4060_v3 = vpop.eup %4059  ;;  %v2855_v40 = vand.u32 2147483647, %v5734_v21 }
 0xf6b   :  { %v5743_v52 = vpop.eup %4061  ;;  %4065 = vrcp.f32 %v5738_v37  ;;  %v2877_v29 = vmul.f32 %v4060_v3, %v5732_v54  ;;  %vm2882_vm9 = vweird.f32 %v4060_v3  ;;  %v2858_v54 = vor.u32 1.1754944e-38, %v2857_v25 }
 0xf6c   :  { %v4064_v57 = vpop.eup %4063  ;;  %4067 = vrcp.f32 %v5740_v49  ;;  %v2939_v42 = vmul.f32 %v4054_v38, %v2938_v7  ;;  %v2847_v1 = vmul.f32 %v5743_v52, %v5734_v21  ;;  %vm2852_vm10 = vweird.f32 %v5743_v52  ;;  %vm2883_vm11 = vmor %vm2881_vm0, %vm2882_vm9 }
 0xf6d   :  { %v5751_v43 = vadd.f32 1.0, %v4064_v57  ;;  %v2878_v0 = vsub.f32 1.0, %v2877_v29  ;;  %vm2853_vm6 = vmor %vm2851_vm12, %vm2852_vm10  ;;  %vm2926_vm10 = vweird.f32 %v5738_v37  ;;  %v2902_v20 = vand.u32 2147483648, %v5740_v49 }
 0xf6e   :  { %v2940_v18 = vadd.f32 %v4054_v38, %v2939_v42  ;;  %v2848_v39 = vsub.f32 1.0, %v2847_v1 }
 0xf6f   :  { %4069 = vrcp.f32 %v5751_v43  ;;  %v2879_v61 = vmul.f32 %v4060_v3, %v2878_v0 }
 0xf70   :  { %v2944_v14 = vsel %vm2943_vm8, %v4054_v38, %v2940_v18  ;;  %v2849_v50 = vmul.f32 %v5743_v52, %v2848_v39  ;;  %vm2856_vm8 = vcmp.eq.f32.partialorder %v2855_v40, 8.507059e+37  ;;  %v2930_v39 = vand.u32 2147483647, %v5738_v37 }
 0xf71   :  { %v5754_v9 = vpop.eup %4065  ;;  %v5765_v31 = vsel %vm2946_vm5, %v2948_v44, %v2944_v14  ;;  %v2880_v59 = vadd.f32 %v4060_v3, %v2879_v61  ;;  %v2900_v14 = vand.u32 2147483647, %v5740_v49 }
 0xf72   :  { %v5756_v45 = vpop.eup %4067  ;;  %v2922_v30 = vmul.f32 %v5754_v9, %v5738_v37  ;;  %v2850_v17 = vadd.f32 %v5743_v52, %v2849_v50  ;;  %vm2927_vm5 = vweird.f32 %v5754_v9 }
 0xf73   :  { %v2892_v24 = vmul.f32 %v5756_v45, %v5740_v49  ;;  %v2884_v6 = vsel %vm2883_vm11, %v4060_v3, %v2880_v59  ;;  %vm2897_vm9 = vweird.f32 %v5756_v45  ;;  %vm2928_vm0 = vmor %vm2926_vm10, %vm2927_vm5  ;;  %vm2896_vm11 = vweird.f32 %v5740_v49 }
 0xf74   :  { %v2923_v11 = vsub.f32 1.0, %v2922_v30  ;;  %v2854_v7 = vsel %vm2853_vm6, %v5743_v52, %v2850_v17  ;;  %vm2898_vm12 = vmor %vm2896_vm11, %vm2897_vm9  ;;  %vm2931_vm6 = vcmp.eq.f32.partialorder %v2930_v39, 8.507059e+37  ;;  %vm2956_vm5 = vweird.f32 %v5751_v43 }
 0xf75   :  { %v2893_v19 = vsub.f32 1.0, %v2892_v24  ;;  %v5771_v38 = vpop.eup %4069 }
 0xf76   :  { %v2952_v42 = vmul.f32 %v5771_v38, %v5751_v43 }
 0xf77   :  { %v2894_v57 = vmul.f32 %v5756_v45, %v2893_v19 }
 0xf78   :  { %v2953_v34 = vsub.f32 1.0, %v2952_v42 }
 0xf79   :  { %v2895_v0 = vadd.f32 %v5756_v45, %v2894_v57 }
 0xf7a   :  { %v2954_v50 = vmul.f32 %v5771_v38, %v2953_v34 }
 0xf7b   :  { %v2899_v44 = vsel %vm2898_vm12, %v5756_v45, %v2895_v0  ;;  %v2962_v45 = vand.u32 2147483648, %v5751_v43 }
 0xf7d   :  { %v2963_v19 = vor.u32 1.1754944e-38, %v2962_v45 }
 0xfa3   :  { %v2969_v55 = vpop.permute.xlu2 %2968 }
 0xfa4   :  { %v2991_v35 = vmul.f32 %v2969_v55, %v5713_v33  ;;  %v2924_v55 = vmul.f32 %v5754_v9, %v2923_v11 }
 0xfa6   :  { %3008 = vrot.lane.b32.xlu1 %v2991_v35, %s4172_s4  ;;  %v2888_v35 = vor.u32 1.1754944e-38, %v2887_v23  ;;  %v2925_v52 = vadd.f32 %v5754_v9, %v2924_v55  ;;  %v2960_v23 = vand.u32 2147483647, %v5751_v43 }
 0xfa8   :  { %v5784_v1 = vsel %vm2886_vm7, %v2888_v35, %v2884_v6  ;;  %v2929_v61 = vsel %vm2928_vm0, %v5754_v9, %v2925_v52  ;;  %vm2901_vm7 = vcmp.eq.f32.partialorder %v2900_v14, 8.507059e+37  ;;  %v2955_v9 = vadd.f32 %v5771_v38, %v2954_v50 }
 0xfa9   :  { %vm2961_vm10 = vcmp.eq.f32.partialorder %v2960_v23, 8.507059e+37  ;;  %vm3546_vm0 = vcmask 523264  }
 0xfab   :  { %v2975_v56 = vpop.permute.xlu2 %2974 }
 0xfac   :  { %v2994_v13 = vmul.f32 %v2975_v56, %v5716_v53  ;;  %v5788_v56 = vsel %vm2856_vm8, %v2858_v54, %v2854_v7  ;;  %vm2957_vm8 = vweird.f32 %v5771_v38 }
 0xfad   :  { %vm2958_vm9 = vmor %vm2956_vm5, %vm2957_vm8 }
 0xfae   :  { %3014 = vrot.lane.b32.xlu1 %v2994_v13, %s4172_s4  ;;  %v2932_v13 = vand.u32 2147483648, %v5738_v37  ;;  %v2903_v37 = vor.u32 1.1754944e-38, %v2902_v20  ;;  %v2959_v17 = vsel %vm2958_vm9, %v5771_v38, %v2955_v9  ;;  %v3047_v9 = vsub.f32 1.0, %v5713_v33 }
 0xfaf   :  { %v5821_v15 = vsel %vm2961_vm10, %v2963_v19, %v2959_v17 }
 0xfb0   :  { %v2933_v30 = vor.u32 1.1754944e-38, %v2932_v13  ;;  %v5810_v59 = vsel %vm2901_vm7, %v2903_v37, %v2899_v44  ;;  %v3096_v37 = vrot.slane %v5637_v22, 7 }
 0xfb2   :  { %v5807_v24 = vsel %vm2931_vm6, %v2933_v30, %v2929_v61  ;;  %v3111_v45 = vmul.f32 %v3096_v37, %v5784_v1 }
 0xfb3   :  { %v2979_v41 = vpop.permute.xlu2 %2978 }
 0xfb4   :  { %v2996_v26 = vmul.f32 %v2979_v41, %v5765_v31 }
 0xfb6   :  { %3018 = vrot.lane.b32.xlu1 %v2996_v26, %s4172_s4 }
 0xfbb   :  { %v2971_v29 = vpop.permute.xlu0 %2970 }
 0xfbc   :  { %v2992_v21 = vmul.f32 %v2971_v29, %v5784_v1  ;;  %v2967_v3 = vpop.permute.xlu1 %2966 }
 0xfbd   :  { %v2990_v18 = vmul.f32 %v2967_v3, %v5788_v56 }
 0xfbe   :  { %3010 = vrot.lane.b32.xlu2 %v2992_v21, %s4172_s4 }
 0xfbf   :  { %3006 = vrot.lane.b32.xlu0 %v2990_v18, %s4172_s4 }
 0xfc3   :  { %v2977_v41 = vpop.permute.xlu0 %2976 }
 0xfc4   :  { %v2995_v26 = vmul.f32 %v2977_v41, %v5807_v24  ;;  %v2973_v11 = vpop.permute.xlu1 %2972  ;;  %v3048_v41 = vsub.f32 1.0, %v5784_v1 }
 0xfc5   :  { %v2993_v49 = vmul.f32 %v2973_v11, %v5810_v59 }
 0xfc6   :  { %3016 = vrot.lane.b32.xlu2 %v2995_v26, %s4172_s4  ;;  %v3094_v26 = vrot.slane %v5641_v32, 7 }
 0xfc7   :  { %3012 = vrot.lane.b32.xlu0 %v2993_v49, %s4172_s4  ;;  %v3046_v49 = vsub.f32 1.0, %v5788_v56 }
 0xfcc   :  { %v2981_v25 = vpop.permute.xlu1 %2980 }
 0xfcd   :  { %v2997_v40 = vmul.f32 %v2981_v25, %v5821_v15  ;;  %v3109_v25 = vmul.f32 %v3094_v26, %v5788_v56  ;;  %v3099_v56 = vrot.slane %v5675_v2, 7 }
 0xfcf   :  { %3020 = vrot.lane.b32.xlu0 %v2997_v40, %s4172_s4 }
0x1018   :  { %v3011_v6 = vpop.permute.xlu2 %3010  ;;  %v3009_v55 = vpop.permute.xlu1 %3008 }
0x1019   :  { %v3032_v35 = vadd.f32 %v3011_v6, %v4378_v4  ;;  %v3031_v7 = vadd.f32 %v3009_v55, %v4374_v62 }
0x101b   :  { %4071 = vtanh.f32 %v3032_v35 }
0x101c   :  { %4073 = vtanh.f32 %v3031_v7  ;;  %v3097_v7 = vrot.slane %v5660_v27, 7 }
0x101e   :  { %v3112_v27 = vmul.f32 %v3097_v7, %v5810_v59 }
0x1020   :  { %v3017_v43 = vpop.permute.xlu2 %3016  ;;  %v3015_v57 = vpop.permute.xlu1 %3014 }
0x1021   :  { %v4072_v38 = vpop.eup %4071  ;;  %v3035_v42 = vadd.f32 %v3017_v43, %v4399_v48  ;;  %v3034_v54 = vadd.f32 %v3015_v57, %v4389_v36  ;;  %v3051_v43 = vsub.f32 1.0, %v5807_v24 }
0x1022   :  { %v4074_v29 = vpop.eup %4073  ;;  %3066 = vrot.lane.b32.xlu1 %v4072_v38, %s4173_s6 }
0x1023   :  { %4075 = vtanh.f32 %v3035_v42  ;;  %3064 = vrot.lane.b32.xlu0 %v4074_v29, %s4173_s6  ;;  %v3049_v42 = vsub.f32 1.0, %v5810_v59  ;;  %v3053_v59 = vsub.f32 1.0, %v5821_v15 }
0x1024   :  { %4077 = vtanh.f32 %v3034_v54 }
0x1028   :  { %v3019_v21 = vpop.permute.xlu1 %3018 }
0x1029   :  { %v4076_v3 = vpop.eup %4075  ;;  %v3036_v52 = vadd.f32 %v3019_v21, %v4409_v47 }
0x102a   :  { %v4078_v13 = vpop.eup %4077  ;;  %3072 = vrot.lane.b32.xlu1 %v4076_v3, %s4173_s6 }
0x102b   :  { %4079 = vtanh.f32 %v3036_v52  ;;  %3070 = vrot.lane.b32.xlu0 %v4078_v13, %s4173_s6  ;;  %v3114_v52 = vmul.f32 %v3099_v56, %v5807_v24 }
0x1031   :  { %v4080_v18 = vpop.eup %4079  ;;  %v3007_v0 = vpop.permute.xlu0 %3006 }
0x1032   :  { %v3030_v34 = vadd.f32 %v3007_v0, %v4369_v58 }
0x1033   :  { %3074 = vrot.lane.b32.xlu0 %v4080_v18, %s4173_s6 }
0x1034   :  { %4081 = vtanh.f32 %v3030_v34 }
0x1039   :  { %v3013_v39 = vpop.permute.xlu0 %3012 }
0x103a   :  { %v4082_v20 = vpop.eup %4081  ;;  %v3033_v14 = vadd.f32 %v3013_v39, %v4382_v12 }
0x103b   :  { %3062 = vrot.lane.b32.xlu2 %v4082_v20, %s4173_s6  ;;  %v3100_v20 = vrot.slane %v5673_v5, 7 }
0x103c   :  { %4083 = vtanh.f32 %v3033_v14 }
0x103d   :  { %v3116_v37 = vmul.f32 %v3100_v20, %v5821_v15  ;;  %v3539_v15 = vld [vmem:[%s6185_s9 + $0x28] sm:$0xff] }
0x1041   :  { %v3021_v61 = vpop.permute.xlu0 %3020 }
0x1042   :  { %v4084_v30 = vpop.eup %4083  ;;  %v3037_v44 = vadd.f32 %v3021_v61, %v4419_v51  ;;  %v3052_v61 = vsub.f32 1.0, %v5765_v31 }
0x1043   :  { %3068 = vrot.lane.b32.xlu2 %v4084_v30, %s4173_s6 }
0x1044   :  { %4085 = vtanh.f32 %v3037_v44 }
0x104a   :  { %v4086_v50 = vpop.eup %4085 }
0x104b   :  { %3076 = vrot.lane.b32.xlu2 %v4086_v50, %s4173_s6 }
0x1094   :  { %v3067_v11 = vpop.permute.xlu1 %3066 }
0x1095   :  { %v3088_v23 = vmul.f32 %v3067_v11, %v3048_v41  ;;  %v3063_v17 = vpop.permute.xlu2 %3062  ;;  %v3065_v19 = vpop.permute.xlu0 %3064 }
0x1096   :  { %v3086_v40 = vmul.f32 %v3063_v17, %v3046_v49  ;;  %v3087_v6 = vmul.f32 %v3065_v19, %v3047_v9  ;;  %v3537_v17 = vld [vmem:[%s6185_s9 + $0x18] sm:$0xff]  ;;  %v3536_v19 = vld [vmem:[%s6185_s9 + $0x10] sm:$0xff] }
0x1097   :  { %v5848_v55 = vadd.f32 %v3111_v45, %v3088_v23  ;;  %v3538_v23 = vld [vmem:[%s6185_s9 + $0x20] sm:$0xff] }
0x1098   :  { %v5850_v22 = vadd.f32 %v3109_v25, %v3086_v40  ;;  %v5853_v32 = vadd.f32 %v5720_v10, %v3087_v6  ;;  %v3050_v10 = vsub.f32 1.0, %v5716_v53  ;;  %v3535_v40 = vld [vmem:[%s6185_s9 + $0x8] sm:$0xff]  ;;  %v3534_v6 = vld [vmem:[%s6185_s9] sm:$0xff] }
0x1099   :  { %v3136_v35 = vrot.slane %v5848_v55, 4 }
0x109a   :  { %v3133_v33 = vrot.slane %v5850_v22, 6  ;;  %v3134_v1 = vrot.slane %v5853_v32, 5 }
0x109c   :  { %v3135_v57 = vsel %vm205_vm13, %v3134_v1, %v3133_v33  ;;  %v3073_v38 = vpop.permute.xlu1 %3072 }
0x109d   :  { %v3091_v54 = vmul.f32 %v3073_v38, %v3051_v43  ;;  %v3069_v29 = vpop.permute.xlu2 %3068  ;;  %v3137_v21 = vsel %vm207_vm14, %v3136_v35, %v3135_v57  ;;  %v3071_v3 = vpop.permute.xlu0 %3070  ;;  %v3533_v35 = vld [vmem:[%s6184_s8] sm:$0xff] }
0x109e   :  { %v3089_v13 = vmul.f32 %v3069_v29, %v3049_v42  ;;  %v3090_v18 = vmul.f32 %v3071_v3, %v3050_v10 }
0x109f   :  { %v5867_v0 = vadd.f32 %v3114_v52, %v3091_v54 }
0x10a0   :  { %v5869_v2 = vadd.f32 %v3112_v27, %v3089_v13  ;;  %v5872_v34 = vadd.f32 %v5723_v28, %v3090_v18  ;;  %v3115_v28 = vmul.f32 %v5765_v31, %v2762_v46  ;;  %v3541_v46 = vld [vmem:[%s6185_s9 + $0x38] sm:$0xff]  ;;  %v3540_v31 = vld [vmem:[%s6185_s9 + $0x30] sm:$0xff] }
0x10a1   :  { %v3142_v14 = vrot.slane %v5867_v0, 1  ;;  %3558 = vmatpush.msra.mxu0 %v3541_v46 }
0x10a2   :  { %v3138_v53 = vrot.slane %v5869_v2, 3  ;;  %v3140_v39 = vrot.slane %v5872_v34, 2 }
0x10a3   :  { %3559 = vmatpush.msra.mxu0 %v3540_v31  ;;  %v3479_v31 = vrot.slane %v5872_v34, 7 }
0x10a4   :  { %v3139_v24 = vsel %vm209_vm15, %v3138_v53, %v3137_v21 }
0x10a5   :  { %v3141_v30 = vsel %vm211_vm1, %v3140_v39, %v3139_v24  ;;  %v3077_v44 = vpop.permute.xlu2 %3076  ;;  %v3075_v50 = vpop.permute.xlu0 %3074  ;;  %3560 = vmatpush.msra.mxu0 %v3539_v15 }
0x10a6   :  { %v3093_v41 = vmul.f32 %v3077_v44, %v3053_v59  ;;  %v3092_v5 = vmul.f32 %v3075_v50, %v3052_v61  ;;  %v3143_v26 = vsel %vm213_vm2, %v3142_v14, %v3141_v30 }
0x10a7   :  { %3561 = vmatpush.msra.mxu0 %v3538_v23  ;;  %v3476_v23 = vrot.slane %v5853_v32, 7 }
0x10a8   :  { %v5887_v11 = vadd.f32 %v3116_v37, %v3093_v41  ;;  %v5889_v49 = vadd.f32 %v3115_v28, %v3092_v5 }
0x10a9   :  { %3562 = vmatpush.msra.mxu0 %v3537_v17 }
0x10aa   :  { %v3145_v9 = vrot.slane %v5887_v11, 7  ;;  %v3144_v45 = vsel %vm215_vm3, %v5889_v49, %v3143_v26 }
0x10ab   :  { %3563 = vmatpush.msra.mxu0 %v3536_v19 }
0x10ac   :  { %v3146_v8 = vsel %vm217_vm4, %v3145_v9, %v3144_v45  ;;  %vm6204_vm4 = vcmask 261120  }
0x10ad   :  { %3147 = vrot.lane.b32.xlu1 %v3146_v8, %s4173_s6  ;;  %3564 = vmatpush.msra.mxu0 %v3535_v40 }
0x10af   :  { %3565 = vmatpush.msra.mxu0 %v3534_v6 }
0x10b0   :  { %3738 = vmatmul.msk.f32.vlgmr.msra.gmra.mxu0 %vm3546_vm0, %v3533_v35 }
0x111f   :  { %v3148_v25 = vpop.permute.xlu1 %3147 }
0x1120   :  { %3729 = vmatmul.msk.f32.vlgmr.msra.gmra.mxu3 %vm6204_vm4, %v3148_v25 }
0x11a3   :  { %v3168_v33 = vpop.f32.mrf.mxu3 }
0x11a4   :  { %v5928_v1 = vadd.f32 %v5690_v63, %v3168_v33 }
0x11a6   :  { %v3175_v7 = vrot.slane %v5928_v1, 4  ;;  %v3174_v43 = vrot.slane %v5928_v1, 3  ;;  %v3173_v56 = vrot.slane %v5928_v1, 2  ;;  %v3176_v57 = vrot.slane %v5928_v1, 5 }
0x11a7   :  { %v3178_v54 = vrot.slane %v5928_v1, 7  ;;  %v3177_v29 = vrot.slane %v5928_v1, 6  ;;  %v3172_v52 = vrot.slane %v5928_v1, 1  ;;  %v3194_v25 = vadd.f32 %v5928_v1, %v4419_v51 }
0x11a8   :  { %3353 = vrot.lane.b32.xlu1 %v3175_v7, %s4172_s4  ;;  %3351 = vrot.lane.b32.xlu0 %v3174_v43, %s4172_s4  ;;  %v3188_v38 = vadd.f32 %v3173_v56, %v4374_v62  ;;  %v3191_v42 = vadd.f32 %v3176_v57, %v4389_v36  ;;  %v3190_v6 = vadd.f32 %v3175_v7, %v4382_v12  ;;  %v3578_v7 = vld [vmem:[%s6187_s11 + $0x38] sm:$0xff] }
0x11a9   :  { %3349 = vrot.lane.b32.xlu2 %v3173_v56, %s4172_s4  ;;  %v3737_v40 = vmul.f32 -1.442695, %v3194_v25  ;;  %v3189_v35 = vadd.f32 %v3174_v43, %v4378_v4  ;;  %v3193_v32 = vadd.f32 %v3178_v54, %v4409_v47  ;;  %3594 = vmatpush.msrb.mxu3 %v3578_v7 }
0x11aa   :  { %v3731_v63 = vmul.f32 -1.442695, %v3188_v38  ;;  %v3734_v10 = vmul.f32 -1.442695, %v3191_v42  ;;  %v3733_v34 = vmul.f32 -1.442695, %v3190_v6 }
0x11ab   :  { %v3732_v33 = vmul.f32 -1.442695, %v3189_v35  ;;  %v3736_v42 = vmul.f32 -1.442695, %v3193_v32 }
0x11ac   :  { %4087 = vpow2.f32 %v3731_v63 }
0x11ad   :  { %4089 = vpow2.f32 %v3734_v10 }
0x11b0   :  { %3359 = vrot.lane.b32.xlu1 %v3178_v54, %s4172_s4  ;;  %3357 = vrot.lane.b32.xlu0 %v3177_v29, %s4172_s4  ;;  %v3187_v54 = vadd.f32 %v3172_v52, %v4369_v58 }
0x11b1   :  { %3355 = vrot.lane.b32.xlu2 %v3176_v57, %s4172_s4  ;;  %v3192_v57 = vadd.f32 %v3177_v29, %v4399_v48 }
0x11b2   :  { %v4088_v21 = vpop.eup %4087 }
0x11b3   :  { %v3220_v3 = vadd.f32 1.0, %v4088_v21  ;;  %v4090_v27 = vpop.eup %4089  ;;  %v3735_v63 = vmul.f32 -1.442695, %v3192_v57  ;;  %v3577_v21 = vld [vmem:[%s6187_s11 + $0x30] sm:$0xff] }
0x11b4   :  { %v3223_v13 = vadd.f32 1.0, %v4090_v27  ;;  %3595 = vmatpush.msrb.mxu3 %v3577_v21  ;;  %v3730_v27 = vmul.f32 -1.442695, %v3187_v54 }
0x11b5   :  { %4091 = vrcp.f32 %v3220_v3  ;;  %v3253_v28 = vand.u32 2147483648, %v3220_v3  ;;  %vm3247_vm7 = vweird.f32 %v3220_v3  ;;  %v3251_v41 = vand.u32 2147483647, %v3220_v3 }
0x11b6   :  { %4093 = vrcp.f32 %v3223_v13  ;;  %v3298_v44 = vand.u32 2147483648, %v3223_v13  ;;  %vm3292_vm6 = vweird.f32 %v3223_v13  ;;  %v3296_v37 = vand.u32 2147483647, %v3223_v13 }
0x11b7   :  { %v3254_v8 = vor.u32 1.1754944e-38, %v3253_v28  ;;  %vm3252_vm10 = vcmp.eq.f32.partialorder %v3251_v41, 8.507059e+37  ;;  %4095 = vpow2.f32 %v3737_v40  ;;  %v3567_v41 = vpop.f32.mrf.mxu0 }
0x11b8   :  { %3347 = vrot.lane.b32.xlu0 %v3172_v52, %s4172_s4  ;;  %v3299_v45 = vor.u32 1.1754944e-38, %v3298_v44  ;;  %vm3297_vm9 = vcmp.eq.f32.partialorder %v3296_v37, 8.507059e+37  ;;  %4097 = vpow2.f32 %v3733_v34  ;;  %v3575_v52 = vld [vmem:[%s6187_s11 + $0x20] sm:$0xff]  ;;  %v3573_v44 = vld [vmem:[%s6187_s11 + $0x10] sm:$0xff] }
0x11b9   :  { %3361 = vrot.lane.b32.xlu2 %v5928_v1, %s4172_s4  ;;  %4099 = vpow2.f32 %v3732_v33 }
0x11bb   :  { %v4092_v18 = vpop.eup %4091 }
0x11bc   :  { %v3243_v53 = vmul.f32 %v4092_v18, %v3220_v3  ;;  %v4094_v39 = vpop.eup %4093  ;;  %vm3248_vm12 = vweird.f32 %v4092_v18 }
0x11bd   :  { %v3288_v14 = vmul.f32 %v4094_v39, %v3223_v13  ;;  %vm3293_vm11 = vweird.f32 %v4094_v39  ;;  %vm3249_vm5 = vmor %vm3247_vm7, %vm3248_vm12  ;;  %v4096_v56 = vpop.eup %4095  ;;  %v3576_v13 = vld [vmem:[%s6187_s11 + $0x28] sm:$0xff] }
0x11be   :  { %v3244_v20 = vsub.f32 1.0, %v3243_v53  ;;  %vm3294_vm8 = vmor %vm3292_vm6, %vm3293_vm11  ;;  %v5966_v38 = vadd.f32 1.0, %v4096_v56  ;;  %v4098_v1 = vpop.eup %4097  ;;  %3596 = vmatpush.msrb.mxu3 %v3576_v13 }
0x11bf   :  { %v3289_v59 = vsub.f32 1.0, %v3288_v14  ;;  %v4100_v43 = vpop.eup %4099  ;;  %v5972_v10 = vadd.f32 1.0, %v4098_v1 }
0x11c0   :  { %v3245_v24 = vmul.f32 %v4092_v18, %v3244_v20  ;;  %4101 = vrcp.f32 %v5966_v38  ;;  %v5975_v29 = vadd.f32 1.0, %v4100_v43  ;;  %3597 = vmatpush.msrb.mxu3 %v3575_v52  ;;  %v3341_v1 = vand.u32 2147483647, %v5966_v38 }
0x11c1   :  { %v3290_v61 = vmul.f32 %v4094_v39, %v3289_v59  ;;  %4103 = vpow2.f32 %v3736_v42 }
0x11c2   :  { %v3246_v30 = vadd.f32 %v4092_v18, %v3245_v24  ;;  %4105 = vpow2.f32 %v3735_v63  ;;  %v3343_v63 = vand.u32 2147483648, %v5966_v38  ;;  %vm3342_vm12 = vcmp.eq.f32.partialorder %v3341_v1, 8.507059e+37 }
0x11c3   :  { %v3291_v50 = vadd.f32 %v4094_v39, %v3290_v61  ;;  %4107 = vrcp.f32 %v5972_v10 }
0x11c4   :  { %v3250_v26 = vsel %vm3249_vm5, %v4092_v18, %v3246_v30  ;;  %4109 = vrcp.f32 %v5975_v29  ;;  %v3749_v30 = vld [vmem:[%s6186_s10] ss:$0 sm:$0xff]  ;;  %v3344_v13 = vor.u32 1.1754944e-38, %v3343_v63 }
0x11c5   :  { %v3295_v5 = vsel %vm3294_vm8, %v4094_v39, %v3291_v50  ;;  %v5951_v15 = vsel %vm3252_vm10, %v3254_v8, %v3250_v26  ;;  %v3574_v39 = vld [vmem:[%s6187_s11 + $0x18] sm:$0xff]  ;;  %4111 = vpow2.f32 %v3730_v27  ;;  %v3571_v26 = vld [vmem:[%s6187_s11] sm:$0xff]  ;;  %vm3277_vm8 = vweird.f32 %v5972_v10 }
0x11c6   :  { %v5948_v46 = vsel %vm3297_vm9, %v3299_v45, %v3295_v5  ;;  %v5958_v19 = vmul.f32 %v3476_v23, %v5951_v15  ;;  %v5980_v3 = vpop.eup %4101  ;;  %3598 = vmatpush.msrb.mxu3 %v3574_v39  ;;  %v3572_v5 = vld [vmem:[%s6187_s11 + $0x8] sm:$0xff]  ;;  %v3568_v45 = vadd.f32 %v3749_v30, %v3567_v41  ;;  %vm3262_vm9 = vweird.f32 %v5975_v29 }
0x11c7   :  { %v5955_v17 = vmul.f32 %v3479_v31, %v5948_v46  ;;  %v4104_v18 = vpop.eup %4103  ;;  %v3333_v20 = vmul.f32 %v5980_v3, %v5966_v38  ;;  %vm3338_vm4 = vweird.f32 %v5980_v3  ;;  %v3266_v41 = vand.u32 2147483647, %v5975_v29 }
0x11c8   :  { %v4106_v53 = vpop.eup %4105  ;;  %v5995_v14 = vadd.f32 1.0, %v4104_v18  ;;  %3599 = vmatpush.msrb.mxu3 %v3573_v44  ;;  %v3570_v40 = vmax.f32 %v3568_v45, 0.0  ;;  %v3268_v44 = vand.u32 2147483648, %v5975_v29 }
0x11c9   :  { %v5997_v24 = vadd.f32 1.0, %v4106_v53  ;;  %v5999_v59 = vpop.eup %4107  ;;  %v3334_v37 = vsub.f32 1.0, %v3333_v20 }
0x11ca   :  { %v6007_v28 = vpop.eup %4109  ;;  %4113 = vrcp.f32 %v5995_v14  ;;  %3600 = vmatpush.msrb.mxu3 %v3572_v5  ;;  %v3273_v31 = vmul.f32 %v5999_v59, %v5972_v10  ;;  %vm3278_vm6 = vweird.f32 %v5999_v59  ;;  %v3326_v1 = vand.u32 2147483647, %v5995_v14 }
0x11cb   :  { %4115 = vrcp.f32 %v5997_v24  ;;  %v4112_v8 = vpop.eup %4111  ;;  %v3258_v23 = vmul.f32 %v6007_v28, %v5975_v29  ;;  %v3335_v25 = vmul.f32 %v5980_v3, %v3334_v37  ;;  %vm3263_vm7 = vweird.f32 %v6007_v28  ;;  %vm6058_vm5 = vmor %vm3277_vm8, %vm3278_vm6 }
0x11cc   :  { %3601 = vmatpush.msrb.mxu3 %v3571_v26  ;;  %v6024_v6 = vadd.f32 1.0, %v4112_v8  ;;  %v3274_v33 = vsub.f32 1.0, %v3273_v31  ;;  %v3281_v37 = vand.u32 2147483647, %v5972_v10  ;;  %vm3264_vm10 = vmor %vm3262_vm9, %vm3263_vm7  ;;  %v3269_v29 = vor.u32 1.1754944e-38, %v3268_v44 }
0x11cd   :  { %3739 = vmatmul.msk.f32.vlgmr.msrb.gmra.mxu3 %vm3546_vm0, %v3570_v40  ;;  %v3259_v56 = vsub.f32 1.0, %v3258_v23  ;;  %v3336_v42 = vadd.f32 %v5980_v3, %v3335_v25  ;;  %vm3337_vm0 = vweird.f32 %v5966_v38  ;;  %vm3322_vm6 = vweird.f32 %v5995_v14 }
0x11ce   :  { %4117 = vrcp.f32 %v6024_v6  ;;  %vm3339_vm11 = vmor %vm3337_vm0, %vm3338_vm4  ;;  %v3275_v43 = vmul.f32 %v5999_v59, %v3274_v33  ;;  %vm3282_vm4 = vcmp.eq.f32.partialorder %v3281_v37, 8.507059e+37  ;;  %vm3267_vm0 = vcmp.eq.f32.partialorder %v3266_v41, 8.507059e+37  ;;  %v4144_v41 = vld [vmem:[%s6176_s0] sm:$0xff] }
0x11cf   :  { %v3260_v54 = vmul.f32 %v6007_v28, %v3259_v56  ;;  %v3340_v27 = vsel %vm3339_vm11, %v5980_v3, %v3336_v42  ;;  %v3283_v3 = vand.u32 2147483648, %v5972_v10  ;;  %v3328_v42 = vand.u32 2147483648, %v5995_v14 }
0x11d0   :  { %v6027_v35 = vpop.eup %4113  ;;  %v6048_v52 = vsel %vm3342_vm12, %v3344_v13, %v3340_v27  ;;  %v3276_v53 = vadd.f32 %v5999_v59, %v3275_v43  ;;  %v3313_v63 = vand.u32 2147483648, %v5997_v24  ;;  %vm3307_vm8 = vweird.f32 %v5997_v24 }
0x11d1   :  { %v6029_v32 = vpop.eup %4115  ;;  %v3318_v7 = vmul.f32 %v6027_v35, %v5995_v14  ;;  %v3261_v39 = vadd.f32 %v6007_v28, %v3260_v54  ;;  %v3284_v31 = vor.u32 1.1754944e-38, %v3283_v3  ;;  %vm3323_vm11 = vweird.f32 %v6027_v35 }
0x11d2   :  { %v3303_v21 = vmul.f32 %v6029_v32, %v5997_v24  ;;  %v3280_v26 = vsel %vm6058_vm5, %v5999_v59, %v3276_v53  ;;  %vm3308_vm12 = vweird.f32 %v6029_v32  ;;  %vm3324_vm7 = vmor %vm3322_vm6, %vm3323_vm11  ;;  %v3329_v27 = vor.u32 1.1754944e-38, %v3328_v42 }
0x11d3   :  { %v3319_v38 = vsub.f32 1.0, %v3318_v7  ;;  %v3265_v45 = vsel %vm3264_vm10, %v6007_v28, %v3261_v39  ;;  %v6077_v25 = vsel %vm3282_vm4, %v3284_v31, %v3280_v26  ;;  %v3311_v7 = vand.u32 2147483647, %v5997_v24  ;;  %vm3309_vm5 = vmor %vm3307_vm8, %vm3308_vm12 }
0x11d4   :  { %v3304_v20 = vsub.f32 1.0, %v3303_v21  ;;  %v3314_v13 = vor.u32 1.1754944e-38, %v3313_v63  ;;  %vm3327_vm9 = vcmp.eq.f32.partialorder %v3326_v1, 8.507059e+37  ;;  %vm133_vm6 = vcmp.ne.s32.totalorder %v4144_v41, 0 }
0x11d5   :  { %v3320_v5 = vmul.f32 %v6027_v35, %v3319_v38  ;;  %vm3312_vm10 = vcmp.eq.f32.partialorder %v3311_v7, 8.507059e+37  ;;  %v3431_v41 = vsub.f32 1.0, %v5948_v46 }
0x11d6   :  { %v3305_v8 = vmul.f32 %v6029_v32, %v3304_v20  ;;  %v3236_v20 = vand.u32 2147483647, %v6024_v6 }
0x11d7   :  { %v3321_v59 = vadd.f32 %v6027_v35, %v3320_v5  ;;  %v3639_v5 = vsel %vm133_vm6, 1.0, %v4171_v16 }
0x11d8   :  { %v3306_v56 = vadd.f32 %v6029_v32, %v3305_v8  ;;  %vm3237_vm12 = vcmp.eq.f32.partialorder %v3236_v20, 8.507059e+37 }
0x11d9   :  { %v3325_v43 = vsel %vm3324_vm7, %v6027_v35, %v3321_v59  ;;  %vm136_vm7 = vcmask 64512  }
0x11da   :  { %v3310_v54 = vsel %vm3309_vm5, %v6029_v32, %v3306_v56  ;;  %v6099_v38 = vsel %vm3327_vm9, %v3329_v27, %v3325_v43  ;;  %v3238_v32 = vand.u32 2147483648, %v6024_v6 }
0x11db   :  { %v6101_v53 = vsel %vm3312_vm10, %v3314_v13, %v3310_v54 }
0x11dc   :  { %v3239_v3 = vor.u32 1.1754944e-38, %v3238_v32 }
0x1203   :  { %v3350_v61 = vpop.permute.xlu2 %3349 }
0x1204   :  { %v3372_v50 = vmul.f32 %v3350_v61, %v5951_v15  ;;  %v6052_v61 = vpop.eup %4117 }
0x1205   :  { %v3228_v10 = vmul.f32 %v6052_v61, %v6024_v6  ;;  %vm3233_vm4 = vweird.f32 %v6052_v61 }
0x1206   :  { %3389 = vrot.lane.b32.xlu1 %v3372_v50, %s4172_s4 }
0x120b   :  { %v3356_v34 = vpop.permute.xlu2 %3355 }
0x120c   :  { %v3375_v57 = vmul.f32 %v3356_v34, %v5948_v46  ;;  %v6079_v34 = vsel %vm3267_vm0, %v3269_v29, %v3265_v45  ;;  %vm3232_vm0 = vweird.f32 %v6024_v6  ;;  %v137_v6 = vsel %vm136_vm7, %v3639_v5, 0.0 }
0x120d   :  { %vm3234_vm11 = vmor %vm3232_vm0, %vm3233_vm4  ;;  %vm6207_vm4 = vcmask 261120   ;;  %vm3529_vm0 = vcmask 523527  }
0x120e   :  { %3395 = vrot.lane.b32.xlu1 %v3375_v57, %s4172_s4  ;;  %v3229_v57 = vsub.f32 1.0, %v3228_v10 }
0x1210   :  { %v3230_v21 = vmul.f32 %v6052_v61, %v3229_v57 }
0x1212   :  { %v3231_v35 = vadd.f32 %v6052_v61, %v3230_v21 }
0x1213   :  { %v3362_v18 = vpop.permute.xlu2 %3361 }
0x1214   :  { %v3378_v30 = vmul.f32 %v3362_v18, %v6048_v52 }
0x1216   :  { %3401 = vrot.lane.b32.xlu1 %v3378_v30, %s4172_s4  ;;  %v3235_v30 = vsel %vm3234_vm11, %v6052_v61, %v3231_v35 }
0x1217   :  { %v6113_v50 = vsel %vm3237_vm12, %v3239_v3, %v3235_v30 }
0x121a   :  { %v3354_v23 = vpop.permute.xlu1 %3353  ;;  %v3352_v40 = vpop.permute.xlu0 %3351 }
0x121b   :  { %v3374_v28 = vmul.f32 %v3354_v23, %v6077_v25  ;;  %v3373_v33 = vmul.f32 %v3352_v40, %v6079_v34 }
0x121d   :  { %3391 = vrot.lane.b32.xlu2 %v3373_v33, %s4172_s4  ;;  %3393 = vrot.lane.b32.xlu0 %v3374_v28, %s4172_s4 }
0x1222   :  { %v3360_v18 = vpop.permute.xlu1 %3359  ;;  %v3358_v14 = vpop.permute.xlu0 %3357 }
0x1223   :  { %v3377_v39 = vmul.f32 %v3360_v18, %v6099_v38  ;;  %v3376_v24 = vmul.f32 %v3358_v14, %v6101_v53 }
0x1225   :  { %3397 = vrot.lane.b32.xlu2 %v3376_v24, %s4172_s4  ;;  %3399 = vrot.lane.b32.xlu0 %v3377_v39, %s4172_s4 }
0x122a   :  { %v3348_v44 = vpop.permute.xlu0 %3347 }
0x122b   :  { %v3371_v37 = vmul.f32 %v3348_v44, %v6113_v50 }
0x122d   :  { %3387 = vrot.lane.b32.xlu2 %v3371_v37, %s4172_s4 }
0x124f   :  { %138 = vadd.xlane.f32.xlu0 %v137_v6 }
0x1277   :  { %v3392_v61 = vpop.permute.xlu2 %3391 }
0x1278   :  { %v3413_v26 = vadd.f32 %v3392_v61, %v4378_v4  ;;  %v3390_v45 = vpop.permute.xlu1 %3389 }
0x1279   :  { %v3412_v8 = vadd.f32 %v3390_v45, %v4374_v62  ;;  %v3477_v45 = vrot.slane %v5848_v55, 7 }
0x127a   :  { %4119 = vtanh.f32 %v3413_v26  ;;  %v3429_v26 = vsub.f32 1.0, %v6079_v34 }
0x127b   :  { %4121 = vtanh.f32 %v3412_v8 }
0x127f   :  { %v3398_v4 = vpop.permute.xlu2 %3397 }
0x1280   :  { %v4120_v10 = vpop.eup %4119  ;;  %v3396_v31 = vpop.permute.xlu1 %3395  ;;  %v3416_v62 = vadd.f32 %v3398_v4, %v4399_v48 }
0x1281   :  { %v4122_v29 = vpop.eup %4121  ;;  %v3415_v23 = vadd.f32 %v3396_v31, %v4389_v36  ;;  %3447 = vrot.lane.b32.xlu2 %v4120_v10, %s4173_s6  ;;  %v3603_v48 = vpop.f32.mrf.mxu3  ;;  %v3492_v10 = vmul.f32 %v3477_v45, %v6079_v34  ;;  %v3428_v31 = vsub.f32 1.0, %v5951_v15 }
0x1282   :  { %3445 = vrot.lane.b32.xlu1 %v4122_v29, %s4173_s6 }
0x1283   :  { %4123 = vtanh.f32 %v3415_v23 }
0x1287   :  { %v3388_v36 = vpop.permute.xlu2 %3387 }
0x1288   :  { %v3402_v42 = vpop.permute.xlu1 %3401  ;;  %v3411_v63 = vadd.f32 %v3388_v36, %v4369_v58 }
0x1289   :  { %v4124_v40 = vpop.eup %4123  ;;  %v3418_v1 = vadd.f32 %v3402_v42, %v4419_v51 }
0x128a   :  { %3451 = vrot.lane.b32.xlu2 %v4124_v40, %s4173_s6 }
0x128f   :  { %v3394_v59 = vpop.permute.xlu0 %3393 }
0x1290   :  { %v3414_v28 = vadd.f32 %v3394_v59, %v4382_v12  ;;  %v3750_v12 = vld [vmem:[%s6188_s12] ss:$0 sm:$0xff]  ;;  %s4174_s12 = smov [#allocation2]  }
0x1291   :  { %v3604_v58 = vadd.f32 %v3750_v12, %v3603_v48  ;;  %v3480_v12 = vrot.slane %v5867_v0, 7  ;;  %v3434_v0 = vsub.f32 1.0, %v6048_v52 }
0x1292   :  { %4125 = vtanh.f32 %v3414_v28 }
0x1293   :  { %4127 = vtanh.f32 %v3416_v62  ;;  %v3606_v51 = vmax.f32 %v3604_v58, 0.0  ;;  %v3427_v62 = vsub.f32 1.0, %v6113_v50  ;;  %v3495_v58 = vmul.f32 %v3480_v12, %v6101_v53 }
0x1297   :  { %v3400_v33 = vpop.permute.xlu0 %3399 }
0x1298   :  { %v4126_v56 = vpop.eup %4125  ;;  %v3417_v57 = vadd.f32 %v3400_v33, %v4409_v47 }
0x1299   :  { %3449 = vrot.lane.b32.xlu1 %v4126_v56, %s4173_s6  ;;  %v4128_v7 = vpop.eup %4127  ;;  %v3478_v56 = vrot.slane %v5869_v2, 7  ;;  %v3432_v2 = vsub.f32 1.0, %v6101_v53 }
0x129a   :  { %4129 = vtanh.f32 %v3417_v57 }
0x129b   :  { %4131 = vtanh.f32 %v3411_v63  ;;  %v3493_v36 = vmul.f32 %v3478_v56, %v6077_v25 }
0x129c   :  { %4133 = vtanh.f32 %v3418_v1 }
0x12a0   :  { %v4130_v43 = vpop.eup %4129 }
0x12a1   :  { %3453 = vrot.lane.b32.xlu1 %v4128_v7, %s4173_s6  ;;  %3455 = vrot.lane.b32.xlu2 %v4130_v43, %s4173_s6  ;;  %v4132_v47 = vpop.eup %4131  ;;  %v3481_v7 = vrot.slane %v5889_v49, 7 }
0x12a2   :  { %v4134_v54 = vpop.eup %4133 }
0x12a9   :  { %3457 = vrot.lane.b32.xlu1 %v4134_v54, %s4173_s6  ;;  %3443 = vrot.lane.b32.xlu2 %v4132_v47, %s4173_s6  ;;  %v3496_v47 = vmul.f32 %v3481_v7, %v6099_v38 }
0x12b1   :  { %3608 = vrot.lane.b32.xlu1 %v3606_v51, %s4172_s4  ;;  %s3620_s4 = sshll.u32 %s4174_s12, 4  ;;  %s3621_s4 = int_to_ptr.vmem [resolvable:$true] %s3620_s4 }
0x12c2   :  { %v139_v21 = vpop.xlane.xlu0 %138 }
0x12c3   :  { %v245_v27 = vmax.f32 %v139_v21, 1e-09 }
0x12c5   :  { %4135 = vrcp.f32 %v245_v27  ;;  %v257_v14 = vand.u32 2147483648, %v245_v27  ;;  %vm251_vm8 = vweird.f32 %v245_v27  ;;  %v255_v24 = vand.u32 2147483647, %v245_v27 }
0x12c7   :  { %v258_v32 = vor.u32 1.1754944e-38, %v257_v14  ;;  %vm256_vm10 = vcmp.eq.f32.partialorder %v255_v24, 8.507059e+37 }
0x12cb   :  { %v4136_v13 = vpop.eup %4135 }
0x12cc   :  { %v247_v18 = vmul.f32 %v4136_v13, %v245_v27  ;;  %vm252_vm5 = vweird.f32 %v4136_v13 }
0x12cd   :  { %vm253_vm9 = vmor %vm251_vm8, %vm252_vm5 }
0x12ce   :  { %v248_v39 = vsub.f32 1.0, %v247_v18 }
0x12d0   :  { %v249_v35 = vmul.f32 %v4136_v13, %v248_v39 }
0x12d2   :  { %v250_v20 = vadd.f32 %v4136_v13, %v249_v35 }
0x12d4   :  { %v254_v30 = vsel %vm253_vm9, %v4136_v13, %v250_v20 }
0x12d5   :  { %v259_v3 = vsel %vm256_vm10, %v258_v32, %v254_v30 }
0x12d6   :  { %v260_v44 = vmul.f32 %v259_v3, %v4820_v60 }
0x12d8   :  { %262 = vst.msk [vmem:[#allocation2] sm:$0xff] %vm6207_vm4, %v260_v44 }
0x12db   :  { %v3448_v37 = vpop.permute.xlu2 %3447 }
0x12dc   :  { %v3469_v8 = vmul.f32 %v3448_v37, %v3429_v26 }
0x12de   :  { %v3500_v60 = vadd.f32 %v3492_v10, %v3469_v8 }
0x12e0   :  { %v3515_v59 = vrot.slane %v3500_v60, 6 }
0x12e4   :  { %v3452_v5 = vpop.permute.xlu2 %3451 }
0x12e5   :  { %v3471_v6 = vmul.f32 %v3452_v5, %v3431_v41 }
0x12e7   :  { %v3502_v61 = vadd.f32 %v5955_v17, %v3471_v6  ;;  %v3475_v17 = vrot.slane %v5850_v22, 7  ;;  %v3433_v22 = vsub.f32 1.0, %v6099_v38  ;;  %v3497_v38 = vmul.f32 %v6048_v52, %v3145_v9 }
0x12e9   :  { %v3490_v33 = vmul.f32 %v3475_v17, %v6113_v50  ;;  %v3519_v43 = vrot.slane %v3502_v61, 4 }
0x12f4   :  { %v3446_v29 = vpop.permute.xlu1 %3445 }
0x12f5   :  { %v3468_v23 = vmul.f32 %v3446_v29, %v3428_v31 }
0x12f7   :  { %v3499_v40 = vadd.f32 %v5958_v19, %v3468_v23  ;;  %v3430_v19 = vsub.f32 1.0, %v6077_v25 }
0x12f9   :  { %v3514_v46 = vrot.slane %v3499_v40, 7 }
0x12fb   :  { %v3516_v4 = vsel %vm205_vm13, %v3515_v59, %v3514_v46  ;;  %v3456_v28 = vpop.permute.xlu2 %3455  ;;  %vm3531_vm13 = vcmask 522496  }
0x12fc   :  { %v3473_v50 = vmul.f32 %v3456_v28, %v3433_v22 }
0x12fe   :  { %v3504_v21 = vadd.f32 %v3496_v47, %v3473_v50 }
0x1300   :  { %v3523_v49 = vrot.slane %v3504_v21, 2 }
0x1303   :  { %v3444_v55 = vpop.permute.xlu2 %3443 }
0x1304   :  { %v3467_v34 = vmul.f32 %v3444_v55, %v3427_v62 }
0x1306   :  { %v3498_v15 = vadd.f32 %v3490_v33, %v3467_v34 }
0x1308   :  { %3530 = vst.msk [vmem:[#allocation2 - $0x7] sm:$0x80] %vm3529_vm0, %v3498_v15 }
0x130b   :  { %v3450_v57 = vpop.permute.xlu1 %3449 }
0x130c   :  { %v3470_v42 = vmul.f32 %v3450_v57, %v3430_v19 }
0x130e   :  { %v3501_v63 = vadd.f32 %v3493_v36, %v3470_v42 }
0x1310   :  { %v3517_v1 = vrot.slane %v3501_v63, 5 }
0x1312   :  { %v3518_v48 = vsel %vm207_vm14, %v3517_v1, %v3516_v4  ;;  %vm3611_vm14 = vcmask 785920  }
0x1313   :  { %v3454_v54 = vpop.permute.xlu1 %3453  ;;  %v3520_v25 = vsel %vm209_vm15, %v3519_v43, %v3518_v48  ;;  %vm3613_vm15 = vcmask 1048320  }
0x1314   :  { %v3472_v51 = vmul.f32 %v3454_v54, %v3432_v2 }
0x1316   :  { %v3503_v27 = vadd.f32 %v3495_v58, %v3472_v51 }
0x1318   :  { %v3521_v13 = vrot.slane %v3503_v27, 3 }
0x131a   :  { %v3522_v18 = vsel %vm211_vm1, %v3521_v13, %v3520_v25 }
0x131b   :  { %v3458_v14 = vpop.permute.xlu1 %3457  ;;  %v3524_v39 = vsel %vm213_vm2, %v3523_v49, %v3522_v18 }
0x131c   :  { %v3474_v24 = vmul.f32 %v3458_v14, %v3434_v0 }
0x131e   :  { %v3505_v35 = vadd.f32 %v3497_v38, %v3474_v24 }
0x1320   :  { %v3525_v32 = vrot.slane %v3505_v35, 1 }
0x1322   :  { %v3526_v53 = vsel %vm215_vm3, %v3525_v32, %v3524_v39 }
0x1323   :  { %v3609_v20 = vpop.permute.xlu1 %3608  ;;  %3532 = vst.msk [vmem:[#allocation2 + $0x1] sm:$0x7f] %vm3531_vm13, %v3526_v53 }
0x1324   :  { %3612 = vst.msk [vmem:[#allocation2] sm:$0xff] %vm3611_vm14, %v3609_v20 }
0x1325   :  { %3614 = vst.msk [vmem:[#allocation2] sm:$0xff] %vm3613_vm15, %v4171_v16 }
0x1326   :  { %3625 = dma.vmem_to_hbm [thread:$0]  %s3621_s4, 128, %s3623_s28, [#allocation3]  }
0x1327   :  { %4169 = dma.done.wait [#allocation3], 128  }
0x1328   :  { %4170 = vsyncadd [#allocation3], 4294967168 }
0x1329   :  { %3630 = vsyncpa [#allocation3], 1 }

</bundles_post_ra>
